<compile_context>
chip_gen: v7x
topology: tpu7x:2x2x1
jax: 0.10.0
libtpu: 0.0.40
codegen_flags: <defaults>
</compile_context>

<pallas_src>
import jax
import jax.numpy as jnp
from jax.experimental import pallas as pl
from jax.experimental.pallas import tpu as pltpu

IN_DIM = 4730
H1_DIM = 1024
H2_DIM = 256
OUT_DIM = 13

K_TILE = 2432               # 19 * 128
K_PAD = 2 * K_TILE          # 4864 = 38 * 128 (tightest 128-multiple >= 4730 that tiles evenly)
OUT_PAD = 128               # 13 padded up to one full lane register


def mlp_kernel(x_ref, w1_ref, b1_ref, w2_ref, b2_ref, w3_ref, b3_ref,
               o_ref, acc_ref):
    k = pl.program_id(0)

    @pl.when(k == 0)
    def _():
        acc_ref[...] = jnp.zeros_like(acc_ref)

    # Layer-1 partial product for this K tile (bf16 inputs, f32 accumulate on MXU).
    acc_ref[...] += jnp.dot(
        x_ref[...], w1_ref[...], preferred_element_type=jnp.float32)

    @pl.when(k == pl.num_programs(0) - 1)
    def _():
        h1 = jnp.maximum(acc_ref[...] + b1_ref[...], 0.0)
        h2 = jnp.dot(h1.astype(jnp.bfloat16), w2_ref[...],
                     preferred_element_type=jnp.float32)
        h2 = jnp.maximum(h2 + b2_ref[...], 0.0)
        o_ref[...] = (
            jnp.dot(h2.astype(jnp.bfloat16), w3_ref[...],
                    preferred_element_type=jnp.float32)
            + b3_ref[...])


def mlp_forward(x, packed_params):
    """x: (B, IN_DIM) f32. packed_params: bf16 weights (K/OUT padded), f32 biases."""
    w1, b1, w2, b2, w3, b3 = packed_params
    B = x.shape[0]
    # Fused pad + bf16 cast: halves x HBM bytes and removes the in-kernel cast.
    # Keep the explicit zero pad (padded w1 rows are zero, but 0 * garbage could
    # still be NaN/Inf if x were left unpadded).
    x_pad = jnp.pad(x.astype(jnp.bfloat16), ((0, 0), (0, K_PAD - IN_DIM)))
    n_k = K_PAD // K_TILE

    flops = 2 * B * (K_PAD * H1_DIM + H1_DIM * H2_DIM + H2_DIM * OUT_PAD)
    bytes_accessed = (
        x_pad.size * 2
        + (w1.size + w2.size + w3.size) * 2
        + (b1.size + b2.size + b3.size) * 4
        + B * OUT_PAD * 4)

    out = pl.pallas_call(
        mlp_kernel,
        out_shape=jax.ShapeDtypeStruct((B, OUT_PAD), jnp.float32),
        grid=(n_k,),
        in_specs=[
            pl.BlockSpec((B, K_TILE), lambda k: (0, k)),       # x: K-tiled, bf16
            pl.BlockSpec((K_TILE, H1_DIM), lambda k: (k, 0)),  # w1: K-tiled, bf16
            pl.BlockSpec((1, H1_DIM), lambda k: (0, 0)),       # b1: resident
            pl.BlockSpec((H1_DIM, H2_DIM), lambda k: (0, 0)),  # w2: resident
            pl.BlockSpec((1, H2_DIM), lambda k: (0, 0)),       # b2: resident
            pl.BlockSpec((H2_DIM, OUT_PAD), lambda k: (0, 0)), # w3: resident
            pl.BlockSpec((1, OUT_PAD), lambda k: (0, 0)),      # b3: resident
        ],
        out_specs=pl.BlockSpec((B, OUT_PAD), lambda k: (0, 0)),
        scratch_shapes=[pltpu.VMEM((B, H1_DIM), jnp.float32)],
        compiler_params=pltpu.CompilerParams(
            dimension_semantics=("arbitrary",)),
        cost_estimate=pl.CostEstimate(
            flops=flops, transcendentals=0, bytes_accessed=bytes_accessed),
    )(x_pad, w1, b1, w2, b2, w3, b3)
    return out[:, :OUT_DIM]


def init_params(key):
    k1, k2, k3 = jax.random.split(key, 3)

    # Deterministic synthetic init (uniform, PyTorch-Linear-style scale),
    # stored as (in, out) so the kernel computes y = x @ W + b.
    def lin(k, fan_in, fan_out):
        kw, kb = jax.random.split(k)
        bound = 1.0 / (fan_in ** 0.5)
        w = jax.random.uniform(kw, (fan_in, fan_out), jnp.float32, -bound, bound)
        b = jax.random.uniform(kb, (1, fan_out), jnp.float32, -bound, bound)
        return w, b

    w1, b1 = lin(k1, IN_DIM, H1_DIM)
    w2, b2 = lin(k2, H1_DIM, H2_DIM)
    w3, b3 = lin(k3, H2_DIM, OUT_DIM)
    return (w1, b1, w2, b2, w3, b3)


def pack_params(params):
    """Kernel layout: bf16 weights, zero-padded K (w1) and OUT (w3/b3), f32 biases."""
    w1, b1, w2, b2, w3, b3 = params
    w1p = jnp.pad(w1, ((0, K_PAD - IN_DIM), (0, 0))).astype(jnp.bfloat16)
    w2p = w2.astype(jnp.bfloat16)
    w3p = jnp.pad(w3, ((0, 0), (0, OUT_PAD - OUT_DIM))).astype(jnp.bfloat16)
    b3p = jnp.pad(b3, ((0, 0), (0, OUT_PAD - OUT_DIM)))
    return (w1p, b1, w2p, b2, w3p, b3p)


def mlp_ref(x, params):
    """Pure-JAX reference with the same bf16-input / f32-accumulate numerics."""
    w1, b1, w2, b2, w3, b3 = params
    h1 = jnp.maximum(
        jnp.dot(x.astype(jnp.bfloat16), w1.astype(jnp.bfloat16),
                preferred_element_type=jnp.float32) + b1, 0.0)
    h2 = jnp.maximum(
        jnp.dot(h1.astype(jnp.bfloat16), w2.astype(jnp.bfloat16),
                preferred_element_type=jnp.float32) + b2, 0.0)
    return jnp.dot(h2.astype(jnp.bfloat16), w3.astype(jnp.bfloat16),
                   preferred_element_type=jnp.float32) + b3


if __name__ == "__main__":
    key = jax.random.PRNGKey(0)
    kx, kp = jax.random.split(key)

    B = 8
    x = jax.random.normal(kx, (B, IN_DIM), dtype=jnp.float32)
    params = init_params(kp)
    packed = pack_params(params)

    out = mlp_forward(x, packed)
    out = jax.block_until_ready(out)

    ref = mlp_ref(x, params)
    assert out.shape == (B, OUT_DIM)
    assert jnp.allclose(out, ref, atol=1e-2, rtol=1e-2), (
        "max abs err = %f" % float(jnp.max(jnp.abs(out - ref))))

    print("KERNEL_OK")
</pallas_src>

<mosaic_0001>
module attributes {stable_mosaic.version = 11 : i64} {
  func.func @mlp_kernel(%arg0: i32, %arg1: memref<8x2432xbf16, #tpu.memory_space<vmem>>, %arg2: memref<2432x1024xbf16, #tpu.memory_space<vmem>>, %arg3: memref<1x1024xf32, #tpu.memory_space<vmem>>, %arg4: memref<1024x256xbf16, #tpu.memory_space<vmem>>, %arg5: memref<1x256xf32, #tpu.memory_space<vmem>>, %arg6: memref<256x128xbf16, #tpu.memory_space<vmem>>, %arg7: memref<1x128xf32, #tpu.memory_space<vmem>>, %arg8: memref<8x128xf32, #tpu.memory_space<vmem>>, %arg9: memref<8x1024xf32, #tpu.memory_space<vmem>>) attributes {dimension_semantics = [#tpu.dimension_semantics<arbitrary>], iteration_bounds = array<i64: 2>, scalar_prefetch = 0 : i64, scratch_operands = 1 : i64, tpu.core_type = #tpu.core_type<tc>, window_params = [{transform_indices = @transform_0, window_bounds = array<i64: 8, 2432>}, {transform_indices = @transform_1, window_bounds = array<i64: 2432, 1024>}, {pipeline_mode = #tpu.pipeline_mode<synchronous>, transform_indices = @transform_2, window_bounds = array<i64: 1, 1024>}, {pipeline_mode = #tpu.pipeline_mode<synchronous>, transform_indices = @transform_3, window_bounds = array<i64: 1024, 256>}, {pipeline_mode = #tpu.pipeline_mode<synchronous>, transform_indices = @transform_4, window_bounds = array<i64: 1, 256>}, {pipeline_mode = #tpu.pipeline_mode<synchronous>, transform_indices = @transform_5, window_bounds = array<i64: 256, 128>}, {pipeline_mode = #tpu.pipeline_mode<synchronous>, transform_indices = @transform_6, window_bounds = array<i64: 1, 128>}, {pipeline_mode = #tpu.pipeline_mode<synchronous>, transform_indices = @transform_7, window_bounds = array<i64: 8, 128>}]} {
    %c0_i32 = arith.constant 0 : i32
    %0 = arith.cmpi eq, %arg0, %c0_i32 : i32
    %1 = arith.extui %0 : i1 to i32
    %c0_i32_0 = arith.constant 0 : i32
    %2 = arith.cmpi ne, %1, %c0_i32_0 : i32
    scf.if %2 {
      %cst_9 = arith.constant 0.000000e+00 : f32
      %12 = vector.broadcast %cst_9 : f32 to vector<8x1024xf32>
      %c0_10 = arith.constant 0 : index
      %c0_11 = arith.constant 0 : index
      %13 = vector.load %arg9[%c0_10, %c0_11] : memref<8x1024xf32, #tpu.memory_space<vmem>>, vector<8x1024xf32>
      tpu.vector_store %arg9[%c0_10, %c0_11], %12 {strides = array<i32>} : memref<8x1024xf32, #tpu.memory_space<vmem>>, vector<8x1024xf32>,
    } else {
    }
    %c0 = arith.constant 0 : index
    %c0_1 = arith.constant 0 : index
    %3 = vector.load %arg9[%c0, %c0_1] : memref<8x1024xf32, #tpu.memory_space<vmem>>, vector<8x1024xf32>
    %c0_2 = arith.constant 0 : index
    %c0_3 = arith.constant 0 : index
    %4 = vector.load %arg1[%c0_2, %c0_3] : memref<8x2432xbf16, #tpu.memory_space<vmem>>, vector<8x2432xbf16>
    %c0_4 = arith.constant 0 : index
    %c0_5 = arith.constant 0 : index
    %5 = vector.load %arg2[%c0_4, %c0_5] : memref<2432x1024xbf16, #tpu.memory_space<vmem>>, vector<2432x1024xbf16>
    %cst = arith.constant dense<0.000000e+00> : vector<8x1024xf32>
    %6 = tpu.matmul %4, %5, %cst {dimension_numbers = #tpu.dot_dimension_numbers<[1], [0], [0], [1], [0, 0, 1, 1], [], []>} : vector<8x2432xbf16>, vector<2432x1024xbf16>, vector<8x1024xf32> -> vector<8x1024xf32>
    %7 = arith.addf %3, %6 : vector<8x1024xf32>
    %c0_6 = arith.constant 0 : index
    %c0_7 = arith.constant 0 : index
    %8 = vector.load %arg9[%c0_6, %c0_7] : memref<8x1024xf32, #tpu.memory_space<vmem>>, vector<8x1024xf32>
    tpu.vector_store %arg9[%c0_6, %c0_7], %7 {strides = array<i32>} : memref<8x1024xf32, #tpu.memory_space<vmem>>, vector<8x1024xf32>,
    %c1_i32 = arith.constant 1 : i32
    %9 = arith.cmpi eq, %arg0, %c1_i32 : i32
    %10 = arith.extui %9 : i1 to i32
    %c0_i32_8 = arith.constant 0 : i32
    %11 = arith.cmpi ne, %10, %c0_i32_8 : i32
    scf.if %11 {
      %c0_9 = arith.constant 0 : index
      %c0_10 = arith.constant 0 : index
      %12 = vector.load %arg9[%c0_9, %c0_10] : memref<8x1024xf32, #tpu.memory_space<vmem>>, vector<8x1024xf32>
      %c0_11 = arith.constant 0 : index
      %c0_12 = arith.constant 0 : index
      %13 = vector.load %arg3[%c0_11, %c0_12] : memref<1x1024xf32, #tpu.memory_space<vmem>>, vector<1x1024xf32>
      %14 = vector.broadcast %13 : vector<1x1024xf32> to vector<8x1024xf32>
      %15 = arith.addf %12, %14 : vector<8x1024xf32>
      %cst_13 = arith.constant 0.000000e+00 : f32
      %16 = vector.broadcast %cst_13 : f32 to vector<8x1024xf32>
      %17 = arith.maximumf %15, %16 : vector<8x1024xf32>
      %18 = arith.truncf %17 : vector<8x1024xf32> to vector<8x1024xbf16>
      %c0_14 = arith.constant 0 : index
      %c0_15 = arith.constant 0 : index
      %19 = vector.load %arg4[%c0_14, %c0_15] : memref<1024x256xbf16, #tpu.memory_space<vmem>>, vector<1024x256xbf16>
      %cst_16 = arith.constant dense<0.000000e+00> : vector<8x256xf32>
      %20 = tpu.matmul %18, %19, %cst_16 {dimension_numbers = #tpu.dot_dimension_numbers<[1], [0], [0], [1], [0, 0, 1, 1], [], []>} : vector<8x1024xbf16>, vector<1024x256xbf16>, vector<8x256xf32> -> vector<8x256xf32>
      %c0_17 = arith.constant 0 : index
      %c0_18 = arith.constant 0 : index
      %21 = vector.load %arg5[%c0_17, %c0_18] : memref<1x256xf32, #tpu.memory_space<vmem>>, vector<1x256xf32>
      %22 = vector.broadcast %21 : vector<1x256xf32> to vector<8x256xf32>
      %23 = arith.addf %20, %22 : vector<8x256xf32>
      %cst_19 = arith.constant 0.000000e+00 : f32
      %24 = vector.broadcast %cst_19 : f32 to vector<8x256xf32>
      %25 = arith.maximumf %23, %24 : vector<8x256xf32>
      %26 = arith.truncf %25 : vector<8x256xf32> to vector<8x256xbf16>
      %c0_20 = arith.constant 0 : index
      %c0_21 = arith.constant 0 : index
      %27 = vector.load %arg6[%c0_20, %c0_21] : memref<256x128xbf16, #tpu.memory_space<vmem>>, vector<256x128xbf16>
      %cst_22 = arith.constant dense<0.000000e+00> : vector<8x128xf32>
      %28 = tpu.matmul %26, %27, %cst_22 {dimension_numbers = #tpu.dot_dimension_numbers<[1], [0], [0], [1], [0, 0, 1, 1], [], []>} : vector<8x256xbf16>, vector<256x128xbf16>, vector<8x128xf32> -> vector<8x128xf32>
      %c0_23 = arith.constant 0 : index
      %c0_24 = arith.constant 0 : index
      %29 = vector.load %arg7[%c0_23, %c0_24] : memref<1x128xf32, #tpu.memory_space<vmem>>, vector<1x128xf32>
      %30 = vector.broadcast %29 : vector<1x128xf32> to vector<8x128xf32>
      %31 = arith.addf %28, %30 : vector<8x128xf32>
      %c0_25 = arith.constant 0 : index
      %c0_26 = arith.constant 0 : index
      %32 = vector.load %arg8[%c0_25, %c0_26] : memref<8x128xf32, #tpu.memory_space<vmem>>, vector<8x128xf32>
      tpu.vector_store %arg8[%c0_25, %c0_26], %31 {strides = array<i32>} : memref<8x128xf32, #tpu.memory_space<vmem>>, vector<8x128xf32>,
    } else {
    }
    return
  }
  func.func @transform_0(%arg0: i32) -> (i32, i32) {
    %c0_i32 = arith.constant 0 : i32
    %c0_i32_0 = arith.constant 0 : i32
    return %c0_i32, %arg0 : i32, i32
  }
  func.func @transform_1(%arg0: i32) -> (i32, i32) {
    %c0_i32 = arith.constant 0 : i32
    %c0_i32_0 = arith.constant 0 : i32
    return %arg0, %c0_i32 : i32, i32
  }
  func.func @transform_2(%arg0: i32) -> (i32, i32) {
    %c0_i32 = arith.constant 0 : i32
    %c0_i32_0 = arith.constant 0 : i32
    %c0_i32_1 = arith.constant 0 : i32
    return %c0_i32, %c0_i32_0 : i32, i32
  }
  func.func @transform_3(%arg0: i32) -> (i32, i32) {
    %c0_i32 = arith.constant 0 : i32
    %c0_i32_0 = arith.constant 0 : i32
    %c0_i32_1 = arith.constant 0 : i32
    return %c0_i32, %c0_i32_0 : i32, i32
  }
  func.func @transform_4(%arg0: i32) -> (i32, i32) {
    %c0_i32 = arith.constant 0 : i32
    %c0_i32_0 = arith.constant 0 : i32
    %c0_i32_1 = arith.constant 0 : i32
    return %c0_i32, %c0_i32_0 : i32, i32
  }
  func.func @transform_5(%arg0: i32) -> (i32, i32) {
    %c0_i32 = arith.constant 0 : i32
    %c0_i32_0 = arith.constant 0 : i32
    %c0_i32_1 = arith.constant 0 : i32
    return %c0_i32, %c0_i32_0 : i32, i32
  }
  func.func @transform_6(%arg0: i32) -> (i32, i32) {
    %c0_i32 = arith.constant 0 : i32
    %c0_i32_0 = arith.constant 0 : i32
    %c0_i32_1 = arith.constant 0 : i32
    return %c0_i32, %c0_i32_0 : i32, i32
  }
  func.func @transform_7(%arg0: i32) -> (i32, i32) {
    %c0_i32 = arith.constant 0 : i32
    %c0_i32_0 = arith.constant 0 : i32
    %c0_i32_1 = arith.constant 0 : i32
    return %c0_i32, %c0_i32_0 : i32, i32
  }
}

</mosaic_0001>

<bundles_post_ra>
// kernel: tpu_custom_call.1
= control target key start
LH: loop header
LB: loop body
LE: loop exit
PB: predicated region body
PF: predicated region fallthrough
CT: control target
= control target key end

     0   :  { %s14754_s0 = inlined_call_operand.hbm [shape: bf16[8,4864], index: 0, kind: input, shape index: {}]   ;;  %s14755_s1 = inlined_call_operand.hbm [shape: bf16[4864,1024], index: 1, kind: input, shape index: {}]   ;;  %s14756_s2 = inlined_call_operand.hbm [shape: f32[1,1024], index: 2, kind: input, shape index: {}]   ;;  %s14757_s3 = inlined_call_operand.hbm [shape: bf16[1024,256], index: 3, kind: input, shape index: {}]   ;;  %s14758_s4 = inlined_call_operand.hbm [shape: f32[1,256], index: 4, kind: input, shape index: {}]   ;;  %s14759_s5 = inlined_call_operand.hbm [shape: bf16[256,128], index: 5, kind: input, shape index: {}]   ;;  %s14760_s6 = inlined_call_operand.hbm [shape: f32[1,128], index: 6, kind: input, shape index: {}]   ;;  %s14761_s7 = inlined_call_operand.hbm [shape: f32[8,128], index: 7, kind: output, shape index: {}]  }
   0x1   :  { %14764 = sst [smem:[#allocation22_spill]] %s14756_s2 }
   0x2   :  { %12 = vsyncpa [#allocation4], 0 }
   0x3   :  { %14 = vsyncpa [#allocation4 + $0x1], 0 }
   0x4   :  { %15 = vsyncpa [#allocation7], 0 }
   0x5   :  { %17 = vsyncpa [#allocation7 + $0x1], 0 }
   0x6   :  { %18 = vsyncpa [#allocation10], 0 }
   0x7   :  { %19 = vsyncpa [#allocation13], 0 }
   0x8   :  { %20 = vsyncpa [#allocation5], 0  ;;  %s12894_s24 = smov 0   ;;  %s12896_s25 = smov 0  }
   0x9   :  { %s12898_s26 = smov 0   ;;  %s12900_s27 = smov 0  }
   0xa LB: > { %s12838_s28 = smov [#allocation8]   ;;  %s12915_s30 = sadd.s32 4294967295, %s12836_s27   ;;  %s12836_s27 = sphi %s12900_s27, %s14783_s27   ;;  %s12832_s26 = sphi %s12898_s26, %s14782_s26   ;;  %s12828_s25 = sphi %s12896_s25, %s14781_s25   ;;  %s12824_s24 = sphi %s12894_s24, %s14780_s24  }
   0xb   : > { %s222_s29 = sshll.u32 %s12838_s28, 4  ;;  %p10772_p0 = scmp.ge.s32.totalorder %s12836_s27, 1  ;;  %s223_s29 = int_to_ptr.vmem [resolvable:$true] %s222_s29 }
   0xc   : > { %p14762_p1 = scmp.eq.s32.totalorder %s12915_s30, 0  ;;  %p209_p2 = scmp.lt.s32.totalorder %s12836_s27, 3 }
   0xd   : > { %s12839_s9 = smov [#allocation9]   ;;  %s12840_s12 = smov [#allocation12]  }
   0xe   : > { %p12921_p4 = pnand %p10772_p0, %p209_p2  ;;  %s232_s10 = sshll.u32 %s12839_s9, 4  ;;  %s12927_s10 = int_to_ptr.vmem [resolvable:$true] %s232_s10 }
   0xf   : > { %s256_s13 = sshll.u32 %s12840_s12, 4  ;;  %s14767_s2 = sld [smem:[#allocation22_spill]]  ;;  %s12935_s13 = int_to_ptr.vmem [resolvable:$true] %s256_s13 }
  0x10   : > { %s14765_s8 = scalar_select %p12921_p4, 1, 0 }
  0x11   : > { %p12244_p5 = pneg %p12921_p4 }
  0x13   : > { %p12931_p6 = pnand %p12244_p5, %p14762_p1 }
  0x15   : > { %s12556_s16 = scalar_lea.hbm %s14767_s2, 128  ;;  %p12945_p8 = pneg %p12931_p6 }
  0x16   : > { %p12557_p7 = scmp.ne.s32.totalorder %s14767_s2, %s12556_s16  ;;  %p12563_p11 = scmp.lt.u32.totalorder %s12556_s16, %s14767_s2 }
  0x18   : > { %p12559_p9 = pnand %p12945_p8, %p12557_p7 }
  0x1a   : > { %p12560_p10 = pneg %p12559_p9 }
  0x1c   : > { %p12565_p12 = pnand %p12563_p11, %p12560_p10 }
  0x1e   : > { %12568 = shalt.err (!%p12565_p12)
}
  0x1f   : > { %s12569_s22 = scalar_lea.vmem %s223_s29, 128  ;;  %p12577_p5 = scmp.lt.s32.totalorder %s223_s29, %s223_s29 }
  0x20   : > { %p12570_p13 = scmp.ne.s32.totalorder %s223_s29, %s12569_s22  ;;  %p12578_p3 = scmp.lt.s32.totalorder %s12569_s22, %s12569_s22 }
  0x22   : > { %p12572_p0 = pnand %p12570_p13, %p12945_p8  ;;  %p12579_p1 = por %p12578_p3, %p12577_p5 }
  0x24   : > { %p12573_p2 = pneg %p12572_p0 }
  0x26   : > { %p12580_p4 = pnand %p12579_p1, %p12573_p2 }
  0x28   : > { %12583 = shalt.err (!%p12580_p4)
}
  0x29   : > { %12247 = dma.hbm_to_vmem [thread:$0]  (!%p12931_p6), %s14767_s2, 128, %s223_s29, [#allocation7]  }
  0x2a   : > { %s12584_s14 = scalar_lea.hbm %s14757_s3, 16384 }
  0x2b   : > { %p12585_p7 = scmp.ne.s32.totalorder %s14757_s3, %s12584_s14  ;;  %p12591_p1 = scmp.lt.u32.totalorder %s12584_s14, %s14757_s3 }
  0x2d   : > { %p12587_p9 = pnand %p12585_p7, %p12945_p8 }
  0x2f   : > { %p12588_p3 = pneg %p12587_p9 }
  0x31   : > { %p12593_p4 = pnand %p12591_p1, %p12588_p3 }
  0x33   : > { %12596 = shalt.err (!%p12593_p4)
}
  0x34   : > { %s12597_s29 = scalar_lea.vmem %s12927_s10, 16384  ;;  %p12605_p13 = scmp.lt.s32.totalorder %s12927_s10, %s12927_s10 }
  0x35   : > { %p12598_p10 = scmp.ne.s32.totalorder %s12927_s10, %s12597_s29  ;;  %p12606_p0 = scmp.lt.s32.totalorder %s12597_s29, %s12597_s29 }
  0x37   : > { %p12600_p11 = pnand %p12598_p10, %p12945_p8  ;;  %p12607_p2 = por %p12606_p0, %p12605_p13 }
  0x39   : > { %p12601_p12 = pneg %p12600_p11 }
  0x3b   : > { %p12608_p5 = pnand %p12607_p2, %p12601_p12 }
  0x3d   : > { %12611 = shalt.err (!%p12608_p5)
}
  0x3e   : > { %s12841_s20 = smov 128   ;;  %s12842_s21 = smov 8  }
  0x3f   : > { %12250 = dma.hbm_to_vmem [thread:$0]  (!%p12931_p6), %s14757_s3, 16384, %s12927_s10, [#allocation10], %s12841_s20, %s12841_s20, %s12842_s21  }
  0x40   : > { %s12612_s12 = scalar_lea.hbm %s14759_s5, 2048 }
  0x41   : > { %p12613_p7 = scmp.ne.s32.totalorder %s14759_s5, %s12612_s12  ;;  %p12619_p1 = scmp.lt.u32.totalorder %s12612_s12, %s14759_s5 }
  0x43   : > { %p12615_p9 = pnand %p12613_p7, %p12945_p8 }
  0x45   : > { %p12616_p3 = pneg %p12615_p9 }
  0x47   : > { %p12621_p4 = pnand %p12619_p1, %p12616_p3 }
  0x49   : > { %12624 = shalt.err (!%p12621_p4)
}
  0x4a   : > { %s12625_s10 = scalar_lea.vmem %s12935_s13, 2048  ;;  %p12633_p13 = scmp.lt.s32.totalorder %s12935_s13, %s12935_s13 }
  0x4b   : > { %p12626_p10 = scmp.ne.s32.totalorder %s12935_s13, %s12625_s10  ;;  %p12634_p0 = scmp.lt.s32.totalorder %s12625_s10, %s12625_s10 }
  0x4d   : > { %p12628_p11 = pnand %p12626_p10, %p12945_p8  ;;  %p12635_p2 = por %p12634_p0, %p12633_p13 }
  0x4f   : > { %p12629_p12 = pneg %p12628_p11 }
  0x51   : > { %p12636_p5 = pnand %p12635_p2, %p12629_p12 }
  0x53   : > { %12639 = shalt.err (!%p12636_p5)
}
  0x54   : > { %s12843_s18 = smov 64   ;;  %s12844_s29 = smov 4  }
  0x55   : > { %12256 = dma.hbm_to_vmem [thread:$0]  (!%p12931_p6), %s14759_s5, 2048, %s12935_s13, [#allocation13], %s12843_s18, %s12843_s18, %s12844_s29  }
  0x56   : > { %s12845_s22 = smov [#allocation11]   ;;  %s12846_s28 = smov [#allocation14]  }
  0x57   : > { %s246_s23 = sshll.u32 %s12845_s22, 4  ;;  %s270_s9 = sshll.u32 %s12846_s28, 4  ;;  %s247_s23 = int_to_ptr.vmem [resolvable:$true] %s246_s23  ;;  %s271_s9 = int_to_ptr.vmem [resolvable:$true] %s270_s9 }
  0x58   : > { %s12640_s15 = scalar_lea.hbm %s14758_s4, 32 }
  0x59   : > { %p12641_p7 = scmp.ne.s32.totalorder %s14758_s4, %s12640_s15  ;;  %p12647_p1 = scmp.lt.u32.totalorder %s12640_s15, %s14758_s4 }
  0x5b   : > { %p12643_p9 = pnand %p12641_p7, %p12945_p8 }
  0x5d   : > { %p12644_p3 = pneg %p12643_p9 }
  0x5f   : > { %p12649_p4 = pnand %p12647_p1, %p12644_p3 }
  0x61   : > { %12652 = shalt.err (!%p12649_p4)
}
  0x62   : > { %s12653_s13 = scalar_lea.vmem %s247_s23, 32  ;;  %p12661_p13 = scmp.lt.s32.totalorder %s247_s23, %s247_s23 }
  0x63   : > { %p12654_p10 = scmp.ne.s32.totalorder %s247_s23, %s12653_s13  ;;  %p12662_p0 = scmp.lt.s32.totalorder %s12653_s13, %s12653_s13 }
  0x65   : > { %p12656_p11 = pnand %p12654_p10, %p12945_p8  ;;  %p12663_p2 = por %p12662_p0, %p12661_p13 }
  0x67   : > { %p12657_p12 = pneg %p12656_p11 }
  0x69   : > { %p12664_p5 = pnand %p12663_p2, %p12657_p12 }
  0x6b   : > { %12667 = shalt.err (!%p12664_p5)
}
  0x6c   : > { %12253 = dma.hbm_to_vmem [thread:$0]  (!%p12931_p6), %s14758_s4, 32, %s247_s23, [#allocation10]  }
  0x6d   : > { %s12668_s21 = scalar_lea.hbm %s14760_s6, 16 }
  0x6e   : > { %p12669_p7 = scmp.ne.s32.totalorder %s14760_s6, %s12668_s21  ;;  %p12675_p1 = scmp.lt.u32.totalorder %s12668_s21, %s14760_s6 }
  0x70   : > { %p12671_p9 = pnand %p12669_p7, %p12945_p8 }
  0x72   : > { %p12672_p3 = pneg %p12671_p9 }
  0x74   : > { %p12677_p4 = pnand %p12675_p1, %p12672_p3 }
  0x76   : > { %12680 = shalt.err (!%p12677_p4)
}
  0x77   : > { %s12681_s15 = scalar_lea.vmem %s271_s9, 16  ;;  %s12688_s23 = scalar_lea.vmem %s271_s9, 32 }
  0x78   : > { %p12682_p10 = scmp.ne.s32.totalorder %s271_s9, %s12681_s15  ;;  %p12689_p13 = scmp.lt.s32.totalorder %s271_s9, %s271_s9 }
  0x79   : > { %p12690_p0 = scmp.lt.s32.totalorder %s12688_s23, %s12681_s15 }
  0x7a   : > { %p12684_p11 = pnand %p12682_p10, %p12945_p8 }
  0x7b   : > { %p12691_p2 = por %p12690_p0, %p12689_p13 }
  0x7c   : > { %p12685_p12 = pneg %p12684_p11 }
  0x7e   : > { %p12692_p5 = pnand %p12691_p2, %p12685_p12 }
  0x80   : > { %12695 = shalt.err (!%p12692_p5)
}
  0x81   : > { %12259 = dma.hbm_to_vmem [thread:$0]  (!%p12931_p6), %s14760_s6, 16, %s271_s9, [#allocation13]  }
  0x82   : > { %s13044_s19 = sadd.s32 1, %s12836_s27   ;;  %s33_s10 = sadd.s32 1, %s12832_s26 }
  0x83   : > { %s30_s11 = ssub.s32 %s12836_s27, %s13044_s19  ;;  %p40_p7 = scmp.ne.s32.totalorder %s12832_s26, %s12828_s25 }
  0x84   : > { %p31_p8 = scmp.eq.s32.totalorder %s30_s11, 0  ;;  %p41_p9 = scmp.eq.s32.totalorder %s12836_s27, 0 }
  0x85   : > { %p46_p3 = scmp.ne.s32.totalorder %s12828_s25, %s12824_s24  ;;  %p14769_p4 = scmp.eq.s32.totalorder %s12915_s30, 0 }
  0x86   : > { %s13055_s13 = scalar_select %p31_p8, %s12832_s26, %s33_s10  }
  0x87   : > { %p42_p1 = por %p41_p9, %p40_p7  ;;  %p13059_p10 = por %p14769_p4, %p46_p3 }
  0x88   : > { %p12272_p11 = scmp.lt.s32.totalorder %s12836_s27, 2  ;;  %s13065_s29 = sand.u32 1, %s12832_s26  }
  0x89   : > { %s12212_s9 = smul.u32 76, %s13065_s29  ;;  %s282_s15 = scalar_lea.sflag [#allocation4], %s13065_s29 }
  0x8a   : > { %s12174_s2 = smul.u32 1216, %s12836_s27  ;;  %p13069_p6 = pnand %p12272_p11, %p42_p1 }
  0x8b   : > { %s12213_s24 = smul.u32 9728, %s13065_s29  ;;  %s285_s12 = scalar_lea.vmem [#allocation3], %s12212_s9 }
  0x8c   : > { %s13077_s28 = scalar_lea.hbm %s14754_s0, %s12174_s2  ;;  %s293_s14 = sshll.u32 %s285_s12, 4  ;;  %s13079_s14 = int_to_ptr.vmem [resolvable:$true] %s293_s14 }
  0x8d   : > { %s12696_s23 = scalar_lea.hbm %s13077_s28, 1216  ;;  %p12698_p13 = pneg %p13069_p6 }
  0x8e   : > { %p12697_p12 = scmp.ne.s32.totalorder %s13077_s28, %s12696_s23  ;;  %s12701_s11 = scalar_lea.hbm %s14754_s0, 2432 }
  0x8f   : > { %p12702_p5 = scmp.lt.u32.totalorder %s13077_s28, %s14754_s0  ;;  %p12703_p8 = scmp.lt.u32.totalorder %s12701_s11, %s12696_s23 }
  0x90   : > { %p12699_p0 = pnand %p12698_p13, %p12697_p12  ;;  %p12705_p9 = scmp.lt.u32.totalorder %s12696_s23, %s13077_s28 }
  0x91   : > { %p12704_p7 = por %p12703_p8, %p12702_p5 }
  0x92   : > { %p12700_p2 = pneg %p12699_p0 }
  0x93   : > { %p12706_p3 = por %p12705_p9, %p12704_p7 }
  0x95   : > { %p12707_p1 = pnand %p12706_p3, %p12700_p2 }
  0x97   : > { %12710 = shalt.err (!%p12707_p1)
}
  0x98   : > { %s12711_s9 = scalar_lea.vmem %s13079_s14, 1216  ;;  %s12847_s21 = smov [#allocation3]  }
  0x99   : > { %p12712_p4 = scmp.ne.s32.totalorder %s13079_s14, %s12711_s9  ;;  %s12716_s22 = sshll.u32 %s12847_s21, 4  ;;  %s12717_s22 = int_to_ptr.vmem [resolvable:$false] %s12716_s22 }
  0x9a   : > { %s12718_s12 = scalar_lea.vmem %s12717_s22, 2432  ;;  %p12719_p0 = scmp.lt.s32.totalorder %s13079_s14, %s12717_s22 }
  0x9b   : > { %p12714_p11 = pnand %p12712_p4, %p12698_p13  ;;  %p12720_p5 = scmp.lt.s32.totalorder %s12718_s12, %s12711_s9 }
  0x9d   : > { %p12715_p12 = pneg %p12714_p11  ;;  %p12721_p8 = por %p12720_p5, %p12719_p0 }
  0x9f   : > { %p12722_p7 = pnand %p12721_p8, %p12715_p12 }
  0xa1   : > { %12725 = shalt.err (!%p12722_p7)
}
  0xa2   : > { %12263 = dma.hbm_to_vmem [thread:$0]  (!%p13069_p6), %s13077_s28, 1216, %s13079_s14, %s282_s15  }
  0xa3   : > { %s300_s23 = sand.u32 1, %s12836_s27   ;;  %s304_s16 = scalar_lea.vmem [#allocation6], %s12213_s24 }
  0xa4   : > { %s312_s17 = sshll.u32 %s304_s16, 4  ;;  %s12177_s11 = smul.u32 155648, %s12836_s27  ;;  %s13110_s17 = int_to_ptr.vmem [resolvable:$true] %s312_s17 }
  0xa5   : > { %s13118_s21 = scalar_lea.sflag [#allocation7], %s300_s23  ;;  %s12731_s27 = scalar_lea.hbm %s14755_s1, 311296 }
  0xa6   : > { %s13116_s9 = scalar_lea.hbm %s14755_s1, %s12177_s11 }
  0xa7   : > { %s12726_s22 = scalar_lea.hbm %s13116_s9, 155648  ;;  %p12732_p1 = scmp.lt.u32.totalorder %s13116_s9, %s14755_s1 }
  0xa8   : > { %p12727_p2 = scmp.ne.s32.totalorder %s13116_s9, %s12726_s22  ;;  %p12733_p4 = scmp.lt.u32.totalorder %s12731_s27, %s12726_s22 }
  0xa9   : > { %p12735_p12 = scmp.lt.u32.totalorder %s12726_s22, %s13116_s9 }
  0xaa   : > { %p12729_p9 = pnand %p12727_p2, %p12698_p13  ;;  %p12734_p11 = por %p12733_p4, %p12732_p1 }
  0xac   : > { %p12730_p3 = pneg %p12729_p9  ;;  %p12736_p0 = por %p12735_p12, %p12734_p11 }
  0xae   : > { %p12737_p5 = pnand %p12736_p0, %p12730_p3 }
  0xb0   : > { %12740 = shalt.err (!%p12737_p5)
}
  0xb1   : > { %s12741_s15 = scalar_lea.vmem %s13110_s17, 155648  ;;  %s12848_s12 = smov [#allocation6]  }
  0xb2   : > { %p12742_p8 = scmp.ne.s32.totalorder %s13110_s17, %s12741_s15  ;;  %s12746_s23 = sshll.u32 %s12848_s12, 4  ;;  %s12747_s23 = int_to_ptr.vmem [resolvable:$false] %s12746_s23 }
  0xb3   : > { %s12748_s16 = scalar_lea.vmem %s12747_s23, 311296  ;;  %p12749_p9 = scmp.lt.s32.totalorder %s13110_s17, %s12747_s23 }
  0xb4   : > { %p12744_p7 = pnand %p12742_p8, %p12698_p13  ;;  %p12750_p1 = scmp.lt.s32.totalorder %s12748_s16, %s12741_s15 }
  0xb6   : > { %p12745_p2 = pneg %p12744_p7  ;;  %p12751_p4 = por %p12750_p1, %p12749_p9 }
  0xb8   : > { %p12752_p11 = pnand %p12751_p4, %p12745_p2 }
  0xba   : > { %12755 = shalt.err (!%p12752_p11)
}
  0xbb   : > { %s12849_s11 = smov 512   ;;  %s12850_s10 = smov 32  }
  0xbc   : > { %12266 = dma.hbm_to_vmem [thread:$0]  (!%p13069_p6), %s13116_s9, 155648, %s13110_s17, %s13118_s21, %s12849_s11, %s12849_s11, %s12850_s10  }
  0xbd   : > { %p14772_p13 = scmp.ne.s32.totalorder %s14765_s8, 0 }
  0xbe   : > { %s326_s2 = sand.u32 (!%p14772_p13), 1, %s12828_s25  }
  0xbf   : > { %324 = sbr.rel (%p14772_p13) target bundleno = 2212 (0x8a4), region = 48  ;;  %s327_s29 = scalar_lea.sflag (!%p14772_p13), [#allocation4], %s326_s2 }
  0xc0   : > { %s12214_s22 = smul.u32 (!%p14772_p13), 76, %s326_s2 }
  0xc2   : > { %s13147_s24 = scalar_lea.vmem (!%p14772_p13), [#allocation3], %s12214_s22 }
  0xc6   : > { %12799 = dma.done.wait (%p13059_p10), %s327_s29, 1216  }
  0xc7   : > { %12801 = vsyncadd (%p13059_p10), %s327_s29, 4294966080  ;;  %s335_s27 = sand.u32 1, %s12915_s30   ;;  %s12215_s20 = smul.u32 9728, %s326_s2 }
  0xc8   : > { %s336_s17 = scalar_lea.sflag [#allocation7], %s335_s27 }
  0xc9   : > { %s13154_s9 = scalar_lea.vmem [#allocation6], %s12215_s20 }
  0xca   : > { %12803 = dma.done.wait (%p13059_p10), %s336_s17, 155648  }
  0xcb   : > { %12805 = vsyncadd (%p13059_p10), %s336_s17, 4294811648  ;;  %p14773_p6 = scmp.eq.s32.totalorder %s12915_s30, 0 }
  0xcd   : > { %12807 = dma.done.wait (%p14773_p6), [#allocation7], 128   ;;  %p14774_p3 = pmov %p14773_p6 }
  0xcf   : > { %12809 = vsyncadd (%p14774_p3), [#allocation7], 4294967168  ;;  %p14775_p12 = pmov %p14774_p3 }
  0xd0   : > { %p14776_p0 = pmov %p14774_p3 }
  0xd1   : > { %12811 = dma.done.wait (%p14775_p12), [#allocation10], 16416  }
  0xd2   : > { %12813 = vsyncadd (%p14776_p0), [#allocation10], 4294950880  ;;  %p14777_p5 = pmov %p14776_p0 }
  0xd3   : > { %p14778_p8 = pmov %p14776_p0 }
  0xd4   : > { %12815 = dma.done.wait (%p14777_p5), [#allocation13], 2064  }
  0xd5   : > { %12817 = vsyncadd (%p14778_p8), [#allocation13], 4294965232  ;;  %p14779_p10 = scmp.ne.s32.totalorder %s12915_s30, 0 }
  0xd6   : > { %v12851_v0 = vmov (!%p14779_p10), 0.0  }
  0xd7   : > { %396 = sbr.rel (%p14779_p10) target bundleno = 222 (0xde), region = 80  ;;  %397 = vst [vmem:[#allocation2] sm:$0xff] (!%p14779_p10), %v12851_v0  ;;  %398 = vst [vmem:[#allocation2 + $0x8] sm:$0xff] (!%p14779_p10), %v12851_v0 }
  0xd8   : > { %399 = vst [vmem:[#allocation2 + $0x10] sm:$0xff] (!%p14779_p10), %v12851_v0  ;;  %400 = vst [vmem:[#allocation2 + $0x18] sm:$0xff] (!%p14779_p10), %v12851_v0 }
  0xd9   : > { %401 = vst [vmem:[#allocation2 + $0x20] sm:$0xff] (!%p14779_p10), %v12851_v0  ;;  %402 = vst [vmem:[#allocation2 + $0x28] sm:$0xff] (!%p14779_p10), %v12851_v0 }
  0xda   : > { %403 = vst [vmem:[#allocation2 + $0x30] sm:$0xff] (!%p14779_p10), %v12851_v0  ;;  %404 = vst [vmem:[#allocation2 + $0x38] sm:$0xff] (!%p14779_p10), %v12851_v0 }
  0xde PF: > { %v423_v1 = vld [vmem:[%s13154_s9] sm:$0xff]  ;;  %v13203_v54 = vld [vmem:[%s13147_s24] sm:$0xff]  ;;  %p12024_p7 = scmp.ne.s32.totalorder %s12915_s30, 1 }
  0xdf   : > { %v427_v2 = vld [vmem:[%s13154_s9 + $0x20] sm:$0xff]  ;;  %v13212_v59 = vcombine.high %v13203_v54, %v13203_v54 }
  0xe0   : > { %v551_v3 = vld [vmem:[%s13154_s9 + $0x400] sm:$0xff]  ;;  %v10809_v4 = vcombine.high %v423_v1, %v427_v2  ;;  %v10808_v6 = vcombine.low %v423_v1, %v427_v2 }
  0xe1   : > { %v555_v5 = vld [vmem:[%s13154_s9 + $0x420] sm:$0xff]  ;;  %7818 = vmatprep.mubr.bf16.mxu0 %v13212_v59 }
  0xe2   : > { %v431_v7 = vld [vmem:[%s13154_s9 + $0x40] sm:$0xff]  ;;  %v10937_v9 = vcombine.high %v551_v3, %v555_v5  ;;  %v10936_v10 = vcombine.low %v551_v3, %v555_v5  ;;  %7786 = vmatprep.subr.bf16.mxu0 %v10809_v4 }
  0xe3   : > { %v435_v8 = vld [vmem:[%s13154_s9 + $0x60] sm:$0xff]  ;;  %7787 = vmatpush1.bf16.msra.mxu0 %v10808_v6 }
  0xe4   : > { %v10817_v11 = vcombine.high %v431_v7, %v435_v8  ;;  %v559_v12 = vld [vmem:[%s13154_s9 + $0x440] sm:$0xff]  ;;  %7827 = vmatprep.subr.bf16.mxu1 %v10937_v9  ;;  %v10816_v19 = vcombine.low %v431_v7, %v435_v8 }
  0xe5   : > { %v563_v13 = vld [vmem:[%s13154_s9 + $0x460] sm:$0xff]  ;;  %7828 = vmatpush1.bf16.msra.mxu1 %v10936_v10 }
  0xe6   : > { %v439_v14 = vld [vmem:[%s13154_s9 + $0x80] sm:$0xff]  ;;  %v10945_v15 = vcombine.high %v559_v12, %v563_v13  ;;  %7788 = vmatprep.subr.bf16.mxu0 %v10817_v11  ;;  %v10944_v20 = vcombine.low %v559_v12, %v563_v13 }
  0xe7   : > { %v443_v16 = vld [vmem:[%s13154_s9 + $0xa0] sm:$0xff]  ;;  %7789 = vmatpush1.bf16.msra.mxu0 %v10816_v19 }
  0xe8   : > { %v567_v17 = vld [vmem:[%s13154_s9 + $0x480] sm:$0xff]  ;;  %v10825_v21 = vcombine.high %v439_v14, %v443_v16  ;;  %7829 = vmatprep.subr.bf16.mxu1 %v10945_v15  ;;  %v10824_v27 = vcombine.low %v439_v14, %v443_v16 }
  0xe9   : > { %v571_v18 = vld [vmem:[%s13154_s9 + $0x4a0] sm:$0xff]  ;;  %7830 = vmatpush1.bf16.msra.mxu1 %v10944_v20 }
  0xea   : > { %v10953_v22 = vcombine.high %v567_v17, %v571_v18  ;;  %v447_v23 = vld [vmem:[%s13154_s9 + $0xc0] sm:$0xff]  ;;  %7790 = vmatprep.subr.bf16.mxu0 %v10825_v21  ;;  %v10952_v28 = vcombine.low %v567_v17, %v571_v18 }
  0xeb   : > { %v451_v24 = vld [vmem:[%s13154_s9 + $0xe0] sm:$0xff]  ;;  %7791 = vmatpush1.bf16.msra.mxu0 %v10824_v27 }
  0xec   : > { %v575_v25 = vld [vmem:[%s13154_s9 + $0x4c0] sm:$0xff]  ;;  %v10833_v29 = vcombine.high %v447_v23, %v451_v24  ;;  %7831 = vmatprep.subr.bf16.mxu1 %v10953_v22  ;;  %v10832_v35 = vcombine.low %v447_v23, %v451_v24 }
  0xed   : > { %v579_v26 = vld [vmem:[%s13154_s9 + $0x4e0] sm:$0xff]  ;;  %7832 = vmatpush1.bf16.msra.mxu1 %v10952_v28 }
  0xee   : > { %v10961_v30 = vcombine.high %v575_v25, %v579_v26  ;;  %v455_v31 = vld [vmem:[%s13154_s9 + $0x100] sm:$0xff]  ;;  %7792 = vmatprep.subr.bf16.mxu0 %v10833_v29  ;;  %v10960_v36 = vcombine.low %v575_v25, %v579_v26 }
  0xef   : > { %v459_v32 = vld [vmem:[%s13154_s9 + $0x120] sm:$0xff]  ;;  %7793 = vmatpush1.bf16.msra.mxu0 %v10832_v35 }
  0xf0   : > { %v583_v33 = vld [vmem:[%s13154_s9 + $0x500] sm:$0xff]  ;;  %v10841_v37 = vcombine.high %v455_v31, %v459_v32  ;;  %7833 = vmatprep.subr.bf16.mxu1 %v10961_v30  ;;  %v10840_v43 = vcombine.low %v455_v31, %v459_v32 }
  0xf1   : > { %v587_v34 = vld [vmem:[%s13154_s9 + $0x520] sm:$0xff]  ;;  %7834 = vmatpush1.bf16.msra.mxu1 %v10960_v36 }
  0xf2   : > { %v10969_v38 = vcombine.high %v583_v33, %v587_v34  ;;  %v463_v39 = vld [vmem:[%s13154_s9 + $0x140] sm:$0xff]  ;;  %7794 = vmatprep.subr.bf16.mxu0 %v10841_v37  ;;  %v10968_v44 = vcombine.low %v583_v33, %v587_v34 }
  0xf3   : > { %v467_v40 = vld [vmem:[%s13154_s9 + $0x160] sm:$0xff]  ;;  %7795 = vmatpush1.bf16.msra.mxu0 %v10840_v43 }
  0xf4   : > { %v591_v41 = vld [vmem:[%s13154_s9 + $0x540] sm:$0xff]  ;;  %v10849_v45 = vcombine.high %v463_v39, %v467_v40  ;;  %7835 = vmatprep.subr.bf16.mxu1 %v10969_v38  ;;  %v10848_v51 = vcombine.low %v463_v39, %v467_v40 }
  0xf5   : > { %v595_v42 = vld [vmem:[%s13154_s9 + $0x560] sm:$0xff]  ;;  %7836 = vmatpush1.bf16.msra.mxu1 %v10968_v44 }
  0xf6   : > { %v10977_v46 = vcombine.high %v591_v41, %v595_v42  ;;  %v471_v47 = vld [vmem:[%s13154_s9 + $0x180] sm:$0xff]  ;;  %7796 = vmatprep.subr.bf16.mxu0 %v10849_v45  ;;  %v10976_v52 = vcombine.low %v591_v41, %v595_v42 }
  0xf7   : > { %v475_v48 = vld [vmem:[%s13154_s9 + $0x1a0] sm:$0xff]  ;;  %7797 = vmatpush1.bf16.msra.mxu0 %v10848_v51 }
  0xf8   : > { %v599_v49 = vld [vmem:[%s13154_s9 + $0x580] sm:$0xff]  ;;  %v10857_v53 = vcombine.high %v471_v47, %v475_v48  ;;  %7837 = vmatprep.subr.bf16.mxu1 %v10977_v46  ;;  %v10856_v63 = vcombine.low %v471_v47, %v475_v48 }
  0xf9   : > { %v603_v50 = vld [vmem:[%s13154_s9 + $0x5a0] sm:$0xff]  ;;  %7838 = vmatpush1.bf16.msra.mxu1 %v10976_v52 }
  0xfa   : > { %v13206_v55 = vld [vmem:[%s13147_s24 + $0x8] sm:$0xff]  ;;  %v10985_v56 = vcombine.high %v599_v49, %v603_v50  ;;  %7798 = vmatprep.subr.bf16.mxu0 %v10857_v53  ;;  %v10984_v0 = vcombine.low %v599_v49, %v603_v50 }
  0xfb   : > { %v479_v57 = vld [vmem:[%s13154_s9 + $0x1c0] sm:$0xff]  ;;  %v13216_v60 = vcombine.high %v13206_v55, %v13206_v55  ;;  %7799 = vmatpush1.bf16.msra.mxu0 %v10856_v63 }
  0xfc   : > { %v483_v58 = vld [vmem:[%s13154_s9 + $0x1e0] sm:$0xff]  ;;  %7839 = vmatprep.subr.bf16.mxu1 %v10985_v56 }
  0xfd   : > { %v607_v61 = vld [vmem:[%s13154_s9 + $0x5c0] sm:$0xff]  ;;  %v10865_v1 = vcombine.high %v479_v57, %v483_v58  ;;  %7859 = vmatprep.mubr.bf16.mxu1 %v13216_v60  ;;  %v10864_v7 = vcombine.low %v479_v57, %v483_v58  ;;  %7840 = vmatpush1.bf16.msra.mxu1 %v10984_v0 }
  0xfe   : > { %v611_v62 = vld [vmem:[%s13154_s9 + $0x5e0] sm:$0xff] }
  0xff   : > { %v10993_v2 = vcombine.high %v607_v61, %v611_v62  ;;  %v487_v3 = vld [vmem:[%s13154_s9 + $0x200] sm:$0xff]  ;;  %7800 = vmatprep.subr.bf16.mxu0 %v10865_v1  ;;  %v10992_v8 = vcombine.low %v607_v61, %v611_v62 }
 0x100   : > { %v491_v4 = vld [vmem:[%s13154_s9 + $0x220] sm:$0xff]  ;;  %7801 = vmatpush1.bf16.msra.mxu0 %v10864_v7 }
 0x101   : > { %v615_v5 = vld [vmem:[%s13154_s9 + $0x600] sm:$0xff]  ;;  %v10873_v9 = vcombine.high %v487_v3, %v491_v4  ;;  %7841 = vmatprep.subr.bf16.mxu1 %v10993_v2  ;;  %v10872_v15 = vcombine.low %v487_v3, %v491_v4 }
 0x102   : > { %v619_v6 = vld [vmem:[%s13154_s9 + $0x620] sm:$0xff]  ;;  %7842 = vmatpush1.bf16.msra.mxu1 %v10992_v8 }
 0x103   : > { %v11001_v10 = vcombine.high %v615_v5, %v619_v6  ;;  %v495_v11 = vld [vmem:[%s13154_s9 + $0x240] sm:$0xff]  ;;  %7802 = vmatprep.subr.bf16.mxu0 %v10873_v9  ;;  %v11000_v16 = vcombine.low %v615_v5, %v619_v6 }
 0x104   : > { %v499_v12 = vld [vmem:[%s13154_s9 + $0x260] sm:$0xff]  ;;  %7803 = vmatpush1.bf16.msra.mxu0 %v10872_v15 }
 0x105   : > { %v623_v13 = vld [vmem:[%s13154_s9 + $0x640] sm:$0xff]  ;;  %v10881_v17 = vcombine.high %v495_v11, %v499_v12  ;;  %7843 = vmatprep.subr.bf16.mxu1 %v11001_v10  ;;  %v10880_v23 = vcombine.low %v495_v11, %v499_v12 }
 0x106   : > { %v627_v14 = vld [vmem:[%s13154_s9 + $0x660] sm:$0xff]  ;;  %7844 = vmatpush1.bf16.msra.mxu1 %v11000_v16 }
 0x107   : > { %v11009_v18 = vcombine.high %v623_v13, %v627_v14  ;;  %v503_v19 = vld [vmem:[%s13154_s9 + $0x280] sm:$0xff]  ;;  %7804 = vmatprep.subr.bf16.mxu0 %v10881_v17  ;;  %v11008_v24 = vcombine.low %v623_v13, %v627_v14  ;;  %v13262_v17 = vcombine.low %v13203_v54, %v13203_v54 }
 0x108   : > { %v507_v20 = vld [vmem:[%s13154_s9 + $0x2a0] sm:$0xff]  ;;  %7805 = vmatpush1.bf16.msra.mxu0 %v10880_v23 }
 0x109   : > { %v631_v21 = vld [vmem:[%s13154_s9 + $0x680] sm:$0xff]  ;;  %v10889_v25 = vcombine.high %v503_v19, %v507_v20  ;;  %7845 = vmatprep.subr.bf16.mxu1 %v11009_v18  ;;  %v10888_v31 = vcombine.low %v503_v19, %v507_v20 }
 0x10a   : > { %v635_v22 = vld [vmem:[%s13154_s9 + $0x6a0] sm:$0xff]  ;;  %7846 = vmatpush1.bf16.msra.mxu1 %v11008_v24 }
 0x10b   : > { %v11017_v26 = vcombine.high %v631_v21, %v635_v22  ;;  %v511_v27 = vld [vmem:[%s13154_s9 + $0x2c0] sm:$0xff]  ;;  %7806 = vmatprep.subr.bf16.mxu0 %v10889_v25  ;;  %v11016_v32 = vcombine.low %v631_v21, %v635_v22  ;;  %v13271_v21 = vcombine.low %v13206_v55, %v13206_v55 }
 0x10c   : > { %v515_v28 = vld [vmem:[%s13154_s9 + $0x2e0] sm:$0xff]  ;;  %7807 = vmatpush1.bf16.msra.mxu0 %v10888_v31 }
 0x10d   : > { %v639_v29 = vld [vmem:[%s13154_s9 + $0x6c0] sm:$0xff]  ;;  %v10897_v33 = vcombine.high %v511_v27, %v515_v28  ;;  %7847 = vmatprep.subr.bf16.mxu1 %v11017_v26  ;;  %v10896_v39 = vcombine.low %v511_v27, %v515_v28 }
 0x10e   : > { %v643_v30 = vld [vmem:[%s13154_s9 + $0x6e0] sm:$0xff]  ;;  %7848 = vmatpush1.bf16.msra.mxu1 %v11016_v32 }
 0x10f   : > { %v11025_v34 = vcombine.high %v639_v29, %v643_v30  ;;  %v519_v35 = vld [vmem:[%s13154_s9 + $0x300] sm:$0xff]  ;;  %7808 = vmatprep.subr.bf16.mxu0 %v10897_v33  ;;  %v11024_v40 = vcombine.low %v639_v29, %v643_v30 }
 0x110   : > { %v523_v36 = vld [vmem:[%s13154_s9 + $0x320] sm:$0xff]  ;;  %7809 = vmatpush1.bf16.msra.mxu0 %v10896_v39 }
 0x111   : > { %v647_v37 = vld [vmem:[%s13154_s9 + $0x700] sm:$0xff]  ;;  %v10905_v41 = vcombine.high %v519_v35, %v523_v36  ;;  %7849 = vmatprep.subr.bf16.mxu1 %v11025_v34  ;;  %v10904_v47 = vcombine.low %v519_v35, %v523_v36 }
 0x112   : > { %v651_v38 = vld [vmem:[%s13154_s9 + $0x720] sm:$0xff]  ;;  %7850 = vmatpush1.bf16.msra.mxu1 %v11024_v40 }
 0x113   : > { %v11033_v42 = vcombine.high %v647_v37, %v651_v38  ;;  %v527_v43 = vld [vmem:[%s13154_s9 + $0x340] sm:$0xff]  ;;  %7810 = vmatprep.subr.bf16.mxu0 %v10905_v41  ;;  %v11032_v48 = vcombine.low %v647_v37, %v651_v38 }
 0x114   : > { %v531_v44 = vld [vmem:[%s13154_s9 + $0x360] sm:$0xff]  ;;  %7811 = vmatpush1.bf16.msra.mxu0 %v10904_v47 }
 0x115   : > { %v655_v45 = vld [vmem:[%s13154_s9 + $0x740] sm:$0xff]  ;;  %v10913_v49 = vcombine.high %v527_v43, %v531_v44  ;;  %7851 = vmatprep.subr.bf16.mxu1 %v11033_v42  ;;  %v10912_v57 = vcombine.low %v527_v43, %v531_v44 }
 0x116   : > { %v659_v46 = vld [vmem:[%s13154_s9 + $0x760] sm:$0xff]  ;;  %7852 = vmatpush1.bf16.msra.mxu1 %v11032_v48 }
 0x117   : > { %v11041_v50 = vcombine.high %v655_v45, %v659_v46  ;;  %v535_v51 = vld [vmem:[%s13154_s9 + $0x380] sm:$0xff]  ;;  %7812 = vmatprep.subr.bf16.mxu0 %v10913_v49  ;;  %v11040_v58 = vcombine.low %v655_v45, %v659_v46 }
 0x118   : > { %v539_v52 = vld [vmem:[%s13154_s9 + $0x3a0] sm:$0xff]  ;;  %7813 = vmatpush1.bf16.msra.mxu0 %v10912_v57 }
 0x119   : > { %v663_v53 = vld [vmem:[%s13154_s9 + $0x780] sm:$0xff]  ;;  %v10921_v61 = vcombine.high %v535_v51, %v539_v52  ;;  %7853 = vmatprep.subr.bf16.mxu1 %v11041_v50  ;;  %v10920_v3 = vcombine.low %v535_v51, %v539_v52 }
 0x11a   : > { %v667_v56 = vld [vmem:[%s13154_s9 + $0x7a0] sm:$0xff]  ;;  %7854 = vmatpush1.bf16.msra.mxu1 %v11040_v58 }
 0x11b   : > { %v11049_v62 = vcombine.high %v663_v53, %v667_v56  ;;  %v543_v63 = vld [vmem:[%s13154_s9 + $0x3c0] sm:$0xff]  ;;  %7814 = vmatprep.subr.bf16.mxu0 %v10921_v61  ;;  %v11048_v4 = vcombine.low %v663_v53, %v667_v56 }
 0x11c   : > { %v547_v0 = vld [vmem:[%s13154_s9 + $0x3e0] sm:$0xff]  ;;  %7815 = vmatpush1.bf16.msra.mxu0 %v10920_v3 }
 0x11d   : > { %v671_v1 = vld [vmem:[%s13154_s9 + $0x7c0] sm:$0xff]  ;;  %v10929_v5 = vcombine.high %v543_v63, %v547_v0  ;;  %7855 = vmatprep.subr.bf16.mxu1 %v11049_v62  ;;  %v10928_v11 = vcombine.low %v543_v63, %v547_v0 }
 0x11e   : > { %v675_v2 = vld [vmem:[%s13154_s9 + $0x7e0] sm:$0xff]  ;;  %7856 = vmatpush1.bf16.msra.mxu1 %v11048_v4 }
 0x11f   : > { %v11057_v6 = vcombine.high %v671_v1, %v675_v2  ;;  %v679_v7 = vld [vmem:[%s13154_s9 + $0x800] sm:$0xff]  ;;  %7816 = vmatprep.subr.bf16.mxu0 %v10929_v5  ;;  %v11056_v12 = vcombine.low %v671_v1, %v675_v2 }
 0x120   : > { %v683_v8 = vld [vmem:[%s13154_s9 + $0x820] sm:$0xff]  ;;  %7817 = vmatpush1.bf16.msra.mxu0 %v10928_v11 }
 0x121   : > { %v807_v9 = vld [vmem:[%s13154_s9 + $0xc00] sm:$0xff]  ;;  %v11065_v13 = vcombine.high %v679_v7, %v683_v8  ;;  %7857 = vmatprep.subr.bf16.mxu1 %v11057_v6  ;;  %v11064_v22 = vcombine.low %v679_v7, %v683_v8 }
 0x122   : > { %v811_v10 = vld [vmem:[%s13154_s9 + $0xc20] sm:$0xff]  ;;  %7858 = vmatpush1.bf16.msra.mxu1 %v11056_v12 }
 0x123   : > { %v11193_v14 = vcombine.high %v807_v9, %v811_v10  ;;  %v687_v15 = vld [vmem:[%s13154_s9 + $0x840] sm:$0xff]  ;;  %7868 = vmatprep.subr.bf16.mxu0 %v11065_v13  ;;  %v11192_v24 = vcombine.low %v807_v9, %v811_v10  ;;  %7819 = vmatmul.mubr.bf16.vlgmr.msra.gmra.mrb[0].mxu0 %v13262_v17 }
 0x124   : > { %v691_v16 = vld [vmem:[%s13154_s9 + $0x860] sm:$0xff]  ;;  %7869 = vmatpush1.bf16.msra.mxu0 %v11064_v22 }
 0x125   : > { %v815_v18 = vld [vmem:[%s13154_s9 + $0xc40] sm:$0xff]  ;;  %v11073_v25 = vcombine.high %v687_v15, %v691_v16  ;;  %7909 = vmatprep.subr.bf16.mxu1 %v11193_v14  ;;  %7860 = vmatmul.mubr.bf16.vlgmr.msra.gmra.mrb[0].mxu1 %v13271_v21  ;;  %v11072_v31 = vcombine.low %v687_v15, %v691_v16 }
 0x126   : > { %v819_v19 = vld [vmem:[%s13154_s9 + $0xc60] sm:$0xff]  ;;  %7910 = vmatpush1.bf16.msra.mxu1 %v11192_v24 }
 0x127   : > { %v13267_v20 = vld [vmem:[%s13147_s24 + $0x10] sm:$0xff]  ;;  %v13274_v23 = vld [vmem:[%s13147_s24 + $0x18] sm:$0xff]  ;;  %v11201_v54 = vcombine.high %v815_v18, %v819_v19  ;;  %7870 = vmatprep.subr.bf16.mxu0 %v11073_v25  ;;  %v11200_v32 = vcombine.low %v815_v18, %v819_v19 }
 0x128   : > { %v695_v26 = vld [vmem:[%s13154_s9 + $0x880] sm:$0xff]  ;;  %v13280_v28 = vcombine.high %v13267_v20, %v13267_v20  ;;  %v13287_v30 = vcombine.high %v13274_v23, %v13274_v23  ;;  %7871 = vmatpush1.bf16.msra.mxu0 %v11072_v31 }
 0x129   : > { %v699_v27 = vld [vmem:[%s13154_s9 + $0x8a0] sm:$0xff]  ;;  %7911 = vmatprep.subr.bf16.mxu1 %v11201_v54 }
 0x12a   : > { %v823_v55 = vld [vmem:[%s13154_s9 + $0xc80] sm:$0xff]  ;;  %v11081_v33 = vcombine.high %v695_v26, %v699_v27  ;;  %7900 = vmatprep.mubr.bf16.mxu0 %v13280_v28  ;;  %7941 = vmatprep.mubr.bf16.mxu1 %v13287_v30  ;;  %v11080_v39 = vcombine.low %v695_v26, %v699_v27 }
 0x12b   : > { %v827_v29 = vld [vmem:[%s13154_s9 + $0xca0] sm:$0xff]  ;;  %7912 = vmatpush1.bf16.msra.mxu1 %v11200_v32 }
 0x12c   : > { %v11209_v34 = vcombine.high %v823_v55, %v827_v29  ;;  %v703_v35 = vld [vmem:[%s13154_s9 + $0x8c0] sm:$0xff]  ;;  %7872 = vmatprep.subr.bf16.mxu0 %v11081_v33  ;;  %v11208_v40 = vcombine.low %v823_v55, %v827_v29 }
 0x12d   : > { %v707_v36 = vld [vmem:[%s13154_s9 + $0x8e0] sm:$0xff]  ;;  %7873 = vmatpush1.bf16.msra.mxu0 %v11080_v39 }
 0x12e   : > { %v831_v37 = vld [vmem:[%s13154_s9 + $0xcc0] sm:$0xff]  ;;  %v11089_v41 = vcombine.high %v703_v35, %v707_v36  ;;  %7913 = vmatprep.subr.bf16.mxu1 %v11209_v34  ;;  %v11088_v47 = vcombine.low %v703_v35, %v707_v36 }
 0x12f   : > { %v835_v38 = vld [vmem:[%s13154_s9 + $0xce0] sm:$0xff]  ;;  %7914 = vmatpush1.bf16.msra.mxu1 %v11208_v40 }
 0x130   : > { %v11217_v42 = vcombine.high %v831_v37, %v835_v38  ;;  %v711_v43 = vld [vmem:[%s13154_s9 + $0x900] sm:$0xff]  ;;  %7874 = vmatprep.subr.bf16.mxu0 %v11089_v41  ;;  %v11216_v48 = vcombine.low %v831_v37, %v835_v38 }
 0x131   : > { %v715_v44 = vld [vmem:[%s13154_s9 + $0x920] sm:$0xff]  ;;  %7875 = vmatpush1.bf16.msra.mxu0 %v11088_v47 }
 0x132   : > { %v839_v45 = vld [vmem:[%s13154_s9 + $0xd00] sm:$0xff]  ;;  %v11097_v49 = vcombine.high %v711_v43, %v715_v44  ;;  %7915 = vmatprep.subr.bf16.mxu1 %v11217_v42  ;;  %v11096_v57 = vcombine.low %v711_v43, %v715_v44 }
 0x133   : > { %v843_v46 = vld [vmem:[%s13154_s9 + $0xd20] sm:$0xff]  ;;  %7916 = vmatpush1.bf16.msra.mxu1 %v11216_v48 }
 0x134   : > { %v11225_v50 = vcombine.high %v839_v45, %v843_v46  ;;  %v719_v51 = vld [vmem:[%s13154_s9 + $0x940] sm:$0xff]  ;;  %7876 = vmatprep.subr.bf16.mxu0 %v11097_v49  ;;  %v11224_v58 = vcombine.low %v839_v45, %v843_v46 }
 0x135   : > { %v723_v52 = vld [vmem:[%s13154_s9 + $0x960] sm:$0xff]  ;;  %7877 = vmatpush1.bf16.msra.mxu0 %v11096_v57 }
 0x136   : > { %v847_v53 = vld [vmem:[%s13154_s9 + $0xd40] sm:$0xff]  ;;  %v11105_v61 = vcombine.high %v719_v51, %v723_v52  ;;  %7917 = vmatprep.subr.bf16.mxu1 %v11225_v50  ;;  %v11104_v3 = vcombine.low %v719_v51, %v723_v52 }
 0x137   : > { %v851_v56 = vld [vmem:[%s13154_s9 + $0xd60] sm:$0xff]  ;;  %7918 = vmatpush1.bf16.msra.mxu1 %v11224_v58 }
 0x138   : > { %v11233_v62 = vcombine.high %v847_v53, %v851_v56  ;;  %v727_v63 = vld [vmem:[%s13154_s9 + $0x980] sm:$0xff]  ;;  %7878 = vmatprep.subr.bf16.mxu0 %v11105_v61  ;;  %v11232_v4 = vcombine.low %v847_v53, %v851_v56 }
 0x139   : > { %v731_v0 = vld [vmem:[%s13154_s9 + $0x9a0] sm:$0xff]  ;;  %7879 = vmatpush1.bf16.msra.mxu0 %v11104_v3 }
 0x13a   : > { %v855_v1 = vld [vmem:[%s13154_s9 + $0xd80] sm:$0xff]  ;;  %v11113_v5 = vcombine.high %v727_v63, %v731_v0  ;;  %7919 = vmatprep.subr.bf16.mxu1 %v11233_v62  ;;  %v11112_v11 = vcombine.low %v727_v63, %v731_v0 }
 0x13b   : > { %v859_v2 = vld [vmem:[%s13154_s9 + $0xda0] sm:$0xff]  ;;  %7920 = vmatpush1.bf16.msra.mxu1 %v11232_v4 }
 0x13c   : > { %v11241_v6 = vcombine.high %v855_v1, %v859_v2  ;;  %v735_v7 = vld [vmem:[%s13154_s9 + $0x9c0] sm:$0xff]  ;;  %7880 = vmatprep.subr.bf16.mxu0 %v11113_v5  ;;  %v11240_v12 = vcombine.low %v855_v1, %v859_v2 }
 0x13d   : > { %v739_v8 = vld [vmem:[%s13154_s9 + $0x9e0] sm:$0xff]  ;;  %7881 = vmatpush1.bf16.msra.mxu0 %v11112_v11 }
 0x13e   : > { %v863_v9 = vld [vmem:[%s13154_s9 + $0xdc0] sm:$0xff]  ;;  %v11121_v13 = vcombine.high %v735_v7, %v739_v8  ;;  %7921 = vmatprep.subr.bf16.mxu1 %v11241_v6  ;;  %v11120_v22 = vcombine.low %v735_v7, %v739_v8 }
 0x13f   : > { %v867_v10 = vld [vmem:[%s13154_s9 + $0xde0] sm:$0xff]  ;;  %7922 = vmatpush1.bf16.msra.mxu1 %v11240_v12 }
 0x140   : > { %v11249_v14 = vcombine.high %v863_v9, %v867_v10  ;;  %v743_v15 = vld [vmem:[%s13154_s9 + $0xa00] sm:$0xff]  ;;  %7882 = vmatprep.subr.bf16.mxu0 %v11121_v13  ;;  %v11248_v24 = vcombine.low %v863_v9, %v867_v10 }
 0x141   : > { %v747_v16 = vld [vmem:[%s13154_s9 + $0xa20] sm:$0xff]  ;;  %7883 = vmatpush1.bf16.msra.mxu0 %v11120_v22 }
 0x142   : > { %v871_v18 = vld [vmem:[%s13154_s9 + $0xe00] sm:$0xff]  ;;  %v11129_v25 = vcombine.high %v743_v15, %v747_v16  ;;  %7923 = vmatprep.subr.bf16.mxu1 %v11249_v14  ;;  %v11128_v31 = vcombine.low %v743_v15, %v747_v16 }
 0x143   : > { %v875_v19 = vld [vmem:[%s13154_s9 + $0xe20] sm:$0xff]  ;;  %7924 = vmatpush1.bf16.msra.mxu1 %v11248_v24 }
 0x144   : > { %v11257_v54 = vcombine.high %v871_v18, %v875_v19  ;;  %v751_v26 = vld [vmem:[%s13154_s9 + $0xa40] sm:$0xff]  ;;  %7884 = vmatprep.subr.bf16.mxu0 %v11129_v25  ;;  %v11256_v32 = vcombine.low %v871_v18, %v875_v19 }
 0x145   : > { %v755_v27 = vld [vmem:[%s13154_s9 + $0xa60] sm:$0xff]  ;;  %7885 = vmatpush1.bf16.msra.mxu0 %v11128_v31 }
 0x146   : > { %v879_v55 = vld [vmem:[%s13154_s9 + $0xe40] sm:$0xff]  ;;  %v11137_v33 = vcombine.high %v751_v26, %v755_v27  ;;  %7925 = vmatprep.subr.bf16.mxu1 %v11257_v54  ;;  %v11136_v39 = vcombine.low %v751_v26, %v755_v27 }
 0x147   : > { %v883_v29 = vld [vmem:[%s13154_s9 + $0xe60] sm:$0xff]  ;;  %7926 = vmatpush1.bf16.msra.mxu1 %v11256_v32 }
 0x148   : > { %v11265_v34 = vcombine.high %v879_v55, %v883_v29  ;;  %v759_v35 = vld [vmem:[%s13154_s9 + $0xa80] sm:$0xff]  ;;  %7886 = vmatprep.subr.bf16.mxu0 %v11137_v33  ;;  %v11264_v40 = vcombine.low %v879_v55, %v883_v29 }
 0x149   : > { %v763_v36 = vld [vmem:[%s13154_s9 + $0xaa0] sm:$0xff]  ;;  %7887 = vmatpush1.bf16.msra.mxu0 %v11136_v39 }
 0x14a   : > { %v887_v37 = vld [vmem:[%s13154_s9 + $0xe80] sm:$0xff]  ;;  %v11145_v41 = vcombine.high %v759_v35, %v763_v36  ;;  %7927 = vmatprep.subr.bf16.mxu1 %v11265_v34  ;;  %v11144_v47 = vcombine.low %v759_v35, %v763_v36 }
 0x14b   : > { %v891_v38 = vld [vmem:[%s13154_s9 + $0xea0] sm:$0xff]  ;;  %7928 = vmatpush1.bf16.msra.mxu1 %v11264_v40  ;;  %v13357_v40 = vld [vmem:[%s13147_s24 + $0x20] sm:$0xff] }
 0x14c   : > { %v11273_v42 = vcombine.high %v887_v37, %v891_v38  ;;  %v767_v43 = vld [vmem:[%s13154_s9 + $0xac0] sm:$0xff]  ;;  %7888 = vmatprep.subr.bf16.mxu0 %v11145_v41  ;;  %v11272_v48 = vcombine.low %v887_v37, %v891_v38  ;;  %v13352_v37 = vcombine.low %v13267_v20, %v13267_v20  ;;  %v13361_v41 = vcombine.low %v13274_v23, %v13274_v23 }
 0x14d   : > { %v771_v44 = vld [vmem:[%s13154_s9 + $0xae0] sm:$0xff]  ;;  %7889 = vmatpush1.bf16.msra.mxu0 %v11144_v47 }
 0x14e   : > { %v895_v45 = vld [vmem:[%s13154_s9 + $0xec0] sm:$0xff]  ;;  %v11153_v49 = vcombine.high %v767_v43, %v771_v44  ;;  %7929 = vmatprep.subr.bf16.mxu1 %v11273_v42  ;;  %v11152_v57 = vcombine.low %v767_v43, %v771_v44 }
 0x14f   : > { %v899_v46 = vld [vmem:[%s13154_s9 + $0xee0] sm:$0xff]  ;;  %7930 = vmatpush1.bf16.msra.mxu1 %v11272_v48  ;;  %v13370_v48 = vcombine.high %v13357_v40, %v13357_v40 }
 0x150   : > { %v11281_v50 = vcombine.high %v895_v45, %v899_v46  ;;  %v775_v51 = vld [vmem:[%s13154_s9 + $0xb00] sm:$0xff]  ;;  %7890 = vmatprep.subr.bf16.mxu0 %v11153_v49  ;;  %v11280_v58 = vcombine.low %v895_v45, %v899_v46 }
 0x151   : > { %v779_v52 = vld [vmem:[%s13154_s9 + $0xb20] sm:$0xff]  ;;  %7891 = vmatpush1.bf16.msra.mxu0 %v11152_v57 }
 0x152   : > { %v903_v53 = vld [vmem:[%s13154_s9 + $0xf00] sm:$0xff]  ;;  %v11161_v61 = vcombine.high %v775_v51, %v779_v52  ;;  %7931 = vmatprep.subr.bf16.mxu1 %v11281_v50  ;;  %v11160_v3 = vcombine.low %v775_v51, %v779_v52 }
 0x153   : > { %v907_v56 = vld [vmem:[%s13154_s9 + $0xf20] sm:$0xff]  ;;  %7932 = vmatpush1.bf16.msra.mxu1 %v11280_v58 }
 0x154   : > { %v11289_v62 = vcombine.high %v903_v53, %v907_v56  ;;  %v783_v63 = vld [vmem:[%s13154_s9 + $0xb40] sm:$0xff]  ;;  %7892 = vmatprep.subr.bf16.mxu0 %v11161_v61  ;;  %v11288_v4 = vcombine.low %v903_v53, %v907_v56 }
 0x155   : > { %v787_v0 = vld [vmem:[%s13154_s9 + $0xb60] sm:$0xff]  ;;  %7893 = vmatpush1.bf16.msra.mxu0 %v11160_v3 }
 0x156   : > { %v911_v1 = vld [vmem:[%s13154_s9 + $0xf40] sm:$0xff]  ;;  %v11169_v5 = vcombine.high %v783_v63, %v787_v0  ;;  %7933 = vmatprep.subr.bf16.mxu1 %v11289_v62  ;;  %v11168_v11 = vcombine.low %v783_v63, %v787_v0 }
 0x157   : > { %v915_v2 = vld [vmem:[%s13154_s9 + $0xf60] sm:$0xff]  ;;  %7934 = vmatpush1.bf16.msra.mxu1 %v11288_v4 }
 0x158   : > { %v11297_v6 = vcombine.high %v911_v1, %v915_v2  ;;  %v791_v7 = vld [vmem:[%s13154_s9 + $0xb80] sm:$0xff]  ;;  %7894 = vmatprep.subr.bf16.mxu0 %v11169_v5  ;;  %v11296_v12 = vcombine.low %v911_v1, %v915_v2 }
 0x159   : > { %v795_v8 = vld [vmem:[%s13154_s9 + $0xba0] sm:$0xff]  ;;  %7895 = vmatpush1.bf16.msra.mxu0 %v11168_v11 }
 0x15a   : > { %v919_v9 = vld [vmem:[%s13154_s9 + $0xf80] sm:$0xff]  ;;  %v11177_v13 = vcombine.high %v791_v7, %v795_v8  ;;  %7935 = vmatprep.subr.bf16.mxu1 %v11297_v6  ;;  %v11176_v22 = vcombine.low %v791_v7, %v795_v8 }
 0x15b   : > { %v923_v10 = vld [vmem:[%s13154_s9 + $0xfa0] sm:$0xff]  ;;  %7936 = vmatpush1.bf16.msra.mxu1 %v11296_v12 }
 0x15c   : > { %v11305_v14 = vcombine.high %v919_v9, %v923_v10  ;;  %v799_v15 = vld [vmem:[%s13154_s9 + $0xbc0] sm:$0xff]  ;;  %7896 = vmatprep.subr.bf16.mxu0 %v11177_v13  ;;  %v11304_v24 = vcombine.low %v919_v9, %v923_v10 }
 0x15d   : > { %v803_v16 = vld [vmem:[%s13154_s9 + $0xbe0] sm:$0xff]  ;;  %7897 = vmatpush1.bf16.msra.mxu0 %v11176_v22 }
 0x15e   : > { %v927_v18 = vld [vmem:[%s13154_s9 + $0xfc0] sm:$0xff]  ;;  %v11185_v25 = vcombine.high %v799_v15, %v803_v16  ;;  %7937 = vmatprep.subr.bf16.mxu1 %v11305_v14  ;;  %v11184_v31 = vcombine.low %v799_v15, %v803_v16 }
 0x15f   : > { %v931_v19 = vld [vmem:[%s13154_s9 + $0xfe0] sm:$0xff]  ;;  %7938 = vmatpush1.bf16.msra.mxu1 %v11304_v24 }
 0x160   : > { %v11313_v54 = vcombine.high %v927_v18, %v931_v19  ;;  %v935_v26 = vld [vmem:[%s13154_s9 + $0x1000] sm:$0xff]  ;;  %7898 = vmatprep.subr.bf16.mxu0 %v11185_v25  ;;  %v11312_v32 = vcombine.low %v927_v18, %v931_v19 }
 0x161   : > { %v939_v27 = vld [vmem:[%s13154_s9 + $0x1020] sm:$0xff]  ;;  %7899 = vmatpush1.bf16.msra.mxu0 %v11184_v31 }
 0x162   : > { %v1063_v55 = vld [vmem:[%s13154_s9 + $0x1400] sm:$0xff]  ;;  %v11321_v33 = vcombine.high %v935_v26, %v939_v27  ;;  %7939 = vmatprep.subr.bf16.mxu1 %v11313_v54  ;;  %v11320_v42 = vcombine.low %v935_v26, %v939_v27 }
 0x163   : > { %v1067_v29 = vld [vmem:[%s13154_s9 + $0x1420] sm:$0xff]  ;;  %7940 = vmatpush1.bf16.msra.mxu1 %v11312_v32 }
 0x164   : > { %v11449_v34 = vcombine.high %v1063_v55, %v1067_v29  ;;  %v943_v35 = vld [vmem:[%s13154_s9 + $0x1040] sm:$0xff]  ;;  %7950 = vmatprep.subr.bf16.mxu0 %v11321_v33  ;;  %v11448_v44 = vcombine.low %v1063_v55, %v1067_v29  ;;  %7901 = vmatmul.mubr.bf16.vlgmr.msra.gmra.mrb[4].mxu0 %v13352_v37 }
 0x165   : > { %v947_v36 = vld [vmem:[%s13154_s9 + $0x1060] sm:$0xff]  ;;  %7951 = vmatpush1.bf16.msra.mxu0 %v11320_v42  ;;  %7982 = vmatprep.mubr.bf16.mxu0 %v13370_v48 }
 0x166   : > { %v1071_v38 = vld [vmem:[%s13154_s9 + $0x1440] sm:$0xff]  ;;  %v11329_v45 = vcombine.high %v943_v35, %v947_v36  ;;  %7991 = vmatprep.subr.bf16.mxu1 %v11449_v34  ;;  %7942 = vmatmul.mubr.bf16.vlgmr.msra.gmra.mrb[4].mxu1 %v13361_v41  ;;  %v11328_v51 = vcombine.low %v943_v35, %v947_v36 }
 0x167   : > { %v1075_v39 = vld [vmem:[%s13154_s9 + $0x1460] sm:$0xff]  ;;  %7992 = vmatpush1.bf16.msra.mxu1 %v11448_v44 }
 0x168   : > { %v13364_v43 = vld [vmem:[%s13147_s24 + $0x28] sm:$0xff]  ;;  %v11457_v20 = vcombine.high %v1071_v38, %v1075_v39  ;;  %7952 = vmatprep.subr.bf16.mxu0 %v11329_v45  ;;  %v11456_v52 = vcombine.low %v1071_v38, %v1075_v39 }
 0x169   : > { %v951_v46 = vld [vmem:[%s13154_s9 + $0x1080] sm:$0xff]  ;;  %v13377_v50 = vcombine.high %v13364_v43, %v13364_v43  ;;  %7953 = vmatpush1.bf16.msra.mxu0 %v11328_v51 }
 0x16a   : > { %v955_v47 = vld [vmem:[%s13154_s9 + $0x10a0] sm:$0xff]  ;;  %7993 = vmatprep.subr.bf16.mxu1 %v11457_v20 }
 0x16b   : > { %v1079_v23 = vld [vmem:[%s13154_s9 + $0x1480] sm:$0xff]  ;;  %v11337_v53 = vcombine.high %v951_v46, %v955_v47  ;;  %8023 = vmatprep.mubr.bf16.mxu1 %v13377_v50  ;;  %v11336_v63 = vcombine.low %v951_v46, %v955_v47  ;;  %7994 = vmatpush1.bf16.msra.mxu1 %v11456_v52 }
 0x16c   : > { %v1083_v49 = vld [vmem:[%s13154_s9 + $0x14a0] sm:$0xff] }
 0x16d   : > { %v11465_v56 = vcombine.high %v1079_v23, %v1083_v49  ;;  %v959_v57 = vld [vmem:[%s13154_s9 + $0x10c0] sm:$0xff]  ;;  %7954 = vmatprep.subr.bf16.mxu0 %v11337_v53  ;;  %v11464_v0 = vcombine.low %v1079_v23, %v1083_v49 }
 0x16e   : > { %v963_v58 = vld [vmem:[%s13154_s9 + $0x10e0] sm:$0xff]  ;;  %7955 = vmatpush1.bf16.msra.mxu0 %v11336_v63 }
 0x16f   : > { %v1087_v61 = vld [vmem:[%s13154_s9 + $0x14c0] sm:$0xff]  ;;  %v11345_v1 = vcombine.high %v959_v57, %v963_v58  ;;  %7995 = vmatprep.subr.bf16.mxu1 %v11465_v56  ;;  %v11344_v7 = vcombine.low %v959_v57, %v963_v58 }
 0x170   : > { %v1091_v62 = vld [vmem:[%s13154_s9 + $0x14e0] sm:$0xff]  ;;  %7996 = vmatpush1.bf16.msra.mxu1 %v11464_v0 }
 0x171   : > { %v11473_v2 = vcombine.high %v1087_v61, %v1091_v62  ;;  %v967_v3 = vld [vmem:[%s13154_s9 + $0x1100] sm:$0xff]  ;;  %7956 = vmatprep.subr.bf16.mxu0 %v11345_v1  ;;  %v11472_v8 = vcombine.low %v1087_v61, %v1091_v62 }
 0x172   : > { %v971_v4 = vld [vmem:[%s13154_s9 + $0x1120] sm:$0xff]  ;;  %7957 = vmatpush1.bf16.msra.mxu0 %v11344_v7 }
 0x173   : > { %v1095_v5 = vld [vmem:[%s13154_s9 + $0x1500] sm:$0xff]  ;;  %v11353_v9 = vcombine.high %v967_v3, %v971_v4  ;;  %7997 = vmatprep.subr.bf16.mxu1 %v11473_v2  ;;  %v11352_v15 = vcombine.low %v967_v3, %v971_v4 }
 0x174   : > { %v1099_v6 = vld [vmem:[%s13154_s9 + $0x1520] sm:$0xff]  ;;  %7998 = vmatpush1.bf16.msra.mxu1 %v11472_v8 }
 0x175   : > { %v11481_v10 = vcombine.high %v1095_v5, %v1099_v6  ;;  %v975_v11 = vld [vmem:[%s13154_s9 + $0x1140] sm:$0xff]  ;;  %7958 = vmatprep.subr.bf16.mxu0 %v11353_v9  ;;  %v11480_v16 = vcombine.low %v1095_v5, %v1099_v6 }
 0x176   : > { %v979_v12 = vld [vmem:[%s13154_s9 + $0x1160] sm:$0xff]  ;;  %7959 = vmatpush1.bf16.msra.mxu0 %v11352_v15 }
 0x177   : > { %v1103_v13 = vld [vmem:[%s13154_s9 + $0x1540] sm:$0xff]  ;;  %v11361_v18 = vcombine.high %v975_v11, %v979_v12  ;;  %7999 = vmatprep.subr.bf16.mxu1 %v11481_v10  ;;  %v11360_v26 = vcombine.low %v975_v11, %v979_v12 }
 0x178   : > { %v1107_v14 = vld [vmem:[%s13154_s9 + $0x1560] sm:$0xff]  ;;  %8000 = vmatpush1.bf16.msra.mxu1 %v11480_v16 }
 0x179   : > { %v11489_v19 = vcombine.high %v1103_v13, %v1107_v14  ;;  %v983_v22 = vld [vmem:[%s13154_s9 + $0x1180] sm:$0xff]  ;;  %7960 = vmatprep.subr.bf16.mxu0 %v11361_v18  ;;  %v11488_v27 = vcombine.low %v1103_v13, %v1107_v14 }
 0x17a   : > { %v987_v24 = vld [vmem:[%s13154_s9 + $0x11a0] sm:$0xff]  ;;  %7961 = vmatpush1.bf16.msra.mxu0 %v11360_v26 }
 0x17b   : > { %v1111_v25 = vld [vmem:[%s13154_s9 + $0x1580] sm:$0xff]  ;;  %v11369_v55 = vcombine.high %v983_v22, %v987_v24  ;;  %8001 = vmatprep.subr.bf16.mxu1 %v11489_v19  ;;  %v11368_v35 = vcombine.low %v983_v22, %v987_v24 }
 0x17c   : > { %v1115_v54 = vld [vmem:[%s13154_s9 + $0x15a0] sm:$0xff]  ;;  %8002 = vmatpush1.bf16.msra.mxu1 %v11488_v27 }
 0x17d   : > { %v11497_v29 = vcombine.high %v1111_v25, %v1115_v54  ;;  %v991_v31 = vld [vmem:[%s13154_s9 + $0x11c0] sm:$0xff]  ;;  %7962 = vmatprep.subr.bf16.mxu0 %v11369_v55  ;;  %v11496_v36 = vcombine.low %v1111_v25, %v1115_v54 }
 0x17e   : > { %v995_v32 = vld [vmem:[%s13154_s9 + $0x11e0] sm:$0xff]  ;;  %7963 = vmatpush1.bf16.msra.mxu0 %v11368_v35 }
 0x17f   : > { %v1119_v33 = vld [vmem:[%s13154_s9 + $0x15c0] sm:$0xff]  ;;  %v11377_v38 = vcombine.high %v991_v31, %v995_v32  ;;  %8003 = vmatprep.subr.bf16.mxu1 %v11497_v29  ;;  %v11376_v46 = vcombine.low %v991_v31, %v995_v32 }
 0x180   : > { %v1123_v34 = vld [vmem:[%s13154_s9 + $0x15e0] sm:$0xff]  ;;  %8004 = vmatpush1.bf16.msra.mxu1 %v11496_v36 }
 0x181   : > { %v11505_v39 = vcombine.high %v1119_v33, %v1123_v34  ;;  %v999_v42 = vld [vmem:[%s13154_s9 + $0x1200] sm:$0xff]  ;;  %7964 = vmatprep.subr.bf16.mxu0 %v11377_v38  ;;  %v11504_v47 = vcombine.low %v1119_v33, %v1123_v34 }
 0x182   : > { %v1003_v44 = vld [vmem:[%s13154_s9 + $0x1220] sm:$0xff]  ;;  %7965 = vmatpush1.bf16.msra.mxu0 %v11376_v46 }
 0x183   : > { %v1127_v45 = vld [vmem:[%s13154_s9 + $0x1600] sm:$0xff]  ;;  %v11385_v23 = vcombine.high %v999_v42, %v1003_v44  ;;  %8005 = vmatprep.subr.bf16.mxu1 %v11505_v39  ;;  %v11384_v57 = vcombine.low %v999_v42, %v1003_v44 }
 0x184   : > { %v1131_v20 = vld [vmem:[%s13154_s9 + $0x1620] sm:$0xff]  ;;  %8006 = vmatpush1.bf16.msra.mxu1 %v11504_v47 }
 0x185   : > { %v11513_v49 = vcombine.high %v1127_v45, %v1131_v20  ;;  %v1007_v51 = vld [vmem:[%s13154_s9 + $0x1240] sm:$0xff]  ;;  %7966 = vmatprep.subr.bf16.mxu0 %v11385_v23  ;;  %v11512_v58 = vcombine.low %v1127_v45, %v1131_v20 }
 0x186   : > { %v1011_v52 = vld [vmem:[%s13154_s9 + $0x1260] sm:$0xff]  ;;  %7967 = vmatpush1.bf16.msra.mxu0 %v11384_v57 }
 0x187   : > { %v1135_v53 = vld [vmem:[%s13154_s9 + $0x1640] sm:$0xff]  ;;  %v11393_v61 = vcombine.high %v1007_v51, %v1011_v52  ;;  %8007 = vmatprep.subr.bf16.mxu1 %v11513_v49  ;;  %v11392_v3 = vcombine.low %v1007_v51, %v1011_v52 }
 0x188   : > { %v1139_v56 = vld [vmem:[%s13154_s9 + $0x1660] sm:$0xff]  ;;  %8008 = vmatpush1.bf16.msra.mxu1 %v11512_v58 }
 0x189   : > { %v11521_v62 = vcombine.high %v1135_v53, %v1139_v56  ;;  %v1015_v63 = vld [vmem:[%s13154_s9 + $0x1280] sm:$0xff]  ;;  %7968 = vmatprep.subr.bf16.mxu0 %v11393_v61  ;;  %v11520_v4 = vcombine.low %v1135_v53, %v1139_v56 }
 0x18a   : > { %v1019_v0 = vld [vmem:[%s13154_s9 + $0x12a0] sm:$0xff]  ;;  %7969 = vmatpush1.bf16.msra.mxu0 %v11392_v3 }
 0x18b   : > { %v1143_v1 = vld [vmem:[%s13154_s9 + $0x1680] sm:$0xff]  ;;  %v11401_v5 = vcombine.high %v1015_v63, %v1019_v0  ;;  %8009 = vmatprep.subr.bf16.mxu1 %v11521_v62  ;;  %v11400_v11 = vcombine.low %v1015_v63, %v1019_v0 }
 0x18c   : > { %v1147_v2 = vld [vmem:[%s13154_s9 + $0x16a0] sm:$0xff]  ;;  %8010 = vmatpush1.bf16.msra.mxu1 %v11520_v4 }
 0x18d   : > { %v11529_v6 = vcombine.high %v1143_v1, %v1147_v2  ;;  %v1023_v7 = vld [vmem:[%s13154_s9 + $0x12c0] sm:$0xff]  ;;  %7970 = vmatprep.subr.bf16.mxu0 %v11401_v5  ;;  %v11528_v12 = vcombine.low %v1143_v1, %v1147_v2  ;;  %v13442_v5 = vcombine.low %v13357_v40, %v13357_v40 }
 0x18e   : > { %v1027_v8 = vld [vmem:[%s13154_s9 + $0x12e0] sm:$0xff]  ;;  %7971 = vmatpush1.bf16.msra.mxu0 %v11400_v11 }
 0x18f   : > { %v1151_v9 = vld [vmem:[%s13154_s9 + $0x16c0] sm:$0xff]  ;;  %v11409_v13 = vcombine.high %v1023_v7, %v1027_v8  ;;  %8011 = vmatprep.subr.bf16.mxu1 %v11529_v6  ;;  %v11408_v22 = vcombine.low %v1023_v7, %v1027_v8 }
 0x190   : > { %v1155_v10 = vld [vmem:[%s13154_s9 + $0x16e0] sm:$0xff]  ;;  %8012 = vmatpush1.bf16.msra.mxu1 %v11528_v12 }
 0x191   : > { %v11537_v14 = vcombine.high %v1151_v9, %v1155_v10  ;;  %v1031_v15 = vld [vmem:[%s13154_s9 + $0x1300] sm:$0xff]  ;;  %7972 = vmatprep.subr.bf16.mxu0 %v11409_v13  ;;  %v11536_v24 = vcombine.low %v1151_v9, %v1155_v10  ;;  %v13451_v9 = vcombine.low %v13364_v43, %v13364_v43 }
 0x192   : > { %v1035_v16 = vld [vmem:[%s13154_s9 + $0x1320] sm:$0xff]  ;;  %7973 = vmatpush1.bf16.msra.mxu0 %v11408_v22 }
 0x193   : > { %v1159_v18 = vld [vmem:[%s13154_s9 + $0x1700] sm:$0xff]  ;;  %v11417_v25 = vcombine.high %v1031_v15, %v1035_v16  ;;  %8013 = vmatprep.subr.bf16.mxu1 %v11537_v14  ;;  %v11416_v31 = vcombine.low %v1031_v15, %v1035_v16 }
 0x194   : > { %v1163_v19 = vld [vmem:[%s13154_s9 + $0x1720] sm:$0xff]  ;;  %8014 = vmatpush1.bf16.msra.mxu1 %v11536_v24 }
 0x195   : > { %v11545_v54 = vcombine.high %v1159_v18, %v1163_v19  ;;  %v1039_v26 = vld [vmem:[%s13154_s9 + $0x1340] sm:$0xff]  ;;  %7974 = vmatprep.subr.bf16.mxu0 %v11417_v25  ;;  %v11544_v32 = vcombine.low %v1159_v18, %v1163_v19 }
 0x196   : > { %v1043_v27 = vld [vmem:[%s13154_s9 + $0x1360] sm:$0xff]  ;;  %7975 = vmatpush1.bf16.msra.mxu0 %v11416_v31 }
 0x197   : > { %v1167_v55 = vld [vmem:[%s13154_s9 + $0x1740] sm:$0xff]  ;;  %v11425_v33 = vcombine.high %v1039_v26, %v1043_v27  ;;  %8015 = vmatprep.subr.bf16.mxu1 %v11545_v54  ;;  %v11424_v42 = vcombine.low %v1039_v26, %v1043_v27 }
 0x198   : > { %v1171_v29 = vld [vmem:[%s13154_s9 + $0x1760] sm:$0xff]  ;;  %8016 = vmatpush1.bf16.msra.mxu1 %v11544_v32 }
 0x199   : > { %v11553_v34 = vcombine.high %v1167_v55, %v1171_v29  ;;  %v1047_v35 = vld [vmem:[%s13154_s9 + $0x1380] sm:$0xff]  ;;  %7976 = vmatprep.subr.bf16.mxu0 %v11425_v33  ;;  %v11552_v44 = vcombine.low %v1167_v55, %v1171_v29 }
 0x19a   : > { %v1051_v36 = vld [vmem:[%s13154_s9 + $0x13a0] sm:$0xff]  ;;  %7977 = vmatpush1.bf16.msra.mxu0 %v11424_v42 }
 0x19b   : > { %v1175_v38 = vld [vmem:[%s13154_s9 + $0x1780] sm:$0xff]  ;;  %v11433_v45 = vcombine.high %v1047_v35, %v1051_v36  ;;  %8017 = vmatprep.subr.bf16.mxu1 %v11553_v34  ;;  %v11432_v51 = vcombine.low %v1047_v35, %v1051_v36 }
 0x19c   : > { %v1179_v39 = vld [vmem:[%s13154_s9 + $0x17a0] sm:$0xff]  ;;  %8018 = vmatpush1.bf16.msra.mxu1 %v11552_v44 }
 0x19d   : > { %v11561_v20 = vcombine.high %v1175_v38, %v1179_v39  ;;  %v1055_v46 = vld [vmem:[%s13154_s9 + $0x13c0] sm:$0xff]  ;;  %7978 = vmatprep.subr.bf16.mxu0 %v11433_v45  ;;  %v11560_v52 = vcombine.low %v1175_v38, %v1179_v39 }
 0x19e   : > { %v1059_v47 = vld [vmem:[%s13154_s9 + $0x13e0] sm:$0xff]  ;;  %7979 = vmatpush1.bf16.msra.mxu0 %v11432_v51 }
 0x19f   : > { %v1183_v23 = vld [vmem:[%s13154_s9 + $0x17c0] sm:$0xff]  ;;  %v11441_v53 = vcombine.high %v1055_v46, %v1059_v47  ;;  %8019 = vmatprep.subr.bf16.mxu1 %v11561_v20  ;;  %v11440_v63 = vcombine.low %v1055_v46, %v1059_v47 }
 0x1a0   : > { %v1187_v49 = vld [vmem:[%s13154_s9 + $0x17e0] sm:$0xff]  ;;  %8020 = vmatpush1.bf16.msra.mxu1 %v11560_v52 }
 0x1a1   : > { %v11569_v56 = vcombine.high %v1183_v23, %v1187_v49  ;;  %v1191_v57 = vld [vmem:[%s13154_s9 + $0x1800] sm:$0xff]  ;;  %7980 = vmatprep.subr.bf16.mxu0 %v11441_v53  ;;  %v11568_v0 = vcombine.low %v1183_v23, %v1187_v49 }
 0x1a2   : > { %v1195_v58 = vld [vmem:[%s13154_s9 + $0x1820] sm:$0xff]  ;;  %7981 = vmatpush1.bf16.msra.mxu0 %v11440_v63 }
 0x1a3   : > { %v1319_v61 = vld [vmem:[%s13154_s9 + $0x1c00] sm:$0xff]  ;;  %v11577_v1 = vcombine.high %v1191_v57, %v1195_v58  ;;  %8021 = vmatprep.subr.bf16.mxu1 %v11569_v56  ;;  %v11576_v10 = vcombine.low %v1191_v57, %v1195_v58 }
 0x1a4   : > { %v1323_v62 = vld [vmem:[%s13154_s9 + $0x1c20] sm:$0xff]  ;;  %8022 = vmatpush1.bf16.msra.mxu1 %v11568_v0 }
 0x1a5   : > { %v11705_v2 = vcombine.high %v1319_v61, %v1323_v62  ;;  %v1199_v3 = vld [vmem:[%s13154_s9 + $0x1840] sm:$0xff]  ;;  %8032 = vmatprep.subr.bf16.mxu0 %v11577_v1  ;;  %v11704_v12 = vcombine.low %v1319_v61, %v1323_v62  ;;  %7983 = vmatmul.mubr.bf16.vlgmr.msra.gmra.mrb[8].mxu0 %v13442_v5 }
 0x1a6   : > { %v1203_v4 = vld [vmem:[%s13154_s9 + $0x1860] sm:$0xff]  ;;  %8033 = vmatpush1.bf16.msra.mxu0 %v11576_v10 }
 0x1a7   : > { %v1327_v6 = vld [vmem:[%s13154_s9 + $0x1c40] sm:$0xff]  ;;  %v11585_v13 = vcombine.high %v1199_v3, %v1203_v4  ;;  %8073 = vmatprep.subr.bf16.mxu1 %v11705_v2  ;;  %8024 = vmatmul.mubr.bf16.vlgmr.msra.gmra.mrb[8].mxu1 %v13451_v9  ;;  %v11584_v22 = vcombine.low %v1199_v3, %v1203_v4 }
 0x1a8   : > { %v1331_v7 = vld [vmem:[%s13154_s9 + $0x1c60] sm:$0xff]  ;;  %8074 = vmatpush1.bf16.msra.mxu1 %v11704_v12 }
 0x1a9   : > { %v13447_v8 = vld [vmem:[%s13147_s24 + $0x30] sm:$0xff]  ;;  %v13454_v11 = vld [vmem:[%s13147_s24 + $0x38] sm:$0xff]  ;;  %v11713_v40 = vcombine.high %v1327_v6, %v1331_v7  ;;  %8034 = vmatprep.subr.bf16.mxu0 %v11585_v13  ;;  %v11712_v24 = vcombine.low %v1327_v6, %v1331_v7 }
 0x1aa   : > { %v1207_v14 = vld [vmem:[%s13154_s9 + $0x1880] sm:$0xff]  ;;  %v13460_v16 = vcombine.high %v13447_v8, %v13447_v8  ;;  %v13467_v19 = vcombine.high %v13454_v11, %v13454_v11  ;;  %8035 = vmatpush1.bf16.msra.mxu0 %v11584_v22 }
 0x1ab   : > { %v1211_v15 = vld [vmem:[%s13154_s9 + $0x18a0] sm:$0xff]  ;;  %8075 = vmatprep.subr.bf16.mxu1 %v11713_v40 }
 0x1ac   : > { %v1335_v43 = vld [vmem:[%s13154_s9 + $0x1c80] sm:$0xff]  ;;  %v11593_v25 = vcombine.high %v1207_v14, %v1211_v15  ;;  %8064 = vmatprep.mubr.bf16.mxu0 %v13460_v16  ;;  %8105 = vmatprep.mubr.bf16.mxu1 %v13467_v19  ;;  %v11592_v31 = vcombine.low %v1207_v14, %v1211_v15 }
 0x1ad   : > { %v1339_v18 = vld [vmem:[%s13154_s9 + $0x1ca0] sm:$0xff]  ;;  %8076 = vmatpush1.bf16.msra.mxu1 %v11712_v24 }
 0x1ae   : > { %v11721_v54 = vcombine.high %v1335_v43, %v1339_v18  ;;  %v1215_v26 = vld [vmem:[%s13154_s9 + $0x18c0] sm:$0xff]  ;;  %8036 = vmatprep.subr.bf16.mxu0 %v11593_v25  ;;  %v11720_v32 = vcombine.low %v1335_v43, %v1339_v18 }
 0x1af   : > { %v1219_v27 = vld [vmem:[%s13154_s9 + $0x18e0] sm:$0xff]  ;;  %8037 = vmatpush1.bf16.msra.mxu0 %v11592_v31 }
 0x1b0   : > { %v1343_v55 = vld [vmem:[%s13154_s9 + $0x1cc0] sm:$0xff]  ;;  %v11601_v33 = vcombine.high %v1215_v26, %v1219_v27  ;;  %8077 = vmatprep.subr.bf16.mxu1 %v11721_v54  ;;  %v11600_v42 = vcombine.low %v1215_v26, %v1219_v27 }
 0x1b1   : > { %v1347_v29 = vld [vmem:[%s13154_s9 + $0x1ce0] sm:$0xff]  ;;  %8078 = vmatpush1.bf16.msra.mxu1 %v11720_v32 }
 0x1b2   : > { %v11729_v34 = vcombine.high %v1343_v55, %v1347_v29  ;;  %v1223_v35 = vld [vmem:[%s13154_s9 + $0x1900] sm:$0xff]  ;;  %8038 = vmatprep.subr.bf16.mxu0 %v11601_v33  ;;  %v11728_v44 = vcombine.low %v1343_v55, %v1347_v29 }
 0x1b3   : > { %v1227_v36 = vld [vmem:[%s13154_s9 + $0x1920] sm:$0xff]  ;;  %8039 = vmatpush1.bf16.msra.mxu0 %v11600_v42 }
 0x1b4   : > { %v1351_v38 = vld [vmem:[%s13154_s9 + $0x1d00] sm:$0xff]  ;;  %v11609_v45 = vcombine.high %v1223_v35, %v1227_v36  ;;  %8079 = vmatprep.subr.bf16.mxu1 %v11729_v34  ;;  %v11608_v51 = vcombine.low %v1223_v35, %v1227_v36 }
 0x1b5   : > { %v1355_v39 = vld [vmem:[%s13154_s9 + $0x1d20] sm:$0xff]  ;;  %8080 = vmatpush1.bf16.msra.mxu1 %v11728_v44 }
 0x1b6   : > { %v11737_v20 = vcombine.high %v1351_v38, %v1355_v39  ;;  %v1231_v46 = vld [vmem:[%s13154_s9 + $0x1940] sm:$0xff]  ;;  %8040 = vmatprep.subr.bf16.mxu0 %v11609_v45  ;;  %v11736_v52 = vcombine.low %v1351_v38, %v1355_v39 }
 0x1b7   : > { %v1235_v47 = vld [vmem:[%s13154_s9 + $0x1960] sm:$0xff]  ;;  %8041 = vmatpush1.bf16.msra.mxu0 %v11608_v51 }
 0x1b8   : > { %v1359_v23 = vld [vmem:[%s13154_s9 + $0x1d40] sm:$0xff]  ;;  %v11617_v53 = vcombine.high %v1231_v46, %v1235_v47  ;;  %8081 = vmatprep.subr.bf16.mxu1 %v11737_v20  ;;  %v11616_v63 = vcombine.low %v1231_v46, %v1235_v47 }
 0x1b9   : > { %v1363_v49 = vld [vmem:[%s13154_s9 + $0x1d60] sm:$0xff]  ;;  %8082 = vmatpush1.bf16.msra.mxu1 %v11736_v52 }
 0x1ba   : > { %v11745_v56 = vcombine.high %v1359_v23, %v1363_v49  ;;  %v1239_v57 = vld [vmem:[%s13154_s9 + $0x1980] sm:$0xff]  ;;  %8042 = vmatprep.subr.bf16.mxu0 %v11617_v53  ;;  %v11744_v0 = vcombine.low %v1359_v23, %v1363_v49 }
 0x1bb   : > { %v1243_v58 = vld [vmem:[%s13154_s9 + $0x19a0] sm:$0xff]  ;;  %8043 = vmatpush1.bf16.msra.mxu0 %v11616_v63 }
 0x1bc   : > { %v1367_v61 = vld [vmem:[%s13154_s9 + $0x1d80] sm:$0xff]  ;;  %v11625_v1 = vcombine.high %v1239_v57, %v1243_v58  ;;  %8083 = vmatprep.subr.bf16.mxu1 %v11745_v56  ;;  %v11624_v10 = vcombine.low %v1239_v57, %v1243_v58 }
 0x1bd   : > { %v1371_v62 = vld [vmem:[%s13154_s9 + $0x1da0] sm:$0xff]  ;;  %8084 = vmatpush1.bf16.msra.mxu1 %v11744_v0 }
 0x1be   : > { %v11753_v2 = vcombine.high %v1367_v61, %v1371_v62  ;;  %v1247_v3 = vld [vmem:[%s13154_s9 + $0x19c0] sm:$0xff]  ;;  %8044 = vmatprep.subr.bf16.mxu0 %v11625_v1  ;;  %v11752_v12 = vcombine.low %v1367_v61, %v1371_v62 }
 0x1bf   : > { %v1251_v4 = vld [vmem:[%s13154_s9 + $0x19e0] sm:$0xff]  ;;  %8045 = vmatpush1.bf16.msra.mxu0 %v11624_v10 }
 0x1c0   : > { %v1375_v6 = vld [vmem:[%s13154_s9 + $0x1dc0] sm:$0xff]  ;;  %v11633_v13 = vcombine.high %v1247_v3, %v1251_v4  ;;  %8085 = vmatprep.subr.bf16.mxu1 %v11753_v2  ;;  %v11632_v22 = vcombine.low %v1247_v3, %v1251_v4 }
 0x1c1   : > { %v1379_v7 = vld [vmem:[%s13154_s9 + $0x1de0] sm:$0xff]  ;;  %8086 = vmatpush1.bf16.msra.mxu1 %v11752_v12 }
 0x1c2   : > { %v11761_v40 = vcombine.high %v1375_v6, %v1379_v7  ;;  %v1255_v14 = vld [vmem:[%s13154_s9 + $0x1a00] sm:$0xff]  ;;  %8046 = vmatprep.subr.bf16.mxu0 %v11633_v13  ;;  %v11760_v24 = vcombine.low %v1375_v6, %v1379_v7 }
 0x1c3   : > { %v1259_v15 = vld [vmem:[%s13154_s9 + $0x1a20] sm:$0xff]  ;;  %8047 = vmatpush1.bf16.msra.mxu0 %v11632_v22 }
 0x1c4   : > { %v1383_v43 = vld [vmem:[%s13154_s9 + $0x1e00] sm:$0xff]  ;;  %v11641_v25 = vcombine.high %v1255_v14, %v1259_v15  ;;  %8087 = vmatprep.subr.bf16.mxu1 %v11761_v40  ;;  %v11640_v31 = vcombine.low %v1255_v14, %v1259_v15 }
 0x1c5   : > { %v1387_v18 = vld [vmem:[%s13154_s9 + $0x1e20] sm:$0xff]  ;;  %8088 = vmatpush1.bf16.msra.mxu1 %v11760_v24 }
 0x1c6   : > { %v11769_v54 = vcombine.high %v1383_v43, %v1387_v18  ;;  %v1263_v26 = vld [vmem:[%s13154_s9 + $0x1a40] sm:$0xff]  ;;  %8048 = vmatprep.subr.bf16.mxu0 %v11641_v25  ;;  %v11768_v32 = vcombine.low %v1383_v43, %v1387_v18 }
 0x1c7   : > { %v1267_v27 = vld [vmem:[%s13154_s9 + $0x1a60] sm:$0xff]  ;;  %8049 = vmatpush1.bf16.msra.mxu0 %v11640_v31 }
 0x1c8   : > { %v1391_v55 = vld [vmem:[%s13154_s9 + $0x1e40] sm:$0xff]  ;;  %v11649_v33 = vcombine.high %v1263_v26, %v1267_v27  ;;  %8089 = vmatprep.subr.bf16.mxu1 %v11769_v54  ;;  %v11648_v42 = vcombine.low %v1263_v26, %v1267_v27 }
 0x1c9   : > { %v1395_v29 = vld [vmem:[%s13154_s9 + $0x1e60] sm:$0xff]  ;;  %8090 = vmatpush1.bf16.msra.mxu1 %v11768_v32 }
 0x1ca   : > { %v11777_v34 = vcombine.high %v1391_v55, %v1395_v29  ;;  %v1271_v35 = vld [vmem:[%s13154_s9 + $0x1a80] sm:$0xff]  ;;  %8050 = vmatprep.subr.bf16.mxu0 %v11649_v33  ;;  %v11776_v44 = vcombine.low %v1391_v55, %v1395_v29 }
 0x1cb   : > { %v1275_v36 = vld [vmem:[%s13154_s9 + $0x1aa0] sm:$0xff]  ;;  %8051 = vmatpush1.bf16.msra.mxu0 %v11648_v42 }
 0x1cc   : > { %v1399_v38 = vld [vmem:[%s13154_s9 + $0x1e80] sm:$0xff]  ;;  %v11657_v45 = vcombine.high %v1271_v35, %v1275_v36  ;;  %8091 = vmatprep.subr.bf16.mxu1 %v11777_v34  ;;  %v11656_v51 = vcombine.low %v1271_v35, %v1275_v36 }
 0x1cd   : > { %v1403_v39 = vld [vmem:[%s13154_s9 + $0x1ea0] sm:$0xff]  ;;  %8092 = vmatpush1.bf16.msra.mxu1 %v11776_v44 }
 0x1ce   : > { %v11785_v20 = vcombine.high %v1399_v38, %v1403_v39  ;;  %v1279_v46 = vld [vmem:[%s13154_s9 + $0x1ac0] sm:$0xff]  ;;  %8052 = vmatprep.subr.bf16.mxu0 %v11657_v45  ;;  %v11784_v52 = vcombine.low %v1399_v38, %v1403_v39 }
 0x1cf   : > { %v1283_v47 = vld [vmem:[%s13154_s9 + $0x1ae0] sm:$0xff]  ;;  %8053 = vmatpush1.bf16.msra.mxu0 %v11656_v51 }
 0x1d0   : > { %v1407_v23 = vld [vmem:[%s13154_s9 + $0x1ec0] sm:$0xff]  ;;  %v11665_v53 = vcombine.high %v1279_v46, %v1283_v47  ;;  %8093 = vmatprep.subr.bf16.mxu1 %v11785_v20  ;;  %v11664_v63 = vcombine.low %v1279_v46, %v1283_v47 }
 0x1d1   : > { %v1411_v49 = vld [vmem:[%s13154_s9 + $0x1ee0] sm:$0xff]  ;;  %8094 = vmatpush1.bf16.msra.mxu1 %v11784_v52  ;;  %v13538_v52 = vcombine.low %v13454_v11, %v13454_v11 }
 0x1d2   : > { %v11793_v56 = vcombine.high %v1407_v23, %v1411_v49  ;;  %v1287_v57 = vld [vmem:[%s13154_s9 + $0x1b00] sm:$0xff]  ;;  %8054 = vmatprep.subr.bf16.mxu0 %v11665_v53  ;;  %v11792_v0 = vcombine.low %v1407_v23, %v1411_v49  ;;  %v13532_v23 = vcombine.low %v13447_v8, %v13447_v8 }
 0x1d3   : > { %v1291_v58 = vld [vmem:[%s13154_s9 + $0x1b20] sm:$0xff]  ;;  %8055 = vmatpush1.bf16.msra.mxu0 %v11664_v63 }
 0x1d4   : > { %v1415_v61 = vld [vmem:[%s13154_s9 + $0x1f00] sm:$0xff]  ;;  %v11673_v1 = vcombine.high %v1287_v57, %v1291_v58  ;;  %8095 = vmatprep.subr.bf16.mxu1 %v11793_v56  ;;  %v11672_v10 = vcombine.low %v1287_v57, %v1291_v58  ;;  %v13541_v56 = vld [vmem:[%s13147_s24 + $0x40] sm:$0xff] }
 0x1d5   : > { %v1419_v62 = vld [vmem:[%s13154_s9 + $0x1f20] sm:$0xff]  ;;  %8096 = vmatpush1.bf16.msra.mxu1 %v11792_v0  ;;  %v13550_v11 = vcombine.high %v13541_v56, %v13541_v56 }
 0x1d6   : > { %v11801_v2 = vcombine.high %v1415_v61, %v1419_v62  ;;  %v1295_v3 = vld [vmem:[%s13154_s9 + $0x1b40] sm:$0xff]  ;;  %8056 = vmatprep.subr.bf16.mxu0 %v11673_v1  ;;  %v11800_v12 = vcombine.low %v1415_v61, %v1419_v62 }
 0x1d7   : > { %v1299_v4 = vld [vmem:[%s13154_s9 + $0x1b60] sm:$0xff]  ;;  %8057 = vmatpush1.bf16.msra.mxu0 %v11672_v10  ;;  %v12852_v10 = vmov 0  }
 0x1d8   : > { %v1423_v6 = vld [vmem:[%s13154_s9 + $0x1f40] sm:$0xff]  ;;  %v11681_v13 = vcombine.high %v1295_v3, %v1299_v4  ;;  %8097 = vmatprep.subr.bf16.mxu1 %v11801_v2  ;;  %v11680_v22 = vcombine.low %v1295_v3, %v1299_v4 }
 0x1d9   : > { %v1427_v7 = vld [vmem:[%s13154_s9 + $0x1f60] sm:$0xff]  ;;  %8098 = vmatpush1.bf16.msra.mxu1 %v11800_v12 }
 0x1da   : > { %v11809_v40 = vcombine.high %v1423_v6, %v1427_v7  ;;  %v1303_v14 = vld [vmem:[%s13154_s9 + $0x1b80] sm:$0xff]  ;;  %8058 = vmatprep.subr.bf16.mxu0 %v11681_v13  ;;  %v11808_v24 = vcombine.low %v1423_v6, %v1427_v7 }
 0x1db   : > { %v1307_v15 = vld [vmem:[%s13154_s9 + $0x1ba0] sm:$0xff]  ;;  %8059 = vmatpush1.bf16.msra.mxu0 %v11680_v22 }
 0x1dc   : > { %v1431_v43 = vld [vmem:[%s13154_s9 + $0x1f80] sm:$0xff]  ;;  %v11689_v25 = vcombine.high %v1303_v14, %v1307_v15  ;;  %8099 = vmatprep.subr.bf16.mxu1 %v11809_v40  ;;  %v11688_v31 = vcombine.low %v1303_v14, %v1307_v15 }
 0x1dd   : > { %v1435_v18 = vld [vmem:[%s13154_s9 + $0x1fa0] sm:$0xff]  ;;  %8100 = vmatpush1.bf16.msra.mxu1 %v11808_v24 }
 0x1de   : > { %v11817_v54 = vcombine.high %v1431_v43, %v1435_v18  ;;  %v1311_v26 = vld [vmem:[%s13154_s9 + $0x1bc0] sm:$0xff]  ;;  %8060 = vmatprep.subr.bf16.mxu0 %v11689_v25  ;;  %v11816_v32 = vcombine.low %v1431_v43, %v1435_v18 }
 0x1df   : > { %v1315_v27 = vld [vmem:[%s13154_s9 + $0x1be0] sm:$0xff]  ;;  %8061 = vmatpush1.bf16.msra.mxu0 %v11688_v31 }
 0x1e0   : > { %v1439_v55 = vld [vmem:[%s13154_s9 + $0x1fc0] sm:$0xff]  ;;  %v11697_v33 = vcombine.high %v1311_v26, %v1315_v27  ;;  %8101 = vmatprep.subr.bf16.mxu1 %v11817_v54  ;;  %v11696_v42 = vcombine.low %v1311_v26, %v1315_v27 }
 0x1e1   : > { %v1443_v29 = vld [vmem:[%s13154_s9 + $0x1fe0] sm:$0xff]  ;;  %8102 = vmatpush1.bf16.msra.mxu1 %v11816_v32 }
 0x1e2   : > { %v11825_v34 = vcombine.high %v1439_v55, %v1443_v29  ;;  %v1447_v35 = vld [vmem:[%s13154_s9 + $0x2000] sm:$0xff]  ;;  %8062 = vmatprep.subr.bf16.mxu0 %v11697_v33  ;;  %v11824_v44 = vcombine.low %v1439_v55, %v1443_v29 }
 0x1e3   : > { %v1451_v36 = vld [vmem:[%s13154_s9 + $0x2020] sm:$0xff]  ;;  %8063 = vmatpush1.bf16.msra.mxu0 %v11696_v42 }
 0x1e4   : > { %v1575_v38 = vld [vmem:[%s13154_s9 + $0x2400] sm:$0xff]  ;;  %v11833_v45 = vcombine.high %v1447_v35, %v1451_v36  ;;  %8103 = vmatprep.subr.bf16.mxu1 %v11825_v34  ;;  %v11832_v53 = vcombine.low %v1447_v35, %v1451_v36 }
 0x1e5   : > { %v1579_v39 = vld [vmem:[%s13154_s9 + $0x2420] sm:$0xff]  ;;  %8104 = vmatpush1.bf16.msra.mxu1 %v11824_v44 }
 0x1e6   : > { %v11961_v20 = vcombine.high %v1575_v38, %v1579_v39  ;;  %v1455_v46 = vld [vmem:[%s13154_s9 + $0x2040] sm:$0xff]  ;;  %8114 = vmatprep.subr.bf16.mxu0 %v11833_v45  ;;  %v11960_v57 = vcombine.low %v1575_v38, %v1579_v39  ;;  %8065 = vmatmul.mubr.bf16.vlgmr.msra.gmra.mrb[12].mxu0 %v13532_v23 }
 0x1e7   : > { %v1459_v47 = vld [vmem:[%s13154_s9 + $0x2060] sm:$0xff]  ;;  %8115 = vmatpush1.bf16.msra.mxu0 %v11832_v53  ;;  %8146 = vmatprep.mubr.bf16.mxu0 %v13550_v11 }
 0x1e8   : > { %v1583_v49 = vld [vmem:[%s13154_s9 + $0x2440] sm:$0xff]  ;;  %v11841_v58 = vcombine.high %v1455_v46, %v1459_v47  ;;  %8155 = vmatprep.subr.bf16.mxu1 %v11961_v20  ;;  %8106 = vmatmul.mubr.bf16.vlgmr.msra.gmra.mrb[12].mxu1 %v13538_v52  ;;  %v11840_v1 = vcombine.low %v1455_v46, %v1459_v47 }
 0x1e9   : > { %v1587_v51 = vld [vmem:[%s13154_s9 + $0x2460] sm:$0xff]  ;;  %8156 = vmatpush1.bf16.msra.mxu1 %v11960_v57  ;;  %8187 = vmatprep.mubr.bf16.mxu1 %v12852_v10 }
 0x1ea   : > { %v11969_v61 = vcombine.high %v1583_v49, %v1587_v51  ;;  %v1463_v8 = vld [vmem:[%s13154_s9 + $0x2080] sm:$0xff]  ;;  %8116 = vmatprep.subr.bf16.mxu0 %v11841_v58  ;;  %v11968_v2 = vcombine.low %v1583_v49, %v1587_v51 }
 0x1eb   : > { %v1467_v62 = vld [vmem:[%s13154_s9 + $0x20a0] sm:$0xff]  ;;  %8117 = vmatpush1.bf16.msra.mxu0 %v11840_v1 }
 0x1ec   : > { %v1591_v63 = vld [vmem:[%s13154_s9 + $0x2480] sm:$0xff]  ;;  %v11849_v3 = vcombine.high %v1463_v8, %v1467_v62  ;;  %8157 = vmatprep.subr.bf16.mxu1 %v11969_v61  ;;  %v11848_v40 = vcombine.low %v1463_v8, %v1467_v62 }
 0x1ed   : > { %v1595_v0 = vld [vmem:[%s13154_s9 + $0x24a0] sm:$0xff]  ;;  %8158 = vmatpush1.bf16.msra.mxu1 %v11968_v2 }
 0x1ee   : > { %v11977_v4 = vcombine.high %v1591_v63, %v1595_v0  ;;  %v1471_v6 = vld [vmem:[%s13154_s9 + $0x20c0] sm:$0xff]  ;;  %8118 = vmatprep.subr.bf16.mxu0 %v11849_v3  ;;  %v11976_v14 = vcombine.low %v1591_v63, %v1595_v0 }
 0x1ef   : > { %v1475_v7 = vld [vmem:[%s13154_s9 + $0x20e0] sm:$0xff]  ;;  %8119 = vmatpush1.bf16.msra.mxu0 %v11848_v40 }
 0x1f0   : > { %v1599_v12 = vld [vmem:[%s13154_s9 + $0x24c0] sm:$0xff]  ;;  %v11857_v15 = vcombine.high %v1471_v6, %v1475_v7  ;;  %8159 = vmatprep.subr.bf16.mxu1 %v11977_v4  ;;  %v11856_v54 = vcombine.low %v1471_v6, %v1475_v7 }
 0x1f1   : > { %v1603_v13 = vld [vmem:[%s13154_s9 + $0x24e0] sm:$0xff]  ;;  %8160 = vmatpush1.bf16.msra.mxu1 %v11976_v14 }
 0x1f2   : > { %v11985_v43 = vcombine.high %v1599_v12, %v1603_v13  ;;  %v1479_v18 = vld [vmem:[%s13154_s9 + $0x2100] sm:$0xff]  ;;  %8120 = vmatprep.subr.bf16.mxu0 %v11857_v15  ;;  %v11984_v26 = vcombine.low %v1599_v12, %v1603_v13 }
 0x1f3   : > { %v1483_v22 = vld [vmem:[%s13154_s9 + $0x2120] sm:$0xff]  ;;  %8121 = vmatpush1.bf16.msra.mxu0 %v11856_v54 }
 0x1f4   : > { %v1607_v24 = vld [vmem:[%s13154_s9 + $0x2500] sm:$0xff]  ;;  %v11865_v27 = vcombine.high %v1479_v18, %v1483_v22  ;;  %8161 = vmatprep.subr.bf16.mxu1 %v11985_v43  ;;  %v11864_v34 = vcombine.low %v1479_v18, %v1483_v22  ;;  %v424_v43 = vld [vmem:[%s13154_s9 + $0x8] sm:$0xff] }
 0x1f5   : > { %v1611_v25 = vld [vmem:[%s13154_s9 + $0x2520] sm:$0xff]  ;;  %8162 = vmatpush1.bf16.msra.mxu1 %v11984_v26  ;;  %v428_v18 = vld [vmem:[%s13154_s9 + $0x28] sm:$0xff] }
 0x1f6   : > { %v11993_v55 = vcombine.high %v1607_v24, %v1611_v25  ;;  %v1487_v29 = vld [vmem:[%s13154_s9 + $0x2140] sm:$0xff]  ;;  %8122 = vmatprep.subr.bf16.mxu0 %v11865_v27  ;;  %v11992_v35 = vcombine.low %v1607_v24, %v1611_v25  ;;  %v7820_v49 = vpop.f32.mrb[0].mxu0  ;;  %v10811_v54 = vcombine.high %v424_v43, %v428_v18 }
 0x1f7   : > { %v1491_v31 = vld [vmem:[%s13154_s9 + $0x2160] sm:$0xff]  ;;  %8123 = vmatpush1.bf16.msra.mxu0 %v11864_v34  ;;  %v7822_v61 = vpop.f32.mrb[1].mxu0 }
 0x1f8   : > { %v1615_v32 = vld [vmem:[%s13154_s9 + $0x2540] sm:$0xff]  ;;  %v11873_v36 = vcombine.high %v1487_v29, %v1491_v31  ;;  %8163 = vmatprep.subr.bf16.mxu1 %v11993_v55  ;;  %v11872_v20 = vcombine.low %v1487_v29, %v1491_v31  ;;  %v7861_v58 = vpop.f32.mrb[0].mxu1  ;;  %v7824_v1 = vpop.f32.mrb[2].mxu0  ;;  %v432_v55 = vld [vmem:[%s13154_s9 + $0x48] sm:$0xff] }
 0x1f9   : > { %v1619_v33 = vld [vmem:[%s13154_s9 + $0x2560] sm:$0xff]  ;;  %8164 = vmatpush1.bf16.msra.mxu1 %v11992_v35  ;;  %v13575_v63 = vadd.f32 %v7861_v58, %v7820_v49  ;;  %v7863_v0 = vpop.f32.mrb[1].mxu1  ;;  %v7825_v6 = vpop.f32.mrb[3].mxu0  ;;  %v436_v29 = vld [vmem:[%s13154_s9 + $0x68] sm:$0xff] }
 0x1fa   : > { %v12001_v38 = vcombine.high %v1615_v32, %v1619_v33  ;;  %v1495_v39 = vld [vmem:[%s13154_s9 + $0x2180] sm:$0xff]  ;;  %8124 = vmatprep.subr.bf16.mxu0 %v11873_v36  ;;  %v12000_v46 = vcombine.low %v1615_v32, %v1619_v33  ;;  %v13577_v3 = vadd.f32 %v7863_v0, %v7822_v61  ;;  %v7865_v4 = vpop.f32.mrb[2].mxu1  ;;  %v12342_v32 = vld [vmem:[%s13147_s24 + $0x48] ss:$0 sps:$4 sm:$0xff]   ;;  %v10810_v33 = vcombine.low %v424_v43, %v428_v18  ;;  %v456_v1 = vld [vmem:[%s13154_s9 + $0x108] sm:$0xff] }
 0x1fb   : > { %v1499_v42 = vld [vmem:[%s13154_s9 + $0x21a0] sm:$0xff]  ;;  %8125 = vmatpush1.bf16.msra.mxu0 %v11872_v20  ;;  %v7866_v13 = vpop.f32.mrb[3].mxu1  ;;  %v10819_v35 = vcombine.high %v432_v55, %v436_v29 }
 0x1fc   : > { %v1623_v44 = vld [vmem:[%s13154_s9 + $0x2580] sm:$0xff]  ;;  %v11881_v47 = vcombine.high %v1495_v39, %v1499_v42  ;;  %8165 = vmatprep.subr.bf16.mxu1 %v12001_v38  ;;  %v11880_v2 = vcombine.low %v1495_v39, %v1499_v42  ;;  %v440_v39 = vld [vmem:[%s13154_s9 + $0x88] sm:$0xff] }
 0x1fd   : > { %v1627_v45 = vld [vmem:[%s13154_s9 + $0x25a0] sm:$0xff]  ;;  %8166 = vmatpush1.bf16.msra.mxu1 %v12000_v46  ;;  %v444_v42 = vld [vmem:[%s13154_s9 + $0xa8] sm:$0xff] }
 0x1fe   : > { %v12009_v51 = vcombine.high %v1623_v44, %v1627_v45  ;;  %v1503_v53 = vld [vmem:[%s13154_s9 + $0x21c0] sm:$0xff]  ;;  %8126 = vmatprep.subr.bf16.mxu0 %v11881_v47  ;;  %v12008_v7 = vcombine.low %v1623_v44, %v1627_v45  ;;  %v10818_v45 = vcombine.low %v432_v55, %v436_v29  ;;  %v10827_v46 = vcombine.high %v440_v39, %v444_v42 }
 0x1ff   : > { %v1507_v57 = vld [vmem:[%s13154_s9 + $0x21e0] sm:$0xff]  ;;  %8127 = vmatpush1.bf16.msra.mxu0 %v11880_v2  ;;  %v10826_v58 = vcombine.low %v440_v39, %v444_v42  ;;  %v460_v2 = vld [vmem:[%s13154_s9 + $0x128] sm:$0xff] }
 0x200   : > { %v1631_v8 = vld [vmem:[%s13154_s9 + $0x25c0] sm:$0xff]  ;;  %v11889_v12 = vcombine.high %v1503_v53, %v1507_v57  ;;  %8167 = vmatprep.subr.bf16.mxu1 %v12009_v51  ;;  %v11888_v22 = vcombine.low %v1503_v53, %v1507_v57  ;;  %v448_v51 = vld [vmem:[%s13154_s9 + $0xc8] sm:$0xff]  ;;  %v10842_v18 = vcombine.low %v456_v1, %v460_v2 }
 0x201   : > { %v1635_v62 = vld [vmem:[%s13154_s9 + $0x25e0] sm:$0xff]  ;;  %8168 = vmatpush1.bf16.msra.mxu1 %v12008_v7  ;;  %v452_v53 = vld [vmem:[%s13154_s9 + $0xe8] sm:$0xff] }
 0x202   : > { %v12017_v40 = vcombine.high %v1631_v8, %v1635_v62  ;;  %v1511_v14 = vld [vmem:[%s13154_s9 + $0x2200] sm:$0xff]  ;;  %8128 = vmatprep.subr.bf16.mxu0 %v11889_v12  ;;  %v12016_v24 = vcombine.low %v1631_v8, %v1635_v62  ;;  %v10835_v8 = vcombine.high %v448_v51, %v452_v53  ;;  %v10834_v6 = vcombine.low %v448_v51, %v452_v53 }
 0x203   : > { %v1515_v15 = vld [vmem:[%s13154_s9 + $0x2220] sm:$0xff]  ;;  %8129 = vmatpush1.bf16.msra.mxu0 %v11888_v22  ;;  %v10843_v12 = vcombine.high %v456_v1, %v460_v2 }
 0x204   : > { %v11897_v25 = vcombine.high %v1511_v14, %v1515_v15  ;;  %8169 = vmatprep.subr.bf16.mxu1 %v12017_v40  ;;  %v1519_v26 = vld [vmem:[%s13154_s9 + $0x2240] sm:$0xff]  ;;  %v11896_v31 = vcombine.low %v1511_v14, %v1515_v15  ;;  %v464_v14 = vld [vmem:[%s13154_s9 + $0x148] sm:$0xff] }
 0x205   : > { %v1523_v27 = vld [vmem:[%s13154_s9 + $0x2260] sm:$0xff]  ;;  %8170 = vmatpush1.bf16.msra.mxu1 %v12016_v24  ;;  %v468_v15 = vld [vmem:[%s13154_s9 + $0x168] sm:$0xff] }
 0x206   : > { %8130 = vmatprep.subr.bf16.mxu0 %v11897_v25  ;;  %v11905_v34 = vcombine.high %v1519_v26, %v1523_v27  ;;  %8196 = vmatprep.subr.bf16.mxu1 %v10811_v54  ;;  %v1527_v36 = vld [vmem:[%s13154_s9 + $0x2280] sm:$0xff]  ;;  %v11904_v44 = vcombine.low %v1519_v26, %v1523_v27  ;;  %v10851_v24 = vcombine.high %v464_v14, %v468_v15  ;;  %v472_v26 = vld [vmem:[%s13154_s9 + $0x188] sm:$0xff] }
 0x207   : > { %v1531_v38 = vld [vmem:[%s13154_s9 + $0x22a0] sm:$0xff]  ;;  %8131 = vmatpush1.bf16.msra.mxu0 %v11896_v31  ;;  %v476_v27 = vld [vmem:[%s13154_s9 + $0x1a8] sm:$0xff]  ;;  %v10850_v29 = vcombine.low %v464_v14, %v468_v15 }
 0x208   : > { %8188 = vmatmul.mubr.bf16.vlgmr.msra.gmra.mrb[16].mxu1 %v12342_v32  ;;  %8132 = vmatprep.subr.bf16.mxu0 %v11905_v34  ;;  %v11913_v20 = vcombine.high %v1527_v36, %v1531_v38  ;;  %v1535_v47 = vld [vmem:[%s13154_s9 + $0x22c0] sm:$0xff]  ;;  %v11912_v57 = vcombine.low %v1527_v36, %v1531_v38  ;;  %v10859_v32 = vcombine.high %v472_v26, %v476_v27  ;;  %v484_v36 = vld [vmem:[%s13154_s9 + $0x1e8] sm:$0xff] }
 0x209   : > { %8197 = vmatpush1.bf16.msra.mxu1 %v10810_v33  ;;  %v1539_v49 = vld [vmem:[%s13154_s9 + $0x22e0] sm:$0xff]  ;;  %8228 = vmatprep.mubr.bf16.mxu1 %v13212_v59  ;;  %v10858_v39 = vcombine.low %v472_v26, %v476_v27 }
 0x20a   : > { %8198 = vmatprep.subr.bf16.mxu1 %v10819_v35  ;;  %v11921_v61 = vcombine.high %v1535_v47, %v1539_v49  ;;  %v1543_v62 = vld [vmem:[%s13154_s9 + $0x2300] sm:$0xff]  ;;  %v11920_v4 = vcombine.low %v1535_v47, %v1539_v49  ;;  %v480_v35 = vld [vmem:[%s13154_s9 + $0x1c8] sm:$0xff] }
 0x20b   : > { %8133 = vmatpush1.bf16.msra.mxu0 %v11904_v44  ;;  %v1547_v0 = vld [vmem:[%s13154_s9 + $0x2320] sm:$0xff]  ;;  %v10867_v44 = vcombine.high %v480_v35, %v484_v36  ;;  %v492_v47 = vld [vmem:[%s13154_s9 + $0x228] sm:$0xff]  ;;  %v10866_v51 = vcombine.low %v480_v35, %v484_v36 }
 0x20c   : > { %8134 = vmatprep.subr.bf16.mxu0 %v11913_v20  ;;  %v11929_v7 = vcombine.high %v1543_v62, %v1547_v0  ;;  %v1551_v13 = vld [vmem:[%s13154_s9 + $0x2340] sm:$0xff]  ;;  %v11928_v43 = vcombine.low %v1543_v62, %v1547_v0  ;;  %v556_v20 = vld [vmem:[%s13154_s9 + $0x428] sm:$0xff] }
 0x20d   : > { %8199 = vmatpush1.bf16.msra.mxu1 %v10818_v45  ;;  %v1555_v40 = vld [vmem:[%s13154_s9 + $0x2360] sm:$0xff]  ;;  %v552_v45 = vld [vmem:[%s13154_s9 + $0x408] sm:$0xff] }
 0x20e   : > { %8200 = vmatprep.subr.bf16.mxu1 %v10827_v46  ;;  %v11937_v22 = vcombine.high %v1551_v13, %v1555_v40  ;;  %v1559_v25 = vld [vmem:[%s13154_s9 + $0x2380] sm:$0xff]  ;;  %v11936_v55 = vcombine.low %v1551_v13, %v1555_v40  ;;  %v488_v46 = vld [vmem:[%s13154_s9 + $0x208] sm:$0xff]  ;;  %v10939_v53 = vcombine.high %v552_v45, %v556_v20  ;;  %v10938_v1 = vcombine.low %v552_v45, %v556_v20 }
 0x20f   : > { %8135 = vmatpush1.bf16.msra.mxu0 %v11912_v57  ;;  %v1563_v54 = vld [vmem:[%s13154_s9 + $0x23a0] sm:$0xff]  ;;  %v10875_v57 = vcombine.high %v488_v46, %v492_v47  ;;  %v496_v62 = vld [vmem:[%s13154_s9 + $0x248] sm:$0xff]  ;;  %v10874_v2 = vcombine.low %v488_v46, %v492_v47 }
 0x210   : > { %8136 = vmatprep.subr.bf16.mxu0 %v11921_v61  ;;  %v11945_v31 = vcombine.high %v1559_v25, %v1563_v54  ;;  %v1567_v33 = vld [vmem:[%s13154_s9 + $0x23c0] sm:$0xff]  ;;  %v11944_v38 = vcombine.low %v1559_v25, %v1563_v54  ;;  %v564_v61 = vld [vmem:[%s13154_s9 + $0x468] sm:$0xff] }
 0x211   : > { %8201 = vmatpush1.bf16.msra.mxu1 %v10826_v58  ;;  %v1571_v34 = vld [vmem:[%s13154_s9 + $0x23e0] sm:$0xff]  ;;  %v560_v58 = vld [vmem:[%s13154_s9 + $0x448] sm:$0xff] }
 0x212   : > { %8202 = vmatprep.subr.bf16.mxu1 %v10835_v8  ;;  %v11953_v42 = vcombine.high %v1567_v33, %v1571_v34  ;;  %v11952_v49 = vcombine.low %v1567_v33, %v1571_v34  ;;  %v13621_v8 = vcombine.low %v13541_v56, %v13541_v56  ;;  %v500_v0 = vld [vmem:[%s13154_s9 + $0x268] sm:$0xff]  ;;  %v10946_v40 = vcombine.low %v560_v58, %v564_v61 }
 0x213   : > { %8137 = vmatpush1.bf16.msra.mxu0 %v11920_v4  ;;  %v10947_v4 = vcombine.high %v560_v58, %v564_v61  ;;  %v504_v56 = vld [vmem:[%s13154_s9 + $0x288] sm:$0xff]  ;;  %v10882_v14 = vcombine.low %v496_v62, %v500_v0 }
 0x214   : > { %8138 = vmatprep.subr.bf16.mxu0 %v11929_v7  ;;  %v568_v7 = vld [vmem:[%s13154_s9 + $0x488] sm:$0xff] }
 0x215   : > { %8203 = vmatpush1.bf16.msra.mxu1 %v10834_v6  ;;  %v10883_v6 = vcombine.high %v496_v62, %v500_v0  ;;  %v508_v13 = vld [vmem:[%s13154_s9 + $0x2a8] sm:$0xff] }
 0x216   : > { %8204 = vmatprep.subr.bf16.mxu1 %v10843_v12  ;;  %v572_v12 = vld [vmem:[%s13154_s9 + $0x4a8] sm:$0xff]  ;;  %v10890_v26 = vcombine.low %v504_v56, %v508_v13 }
 0x217   : > { %8139 = vmatpush1.bf16.msra.mxu0 %v11928_v43  ;;  %v10955_v15 = vcombine.high %v568_v7, %v572_v12  ;;  %v10891_v43 = vcombine.high %v504_v56, %v508_v13  ;;  %v516_v25 = vld [vmem:[%s13154_s9 + $0x2e8] sm:$0xff]  ;;  %v10954_v54 = vcombine.low %v568_v7, %v572_v12 }
 0x218   : > { %8140 = vmatprep.subr.bf16.mxu0 %v11937_v22  ;;  %v580_v22 = vld [vmem:[%s13154_s9 + $0x4e8] sm:$0xff] }
 0x219   : > { %8205 = vmatpush1.bf16.msra.mxu1 %v10842_v18  ;;  %v576_v18 = vld [vmem:[%s13154_s9 + $0x4c8] sm:$0xff] }
 0x21a   : > { %8206 = vmatprep.subr.bf16.mxu1 %v10851_v24  ;;  %v512_v24 = vld [vmem:[%s13154_s9 + $0x2c8] sm:$0xff]  ;;  %v10963_v27 = vcombine.high %v576_v18, %v580_v22  ;;  %v10962_v34 = vcombine.low %v576_v18, %v580_v22 }
 0x21b   : > { %8141 = vmatpush1.bf16.msra.mxu0 %v11936_v55  ;;  %v10899_v55 = vcombine.high %v512_v24, %v516_v25  ;;  %v524_v33 = vld [vmem:[%s13154_s9 + $0x328] sm:$0xff]  ;;  %v10898_v35 = vcombine.low %v512_v24, %v516_v25 }
 0x21c   : > { %8142 = vmatprep.subr.bf16.mxu0 %v11945_v31  ;;  %v588_v31 = vld [vmem:[%s13154_s9 + $0x528] sm:$0xff] }
 0x21d   : > { %8207 = vmatpush1.bf16.msra.mxu1 %v10850_v29  ;;  %v584_v29 = vld [vmem:[%s13154_s9 + $0x508] sm:$0xff] }
 0x21e   : > { %8208 = vmatprep.subr.bf16.mxu1 %v10859_v32  ;;  %v520_v32 = vld [vmem:[%s13154_s9 + $0x308] sm:$0xff]  ;;  %v10971_v36 = vcombine.high %v584_v29, %v588_v31  ;;  %v10970_v20 = vcombine.low %v584_v29, %v588_v31 }
 0x21f   : > { %8143 = vmatpush1.bf16.msra.mxu0 %v11944_v38  ;;  %v10907_v38 = vcombine.high %v520_v32, %v524_v33  ;;  %v532_v45 = vld [vmem:[%s13154_s9 + $0x368] sm:$0xff]  ;;  %v10906_v46 = vcombine.low %v520_v32, %v524_v33 }
 0x220   : > { %8144 = vmatprep.subr.bf16.mxu0 %v11953_v42  ;;  %v596_v42 = vld [vmem:[%s13154_s9 + $0x568] sm:$0xff] }
 0x221   : > { %8209 = vmatpush1.bf16.msra.mxu1 %v10858_v39  ;;  %v592_v39 = vld [vmem:[%s13154_s9 + $0x548] sm:$0xff] }
 0x222   : > { %8210 = vmatprep.subr.bf16.mxu1 %v10867_v44  ;;  %v528_v44 = vld [vmem:[%s13154_s9 + $0x348] sm:$0xff]  ;;  %v10979_v47 = vcombine.high %v592_v39, %v596_v42  ;;  %v10978_v61 = vcombine.low %v592_v39, %v596_v42 }
 0x223   : > { %8145 = vmatpush1.bf16.msra.mxu0 %v11952_v49  ;;  %v10915_v49 = vcombine.high %v528_v44, %v532_v45  ;;  %v540_v58 = vld [vmem:[%s13154_s9 + $0x3a8] sm:$0xff]  ;;  %v10914_v62 = vcombine.low %v528_v44, %v532_v45 }
 0x224   : > { %8237 = vmatprep.subr.bf16.mxu0 %v10939_v53  ;;  %v604_v53 = vld [vmem:[%s13154_s9 + $0x5a8] sm:$0xff] }
 0x225   : > { %8211 = vmatpush1.bf16.msra.mxu1 %v10866_v51  ;;  %v600_v51 = vld [vmem:[%s13154_s9 + $0x588] sm:$0xff] }
 0x226   : > { %8212 = vmatprep.subr.bf16.mxu1 %v10875_v57  ;;  %8147 = vmatmul.mubr.bf16.vlgmr.msra.gmra.mrb[16].mxu0 %v13621_v8  ;;  %v536_v57 = vld [vmem:[%s13154_s9 + $0x388] sm:$0xff]  ;;  %v10987_v0 = vcombine.high %v600_v51, %v604_v53  ;;  %v10986_v18 = vcombine.low %v600_v51, %v604_v53 }
 0x227   : > { %8238 = vmatpush1.bf16.msra.mxu0 %v10938_v1  ;;  %8269 = vmatprep.mubr.bf16.mxu0 %v13216_v60  ;;  %v544_v13 = vld [vmem:[%s13154_s9 + $0x3c8] sm:$0xff] }
 0x228   : > { %8239 = vmatprep.subr.bf16.mxu0 %v10947_v4  ;;  %v608_v4 = vld [vmem:[%s13154_s9 + $0x5c8] sm:$0xff] }
 0x229   : > { %8213 = vmatpush1.bf16.msra.mxu1 %v10874_v2  ;;  %v10923_v2 = vcombine.high %v536_v57, %v540_v58  ;;  %v620_v29 = vld [vmem:[%s13154_s9 + $0x628] sm:$0xff] }
 0x22a   : > { %8214 = vmatprep.subr.bf16.mxu1 %v10883_v6  ;;  %v612_v6 = vld [vmem:[%s13154_s9 + $0x5e8] sm:$0xff] }
 0x22b   : > { %8240 = vmatpush1.bf16.msra.mxu0 %v10946_v40  ;;  %v548_v40 = vld [vmem:[%s13154_s9 + $0x3e8] sm:$0xff]  ;;  %v10994_v33 = vcombine.low %v608_v4, %v612_v6 }
 0x22c   : > { %8241 = vmatprep.subr.bf16.mxu0 %v10955_v15  ;;  %v680_v31 = vld [vmem:[%s13154_s9 + $0x808] sm:$0xff] }
 0x22d   : > { %8215 = vmatpush1.bf16.msra.mxu1 %v10882_v14  ;;  %v684_v32 = vld [vmem:[%s13154_s9 + $0x828] sm:$0xff] }
 0x22e   : > { %8216 = vmatprep.subr.bf16.mxu1 %v10891_v43  ;;  %v628_v39 = vld [vmem:[%s13154_s9 + $0x668] sm:$0xff] }
 0x22f   : > { %8242 = vmatpush1.bf16.msra.mxu0 %v10954_v54  ;;  %v10995_v54 = vcombine.high %v608_v4, %v612_v6  ;;  %v688_v42 = vld [vmem:[%s13154_s9 + $0x848] sm:$0xff] }
 0x230   : > { %8243 = vmatprep.subr.bf16.mxu0 %v10963_v27  ;;  %v10931_v27 = vcombine.high %v544_v13, %v548_v40  ;;  %v692_v44 = vld [vmem:[%s13154_s9 + $0x868] sm:$0xff] }
 0x231   : > { %8217 = vmatpush1.bf16.msra.mxu1 %v10890_v26  ;;  %v636_v51 = vld [vmem:[%s13154_s9 + $0x6a8] sm:$0xff] }
 0x232   : > { %8218 = vmatprep.subr.bf16.mxu1 %v10899_v55  ;;  %v616_v55 = vld [vmem:[%s13154_s9 + $0x608] sm:$0xff] }
 0x233   : > { %8244 = vmatpush1.bf16.msra.mxu0 %v10962_v34  ;;  %v10930_v34 = vcombine.low %v544_v13, %v548_v40  ;;  %v11002_v45 = vcombine.low %v616_v55, %v620_v29  ;;  %v696_v53 = vld [vmem:[%s13154_s9 + $0x888] sm:$0xff] }
 0x234   : > { %8245 = vmatprep.subr.bf16.mxu0 %v10971_v36  ;;  %v11067_v36 = vcombine.high %v680_v31, %v684_v32  ;;  %v704_v4 = vld [vmem:[%s13154_s9 + $0x8c8] sm:$0xff] }
 0x235   : > { %8219 = vmatpush1.bf16.msra.mxu1 %v10898_v35  ;;  %v11003_v35 = vcombine.high %v616_v55, %v620_v29  ;;  %v708_v6 = vld [vmem:[%s13154_s9 + $0x8e8] sm:$0xff] }
 0x236   : > { %8220 = vmatprep.subr.bf16.mxu1 %v10907_v38  ;;  %v624_v38 = vld [vmem:[%s13154_s9 + $0x648] sm:$0xff]  ;;  %v11091_v13 = vcombine.high %v704_v4, %v708_v6 }
 0x237   : > { %8246 = vmatpush1.bf16.msra.mxu0 %v10970_v20  ;;  %v7902_v1 = vpop.f32.mrb[4].mxu0  ;;  %v11066_v20 = vcombine.low %v680_v31, %v684_v32  ;;  %v648_v40 = vld [vmem:[%s13154_s9 + $0x708] sm:$0xff] }
 0x238   : > { %8247 = vmatprep.subr.bf16.mxu0 %v10979_v47  ;;  %v7903_v7 = vadd.f32 %v7902_v1, %v13575_v63  ;;  %v7904_v56 = vpop.f32.mrb[5].mxu0  ;;  %v10922_v63 = vcombine.low %v536_v57, %v540_v58  ;;  %v11075_v47 = vcombine.high %v688_v42, %v692_v44  ;;  %v700_v57 = vld [vmem:[%s13154_s9 + $0x8a8] sm:$0xff]  ;;  %v11010_v58 = vcombine.low %v624_v38, %v628_v39 }
 0x239   : > { %8221 = vmatpush1.bf16.msra.mxu1 %v10906_v46  ;;  %v7943_v12 = vpop.f32.mrb[4].mxu1  ;;  %v7905_v14 = vadd.f32 %v7904_v56, %v13577_v3  ;;  %v7906_v43 = vpop.f32.mrb[6].mxu0  ;;  %v11011_v46 = vcombine.high %v624_v38, %v628_v39  ;;  %v640_v1 = vld [vmem:[%s13154_s9 + $0x6c8] sm:$0xff] }
 0x23a   : > { %8222 = vmatprep.subr.bf16.mxu1 %v10915_v49  ;;  %v7945_v15 = vpop.f32.mrb[5].mxu1  ;;  %v13653_v22 = vadd.f32 %v7943_v12, %v7903_v7  ;;  %v7907_v25 = vpop.f32.mrb[7].mxu0  ;;  %v632_v49 = vld [vmem:[%s13154_s9 + $0x688] sm:$0xff]  ;;  %v11082_v12 = vcombine.low %v696_v53, %v700_v57 }
 0x23b   : > { %8248 = vmatpush1.bf16.msra.mxu0 %v10978_v61  ;;  %v7947_v24 = vpop.f32.mrb[6].mxu1  ;;  %v13655_v26 = vadd.f32 %v7945_v15, %v7905_v14  ;;  %v11074_v61 = vcombine.low %v688_v42, %v692_v44  ;;  %v11018_v7 = vcombine.low %v632_v49, %v636_v51  ;;  %v652_v14 = vld [vmem:[%s13154_s9 + $0x728] sm:$0xff] }
 0x23c   : > { %8249 = vmatprep.subr.bf16.mxu0 %v10987_v0  ;;  %v7948_v3 = vpop.f32.mrb[7].mxu1  ;;  %v11083_v0 = vcombine.high %v696_v53, %v700_v57  ;;  %v712_v15 = vld [vmem:[%s13154_s9 + $0x908] sm:$0xff]  ;;  %v11090_v24 = vcombine.low %v704_v4, %v708_v6  ;;  %v11035_v25 = vcombine.high %v648_v40, %v652_v14  ;;  %v11034_v29 = vcombine.low %v648_v40, %v652_v14 }
 0x23d   : > { %8223 = vmatpush1.bf16.msra.mxu1 %v10914_v62  ;;  %v11019_v62 = vcombine.high %v632_v49, %v636_v51  ;;  %v716_v43 = vld [vmem:[%s13154_s9 + $0x928] sm:$0xff] }
 0x23e   : > { %8224 = vmatprep.subr.bf16.mxu1 %v10923_v2  ;;  %v644_v2 = vld [vmem:[%s13154_s9 + $0x6e8] sm:$0xff]  ;;  %v11098_v31 = vcombine.low %v712_v15, %v716_v43 }
 0x23f   : > { %8250 = vmatpush1.bf16.msra.mxu0 %v10986_v18  ;;  %v11027_v56 = vcombine.high %v640_v1, %v644_v2  ;;  %v11026_v18 = vcombine.low %v640_v1, %v644_v2  ;;  %v660_v3 = vld [vmem:[%s13154_s9 + $0x768] sm:$0xff] }
 0x240   : > { %8251 = vmatprep.subr.bf16.mxu0 %v10995_v54  ;;  %v656_v54 = vld [vmem:[%s13154_s9 + $0x748] sm:$0xff] }
 0x241   : > { %8225 = vmatpush1.bf16.msra.mxu1 %v10922_v63  ;;  %v11099_v63 = vcombine.high %v712_v15, %v716_v43  ;;  %v724_v55 = vld [vmem:[%s13154_s9 + $0x968] sm:$0xff]  ;;  %v11043_v32 = vcombine.high %v656_v54, %v660_v3  ;;  %v11042_v39 = vcombine.low %v656_v54, %v660_v3 }
 0x242   : > { %8226 = vmatprep.subr.bf16.mxu1 %v10931_v27  ;;  %v720_v27 = vld [vmem:[%s13154_s9 + $0x948] sm:$0xff] }
 0x243   : > { %8252 = vmatpush1.bf16.msra.mxu0 %v10994_v33  ;;  %v11107_v33 = vcombine.high %v720_v27, %v724_v55  ;;  %v732_v38 = vld [vmem:[%s13154_s9 + $0x9a8] sm:$0xff]  ;;  %v11106_v42 = vcombine.low %v720_v27, %v724_v55 }
 0x244   : > { %8253 = vmatprep.subr.bf16.mxu0 %v11003_v35  ;;  %v668_v35 = vld [vmem:[%s13154_s9 + $0x7a8] sm:$0xff] }
 0x245   : > { %8227 = vmatpush1.bf16.msra.mxu1 %v10930_v34  ;;  %v664_v34 = vld [vmem:[%s13154_s9 + $0x788] sm:$0xff] }
 0x246   : > { %8278 = vmatprep.subr.bf16.mxu1 %v11067_v36  ;;  %v728_v36 = vld [vmem:[%s13154_s9 + $0x988] sm:$0xff]  ;;  %v11051_v44 = vcombine.high %v664_v34, %v668_v35  ;;  %v11050_v51 = vcombine.low %v664_v34, %v668_v35 }
 0x247   : > { %8254 = vmatpush1.bf16.msra.mxu0 %v11002_v45  ;;  %v11115_v45 = vcombine.high %v728_v36, %v732_v38  ;;  %v740_v49 = vld [vmem:[%s13154_s9 + $0x9e8] sm:$0xff]  ;;  %v11114_v53 = vcombine.low %v728_v36, %v732_v38 }
 0x248   : > { %8229 = vmatmul.mubr.bf16.vlgmr.msra.gmra.mrb[20].mxu1 %v13262_v17  ;;  %8255 = vmatprep.subr.bf16.mxu0 %v11011_v46  ;;  %v676_v46 = vld [vmem:[%s13154_s9 + $0x7e8] sm:$0xff] }
 0x249   : > { %8279 = vmatpush1.bf16.msra.mxu1 %v11066_v20  ;;  %8310 = vmatprep.mubr.bf16.mxu1 %v13280_v28  ;;  %v672_v20 = vld [vmem:[%s13154_s9 + $0x7c8] sm:$0xff] }
 0x24a   : > { %8280 = vmatprep.subr.bf16.mxu1 %v11075_v47  ;;  %v736_v47 = vld [vmem:[%s13154_s9 + $0x9c8] sm:$0xff]  ;;  %v11059_v57 = vcombine.high %v672_v20, %v676_v46  ;;  %v11058_v2 = vcombine.low %v672_v20, %v676_v46 }
 0x24b   : > { %8256 = vmatpush1.bf16.msra.mxu0 %v11010_v58  ;;  %v11123_v58 = vcombine.high %v736_v47, %v740_v49  ;;  %v748_v1 = vld [vmem:[%s13154_s9 + $0xa28] sm:$0xff]  ;;  %v11122_v4 = vcombine.low %v736_v47, %v740_v49 }
 0x24c   : > { %8257 = vmatprep.subr.bf16.mxu0 %v11019_v62  ;;  %v812_v62 = vld [vmem:[%s13154_s9 + $0xc28] sm:$0xff] }
 0x24d   : > { %8281 = vmatpush1.bf16.msra.mxu1 %v11074_v61  ;;  %v808_v61 = vld [vmem:[%s13154_s9 + $0xc08] sm:$0xff] }
 0x24e   : > { %8282 = vmatprep.subr.bf16.mxu1 %v11083_v0  ;;  %v744_v0 = vld [vmem:[%s13154_s9 + $0xa08] sm:$0xff]  ;;  %v11195_v6 = vcombine.high %v808_v61, %v812_v62  ;;  %v11194_v14 = vcombine.low %v808_v61, %v812_v62 }
 0x24f   : > { %8258 = vmatpush1.bf16.msra.mxu0 %v11018_v7  ;;  %v11131_v7 = vcombine.high %v744_v0, %v748_v1  ;;  %v756_v40 = vld [vmem:[%s13154_s9 + $0xa68] sm:$0xff]  ;;  %v11130_v15 = vcombine.low %v744_v0, %v748_v1 }
 0x250   : > { %8259 = vmatprep.subr.bf16.mxu0 %v11027_v56  ;;  %v820_v56 = vld [vmem:[%s13154_s9 + $0xc68] sm:$0xff] }
 0x251   : > { %8283 = vmatpush1.bf16.msra.mxu1 %v11082_v12  ;;  %v816_v12 = vld [vmem:[%s13154_s9 + $0xc48] sm:$0xff] }
 0x252   : > { %8284 = vmatprep.subr.bf16.mxu1 %v11091_v13  ;;  %v752_v13 = vld [vmem:[%s13154_s9 + $0xa48] sm:$0xff]  ;;  %v11203_v43 = vcombine.high %v816_v12, %v820_v56  ;;  %v11202_v3 = vcombine.low %v816_v12, %v820_v56 }
 0x253   : > { %8260 = vmatpush1.bf16.msra.mxu0 %v11026_v18  ;;  %v11139_v18 = vcombine.high %v752_v13, %v756_v40  ;;  %v764_v54 = vld [vmem:[%s13154_s9 + $0xaa8] sm:$0xff]  ;;  %v11138_v27 = vcombine.low %v752_v13, %v756_v40 }
 0x254   : > { %8261 = vmatprep.subr.bf16.mxu0 %v11035_v25  ;;  %v828_v25 = vld [vmem:[%s13154_s9 + $0xca8] sm:$0xff] }
 0x255   : > { %8285 = vmatpush1.bf16.msra.mxu1 %v11090_v24  ;;  %v824_v24 = vld [vmem:[%s13154_s9 + $0xc88] sm:$0xff] }
 0x256   : > { %8286 = vmatprep.subr.bf16.mxu1 %v11099_v63  ;;  %v760_v63 = vld [vmem:[%s13154_s9 + $0xa88] sm:$0xff]  ;;  %v11211_v55 = vcombine.high %v824_v24, %v828_v25  ;;  %v11210_v35 = vcombine.low %v824_v24, %v828_v25 }
 0x257   : > { %8262 = vmatpush1.bf16.msra.mxu0 %v11034_v29  ;;  %v11147_v29 = vcombine.high %v760_v63, %v764_v54  ;;  %v772_v34 = vld [vmem:[%s13154_s9 + $0xae8] sm:$0xff]  ;;  %v11146_v36 = vcombine.low %v760_v63, %v764_v54 }
 0x258   : > { %8263 = vmatprep.subr.bf16.mxu0 %v11043_v32  ;;  %v836_v32 = vld [vmem:[%s13154_s9 + $0xce8] sm:$0xff] }
 0x259   : > { %8287 = vmatpush1.bf16.msra.mxu1 %v11098_v31  ;;  %v832_v31 = vld [vmem:[%s13154_s9 + $0xcc8] sm:$0xff] }
 0x25a   : > { %8288 = vmatprep.subr.bf16.mxu1 %v11107_v33  ;;  %v768_v33 = vld [vmem:[%s13154_s9 + $0xac8] sm:$0xff]  ;;  %v11219_v38 = vcombine.high %v832_v31, %v836_v32  ;;  %v11218_v46 = vcombine.low %v832_v31, %v836_v32 }
 0x25b   : > { %8264 = vmatpush1.bf16.msra.mxu0 %v11042_v39  ;;  %v11155_v39 = vcombine.high %v768_v33, %v772_v34  ;;  %v780_v20 = vld [vmem:[%s13154_s9 + $0xb28] sm:$0xff]  ;;  %v11154_v47 = vcombine.low %v768_v33, %v772_v34 }
 0x25c   : > { %8265 = vmatprep.subr.bf16.mxu0 %v11051_v44  ;;  %v844_v44 = vld [vmem:[%s13154_s9 + $0xd28] sm:$0xff] }
 0x25d   : > { %8289 = vmatpush1.bf16.msra.mxu1 %v11106_v42  ;;  %v840_v42 = vld [vmem:[%s13154_s9 + $0xd08] sm:$0xff] }
 0x25e   : > { %8290 = vmatprep.subr.bf16.mxu1 %v11115_v45  ;;  %v776_v45 = vld [vmem:[%s13154_s9 + $0xb08] sm:$0xff]  ;;  %v11227_v49 = vcombine.high %v840_v42, %v844_v44  ;;  %v11226_v62 = vcombine.low %v840_v42, %v844_v44 }
 0x25f   : > { %8266 = vmatpush1.bf16.msra.mxu0 %v11050_v51  ;;  %v11163_v51 = vcombine.high %v776_v45, %v780_v20  ;;  %v788_v61 = vld [vmem:[%s13154_s9 + $0xb68] sm:$0xff]  ;;  %v11162_v0 = vcombine.low %v776_v45, %v780_v20 }
 0x260   : > { %8267 = vmatprep.subr.bf16.mxu0 %v11059_v57  ;;  %v852_v57 = vld [vmem:[%s13154_s9 + $0xd68] sm:$0xff] }
 0x261   : > { %8291 = vmatpush1.bf16.msra.mxu1 %v11114_v53  ;;  %v848_v53 = vld [vmem:[%s13154_s9 + $0xd48] sm:$0xff] }
 0x262   : > { %8292 = vmatprep.subr.bf16.mxu1 %v11123_v58  ;;  %v784_v58 = vld [vmem:[%s13154_s9 + $0xb48] sm:$0xff]  ;;  %v11235_v1 = vcombine.high %v848_v53, %v852_v57  ;;  %v11234_v56 = vcombine.low %v848_v53, %v852_v57 }
 0x263   : > { %8268 = vmatpush1.bf16.msra.mxu0 %v11058_v2  ;;  %v11171_v2 = vcombine.high %v784_v58, %v788_v61  ;;  %v796_v12 = vld [vmem:[%s13154_s9 + $0xba8] sm:$0xff]  ;;  %v11170_v13 = vcombine.low %v784_v58, %v788_v61 }
 0x264   : > { %8319 = vmatprep.subr.bf16.mxu0 %v11195_v6  ;;  %v860_v6 = vld [vmem:[%s13154_s9 + $0xda8] sm:$0xff] }
 0x265   : > { %8293 = vmatpush1.bf16.msra.mxu1 %v11122_v4  ;;  %v856_v4 = vld [vmem:[%s13154_s9 + $0xd88] sm:$0xff] }
 0x266   : > { %8294 = vmatprep.subr.bf16.mxu1 %v11131_v7  ;;  %8270 = vmatmul.mubr.bf16.vlgmr.msra.gmra.mrb[20].mxu0 %v13271_v21  ;;  %v792_v7 = vld [vmem:[%s13154_s9 + $0xb88] sm:$0xff]  ;;  %v11243_v40 = vcombine.high %v856_v4, %v860_v6  ;;  %v11242_v31 = vcombine.low %v856_v4, %v860_v6 }
 0x267   : > { %8320 = vmatpush1.bf16.msra.mxu0 %v11194_v14  ;;  %8351 = vmatprep.mubr.bf16.mxu0 %v13287_v30  ;;  %v800_v54 = vld [vmem:[%s13154_s9 + $0xbc8] sm:$0xff] }
 0x268   : > { %8321 = vmatprep.subr.bf16.mxu0 %v11203_v43  ;;  %v864_v43 = vld [vmem:[%s13154_s9 + $0xdc8] sm:$0xff] }
 0x269   : > { %8295 = vmatpush1.bf16.msra.mxu1 %v11130_v15  ;;  %v11179_v15 = vcombine.high %v792_v7, %v796_v12  ;;  %v876_v42 = vld [vmem:[%s13154_s9 + $0xe28] sm:$0xff] }
 0x26a   : > { %8296 = vmatprep.subr.bf16.mxu1 %v11139_v18  ;;  %v868_v18 = vld [vmem:[%s13154_s9 + $0xde8] sm:$0xff] }
 0x26b   : > { %8322 = vmatpush1.bf16.msra.mxu0 %v11202_v3  ;;  %v804_v3 = vld [vmem:[%s13154_s9 + $0xbe8] sm:$0xff]  ;;  %v11250_v20 = vcombine.low %v864_v43, %v868_v18 }
 0x26c   : > { %8323 = vmatprep.subr.bf16.mxu0 %v11211_v55  ;;  %v936_v44 = vld [vmem:[%s13154_s9 + $0x1008] sm:$0xff] }
 0x26d   : > { %8297 = vmatpush1.bf16.msra.mxu1 %v11138_v27  ;;  %v940_v45 = vld [vmem:[%s13154_s9 + $0x1028] sm:$0xff] }
 0x26e   : > { %8298 = vmatprep.subr.bf16.mxu1 %v11147_v29  ;;  %v884_v53 = vld [vmem:[%s13154_s9 + $0xe68] sm:$0xff] }
 0x26f   : > { %8324 = vmatpush1.bf16.msra.mxu0 %v11210_v35  ;;  %v11251_v35 = vcombine.high %v864_v43, %v868_v18  ;;  %v944_v57 = vld [vmem:[%s13154_s9 + $0x1048] sm:$0xff] }
 0x270   : > { %8325 = vmatprep.subr.bf16.mxu0 %v11219_v38  ;;  %v11187_v38 = vcombine.high %v800_v54, %v804_v3  ;;  %v948_v58 = vld [vmem:[%s13154_s9 + $0x1068] sm:$0xff] }
 0x271   : > { %8299 = vmatpush1.bf16.msra.mxu1 %v11146_v36  ;;  %v892_v4 = vld [vmem:[%s13154_s9 + $0xea8] sm:$0xff] }
 0x272   : > { %8300 = vmatprep.subr.bf16.mxu1 %v11155_v39  ;;  %v872_v39 = vld [vmem:[%s13154_s9 + $0xe08] sm:$0xff] }
 0x273   : > { %8326 = vmatpush1.bf16.msra.mxu0 %v11218_v46  ;;  %v11186_v46 = vcombine.low %v800_v54, %v804_v3  ;;  %v11258_v61 = vcombine.low %v872_v39, %v876_v42  ;;  %v952_v6 = vld [vmem:[%s13154_s9 + $0x1088] sm:$0xff] }
 0x274   : > { %8327 = vmatprep.subr.bf16.mxu0 %v11227_v49  ;;  %v11323_v49 = vcombine.high %v936_v44, %v940_v45  ;;  %v960_v43 = vld [vmem:[%s13154_s9 + $0x10c8] sm:$0xff] }
 0x275   : > { %8301 = vmatpush1.bf16.msra.mxu1 %v11154_v47  ;;  %v11259_v47 = vcombine.high %v872_v39, %v876_v42  ;;  %v964_v18 = vld [vmem:[%s13154_s9 + $0x10e8] sm:$0xff] }
 0x276   : > { %8302 = vmatprep.subr.bf16.mxu1 %v11163_v51  ;;  %v880_v51 = vld [vmem:[%s13154_s9 + $0xe48] sm:$0xff]  ;;  %v11347_v54 = vcombine.high %v960_v43, %v964_v18 }
 0x277   : > { %8328 = vmatpush1.bf16.msra.mxu0 %v11226_v62  ;;  %v11322_v62 = vcombine.low %v936_v44, %v940_v45  ;;  %v904_v3 = vld [vmem:[%s13154_s9 + $0xf08] sm:$0xff] }
 0x278   : > { %8329 = vmatprep.subr.bf16.mxu0 %v11235_v1  ;;  %v7984_v14 = vpop.f32.mrb[8].mxu0  ;;  %v11331_v1 = vcombine.high %v944_v57, %v948_v58  ;;  %v980_v39 = vld [vmem:[%s13154_s9 + $0x1168] sm:$0xff] }
 0x279   : > { %8303 = vmatpush1.bf16.msra.mxu1 %v11162_v0  ;;  %v7985_v24 = vadd.f32 %v7984_v14, %v13653_v22  ;;  %v7986_v63 = vpop.f32.mrb[9].mxu0  ;;  %v11178_v22 = vcombine.low %v792_v7, %v796_v12  ;;  %v11267_v0 = vcombine.high %v880_v51, %v884_v53  ;;  %v956_v7 = vld [vmem:[%s13154_s9 + $0x10a8] sm:$0xff]  ;;  %v11266_v12 = vcombine.low %v880_v51, %v884_v53 }
 0x27a   : > { %8304 = vmatprep.subr.bf16.mxu1 %v11171_v2  ;;  %v8025_v25 = vpop.f32.mrb[8].mxu1  ;;  %v7987_v27 = vadd.f32 %v7986_v63, %v13655_v26  ;;  %v7988_v29 = vpop.f32.mrb[10].mxu0  ;;  %v888_v2 = vld [vmem:[%s13154_s9 + $0xe88] sm:$0xff] }
 0x27b   : > { %v8027_v55 = vpop.f32.mrb[9].mxu1  ;;  %8330 = vmatpush1.bf16.msra.mxu0 %v11234_v56  ;;  %v13727_v32 = vadd.f32 %v8025_v25, %v7985_v24  ;;  %v7989_v34 = vpop.f32.mrb[11].mxu0  ;;  %v11330_v56 = vcombine.low %v944_v57, %v948_v58  ;;  %v896_v14 = vld [vmem:[%s13154_s9 + $0xec8] sm:$0xff]  ;;  %v11274_v24 = vcombine.low %v888_v2, %v892_v4  ;;  %v11338_v25 = vcombine.low %v952_v6, %v956_v7 }
 0x27c   : > { %v8029_v33 = vpop.f32.mrb[10].mxu1  ;;  %8331 = vmatprep.subr.bf16.mxu0 %v11243_v40  ;;  %v13729_v36 = vadd.f32 %v8027_v55, %v7987_v27  ;;  %v11339_v40 = vcombine.high %v952_v6, %v956_v7  ;;  %v908_v27 = vld [vmem:[%s13154_s9 + $0xf28] sm:$0xff] }
 0x27d   : > { %8305 = vmatpush1.bf16.msra.mxu1 %v11170_v13  ;;  %v8030_v26 = vpop.f32.mrb[11].mxu1  ;;  %v11275_v13 = vcombine.high %v888_v2, %v892_v4  ;;  %v968_v55 = vld [vmem:[%s13154_s9 + $0x1108] sm:$0xff]  ;;  %v11346_v33 = vcombine.low %v960_v43, %v964_v18  ;;  %v11291_v34 = vcombine.high %v904_v3, %v908_v27  ;;  %v11290_v42 = vcombine.low %v904_v3, %v908_v27 }
 0x27e   : > { %8306 = vmatprep.subr.bf16.mxu1 %v11179_v15  ;;  %v900_v15 = vld [vmem:[%s13154_s9 + $0xee8] sm:$0xff] }
 0x27f   : > { %8332 = vmatpush1.bf16.msra.mxu0 %v11242_v31  ;;  %v11283_v63 = vcombine.high %v896_v14, %v900_v15  ;;  %v972_v29 = vld [vmem:[%s13154_s9 + $0x1128] sm:$0xff]  ;;  %v11282_v31 = vcombine.low %v896_v14, %v900_v15 }
 0x280   : > { %8333 = vmatprep.subr.bf16.mxu0 %v11251_v35  ;;  %v912_v35 = vld [vmem:[%s13154_s9 + $0xf48] sm:$0xff]  ;;  %v11354_v44 = vcombine.low %v968_v55, %v972_v29 }
 0x281   : > { %8307 = vmatpush1.bf16.msra.mxu1 %v11178_v22  ;;  %v11355_v22 = vcombine.high %v968_v55, %v972_v29  ;;  %v916_v26 = vld [vmem:[%s13154_s9 + $0xf68] sm:$0xff] }
 0x282   : > { %8308 = vmatprep.subr.bf16.mxu1 %v11187_v38  ;;  %v976_v38 = vld [vmem:[%s13154_s9 + $0x1148] sm:$0xff]  ;;  %v11299_v45 = vcombine.high %v912_v35, %v916_v26  ;;  %v11298_v53 = vcombine.low %v912_v35, %v916_v26 }
 0x283   : > { %8334 = vmatpush1.bf16.msra.mxu0 %v11250_v20  ;;  %v11363_v20 = vcombine.high %v976_v38, %v980_v39  ;;  %v988_v51 = vld [vmem:[%s13154_s9 + $0x11a8] sm:$0xff]  ;;  %v11362_v57 = vcombine.low %v976_v38, %v980_v39 }
 0x284   : > { %8335 = vmatprep.subr.bf16.mxu0 %v11259_v47  ;;  %v924_v47 = vld [vmem:[%s13154_s9 + $0xfa8] sm:$0xff] }
 0x285   : > { %8309 = vmatpush1.bf16.msra.mxu1 %v11186_v46  ;;  %v920_v46 = vld [vmem:[%s13154_s9 + $0xf88] sm:$0xff] }
 0x286   : > { %8360 = vmatprep.subr.bf16.mxu1 %v11323_v49  ;;  %v984_v49 = vld [vmem:[%s13154_s9 + $0x1188] sm:$0xff]  ;;  %v11307_v58 = vcombine.high %v920_v46, %v924_v47  ;;  %v11306_v4 = vcombine.low %v920_v46, %v924_v47 }
 0x287   : > { %8336 = vmatpush1.bf16.msra.mxu0 %v11258_v61  ;;  %v11371_v61 = vcombine.high %v984_v49, %v988_v51  ;;  %v996_v2 = vld [vmem:[%s13154_s9 + $0x11e8] sm:$0xff]  ;;  %v11370_v6 = vcombine.low %v984_v49, %v988_v51 }
 0x288   : > { %8311 = vmatmul.mubr.bf16.vlgmr.msra.gmra.mrb[24].mxu1 %v13352_v37  ;;  %8337 = vmatprep.subr.bf16.mxu0 %v11267_v0  ;;  %v932_v0 = vld [vmem:[%s13154_s9 + $0xfe8] sm:$0xff] }
 0x289   : > { %8361 = vmatpush1.bf16.msra.mxu1 %v11322_v62  ;;  %8392 = vmatprep.mubr.bf16.mxu1 %v13370_v48  ;;  %v928_v62 = vld [vmem:[%s13154_s9 + $0xfc8] sm:$0xff] }
 0x28a   : > { %8362 = vmatprep.subr.bf16.mxu1 %v11331_v1  ;;  %v992_v1 = vld [vmem:[%s13154_s9 + $0x11c8] sm:$0xff]  ;;  %v11315_v7 = vcombine.high %v928_v62, %v932_v0  ;;  %v11314_v15 = vcombine.low %v928_v62, %v932_v0 }
 0x28b   : > { %8338 = vmatpush1.bf16.msra.mxu0 %v11266_v12  ;;  %v11379_v12 = vcombine.high %v992_v1, %v996_v2  ;;  %v1004_v14 = vld [vmem:[%s13154_s9 + $0x1228] sm:$0xff]  ;;  %v11378_v43 = vcombine.low %v992_v1, %v996_v2 }
 0x28c   : > { %8339 = vmatprep.subr.bf16.mxu0 %v11275_v13  ;;  %v1068_v13 = vld [vmem:[%s13154_s9 + $0x1428] sm:$0xff] }
 0x28d   : > { %8363 = vmatpush1.bf16.msra.mxu1 %v11330_v56  ;;  %v1064_v56 = vld [vmem:[%s13154_s9 + $0x1408] sm:$0xff] }
 0x28e   : > { %8364 = vmatprep.subr.bf16.mxu1 %v11339_v40  ;;  %v1000_v40 = vld [vmem:[%s13154_s9 + $0x1208] sm:$0xff]  ;;  %v11451_v18 = vcombine.high %v1064_v56, %v1068_v13  ;;  %v11450_v27 = vcombine.low %v1064_v56, %v1068_v13 }
 0x28f   : > { %8340 = vmatpush1.bf16.msra.mxu0 %v11274_v24  ;;  %v11387_v24 = vcombine.high %v1000_v40, %v1004_v14  ;;  %v1012_v3 = vld [vmem:[%s13154_s9 + $0x1268] sm:$0xff]  ;;  %v11386_v55 = vcombine.low %v1000_v40, %v1004_v14 }
 0x290   : > { %8341 = vmatprep.subr.bf16.mxu0 %v11283_v63  ;;  %v1076_v63 = vld [vmem:[%s13154_s9 + $0x1468] sm:$0xff] }
 0x291   : > { %8365 = vmatpush1.bf16.msra.mxu1 %v11338_v25  ;;  %v1072_v25 = vld [vmem:[%s13154_s9 + $0x1448] sm:$0xff] }
 0x292   : > { %8366 = vmatprep.subr.bf16.mxu1 %v11347_v54  ;;  %v1008_v54 = vld [vmem:[%s13154_s9 + $0x1248] sm:$0xff]  ;;  %v11459_v29 = vcombine.high %v1072_v25, %v1076_v63  ;;  %v11458_v26 = vcombine.low %v1072_v25, %v1076_v63 }
 0x293   : > { %8342 = vmatpush1.bf16.msra.mxu0 %v11282_v31  ;;  %v11395_v31 = vcombine.high %v1008_v54, %v1012_v3  ;;  %v1020_v35 = vld [vmem:[%s13154_s9 + $0x12a8] sm:$0xff]  ;;  %v11394_v38 = vcombine.low %v1008_v54, %v1012_v3 }
 0x294   : > { %8343 = vmatprep.subr.bf16.mxu0 %v11291_v34  ;;  %v1084_v34 = vld [vmem:[%s13154_s9 + $0x14a8] sm:$0xff] }
 0x295   : > { %8367 = vmatpush1.bf16.msra.mxu1 %v11346_v33  ;;  %v1080_v33 = vld [vmem:[%s13154_s9 + $0x1488] sm:$0xff] }
 0x296   : > { %8368 = vmatprep.subr.bf16.mxu1 %v11355_v22  ;;  %v1016_v22 = vld [vmem:[%s13154_s9 + $0x1288] sm:$0xff]  ;;  %v11467_v39 = vcombine.high %v1080_v33, %v1084_v34  ;;  %v11466_v47 = vcombine.low %v1080_v33, %v1084_v34 }
 0x297   : > { %8344 = vmatpush1.bf16.msra.mxu0 %v11290_v42  ;;  %v11403_v42 = vcombine.high %v1016_v22, %v1020_v35  ;;  %v1028_v46 = vld [vmem:[%s13154_s9 + $0x12e8] sm:$0xff]  ;;  %v11402_v49 = vcombine.low %v1016_v22, %v1020_v35 }
 0x298   : > { %8345 = vmatprep.subr.bf16.mxu0 %v11299_v45  ;;  %v1092_v45 = vld [vmem:[%s13154_s9 + $0x14e8] sm:$0xff] }
 0x299   : > { %8369 = vmatpush1.bf16.msra.mxu1 %v11354_v44  ;;  %v1088_v44 = vld [vmem:[%s13154_s9 + $0x14c8] sm:$0xff] }
 0x29a   : > { %8370 = vmatprep.subr.bf16.mxu1 %v11363_v20  ;;  %v1024_v20 = vld [vmem:[%s13154_s9 + $0x12c8] sm:$0xff]  ;;  %v11475_v51 = vcombine.high %v1088_v44, %v1092_v45  ;;  %v11474_v0 = vcombine.low %v1088_v44, %v1092_v45 }
 0x29b   : > { %8346 = vmatpush1.bf16.msra.mxu0 %v11298_v53  ;;  %v11411_v53 = vcombine.high %v1024_v20, %v1028_v46  ;;  %v1036_v62 = vld [vmem:[%s13154_s9 + $0x1328] sm:$0xff]  ;;  %v11410_v1 = vcombine.low %v1024_v20, %v1028_v46 }
 0x29c   : > { %8347 = vmatprep.subr.bf16.mxu0 %v11307_v58  ;;  %v1100_v58 = vld [vmem:[%s13154_s9 + $0x1528] sm:$0xff] }
 0x29d   : > { %8371 = vmatpush1.bf16.msra.mxu1 %v11362_v57  ;;  %v1096_v57 = vld [vmem:[%s13154_s9 + $0x1508] sm:$0xff] }
 0x29e   : > { %8372 = vmatprep.subr.bf16.mxu1 %v11371_v61  ;;  %v1032_v61 = vld [vmem:[%s13154_s9 + $0x1308] sm:$0xff]  ;;  %v11483_v2 = vcombine.high %v1096_v57, %v1100_v58  ;;  %v11482_v13 = vcombine.low %v1096_v57, %v1100_v58 }
 0x29f   : > { %8348 = vmatpush1.bf16.msra.mxu0 %v11306_v4  ;;  %v11419_v4 = vcombine.high %v1032_v61, %v1036_v62  ;;  %v1044_v56 = vld [vmem:[%s13154_s9 + $0x1368] sm:$0xff]  ;;  %v11418_v40 = vcombine.low %v1032_v61, %v1036_v62 }
 0x2a0   : > { %8349 = vmatprep.subr.bf16.mxu0 %v11315_v7  ;;  %v1108_v7 = vld [vmem:[%s13154_s9 + $0x1568] sm:$0xff] }
 0x2a1   : > { %8373 = vmatpush1.bf16.msra.mxu1 %v11370_v6  ;;  %v1104_v6 = vld [vmem:[%s13154_s9 + $0x1548] sm:$0xff] }
 0x2a2   : > { %8374 = vmatprep.subr.bf16.mxu1 %v11379_v12  ;;  %v1040_v12 = vld [vmem:[%s13154_s9 + $0x1348] sm:$0xff]  ;;  %v11491_v14 = vcombine.high %v1104_v6, %v1108_v7  ;;  %v11490_v63 = vcombine.low %v1104_v6, %v1108_v7 }
 0x2a3   : > { %8350 = vmatpush1.bf16.msra.mxu0 %v11314_v15  ;;  %v11427_v15 = vcombine.high %v1040_v12, %v1044_v56  ;;  %v1052_v25 = vld [vmem:[%s13154_s9 + $0x13a8] sm:$0xff]  ;;  %v11426_v54 = vcombine.low %v1040_v12, %v1044_v56 }
 0x2a4   : > { %8401 = vmatprep.subr.bf16.mxu0 %v11451_v18  ;;  %v1116_v18 = vld [vmem:[%s13154_s9 + $0x15a8] sm:$0xff] }
 0x2a5   : > { %8375 = vmatpush1.bf16.msra.mxu1 %v11378_v43  ;;  %v1112_v43 = vld [vmem:[%s13154_s9 + $0x1588] sm:$0xff] }
 0x2a6   : > { %8376 = vmatprep.subr.bf16.mxu1 %v11387_v24  ;;  %8352 = vmatmul.mubr.bf16.vlgmr.msra.gmra.mrb[24].mxu0 %v13361_v41  ;;  %v1048_v24 = vld [vmem:[%s13154_s9 + $0x1388] sm:$0xff]  ;;  %v11499_v3 = vcombine.high %v1112_v43, %v1116_v18  ;;  %v11498_v44 = vcombine.low %v1112_v43, %v1116_v18 }
 0x2a7   : > { %8402 = vmatpush1.bf16.msra.mxu0 %v11450_v27  ;;  %8433 = vmatprep.mubr.bf16.mxu0 %v13377_v50  ;;  %v1056_v35 = vld [vmem:[%s13154_s9 + $0x13c8] sm:$0xff] }
 0x2a8   : > { %8403 = vmatprep.subr.bf16.mxu0 %v11459_v29  ;;  %v1120_v29 = vld [vmem:[%s13154_s9 + $0x15c8] sm:$0xff] }
 0x2a9   : > { %8377 = vmatpush1.bf16.msra.mxu1 %v11386_v55  ;;  %v11435_v55 = vcombine.high %v1048_v24, %v1052_v25  ;;  %v1132_v57 = vld [vmem:[%s13154_s9 + $0x1628] sm:$0xff] }
 0x2aa   : > { %8378 = vmatprep.subr.bf16.mxu1 %v11395_v31  ;;  %v1124_v31 = vld [vmem:[%s13154_s9 + $0x15e8] sm:$0xff] }
 0x2ab   : > { %8404 = vmatpush1.bf16.msra.mxu0 %v11458_v26  ;;  %v1060_v26 = vld [vmem:[%s13154_s9 + $0x13e8] sm:$0xff]  ;;  %v11506_v62 = vcombine.low %v1120_v29, %v1124_v31 }
 0x2ac   : > { %8405 = vmatprep.subr.bf16.mxu0 %v11467_v39  ;;  %v1192_v58 = vld [vmem:[%s13154_s9 + $0x1808] sm:$0xff] }
 0x2ad   : > { %8379 = vmatpush1.bf16.msra.mxu1 %v11394_v38  ;;  %v1196_v61 = vld [vmem:[%s13154_s9 + $0x1828] sm:$0xff] }
 0x2ae   : > { %8380 = vmatprep.subr.bf16.mxu1 %v11403_v42  ;;  %v1140_v6 = vld [vmem:[%s13154_s9 + $0x1668] sm:$0xff] }
 0x2af   : > { %8406 = vmatpush1.bf16.msra.mxu0 %v11466_v47  ;;  %v11507_v47 = vcombine.high %v1120_v29, %v1124_v31  ;;  %v1200_v7 = vld [vmem:[%s13154_s9 + $0x1848] sm:$0xff] }
 0x2b0   : > { %8407 = vmatprep.subr.bf16.mxu0 %v11475_v51  ;;  %v11443_v51 = vcombine.high %v1056_v35, %v1060_v26  ;;  %v1204_v12 = vld [vmem:[%s13154_s9 + $0x1868] sm:$0xff] }
 0x2b1   : > { %8381 = vmatpush1.bf16.msra.mxu1 %v11402_v49  ;;  %v1148_v43 = vld [vmem:[%s13154_s9 + $0x16a8] sm:$0xff] }
 0x2b2   : > { %8382 = vmatprep.subr.bf16.mxu1 %v11411_v53  ;;  %v1128_v53 = vld [vmem:[%s13154_s9 + $0x1608] sm:$0xff] }
 0x2b3   : > { %8408 = vmatpush1.bf16.msra.mxu0 %v11474_v0  ;;  %v11442_v0 = vcombine.low %v1056_v35, %v1060_v26  ;;  %v11514_v56 = vcombine.low %v1128_v53, %v1132_v57  ;;  %v1208_v18 = vld [vmem:[%s13154_s9 + $0x1888] sm:$0xff] }
 0x2b4   : > { %8409 = vmatprep.subr.bf16.mxu0 %v11483_v2  ;;  %v11579_v2 = vcombine.high %v1192_v58, %v1196_v61  ;;  %v1216_v29 = vld [vmem:[%s13154_s9 + $0x18c8] sm:$0xff] }
 0x2b5   : > { %8383 = vmatpush1.bf16.msra.mxu1 %v11410_v1  ;;  %v11515_v1 = vcombine.high %v1128_v53, %v1132_v57  ;;  %v1220_v31 = vld [vmem:[%s13154_s9 + $0x18e8] sm:$0xff] }
 0x2b6   : > { %8384 = vmatprep.subr.bf16.mxu1 %v11419_v4  ;;  %v1136_v4 = vld [vmem:[%s13154_s9 + $0x1648] sm:$0xff]  ;;  %v11603_v35 = vcombine.high %v1216_v29, %v1220_v31 }
 0x2b7   : > { %8410 = vmatpush1.bf16.msra.mxu0 %v11482_v13  ;;  %v11578_v13 = vcombine.low %v1192_v58, %v1196_v61  ;;  %v1160_v26 = vld [vmem:[%s13154_s9 + $0x1708] sm:$0xff] }
 0x2b8   : > { %8411 = vmatprep.subr.bf16.mxu0 %v11491_v14  ;;  %v11587_v14 = vcombine.high %v1200_v7, %v1204_v12  ;;  %v1236_v53 = vld [vmem:[%s13154_s9 + $0x1968] sm:$0xff] }
 0x2b9   : > { %8385 = vmatpush1.bf16.msra.mxu1 %v11418_v40  ;;  %v8066_v27 = vpop.f32.mrb[12].mxu0  ;;  %v11523_v40 = vcombine.high %v1136_v4, %v1140_v6 }
 0x2ba   : > { %8386 = vmatprep.subr.bf16.mxu1 %v11427_v15  ;;  %v8067_v33 = vadd.f32 %v8066_v27, %v13727_v32  ;;  %v8068_v22 = vpop.f32.mrb[13].mxu0  ;;  %v11434_v32 = vcombine.low %v1048_v24, %v1052_v25  ;;  %v1144_v15 = vld [vmem:[%s13154_s9 + $0x1688] sm:$0xff]  ;;  %v11522_v25 = vcombine.low %v1136_v4, %v1140_v6 }
 0x2bb   : > { %v8107_v34 = vpop.f32.mrb[12].mxu1  ;;  %v8069_v38 = vadd.f32 %v8068_v22, %v13729_v36  ;;  %v8070_v42 = vpop.f32.mrb[14].mxu0  ;;  %8412 = vmatpush1.bf16.msra.mxu0 %v11490_v63  ;;  %v1212_v24 = vld [vmem:[%s13154_s9 + $0x18a8] sm:$0xff]  ;;  %v11586_v63 = vcombine.low %v1200_v7, %v1204_v12 }
 0x2bc   : > { %v8109_v39 = vpop.f32.mrb[13].mxu1  ;;  %v13801_v45 = vadd.f32 %v8107_v34, %v8067_v33  ;;  %v8071_v46 = vpop.f32.mrb[15].mxu0  ;;  %8413 = vmatprep.subr.bf16.mxu0 %v11499_v3  ;;  %v11595_v3 = vcombine.high %v1208_v18, %v1212_v24  ;;  %v1152_v27 = vld [vmem:[%s13154_s9 + $0x16c8] sm:$0xff]  ;;  %v11530_v33 = vcombine.low %v1144_v15, %v1148_v43  ;;  %v11594_v34 = vcombine.low %v1208_v18, %v1212_v24 }
 0x2bd   : > { %v8111_v20 = vpop.f32.mrb[14].mxu1  ;;  %8387 = vmatpush1.bf16.msra.mxu1 %v11426_v54  ;;  %v13803_v49 = vadd.f32 %v8109_v39, %v8069_v38  ;;  %v11531_v54 = vcombine.high %v1144_v15, %v1148_v43  ;;  %v1164_v38 = vld [vmem:[%s13154_s9 + $0x1728] sm:$0xff] }
 0x2be   : > { %v8112_v36 = vpop.f32.mrb[15].mxu1  ;;  %8388 = vmatprep.subr.bf16.mxu1 %v11435_v55  ;;  %v1156_v55 = vld [vmem:[%s13154_s9 + $0x16e8] sm:$0xff]  ;;  %v11602_v20 = vcombine.low %v1216_v29, %v1220_v31  ;;  %v11547_v46 = vcombine.high %v1160_v26, %v1164_v38  ;;  %v11546_v57 = vcombine.low %v1160_v26, %v1164_v38 }
 0x2bf   : > { %8414 = vmatpush1.bf16.msra.mxu0 %v11498_v44  ;;  %v11539_v22 = vcombine.high %v1152_v27, %v1156_v55  ;;  %v1224_v39 = vld [vmem:[%s13154_s9 + $0x1908] sm:$0xff]  ;;  %v11538_v44 = vcombine.low %v1152_v27, %v1156_v55 }
 0x2c0   : > { %8415 = vmatprep.subr.bf16.mxu0 %v11507_v47  ;;  %v1228_v42 = vld [vmem:[%s13154_s9 + $0x1928] sm:$0xff] }
 0x2c1   : > { %8389 = vmatpush1.bf16.msra.mxu1 %v11434_v32  ;;  %v11611_v32 = vcombine.high %v1224_v39, %v1228_v42  ;;  %v1168_v47 = vld [vmem:[%s13154_s9 + $0x1748] sm:$0xff]  ;;  %v11610_v58 = vcombine.low %v1224_v39, %v1228_v42 }
 0x2c2   : > { %8390 = vmatprep.subr.bf16.mxu1 %v11443_v51  ;;  %v1172_v36 = vld [vmem:[%s13154_s9 + $0x1768] sm:$0xff] }
 0x2c3   : > { %8416 = vmatpush1.bf16.msra.mxu0 %v11506_v62  ;;  %v1232_v51 = vld [vmem:[%s13154_s9 + $0x1948] sm:$0xff]  ;;  %v11555_v61 = vcombine.high %v1168_v47, %v1172_v36  ;;  %v11554_v6 = vcombine.low %v1168_v47, %v1172_v36 }
 0x2c4   : > { %8417 = vmatprep.subr.bf16.mxu0 %v11515_v1  ;;  %v11619_v62 = vcombine.high %v1232_v51, %v1236_v53  ;;  %v1180_v1 = vld [vmem:[%s13154_s9 + $0x17a8] sm:$0xff]  ;;  %v11618_v7 = vcombine.low %v1232_v51, %v1236_v53 }
 0x2c5   : > { %8391 = vmatpush1.bf16.msra.mxu1 %v11442_v0  ;;  %v1176_v0 = vld [vmem:[%s13154_s9 + $0x1788] sm:$0xff] }
 0x2c6   : > { %8442 = vmatprep.subr.bf16.mxu1 %v11579_v2  ;;  %v1240_v2 = vld [vmem:[%s13154_s9 + $0x1988] sm:$0xff]  ;;  %v11563_v12 = vcombine.high %v1176_v0, %v1180_v1  ;;  %v11562_v24 = vcombine.low %v1176_v0, %v1180_v1 }
 0x2c7   : > { %8418 = vmatpush1.bf16.msra.mxu0 %v11514_v56  ;;  %v1244_v4 = vld [vmem:[%s13154_s9 + $0x19a8] sm:$0xff] }
 0x2c8   : > { %8393 = vmatmul.mubr.bf16.vlgmr.msra.gmra.mrb[28].mxu1 %v13442_v5  ;;  %8419 = vmatprep.subr.bf16.mxu0 %v11523_v40  ;;  %v11627_v56 = vcombine.high %v1240_v2, %v1244_v4  ;;  %v1188_v40 = vld [vmem:[%s13154_s9 + $0x17e8] sm:$0xff] }
 0x2c9   : > { %8443 = vmatpush1.bf16.msra.mxu1 %v11578_v13  ;;  %8474 = vmatprep.mubr.bf16.mxu1 %v13460_v16  ;;  %v1184_v13 = vld [vmem:[%s13154_s9 + $0x17c8] sm:$0xff] }
 0x2ca   : > { %8444 = vmatprep.subr.bf16.mxu1 %v11587_v14  ;;  %v1248_v15 = vld [vmem:[%s13154_s9 + $0x19c8] sm:$0xff] }
 0x2cb   : > { %8420 = vmatpush1.bf16.msra.mxu0 %v11522_v25  ;;  %v1252_v43 = vld [vmem:[%s13154_s9 + $0x19e8] sm:$0xff] }
 0x2cc   : > { %8421 = vmatprep.subr.bf16.mxu0 %v11531_v54  ;;  %v11571_v54 = vcombine.high %v1184_v13, %v1188_v40  ;;  %v11635_v27 = vcombine.high %v1248_v15, %v1252_v43  ;;  %v1320_v55 = vld [vmem:[%s13154_s9 + $0x1c08] sm:$0xff] }
 0x2cd   : > { %8445 = vmatpush1.bf16.msra.mxu1 %v11586_v63  ;;  %v11626_v63 = vcombine.low %v1240_v2, %v1244_v4  ;;  %v1324_v29 = vld [vmem:[%s13154_s9 + $0x1c28] sm:$0xff] }
 0x2ce   : > { %8446 = vmatprep.subr.bf16.mxu1 %v11595_v3  ;;  %v1256_v31 = vld [vmem:[%s13154_s9 + $0x1a08] sm:$0xff] }
 0x2cf   : > { %8422 = vmatpush1.bf16.msra.mxu0 %v11530_v33  ;;  %v1260_v33 = vld [vmem:[%s13154_s9 + $0x1a28] sm:$0xff] }
 0x2d0   : > { %8423 = vmatprep.subr.bf16.mxu0 %v11539_v22  ;;  %v11634_v22 = vcombine.low %v1248_v15, %v1252_v43  ;;  %v11643_v26 = vcombine.high %v1256_v31, %v1260_v33  ;;  %v1328_v38 = vld [vmem:[%s13154_s9 + $0x1c48] sm:$0xff] }
 0x2d1   : > { %8447 = vmatpush1.bf16.msra.mxu1 %v11594_v34  ;;  %v11570_v34 = vcombine.low %v1184_v13, %v1188_v40  ;;  %v1332_v39 = vld [vmem:[%s13154_s9 + $0x1c68] sm:$0xff] }
 0x2d2   : > { %8448 = vmatprep.subr.bf16.mxu1 %v11603_v35  ;;  %v11707_v35 = vcombine.high %v1320_v55, %v1324_v29  ;;  %v1264_v42 = vld [vmem:[%s13154_s9 + $0x1a48] sm:$0xff] }
 0x2d3   : > { %8424 = vmatpush1.bf16.msra.mxu0 %v11538_v44  ;;  %v1268_v44 = vld [vmem:[%s13154_s9 + $0x1a68] sm:$0xff] }
 0x2d4   : > { %8425 = vmatprep.subr.bf16.mxu0 %v11547_v46  ;;  %v11642_v46 = vcombine.low %v1256_v31, %v1260_v33  ;;  %v11651_v47 = vcombine.high %v1264_v42, %v1268_v44  ;;  %v1336_v36 = vld [vmem:[%s13154_s9 + $0x1c88] sm:$0xff] }
 0x2d5   : > { %8449 = vmatpush1.bf16.msra.mxu1 %v11602_v20  ;;  %v11706_v20 = vcombine.low %v1320_v55, %v1324_v29  ;;  %v1340_v51 = vld [vmem:[%s13154_s9 + $0x1ca8] sm:$0xff] }
 0x2d6   : > { %8450 = vmatprep.subr.bf16.mxu1 %v11611_v32  ;;  %v11715_v32 = vcombine.high %v1328_v38, %v1332_v39  ;;  %v1272_v53 = vld [vmem:[%s13154_s9 + $0x1a88] sm:$0xff] }
 0x2d7   : > { %8426 = vmatpush1.bf16.msra.mxu0 %v11546_v57  ;;  %v1276_v57 = vld [vmem:[%s13154_s9 + $0x1aa8] sm:$0xff] }
 0x2d8   : > { %8427 = vmatprep.subr.bf16.mxu0 %v11555_v61  ;;  %v11650_v61 = vcombine.low %v1264_v42, %v1268_v44  ;;  %v11659_v0 = vcombine.high %v1272_v53, %v1276_v57  ;;  %v1344_v1 = vld [vmem:[%s13154_s9 + $0x1cc8] sm:$0xff] }
 0x2d9   : > { %8451 = vmatpush1.bf16.msra.mxu1 %v11610_v58  ;;  %v11714_v58 = vcombine.low %v1328_v38, %v1332_v39  ;;  %v1348_v2 = vld [vmem:[%s13154_s9 + $0x1ce8] sm:$0xff] }
 0x2da   : > { %8452 = vmatprep.subr.bf16.mxu1 %v11619_v62  ;;  %v11723_v62 = vcombine.high %v1336_v36, %v1340_v51  ;;  %v1280_v4 = vld [vmem:[%s13154_s9 + $0x1ac8] sm:$0xff] }
 0x2db   : > { %v13837_v14 = vpop.f32.mrb[16].mxu1  ;;  %8428 = vmatpush1.bf16.msra.mxu0 %v11554_v6  ;;  %v1284_v6 = vld [vmem:[%s13154_s9 + $0x1ae8] sm:$0xff] }
 0x2dc   : > { %v13841_v18 = vpop.f32.mrb[17].mxu1  ;;  %8429 = vmatprep.subr.bf16.mxu0 %v11563_v12  ;;  %v11658_v12 = vcombine.low %v1272_v53, %v1276_v57  ;;  %v11667_v13 = vcombine.high %v1280_v4, %v1284_v6  ;;  %v1352_v40 = vld [vmem:[%s13154_s9 + $0x1d08] sm:$0xff] }
 0x2dd   : > { %v8193_v25 = vpop.f32.mrb[18].mxu1  ;;  %8453 = vmatpush1.bf16.msra.mxu1 %v11618_v7  ;;  %v11722_v7 = vcombine.low %v1336_v36, %v1340_v51  ;;  %v1356_v15 = vld [vmem:[%s13154_s9 + $0x1d28] sm:$0xff] }
 0x2de   : > { %v8194_v3 = vpop.f32.mrb[19].mxu1  ;;  %8454 = vmatprep.subr.bf16.mxu1 %v11627_v56  ;;  %v11731_v56 = vcombine.high %v1344_v1, %v1348_v2  ;;  %v1288_v43 = vld [vmem:[%s13154_s9 + $0x1b08] sm:$0xff]  ;;  %v11730_v25 = vcombine.low %v1344_v1, %v1348_v2  ;;  %v11738_v33 = vcombine.low %v1352_v40, %v1356_v15 }
 0x2df   : > { %8430 = vmatpush1.bf16.msra.mxu0 %v11562_v24  ;;  %v1292_v24 = vld [vmem:[%s13154_s9 + $0x1b28] sm:$0xff] }
 0x2e0   : > { %8431 = vmatprep.subr.bf16.mxu0 %v11571_v54  ;;  %v11739_v54 = vcombine.high %v1352_v40, %v1356_v15  ;;  %v11675_v3 = vcombine.high %v1288_v43, %v1292_v24  ;;  %v1364_v55 = vld [vmem:[%s13154_s9 + $0x1d68] sm:$0xff] }
 0x2e1   : > { %8455 = vmatpush1.bf16.msra.mxu1 %v11626_v63  ;;  %v11666_v63 = vcombine.low %v1280_v4, %v1284_v6  ;;  %v1296_v29 = vld [vmem:[%s13154_s9 + $0x1b48] sm:$0xff]  ;;  %v406_v6 = vld [vmem:[#allocation2 + $0x8] sm:$0xff] }
 0x2e2   : > { %8456 = vmatprep.subr.bf16.mxu1 %v11635_v27  ;;  %v1360_v27 = vld [vmem:[%s13154_s9 + $0x1d48] sm:$0xff] }
 0x2e3   : > { %8432 = vmatpush1.bf16.msra.mxu0 %v11570_v34  ;;  %v1300_v31 = vld [vmem:[%s13154_s9 + $0x1b68] sm:$0xff]  ;;  %v11674_v34 = vcombine.low %v1288_v43, %v1292_v24  ;;  %v11746_v44 = vcombine.low %v1360_v27, %v1364_v55 }
 0x2e4   : > { %8483 = vmatprep.subr.bf16.mxu0 %v11707_v35  ;;  %v11683_v35 = vcombine.high %v1296_v29, %v1300_v31  ;;  %v1372_v38 = vld [vmem:[%s13154_s9 + $0x1da8] sm:$0xff] }
 0x2e5   : > { %8457 = vmatpush1.bf16.msra.mxu1 %v11634_v22  ;;  %v11747_v22 = vcombine.high %v1360_v27, %v1364_v55  ;;  %v1304_v39 = vld [vmem:[%s13154_s9 + $0x1b88] sm:$0xff] }
 0x2e6   : > { %8458 = vmatprep.subr.bf16.mxu1 %v11643_v26  ;;  %8434 = vmatmul.mubr.bf16.vlgmr.msra.gmra.mrb[28].mxu0 %v13451_v9  ;;  %v1368_v26 = vld [vmem:[%s13154_s9 + $0x1d88] sm:$0xff] }
 0x2e7   : > { %8484 = vmatpush1.bf16.msra.mxu0 %v11706_v20  ;;  %8515 = vmatprep.mubr.bf16.mxu0 %v13467_v19  ;;  %v1308_v42 = vld [vmem:[%s13154_s9 + $0x1ba8] sm:$0xff]  ;;  %v11682_v20 = vcombine.low %v1296_v29, %v1300_v31  ;;  %v11754_v2 = vcombine.low %v1368_v26, %v1372_v38 }
 0x2e8   : > { %8485 = vmatprep.subr.bf16.mxu0 %v11715_v32  ;;  %v1376_v36 = vld [vmem:[%s13154_s9 + $0x1dc8] sm:$0xff] }
 0x2e9   : > { %8459 = vmatpush1.bf16.msra.mxu1 %v11642_v46  ;;  %v11755_v46 = vcombine.high %v1368_v26, %v1372_v38  ;;  %v1380_v51 = vld [vmem:[%s13154_s9 + $0x1de8] sm:$0xff] }
 0x2ea   : > { %8460 = vmatprep.subr.bf16.mxu1 %v11651_v47  ;;  %v11691_v47 = vcombine.high %v1304_v39, %v1308_v42  ;;  %v1384_v40 = vld [vmem:[%s13154_s9 + $0x1e08] sm:$0xff] }
 0x2eb   : > { %8486 = vmatpush1.bf16.msra.mxu0 %v11714_v58  ;;  %v1312_v58 = vld [vmem:[%s13154_s9 + $0x1bc8] sm:$0xff] }
 0x2ec   : > { %8487 = vmatprep.subr.bf16.mxu0 %v11723_v62  ;;  %v405_v62 = vld [vmem:[#allocation2] sm:$0xff] }
 0x2ed   : > { %8461 = vmatpush1.bf16.msra.mxu1 %v11650_v61  ;;  %v1316_v61 = vld [vmem:[%s13154_s9 + $0x1be8] sm:$0xff] }
 0x2ee   : > { %8462 = vmatprep.subr.bf16.mxu1 %v11659_v0  ;;  %v1448_v43 = vld [vmem:[%s13154_s9 + $0x2008] sm:$0xff] }
 0x2ef   : > { %8488 = vmatpush1.bf16.msra.mxu0 %v11722_v7  ;;  %v1452_v24 = vld [vmem:[%s13154_s9 + $0x2028] sm:$0xff] }
 0x2f0   : > { %8489 = vmatprep.subr.bf16.mxu0 %v11731_v56  ;;  %v1396_v27 = vld [vmem:[%s13154_s9 + $0x1e68] sm:$0xff] }
 0x2f1   : > { %8463 = vmatpush1.bf16.msra.mxu1 %v11658_v12  ;;  %v11690_v12 = vcombine.low %v1304_v39, %v1308_v42  ;;  %v1456_v55 = vld [vmem:[%s13154_s9 + $0x2048] sm:$0xff] }
 0x2f2   : > { %8464 = vmatprep.subr.bf16.mxu1 %v11667_v13  ;;  %v11699_v13 = vcombine.high %v1312_v58, %v1316_v61  ;;  %v1460_v29 = vld [vmem:[%s13154_s9 + $0x2068] sm:$0xff] }
 0x2f3   : > { %8490 = vmatpush1.bf16.msra.mxu0 %v11730_v25  ;;  %v11762_v25 = vcombine.low %v1376_v36, %v1380_v51  ;;  %v1404_v26 = vld [vmem:[%s13154_s9 + $0x1ea8] sm:$0xff] }
 0x2f4   : > { %8491 = vmatprep.subr.bf16.mxu0 %v11739_v54  ;;  %v1464_v38 = vld [vmem:[%s13154_s9 + $0x2088] sm:$0xff] }
 0x2f5   : > { %8465 = vmatpush1.bf16.msra.mxu1 %v11666_v63  ;;  %v11698_v63 = vcombine.low %v1312_v58, %v1316_v61  ;;  %v1468_v39 = vld [vmem:[%s13154_s9 + $0x20a8] sm:$0xff] }
 0x2f6   : > { %8466 = vmatprep.subr.bf16.mxu1 %v11675_v3  ;;  %v1392_v3 = vld [vmem:[%s13154_s9 + $0x1e48] sm:$0xff] }
 0x2f7   : > { %8492 = vmatpush1.bf16.msra.mxu0 %v11738_v33  ;;  %v11834_v33 = vcombine.low %v1448_v43, %v1452_v24  ;;  %v11778_v42 = vcombine.low %v1392_v3, %v1396_v27 }
 0x2f8   : > { %8493 = vmatprep.subr.bf16.mxu0 %v11747_v22  ;;  %v11843_v22 = vcombine.high %v1456_v55, %v1460_v29 }
 0x2f9   : > { %8467 = vmatpush1.bf16.msra.mxu1 %v11674_v34  ;;  %v8148_v32 = vpop.f32.mrb[16].mxu0  ;;  %v11779_v34 = vcombine.high %v1392_v3, %v1396_v27 }
 0x2fa   : > { %8468 = vmatprep.subr.bf16.mxu1 %v11683_v35  ;;  %v8149_v53 = vadd.f32 %v8148_v32, %v13801_v45  ;;  %v8150_v57 = vpop.f32.mrb[17].mxu0  ;;  %v11763_v45 = vcombine.high %v1376_v36, %v1380_v51  ;;  %v1400_v35 = vld [vmem:[%s13154_s9 + $0x1e88] sm:$0xff] }
 0x2fb   : > { %v8151_v0 = vadd.f32 %v8150_v57, %v13803_v49  ;;  %v8152_v1 = vpop.f32.mrb[18].mxu0  ;;  %8494 = vmatpush1.bf16.msra.mxu0 %v11746_v44  ;;  %v1388_v49 = vld [vmem:[%s13154_s9 + $0x1e28] sm:$0xff]  ;;  %v11842_v44 = vcombine.low %v1456_v55, %v1460_v29  ;;  %v11850_v57 = vcombine.low %v1464_v38, %v1468_v39 }
 0x2fc   : > { %v8190_v4 = vadd.f32 %v13837_v14, %v8149_v53  ;;  %v8153_v7 = vpop.f32.mrb[19].mxu0  ;;  %8495 = vmatprep.subr.bf16.mxu0 %v11755_v46  ;;  %v11771_v54 = vcombine.high %v1384_v40, %v1388_v49  ;;  %v11770_v31 = vcombine.low %v1384_v40, %v1388_v49  ;;  %v11851_v46 = vcombine.high %v1464_v38, %v1468_v39  ;;  %v1408_v32 = vld [vmem:[%s13154_s9 + $0x1ec8] sm:$0xff] }
 0x2fd   : > { %8469 = vmatpush1.bf16.msra.mxu1 %v11682_v20  ;;  %v8192_v56 = vadd.f32 %v13841_v18, %v8151_v0  ;;  %v11835_v18 = vcombine.high %v1448_v43, %v1452_v24  ;;  %v11787_v20 = vcombine.high %v1400_v35, %v1404_v26  ;;  %v1472_v36 = vld [vmem:[%s13154_s9 + $0x20c8] sm:$0xff]  ;;  %v11786_v53 = vcombine.low %v1400_v35, %v1404_v26 }
 0x2fe   : > { %8470 = vmatprep.subr.bf16.mxu1 %v11691_v47  ;;  %v9426_v15 = vadd.f32 %v8190_v4, %v405_v62  ;;  %v1412_v47 = vld [vmem:[%s13154_s9 + $0x1ee8] sm:$0xff] }
 0x2ff   : > { %v9427_v14 = vadd.f32 %v8192_v56, %v406_v6  ;;  %8496 = vmatpush1.bf16.msra.mxu0 %v11754_v2  ;;  %v1476_v51 = vld [vmem:[%s13154_s9 + $0x20e8] sm:$0xff]  ;;  %v11795_v58 = vcombine.high %v1408_v32, %v1412_v47  ;;  %v11794_v4 = vcombine.low %v1408_v32, %v1412_v47 }
 0x300   : > { %9434 = vst [vmem:[#allocation2] sm:$0xff] %v9426_v15  ;;  %8497 = vmatprep.subr.bf16.mxu0 %v11763_v45  ;;  %v11859_v61 = vcombine.high %v1472_v36, %v1476_v51  ;;  %v1416_v62 = vld [vmem:[%s13154_s9 + $0x1f08] sm:$0xff]  ;;  %v11858_v6 = vcombine.low %v1472_v36, %v1476_v51 }
 0x301   : > { %8471 = vmatpush1.bf16.msra.mxu1 %v11690_v12  ;;  %9435 = vst [vmem:[#allocation2 + $0x8] sm:$0xff] %v9427_v14  ;;  %v1420_v0 = vld [vmem:[%s13154_s9 + $0x1f28] sm:$0xff] }
 0x302   : > { %8472 = vmatprep.subr.bf16.mxu1 %v11699_v13  ;;  %v1480_v1 = vld [vmem:[%s13154_s9 + $0x2108] sm:$0xff]  ;;  %v11803_v7 = vcombine.high %v1416_v62, %v1420_v0  ;;  %v11802_v49 = vcombine.low %v1416_v62, %v1420_v0 }
 0x303   : > { %8498 = vmatpush1.bf16.msra.mxu0 %v11762_v25  ;;  %v1484_v2 = vld [vmem:[%s13154_s9 + $0x2128] sm:$0xff] }
 0x304   : > { %8499 = vmatprep.subr.bf16.mxu0 %v11771_v54  ;;  %v11867_v12 = vcombine.high %v1480_v1, %v1484_v2  ;;  %v1424_v45 = vld [vmem:[%s13154_s9 + $0x1f48] sm:$0xff]  ;;  %v11866_v15 = vcombine.low %v1480_v1, %v1484_v2 }
 0x305   : > { %8473 = vmatpush1.bf16.msra.mxu1 %v11698_v63  ;;  %v1428_v56 = vld [vmem:[%s13154_s9 + $0x1f68] sm:$0xff] }
 0x306   : > { %8524 = vmatprep.subr.bf16.mxu1 %v11835_v18  ;;  %v1488_v13 = vld [vmem:[%s13154_s9 + $0x2148] sm:$0xff]  ;;  %v11811_v43 = vcombine.high %v1424_v45, %v1428_v56  ;;  %v11810_v18 = vcombine.low %v1424_v45, %v1428_v56 }
 0x307   : > { %8500 = vmatpush1.bf16.msra.mxu0 %v11770_v31  ;;  %v1492_v40 = vld [vmem:[%s13154_s9 + $0x2168] sm:$0xff] }
 0x308   : > { %8475 = vmatmul.mubr.bf16.vlgmr.msra.gmra.mrb[32].mxu1 %v13532_v23  ;;  %8501 = vmatprep.subr.bf16.mxu0 %v11779_v34  ;;  %v11875_v24 = vcombine.high %v1488_v13, %v1492_v40  ;;  %v1432_v14 = vld [vmem:[%s13154_s9 + $0x1f88] sm:$0xff]  ;;  %v11874_v3 = vcombine.low %v1488_v13, %v1492_v40 }
 0x309   : > { %8525 = vmatpush1.bf16.msra.mxu1 %v11834_v33  ;;  %8556 = vmatprep.mubr.bf16.mxu1 %v13550_v11  ;;  %v1436_v25 = vld [vmem:[%s13154_s9 + $0x1fa8] sm:$0xff] }
 0x30a   : > { %8526 = vmatprep.subr.bf16.mxu1 %v11843_v22  ;;  %v1496_v63 = vld [vmem:[%s13154_s9 + $0x2188] sm:$0xff]  ;;  %v11819_v27 = vcombine.high %v1432_v14, %v1436_v25  ;;  %v11818_v26 = vcombine.low %v1432_v14, %v1436_v25 }
 0x30b   : > { %8502 = vmatpush1.bf16.msra.mxu0 %v11778_v42  ;;  %v1500_v54 = vld [vmem:[%s13154_s9 + $0x21a8] sm:$0xff] }
 0x30c   : > { %8503 = vmatprep.subr.bf16.mxu0 %v11787_v20  ;;  %v11883_v55 = vcombine.high %v1496_v63, %v1500_v54  ;;  %v1440_v29 = vld [vmem:[%s13154_s9 + $0x1fc8] sm:$0xff]  ;;  %v11882_v39 = vcombine.low %v1496_v63, %v1500_v54 }
 0x30d   : > { %8527 = vmatpush1.bf16.msra.mxu1 %v11842_v44  ;;  %v1444_v31 = vld [vmem:[%s13154_s9 + $0x1fe8] sm:$0xff] }
 0x30e   : > { %8528 = vmatprep.subr.bf16.mxu1 %v11851_v46  ;;  %v1504_v34 = vld [vmem:[%s13154_s9 + $0x21c8] sm:$0xff]  ;;  %v11827_v42 = vcombine.high %v1440_v29, %v1444_v31  ;;  %v11826_v51 = vcombine.low %v1440_v29, %v1444_v31 }
 0x30f   : > { %8504 = vmatpush1.bf16.msra.mxu0 %v11786_v53  ;;  %v1508_v22 = vld [vmem:[%s13154_s9 + $0x21e8] sm:$0xff] }
 0x310   : > { %8505 = vmatprep.subr.bf16.mxu0 %v11795_v58  ;;  %v11891_v20 = vcombine.high %v1504_v34, %v1508_v22  ;;  %v1576_v46 = vld [vmem:[%s13154_s9 + $0x2408] sm:$0xff]  ;;  %v11890_v53 = vcombine.low %v1504_v34, %v1508_v22 }
 0x311   : > { %8529 = vmatpush1.bf16.msra.mxu1 %v11850_v57  ;;  %v1580_v32 = vld [vmem:[%s13154_s9 + $0x2428] sm:$0xff] }
 0x312   : > { %8530 = vmatprep.subr.bf16.mxu1 %v11859_v61  ;;  %v1512_v47 = vld [vmem:[%s13154_s9 + $0x2208] sm:$0xff]  ;;  %v11963_v57 = vcombine.high %v1576_v46, %v1580_v32  ;;  %v11962_v2 = vcombine.low %v1576_v46, %v1580_v32 }
 0x313   : > { %8506 = vmatpush1.bf16.msra.mxu0 %v11794_v4  ;;  %v1516_v36 = vld [vmem:[%s13154_s9 + $0x2228] sm:$0xff] }
 0x314   : > { %8507 = vmatprep.subr.bf16.mxu0 %v11803_v7  ;;  %v11899_v58 = vcombine.high %v1512_v47, %v1516_v36  ;;  %v1584_v61 = vld [vmem:[%s13154_s9 + $0x2448] sm:$0xff]  ;;  %v11898_v4 = vcombine.low %v1512_v47, %v1516_v36 }
 0x315   : > { %8531 = vmatpush1.bf16.msra.mxu1 %v11858_v6  ;;  %v1588_v62 = vld [vmem:[%s13154_s9 + $0x2468] sm:$0xff] }
 0x316   : > { %8532 = vmatprep.subr.bf16.mxu1 %v11867_v12  ;;  %v1520_v0 = vld [vmem:[%s13154_s9 + $0x2248] sm:$0xff]  ;;  %v11971_v6 = vcombine.high %v1584_v61, %v1588_v62  ;;  %v11970_v40 = vcombine.low %v1584_v61, %v1588_v62 }
 0x317   : > { %8508 = vmatpush1.bf16.msra.mxu0 %v11802_v49  ;;  %v1524_v1 = vld [vmem:[%s13154_s9 + $0x2268] sm:$0xff] }
 0x318   : > { %8509 = vmatprep.subr.bf16.mxu0 %v11811_v43  ;;  %v11907_v7 = vcombine.high %v1520_v0, %v1524_v1  ;;  %v1592_v12 = vld [vmem:[%s13154_s9 + $0x2488] sm:$0xff]  ;;  %v11906_v49 = vcombine.low %v1520_v0, %v1524_v1 }
 0x319   : > { %8533 = vmatpush1.bf16.msra.mxu1 %v11866_v15  ;;  %v1596_v45 = vld [vmem:[%s13154_s9 + $0x24a8] sm:$0xff] }
 0x31a   : > { %8534 = vmatprep.subr.bf16.mxu1 %v11875_v24  ;;  %v1528_v56 = vld [vmem:[%s13154_s9 + $0x2288] sm:$0xff]  ;;  %v11979_v15 = vcombine.high %v1592_v12, %v1596_v45  ;;  %v11978_v54 = vcombine.low %v1592_v12, %v1596_v45 }
 0x31b   : > { %v13913_v33 = vpop.f32.mrb[20].mxu1  ;;  %8510 = vmatpush1.bf16.msra.mxu0 %v11810_v18  ;;  %v1532_v13 = vld [vmem:[%s13154_s9 + $0x22a8] sm:$0xff] }
 0x31c   : > { %v13917_v35 = vpop.f32.mrb[21].mxu1  ;;  %8511 = vmatprep.subr.bf16.mxu0 %v11819_v27  ;;  %v11915_v43 = vcombine.high %v1528_v56, %v1532_v13  ;;  %v1600_v24 = vld [vmem:[%s13154_s9 + $0x24c8] sm:$0xff]  ;;  %v11914_v18 = vcombine.low %v1528_v56, %v1532_v13 }
 0x31d   : > { %v8234_v38 = vpop.f32.mrb[22].mxu1  ;;  %8535 = vmatpush1.bf16.msra.mxu1 %v11874_v3  ;;  %v1604_v14 = vld [vmem:[%s13154_s9 + $0x24e8] sm:$0xff] }
 0x31e   : > { %v8235_v44 = vpop.f32.mrb[23].mxu1  ;;  %8536 = vmatprep.subr.bf16.mxu1 %v11883_v55  ;;  %v1536_v25 = vld [vmem:[%s13154_s9 + $0x22c8] sm:$0xff]  ;;  %v11987_v3 = vcombine.high %v1600_v24, %v1604_v14  ;;  %v11986_v22 = vcombine.low %v1600_v24, %v1604_v14 }
 0x31f   : > { %8512 = vmatpush1.bf16.msra.mxu0 %v11818_v26  ;;  %v1540_v63 = vld [vmem:[%s13154_s9 + $0x22e8] sm:$0xff] }
 0x320   : > { %8513 = vmatprep.subr.bf16.mxu0 %v11827_v42  ;;  %v11923_v27 = vcombine.high %v1536_v25, %v1540_v63  ;;  %v1608_v55 = vld [vmem:[%s13154_s9 + $0x2508] sm:$0xff]  ;;  %v11922_v26 = vcombine.low %v1536_v25, %v1540_v63  ;;  %v425_v25 = vld [vmem:[%s13154_s9 + $0x10] sm:$0xff] }
 0x321   : > { %8537 = vmatpush1.bf16.msra.mxu1 %v11882_v39  ;;  %v1612_v29 = vld [vmem:[%s13154_s9 + $0x2528] sm:$0xff]  ;;  %v429_v63 = vld [vmem:[%s13154_s9 + $0x30] sm:$0xff] }
 0x322   : > { %8538 = vmatprep.subr.bf16.mxu1 %v11891_v20  ;;  %v1544_v31 = vld [vmem:[%s13154_s9 + $0x2308] sm:$0xff]  ;;  %v11995_v38 = vcombine.high %v1608_v55, %v1612_v29  ;;  %v11994_v32 = vcombine.low %v1608_v55, %v1612_v29  ;;  %v433_v29 = vld [vmem:[%s13154_s9 + $0x50] sm:$0xff] }
 0x323   : > { %8514 = vmatpush1.bf16.msra.mxu0 %v11826_v51  ;;  %v1548_v34 = vld [vmem:[%s13154_s9 + $0x2328] sm:$0xff] }
 0x324   : > { %8565 = vmatprep.subr.bf16.mxu0 %v11963_v57  ;;  %v11931_v39 = vcombine.high %v1544_v31, %v1548_v34  ;;  %v1616_v42 = vld [vmem:[%s13154_s9 + $0x2548] sm:$0xff]  ;;  %v11930_v47 = vcombine.low %v1544_v31, %v1548_v34  ;;  %v437_v31 = vld [vmem:[%s13154_s9 + $0x70] sm:$0xff] }
 0x325   : > { %8539 = vmatpush1.bf16.msra.mxu1 %v11890_v53  ;;  %v1620_v44 = vld [vmem:[%s13154_s9 + $0x2568] sm:$0xff]  ;;  %v561_v34 = vld [vmem:[%s13154_s9 + $0x450] sm:$0xff] }
 0x326   : > { %8540 = vmatprep.subr.bf16.mxu1 %v11899_v58  ;;  %8516 = vmatmul.mubr.bf16.vlgmr.msra.gmra.mrb[32].mxu0 %v13538_v52  ;;  %v1552_v20 = vld [vmem:[%s13154_s9 + $0x2348] sm:$0xff]  ;;  %v12003_v36 = vcombine.high %v1616_v42, %v1620_v44  ;;  %v12002_v62 = vcombine.low %v1616_v42, %v1620_v44  ;;  %v441_v44 = vld [vmem:[%s13154_s9 + $0x90] sm:$0xff] }
 0x327   : > { %8566 = vmatpush1.bf16.msra.mxu0 %v11962_v2  ;;  %8597 = vmatprep.mubr.bf16.mxu0 %v12852_v10  ;;  %v1556_v46 = vld [vmem:[%s13154_s9 + $0x2368] sm:$0xff] }
 0x328   : > { %8567 = vmatprep.subr.bf16.mxu0 %v11971_v6  ;;  %v11939_v51 = vcombine.high %v1552_v20, %v1556_v46  ;;  %v1624_v53 = vld [vmem:[%s13154_s9 + $0x2588] sm:$0xff]  ;;  %v11938_v0 = vcombine.low %v1552_v20, %v1556_v46  ;;  %v445_v20 = vld [vmem:[%s13154_s9 + $0xb0] sm:$0xff] }
 0x329   : > { %8541 = vmatpush1.bf16.msra.mxu1 %v11898_v4  ;;  %v1628_v57 = vld [vmem:[%s13154_s9 + $0x25a8] sm:$0xff]  ;;  %v12345_v46 = vld [vmem:[%s13147_s24 + $0x48] ss:$0 sps:$4 sm:$0xff]  }
 0x32a   : > { %8542 = vmatprep.subr.bf16.mxu1 %v11907_v7  ;;  %v1560_v58 = vld [vmem:[%s13154_s9 + $0x2388] sm:$0xff]  ;;  %v12011_v1 = vcombine.high %v1624_v53, %v1628_v57 }
 0x32b   : > { %8568 = vmatpush1.bf16.msra.mxu0 %v11970_v40  ;;  %v1564_v61 = vld [vmem:[%s13154_s9 + $0x23a8] sm:$0xff] }
 0x32c   : > { %8569 = vmatprep.subr.bf16.mxu0 %v11979_v15  ;;  %v11947_v4 = vcombine.high %v1560_v58, %v1564_v61  ;;  %v1632_v6 = vld [vmem:[%s13154_s9 + $0x25c8] sm:$0xff]  ;;  %v12010_v15 = vcombine.low %v1624_v53, %v1628_v57  ;;  %v11946_v24 = vcombine.low %v1560_v58, %v1564_v61  ;;  %v10829_v53 = vcombine.high %v441_v44, %v445_v20  ;;  %v449_v58 = vld [vmem:[%s13154_s9 + $0xd0] sm:$0xff] }
 0x32d   : > { %8543 = vmatpush1.bf16.msra.mxu1 %v11906_v49  ;;  %v1636_v7 = vld [vmem:[%s13154_s9 + $0x25e8] sm:$0xff]  ;;  %v453_v61 = vld [vmem:[%s13154_s9 + $0xf0] sm:$0xff] }
 0x32e   : > { %8544 = vmatprep.subr.bf16.mxu1 %v11915_v43  ;;  %v1568_v56 = vld [vmem:[%s13154_s9 + $0x23c8] sm:$0xff]  ;;  %v12019_v14 = vcombine.high %v1632_v6, %v1636_v7 }
 0x32f   : > { %8570 = vmatpush1.bf16.msra.mxu0 %v11978_v54  ;;  %v1572_v13 = vld [vmem:[%s13154_s9 + $0x23e8] sm:$0xff]  ;;  %v553_v54 = vld [vmem:[%s13154_s9 + $0x410] sm:$0xff] }
 0x330   : > { %8571 = vmatprep.subr.bf16.mxu0 %v11987_v3  ;;  %v11954_v3 = vcombine.low %v1568_v56, %v1572_v13 }
 0x331   : > { %8545 = vmatpush1.bf16.msra.mxu1 %v11914_v18  ;;  %v557_v18 = vld [vmem:[%s13154_s9 + $0x430] sm:$0xff] }
 0x332   : > { %8546 = vmatprep.subr.bf16.mxu1 %v11923_v27  ;;  %v10813_v27 = vcombine.high %v425_v25, %v429_v63  ;;  %v10941_v55 = vcombine.high %v553_v54, %v557_v18 }
 0x333   : > { %8572 = vmatpush1.bf16.msra.mxu0 %v11986_v22  ;;  %v565_v22 = vld [vmem:[%s13154_s9 + $0x470] sm:$0xff] }
 0x334   : > { %8573 = vmatprep.subr.bf16.mxu0 %v11995_v38  ;;  %v10940_v38 = vcombine.low %v553_v54, %v557_v18  ;;  %v10949_v42 = vcombine.high %v561_v34, %v565_v22 }
 0x335   : > { %8547 = vmatpush1.bf16.msra.mxu1 %v11922_v26  ;;  %v10812_v26 = vcombine.low %v425_v25, %v429_v63  ;;  %v593_v25 = vld [vmem:[%s13154_s9 + $0x550] sm:$0xff] }
 0x336   : > { %8548 = vmatprep.subr.bf16.mxu1 %v11931_v39  ;;  %v10821_v39 = vcombine.high %v433_v29, %v437_v31  ;;  %v597_v63 = vld [vmem:[%s13154_s9 + $0x570] sm:$0xff] }
 0x337   : > { %8574 = vmatpush1.bf16.msra.mxu0 %v11994_v32  ;;  %v569_v32 = vld [vmem:[%s13154_s9 + $0x490] sm:$0xff] }
 0x338   : > { %8575 = vmatprep.subr.bf16.mxu0 %v12003_v36  ;;  %v10820_v36 = vcombine.low %v433_v29, %v437_v31  ;;  %v601_v29 = vld [vmem:[%s13154_s9 + $0x590] sm:$0xff] }
 0x339   : > { %8549 = vmatpush1.bf16.msra.mxu1 %v11930_v47  ;;  %v8271_v2 = vpop.f32.mrb[20].mxu0  ;;  %v573_v47 = vld [vmem:[%s13154_s9 + $0x4b0] sm:$0xff] }
 0x33a   : > { %8550 = vmatprep.subr.bf16.mxu1 %v11939_v51  ;;  %v13952_v12 = vadd.f32 %v8271_v2, %v13913_v33  ;;  %v8273_v45 = vpop.f32.mrb[21].mxu0  ;;  %v11955_v33 = vcombine.high %v1568_v56, %v1572_v13  ;;  %v10948_v51 = vcombine.low %v561_v34, %v565_v22  ;;  %v10957_v57 = vcombine.high %v569_v32, %v573_v47  ;;  %v585_v56 = vld [vmem:[%s13154_s9 + $0x510] sm:$0xff] }
 0x33b   : > { %v13957_v40 = vadd.f32 %v8273_v45, %v13917_v35  ;;  %v8275_v49 = vpop.f32.mrb[22].mxu0  ;;  %8576 = vmatpush1.bf16.msra.mxu0 %v12002_v62  ;;  %v12018_v35 = vcombine.low %v1632_v6, %v1636_v7  ;;  %v577_v62 = vld [vmem:[%s13154_s9 + $0x4d0] sm:$0xff]  ;;  %v10956_v2 = vcombine.low %v569_v32, %v573_v47  ;;  %v10980_v22 = vcombine.low %v593_v25, %v597_v63 }
 0x33c   : > { %v8276_v43 = vpop.f32.mrb[23].mxu0  ;;  %8577 = vmatprep.subr.bf16.mxu0 %v12011_v1  ;;  %v10828_v1 = vcombine.low %v441_v44, %v445_v20  ;;  %v457_v7 = vld [vmem:[%s13154_s9 + $0x110] sm:$0xff]  ;;  %v10836_v49 = vcombine.low %v449_v58, %v453_v61 }
 0x33d   : > { %8551 = vmatpush1.bf16.msra.mxu1 %v11938_v0  ;;  %v581_v0 = vld [vmem:[%s13154_s9 + $0x4f0] sm:$0xff] }
 0x33e   : > { %8552 = vmatprep.subr.bf16.mxu1 %v11947_v4  ;;  %v10837_v4 = vcombine.high %v449_v58, %v453_v61  ;;  %v10965_v6 = vcombine.high %v577_v62, %v581_v0  ;;  %v461_v45 = vld [vmem:[%s13154_s9 + $0x130] sm:$0xff] }
 0x33f   : > { %8578 = vmatpush1.bf16.msra.mxu0 %v12010_v15  ;;  %v589_v13 = vld [vmem:[%s13154_s9 + $0x530] sm:$0xff]  ;;  %v10964_v15 = vcombine.low %v577_v62, %v581_v0  ;;  %v10845_v43 = vcombine.high %v457_v7, %v461_v45  ;;  %v10844_v54 = vcombine.low %v457_v7, %v461_v45 }
 0x340   : > { %8579 = vmatprep.subr.bf16.mxu0 %v12019_v14  ;;  %v465_v14 = vld [vmem:[%s13154_s9 + $0x150] sm:$0xff]  ;;  %v10972_v18 = vcombine.low %v585_v56, %v589_v13 }
 0x341   : > { %8553 = vmatpush1.bf16.msra.mxu1 %v11946_v24  ;;  %v10973_v24 = vcombine.high %v585_v56, %v589_v13  ;;  %v605_v31 = vld [vmem:[%s13154_s9 + $0x5b0] sm:$0xff] }
 0x342   : > { %8554 = vmatprep.subr.bf16.mxu1 %v11955_v33  ;;  %v469_v33 = vld [vmem:[%s13154_s9 + $0x170] sm:$0xff] }
 0x343   : > { %8580 = vmatpush1.bf16.msra.mxu0 %v12018_v35  ;;  %v10853_v35 = vcombine.high %v465_v14, %v469_v33  ;;  %v10852_v34 = vcombine.low %v465_v14, %v469_v33  ;;  %v609_v20 = vld [vmem:[%s13154_s9 + $0x5d0] sm:$0xff] }
 0x344   : > { %8606 = vmatprep.subr.bf16.mxu0 %v10813_v27  ;;  %v473_v27 = vld [vmem:[%s13154_s9 + $0x190] sm:$0xff] }
 0x345   : > { %8555 = vmatpush1.bf16.msra.mxu1 %v11954_v3  ;;  %v10981_v3 = vcombine.high %v593_v25, %v597_v63  ;;  %v493_v0 = vld [vmem:[%s13154_s9 + $0x230] sm:$0xff] }
 0x346   : > { %8647 = vmatprep.subr.bf16.mxu1 %v10941_v55  ;;  %8598 = vmatmul.mubr.bf16.vlgmr.msra.gmra.mrb[36].mxu0 %v12345_v46  ;;  %v477_v55 = vld [vmem:[%s13154_s9 + $0x1b0] sm:$0xff] }
 0x347   : > { %8607 = vmatpush1.bf16.msra.mxu0 %v10812_v26  ;;  %8638 = vmatprep.mubr.bf16.mxu0 %v13212_v59  ;;  %v10861_v26 = vcombine.high %v473_v27, %v477_v55  ;;  %v613_v46 = vld [vmem:[%s13154_s9 + $0x5f0] sm:$0xff] }
 0x348   : > { %8557 = vmatmul.mubr.bf16.vlgmr.msra.gmra.mrb[36].mxu1 %v13621_v8  ;;  %8608 = vmatprep.subr.bf16.mxu0 %v10821_v39  ;;  %v481_v39 = vld [vmem:[%s13154_s9 + $0x1d0] sm:$0xff]  ;;  %v10997_v62 = vcombine.high %v609_v20, %v613_v46 }
 0x349   : > { %8648 = vmatpush1.bf16.msra.mxu1 %v10940_v38  ;;  %8679 = vmatprep.mubr.bf16.mxu1 %v13216_v60  ;;  %v10989_v38 = vcombine.high %v601_v29, %v605_v31  ;;  %v497_v45 = vld [vmem:[%s13154_s9 + $0x250] sm:$0xff] }
 0x34a   : > { %8649 = vmatprep.subr.bf16.mxu1 %v10949_v42  ;;  %v485_v42 = vld [vmem:[%s13154_s9 + $0x1f0] sm:$0xff] }
 0x34b   : > { %8609 = vmatpush1.bf16.msra.mxu0 %v10820_v36  ;;  %v10860_v36 = vcombine.low %v473_v27, %v477_v55  ;;  %v10869_v58 = vcombine.high %v481_v39, %v485_v42  ;;  %v501_v56 = vld [vmem:[%s13154_s9 + $0x270] sm:$0xff] }
 0x34c   : > { %8610 = vmatprep.subr.bf16.mxu0 %v10829_v53  ;;  %v625_v13 = vld [vmem:[%s13154_s9 + $0x650] sm:$0xff] }
 0x34d   : > { %8650 = vmatpush1.bf16.msra.mxu1 %v10948_v51  ;;  %v505_v33 = vld [vmem:[%s13154_s9 + $0x290] sm:$0xff] }
 0x34e   : > { %8651 = vmatprep.subr.bf16.mxu1 %v10957_v57  ;;  %v10988_v57 = vcombine.low %v601_v29, %v605_v31  ;;  %v509_v25 = vld [vmem:[%s13154_s9 + $0x2b0] sm:$0xff] }
 0x34f   : > { %8611 = vmatpush1.bf16.msra.mxu0 %v10828_v1  ;;  %v617_v1 = vld [vmem:[%s13154_s9 + $0x610] sm:$0xff] }
 0x350   : > { %8612 = vmatprep.subr.bf16.mxu0 %v10837_v4  ;;  %v10868_v4 = vcombine.low %v481_v39, %v485_v42  ;;  %v633_v63 = vld [vmem:[%s13154_s9 + $0x690] sm:$0xff] }
 0x351   : > { %8652 = vmatpush1.bf16.msra.mxu1 %v10956_v2  ;;  %v621_v2 = vld [vmem:[%s13154_s9 + $0x630] sm:$0xff] }
 0x352   : > { %8653 = vmatprep.subr.bf16.mxu1 %v10965_v6  ;;  %v11005_v7 = vcombine.high %v617_v1, %v621_v2  ;;  %v513_v55 = vld [vmem:[%s13154_s9 + $0x2d0] sm:$0xff] }
 0x353   : > { %8613 = vmatpush1.bf16.msra.mxu0 %v10836_v49  ;;  %v629_v49 = vld [vmem:[%s13154_s9 + $0x670] sm:$0xff] }
 0x354   : > { %8614 = vmatprep.subr.bf16.mxu0 %v10845_v43  ;;  %v11004_v43 = vcombine.low %v617_v1, %v621_v2  ;;  %v11013_v14 = vcombine.high %v625_v13, %v629_v49  ;;  %v517_v29 = vld [vmem:[%s13154_s9 + $0x2f0] sm:$0xff] }
 0x355   : > { %8654 = vmatpush1.bf16.msra.mxu1 %v10964_v15  ;;  %v641_v31 = vld [vmem:[%s13154_s9 + $0x6d0] sm:$0xff] }
 0x356   : > { %8655 = vmatprep.subr.bf16.mxu1 %v10973_v24  ;;  %v10885_v24 = vcombine.high %v497_v45, %v501_v56  ;;  %v521_v42 = vld [vmem:[%s13154_s9 + $0x310] sm:$0xff] }
 0x357   : > { %8615 = vmatpush1.bf16.msra.mxu0 %v10844_v54  ;;  %v637_v54 = vld [vmem:[%s13154_s9 + $0x6b0] sm:$0xff] }
 0x358   : > { %8616 = vmatprep.subr.bf16.mxu0 %v10853_v35  ;;  %v11012_v35 = vcombine.low %v625_v13, %v629_v49  ;;  %v11021_v27 = vcombine.high %v633_v63, %v637_v54 }
 0x359   : > { %8656 = vmatpush1.bf16.msra.mxu1 %v10972_v18  ;;  %v10884_v18 = vcombine.low %v497_v45, %v501_v56  ;;  %v669_v45 = vld [vmem:[%s13154_s9 + $0x7b0] sm:$0xff] }
 0x35a   : > { %8657 = vmatprep.subr.bf16.mxu1 %v10981_v3  ;;  %v10893_v3 = vcombine.high %v505_v33, %v509_v25 }
 0x35b   : > { %v8312_v44 = vpop.f32.mrb[24].mxu1  ;;  %8617 = vmatpush1.bf16.msra.mxu0 %v10852_v34  ;;  %v645_v34 = vld [vmem:[%s13154_s9 + $0x6f0] sm:$0xff] }
 0x35c   : > { %v13996_v32 = vadd.f32 %v8312_v44, %v13952_v12  ;;  %v8314_v47 = vpop.f32.mrb[25].mxu1  ;;  %8618 = vmatprep.subr.bf16.mxu0 %v10861_v26  ;;  %v489_v12 = vld [vmem:[%s13154_s9 + $0x210] sm:$0xff]  ;;  %v11020_v26 = vcombine.low %v633_v63, %v637_v54  ;;  %v11029_v39 = vcombine.high %v641_v31, %v645_v34 }
 0x35d   : > { %v13999_v51 = vadd.f32 %v8314_v47, %v13957_v40  ;;  %v8316_v53 = vpop.f32.mrb[26].mxu1  ;;  %8658 = vmatpush1.bf16.msra.mxu1 %v10980_v22  ;;  %v10996_v40 = vcombine.low %v609_v20, %v613_v46  ;;  %v10877_v6 = vcombine.high %v489_v12, %v493_v0  ;;  %v10876_v15 = vcombine.low %v489_v12, %v493_v0  ;;  %v525_v44 = vld [vmem:[%s13154_s9 + $0x330] sm:$0xff] }
 0x35e   : > { %v8317_v61 = vpop.f32.mrb[27].mxu1  ;;  %8659 = vmatprep.subr.bf16.mxu1 %v10989_v38  ;;  %v10892_v22 = vcombine.low %v505_v33, %v509_v25  ;;  %v10901_v38 = vcombine.high %v513_v55, %v517_v29  ;;  %v649_v20 = vld [vmem:[%s13154_s9 + $0x710] sm:$0xff]  ;;  %v10900_v47 = vcombine.low %v513_v55, %v517_v29  ;;  %v10909_v53 = vcombine.high %v521_v42, %v525_v44 }
 0x35f   : > { %8619 = vmatpush1.bf16.msra.mxu0 %v10860_v36  ;;  %v653_v46 = vld [vmem:[%s13154_s9 + $0x730] sm:$0xff]  ;;  %v11028_v36 = vcombine.low %v641_v31, %v645_v34  ;;  %v10908_v0 = vcombine.low %v521_v42, %v525_v44 }
 0x360   : > { %8620 = vmatprep.subr.bf16.mxu0 %v10869_v58  ;;  %v529_v58 = vld [vmem:[%s13154_s9 + $0x350] sm:$0xff]  ;;  %v11036_v1 = vcombine.low %v649_v20, %v653_v46 }
 0x361   : > { %8660 = vmatpush1.bf16.msra.mxu1 %v10988_v57  ;;  %v11037_v57 = vcombine.high %v649_v20, %v653_v46  ;;  %v533_v61 = vld [vmem:[%s13154_s9 + $0x370] sm:$0xff] }
 0x362   : > { %8661 = vmatprep.subr.bf16.mxu1 %v10997_v62  ;;  %v657_v62 = vld [vmem:[%s13154_s9 + $0x750] sm:$0xff]  ;;  %v10917_v2 = vcombine.high %v529_v58, %v533_v61  ;;  %v10916_v56 = vcombine.low %v529_v58, %v533_v61 }
 0x363   : > { %8621 = vmatpush1.bf16.msra.mxu0 %v10868_v4  ;;  %v661_v12 = vld [vmem:[%s13154_s9 + $0x770] sm:$0xff] }
 0x364   : > { %8622 = vmatprep.subr.bf16.mxu0 %v10877_v6  ;;  %v11045_v4 = vcombine.high %v657_v62, %v661_v12  ;;  %v541_v6 = vld [vmem:[%s13154_s9 + $0x3b0] sm:$0xff]  ;;  %v11044_v13 = vcombine.low %v657_v62, %v661_v12 }
 0x365   : > { %8662 = vmatpush1.bf16.msra.mxu1 %v10996_v40  ;;  %v537_v40 = vld [vmem:[%s13154_s9 + $0x390] sm:$0xff] }
 0x366   : > { %8663 = vmatprep.subr.bf16.mxu1 %v11005_v7  ;;  %v665_v7 = vld [vmem:[%s13154_s9 + $0x790] sm:$0xff]  ;;  %v10925_v49 = vcombine.high %v537_v40, %v541_v6 }
 0x367   : > { %8623 = vmatpush1.bf16.msra.mxu0 %v10876_v15  ;;  %v673_v63 = vld [vmem:[%s13154_s9 + $0x7d0] sm:$0xff]  ;;  %v11052_v55 = vcombine.low %v665_v7, %v669_v45 }
 0x368   : > { %8624 = vmatprep.subr.bf16.mxu0 %v10885_v24  ;;  %v545_v24 = vld [vmem:[%s13154_s9 + $0x3d0] sm:$0xff] }
 0x369   : > { %8664 = vmatpush1.bf16.msra.mxu1 %v11004_v43  ;;  %v11053_v43 = vcombine.high %v665_v7, %v669_v45  ;;  %v677_v54 = vld [vmem:[%s13154_s9 + $0x7f0] sm:$0xff] }
 0x36a   : > { %8665 = vmatprep.subr.bf16.mxu1 %v11013_v14  ;;  %v549_v14 = vld [vmem:[%s13154_s9 + $0x3f0] sm:$0xff] }
 0x36b   : > { %8625 = vmatpush1.bf16.msra.mxu0 %v10884_v18  ;;  %v10933_v29 = vcombine.high %v545_v24, %v549_v14  ;;  %v681_v31 = vld [vmem:[%s13154_s9 + $0x810] sm:$0xff] }
 0x36c   : > { %8626 = vmatprep.subr.bf16.mxu0 %v10893_v3  ;;  %v10924_v3 = vcombine.low %v537_v40, %v541_v6  ;;  %v685_v34 = vld [vmem:[%s13154_s9 + $0x830] sm:$0xff] }
 0x36d   : > { %8666 = vmatpush1.bf16.msra.mxu1 %v11012_v35  ;;  %v689_v44 = vld [vmem:[%s13154_s9 + $0x850] sm:$0xff] }
 0x36e   : > { %8667 = vmatprep.subr.bf16.mxu1 %v11021_v27  ;;  %v693_v20 = vld [vmem:[%s13154_s9 + $0x870] sm:$0xff] }
 0x36f   : > { %8627 = vmatpush1.bf16.msra.mxu0 %v10892_v22  ;;  %v809_v22 = vld [vmem:[%s13154_s9 + $0xc10] sm:$0xff] }
 0x370   : > { %8628 = vmatprep.subr.bf16.mxu0 %v10901_v38  ;;  %v11060_v38 = vcombine.low %v673_v63, %v677_v54  ;;  %v817_v46 = vld [vmem:[%s13154_s9 + $0xc50] sm:$0xff] }
 0x371   : > { %8668 = vmatpush1.bf16.msra.mxu1 %v11020_v26  ;;  %v813_v26 = vld [vmem:[%s13154_s9 + $0xc30] sm:$0xff] }
 0x372   : > { %8669 = vmatprep.subr.bf16.mxu1 %v11029_v39  ;;  %v11069_v39 = vcombine.high %v681_v31, %v685_v34  ;;  %v11197_v42 = vcombine.high %v809_v22, %v813_v26  ;;  %v697_v61 = vld [vmem:[%s13154_s9 + $0x890] sm:$0xff] }
 0x373   : > { %8629 = vmatpush1.bf16.msra.mxu0 %v10900_v47  ;;  %v821_v47 = vld [vmem:[%s13154_s9 + $0xc70] sm:$0xff] }
 0x374   : > { %8630 = vmatprep.subr.bf16.mxu0 %v10909_v53  ;;  %v11196_v53 = vcombine.low %v809_v22, %v813_v26  ;;  %v11205_v58 = vcombine.high %v817_v46, %v821_v47  ;;  %v701_v62 = vld [vmem:[%s13154_s9 + $0x8b0] sm:$0xff] }
 0x375   : > { %8670 = vmatpush1.bf16.msra.mxu1 %v11028_v36  ;;  %v11068_v36 = vcombine.low %v681_v31, %v685_v34  ;;  %v825_v12 = vld [vmem:[%s13154_s9 + $0xc90] sm:$0xff] }
 0x376   : > { %8671 = vmatprep.subr.bf16.mxu1 %v11037_v57  ;;  %v11077_v57 = vcombine.high %v689_v44, %v693_v20  ;;  %v705_v6 = vld [vmem:[%s13154_s9 + $0x8d0] sm:$0xff] }
 0x377   : > { %8631 = vmatpush1.bf16.msra.mxu0 %v10908_v0  ;;  %v829_v0 = vld [vmem:[%s13154_s9 + $0xcb0] sm:$0xff] }
 0x378   : > { %8632 = vmatprep.subr.bf16.mxu0 %v10917_v2  ;;  %v11204_v2 = vcombine.low %v817_v46, %v821_v47  ;;  %v11213_v40 = vcombine.high %v825_v12, %v829_v0  ;;  %v709_v7 = vld [vmem:[%s13154_s9 + $0x8f0] sm:$0xff] }
 0x379   : > { %8672 = vmatpush1.bf16.msra.mxu1 %v11036_v1  ;;  %v8353_v15 = vpop.f32.mrb[24].mxu0  ;;  %v11076_v1 = vcombine.low %v689_v44, %v693_v20  ;;  %v833_v45 = vld [vmem:[%s13154_s9 + $0xcd0] sm:$0xff] }
 0x37a   : > { %8673 = vmatprep.subr.bf16.mxu1 %v11045_v4  ;;  %v14032_v33 = vadd.f32 %v8353_v15, %v13996_v32  ;;  %v8355_v25 = vpop.f32.mrb[25].mxu0  ;;  %v11061_v32 = vcombine.high %v673_v63, %v677_v54  ;;  %v11085_v4 = vcombine.high %v697_v61, %v701_v62  ;;  %v11093_v15 = vcombine.high %v705_v6, %v709_v7  ;;  %v845_v63 = vld [vmem:[%s13154_s9 + $0xd30] sm:$0xff] }
 0x37b   : > { %v14037_v18 = vadd.f32 %v8355_v25, %v13999_v51  ;;  %v8357_v35 = vpop.f32.mrb[26].mxu0  ;;  %8633 = vmatpush1.bf16.msra.mxu0 %v10916_v56  ;;  %v10932_v51 = vcombine.low %v545_v24, %v549_v14  ;;  %v837_v56 = vld [vmem:[%s13154_s9 + $0xcf0] sm:$0xff]  ;;  %v11092_v54 = vcombine.low %v705_v6, %v709_v7 }
 0x37c   : > { %v8358_v27 = vpop.f32.mrb[27].mxu0  ;;  %8634 = vmatprep.subr.bf16.mxu0 %v10925_v49  ;;  %v11212_v49 = vcombine.low %v825_v12, %v829_v0  ;;  %v713_v24 = vld [vmem:[%s13154_s9 + $0x910] sm:$0xff]  ;;  %v11220_v35 = vcombine.low %v833_v45, %v837_v56 }
 0x37d   : > { %8674 = vmatpush1.bf16.msra.mxu1 %v11044_v13  ;;  %v11084_v13 = vcombine.low %v697_v61, %v701_v62  ;;  %v717_v14 = vld [vmem:[%s13154_s9 + $0x930] sm:$0xff] }
 0x37e   : > { %8675 = vmatprep.subr.bf16.mxu1 %v11053_v43  ;;  %v11221_v43 = vcombine.high %v833_v45, %v837_v56  ;;  %v841_v25 = vld [vmem:[%s13154_s9 + $0xd10] sm:$0xff]  ;;  %v11100_v34 = vcombine.low %v713_v24, %v717_v14 }
 0x37f   : > { %8635 = vmatpush1.bf16.msra.mxu0 %v10924_v3  ;;  %v11101_v3 = vcombine.high %v713_v24, %v717_v14  ;;  %v11229_v27 = vcombine.high %v841_v25, %v845_v63  ;;  %v853_v31 = vld [vmem:[%s13154_s9 + $0xd70] sm:$0xff]  ;;  %v11228_v22 = vcombine.low %v841_v25, %v845_v63 }
 0x380   : > { %8636 = vmatprep.subr.bf16.mxu0 %v10933_v29  ;;  %v725_v29 = vld [vmem:[%s13154_s9 + $0x970] sm:$0xff] }
 0x381   : > { %8676 = vmatpush1.bf16.msra.mxu1 %v11052_v55  ;;  %v721_v55 = vld [vmem:[%s13154_s9 + $0x950] sm:$0xff] }
 0x382   : > { %8677 = vmatprep.subr.bf16.mxu1 %v11061_v32  ;;  %v849_v32 = vld [vmem:[%s13154_s9 + $0xd50] sm:$0xff]  ;;  %v11109_v26 = vcombine.high %v721_v55, %v725_v29  ;;  %v11108_v20 = vcombine.low %v721_v55, %v725_v29 }
 0x383   : > { %8637 = vmatpush1.bf16.msra.mxu0 %v10932_v51  ;;  %v11237_v51 = vcombine.high %v849_v32, %v853_v31  ;;  %v861_v44 = vld [vmem:[%s13154_s9 + $0xdb0] sm:$0xff]  ;;  %v11236_v46 = vcombine.low %v849_v32, %v853_v31 }
 0x384   : > { %8688 = vmatprep.subr.bf16.mxu0 %v11069_v39  ;;  %v733_v39 = vld [vmem:[%s13154_s9 + $0x9b0] sm:$0xff] }
 0x385   : > { %8678 = vmatpush1.bf16.msra.mxu1 %v11060_v38  ;;  %v729_v38 = vld [vmem:[%s13154_s9 + $0x990] sm:$0xff] }
 0x386   : > { %8729 = vmatprep.subr.bf16.mxu1 %v11197_v42  ;;  %8639 = vmatmul.mubr.bf16.vlgmr.msra.gmra.mrb[40].mxu0 %v13262_v17  ;;  %v857_v42 = vld [vmem:[%s13154_s9 + $0xd90] sm:$0xff]  ;;  %v11117_v47 = vcombine.high %v729_v38, %v733_v39 }
 0x387   : > { %8689 = vmatpush1.bf16.msra.mxu0 %v11068_v36  ;;  %8720 = vmatprep.mubr.bf16.mxu0 %v13280_v28  ;;  %v11245_v36 = vcombine.high %v857_v42, %v861_v44  ;;  %v865_v61 = vld [vmem:[%s13154_s9 + $0xdd0] sm:$0xff] }
 0x388   : > { %8680 = vmatmul.mubr.bf16.vlgmr.msra.gmra.mrb[40].mxu1 %v13271_v21  ;;  %8690 = vmatprep.subr.bf16.mxu0 %v11077_v57  ;;  %v741_v57 = vld [vmem:[%s13154_s9 + $0x9f0] sm:$0xff] }
 0x389   : > { %8730 = vmatpush1.bf16.msra.mxu1 %v11196_v53  ;;  %8761 = vmatprep.mubr.bf16.mxu1 %v13287_v30  ;;  %v737_v53 = vld [vmem:[%s13154_s9 + $0x9d0] sm:$0xff] }
 0x38a   : > { %8731 = vmatprep.subr.bf16.mxu1 %v11205_v58  ;;  %v869_v62 = vld [vmem:[%s13154_s9 + $0xdf0] sm:$0xff]  ;;  %v11125_v6 = vcombine.high %v737_v53, %v741_v57 }
 0x38b   : > { %8691 = vmatpush1.bf16.msra.mxu0 %v11076_v1  ;;  %v11116_v1 = vcombine.low %v729_v38, %v733_v39  ;;  %v11253_v45 = vcombine.high %v865_v61, %v869_v62  ;;  %v749_v56 = vld [vmem:[%s13154_s9 + $0xa30] sm:$0xff] }
 0x38c   : > { %8692 = vmatprep.subr.bf16.mxu0 %v11085_v4  ;;  %v753_v14 = vld [vmem:[%s13154_s9 + $0xa50] sm:$0xff] }
 0x38d   : > { %8732 = vmatpush1.bf16.msra.mxu1 %v11204_v2  ;;  %v757_v25 = vld [vmem:[%s13154_s9 + $0xa70] sm:$0xff] }
 0x38e   : > { %8733 = vmatprep.subr.bf16.mxu1 %v11213_v40  ;;  %v11244_v40 = vcombine.low %v857_v42, %v861_v44  ;;  %v881_v63 = vld [vmem:[%s13154_s9 + $0xe50] sm:$0xff] }
 0x38f   : > { %8693 = vmatpush1.bf16.msra.mxu0 %v11084_v13  ;;  %v873_v13 = vld [vmem:[%s13154_s9 + $0xe10] sm:$0xff] }
 0x390   : > { %8694 = vmatprep.subr.bf16.mxu0 %v11093_v15  ;;  %v11124_v15 = vcombine.low %v737_v53, %v741_v57  ;;  %v761_v29 = vld [vmem:[%s13154_s9 + $0xa90] sm:$0xff] }
 0x391   : > { %8734 = vmatpush1.bf16.msra.mxu1 %v11212_v49  ;;  %v877_v49 = vld [vmem:[%s13154_s9 + $0xe30] sm:$0xff] }
 0x392   : > { %8735 = vmatprep.subr.bf16.mxu1 %v11221_v43  ;;  %v11261_v24 = vcombine.high %v873_v13, %v877_v49  ;;  %v765_v32 = vld [vmem:[%s13154_s9 + $0xab0] sm:$0xff] }
 0x393   : > { %8695 = vmatpush1.bf16.msra.mxu0 %v11092_v54  ;;  %v885_v54 = vld [vmem:[%s13154_s9 + $0xe70] sm:$0xff] }
 0x394   : > { %8696 = vmatprep.subr.bf16.mxu0 %v11101_v3  ;;  %v11260_v3 = vcombine.low %v873_v13, %v877_v49  ;;  %v11269_v55 = vcombine.high %v881_v63, %v885_v54  ;;  %v889_v31 = vld [vmem:[%s13154_s9 + $0xe90] sm:$0xff] }
 0x395   : > { %8736 = vmatpush1.bf16.msra.mxu1 %v11220_v35  ;;  %v769_v39 = vld [vmem:[%s13154_s9 + $0xad0] sm:$0xff] }
 0x396   : > { %8737 = vmatprep.subr.bf16.mxu1 %v11229_v27  ;;  %v11141_v27 = vcombine.high %v753_v14, %v757_v25  ;;  %v773_v42 = vld [vmem:[%s13154_s9 + $0xaf0] sm:$0xff] }
 0x397   : > { %8697 = vmatpush1.bf16.msra.mxu0 %v11100_v34  ;;  %v893_v34 = vld [vmem:[%s13154_s9 + $0xeb0] sm:$0xff] }
 0x398   : > { %8698 = vmatprep.subr.bf16.mxu0 %v11109_v26  ;;  %v11268_v26 = vcombine.low %v881_v63, %v885_v54  ;;  %v11277_v38 = vcombine.high %v889_v31, %v893_v34  ;;  %v897_v44 = vld [vmem:[%s13154_s9 + $0xed0] sm:$0xff] }
 0x399   : > { %8738 = vmatpush1.bf16.msra.mxu1 %v11228_v22  ;;  %v11140_v22 = vcombine.low %v753_v14, %v757_v25  ;;  %v777_v57 = vld [vmem:[%s13154_s9 + $0xb10] sm:$0xff] }
 0x39a   : > { %8739 = vmatprep.subr.bf16.mxu1 %v11237_v51  ;;  %v11149_v51 = vcombine.high %v761_v29, %v765_v32  ;;  %v925_v14 = vld [vmem:[%s13154_s9 + $0xfb0] sm:$0xff] }
 0x39b   : > { %v8394_v58 = vpop.f32.mrb[28].mxu1  ;;  %8699 = vmatpush1.bf16.msra.mxu0 %v11108_v20  ;;  %v901_v20 = vld [vmem:[%s13154_s9 + $0xef0] sm:$0xff] }
 0x39c   : > { %v14076_v12 = vadd.f32 %v8394_v58, %v14032_v33  ;;  %v8396_v0 = vpop.f32.mrb[29].mxu1  ;;  %8700 = vmatprep.subr.bf16.mxu0 %v11117_v47  ;;  %v745_v33 = vld [vmem:[%s13154_s9 + $0xa10] sm:$0xff]  ;;  %v11276_v47 = vcombine.low %v889_v31, %v893_v34  ;;  %v11285_v53 = vcombine.high %v897_v44, %v901_v20 }
 0x39d   : > { %v14079_v2 = vadd.f32 %v8396_v0, %v14037_v18  ;;  %v8398_v4 = vpop.f32.mrb[30].mxu1  ;;  %8740 = vmatpush1.bf16.msra.mxu1 %v11236_v46  ;;  %v11252_v18 = vcombine.low %v865_v61, %v869_v62  ;;  %v11133_v43 = vcombine.high %v745_v33, %v749_v56  ;;  %v11132_v35 = vcombine.low %v745_v33, %v749_v56  ;;  %v781_v58 = vld [vmem:[%s13154_s9 + $0xb30] sm:$0xff] }
 0x39e   : > { %v8399_v7 = vpop.f32.mrb[31].mxu1  ;;  %8741 = vmatprep.subr.bf16.mxu1 %v11245_v36  ;;  %v11148_v46 = vcombine.low %v761_v29, %v765_v32  ;;  %v11157_v36 = vcombine.high %v769_v39, %v773_v42  ;;  %v905_v61 = vld [vmem:[%s13154_s9 + $0xf10] sm:$0xff]  ;;  %v11156_v0 = vcombine.low %v769_v39, %v773_v42  ;;  %v11165_v4 = vcombine.high %v777_v57, %v781_v58 }
 0x39f   : > { %8701 = vmatpush1.bf16.msra.mxu0 %v11116_v1  ;;  %v909_v62 = vld [vmem:[%s13154_s9 + $0xf30] sm:$0xff]  ;;  %v11284_v1 = vcombine.low %v897_v44, %v901_v20  ;;  %v11164_v56 = vcombine.low %v777_v57, %v781_v58 }
 0x3a0   : > { %8702 = vmatprep.subr.bf16.mxu0 %v11125_v6  ;;  %v785_v6 = vld [vmem:[%s13154_s9 + $0xb50] sm:$0xff]  ;;  %v11292_v13 = vcombine.low %v905_v61, %v909_v62 }
 0x3a1   : > { %8742 = vmatpush1.bf16.msra.mxu1 %v11244_v40  ;;  %v11293_v40 = vcombine.high %v905_v61, %v909_v62  ;;  %v789_v7 = vld [vmem:[%s13154_s9 + $0xb70] sm:$0xff] }
 0x3a2   : > { %8743 = vmatprep.subr.bf16.mxu1 %v11253_v45  ;;  %v913_v45 = vld [vmem:[%s13154_s9 + $0xf50] sm:$0xff]  ;;  %v11173_v49 = vcombine.high %v785_v6, %v789_v7  ;;  %v11172_v25 = vcombine.low %v785_v6, %v789_v7 }
 0x3a3   : > { %8703 = vmatpush1.bf16.msra.mxu0 %v11124_v15  ;;  %v917_v33 = vld [vmem:[%s13154_s9 + $0xf70] sm:$0xff] }
 0x3a4   : > { %8704 = vmatprep.subr.bf16.mxu0 %v11133_v43  ;;  %v11301_v15 = vcombine.high %v913_v45, %v917_v33  ;;  %v797_v43 = vld [vmem:[%s13154_s9 + $0xbb0] sm:$0xff]  ;;  %v11300_v63 = vcombine.low %v913_v45, %v917_v33 }
 0x3a5   : > { %8744 = vmatpush1.bf16.msra.mxu1 %v11252_v18  ;;  %v793_v18 = vld [vmem:[%s13154_s9 + $0xb90] sm:$0xff] }
 0x3a6   : > { %8745 = vmatprep.subr.bf16.mxu1 %v11261_v24  ;;  %v921_v24 = vld [vmem:[%s13154_s9 + $0xf90] sm:$0xff]  ;;  %v11181_v54 = vcombine.high %v793_v18, %v797_v43 }
 0x3a7   : > { %8705 = vmatpush1.bf16.msra.mxu0 %v11132_v35  ;;  %v929_v31 = vld [vmem:[%s13154_s9 + $0xfd0] sm:$0xff]  ;;  %v11308_v39 = vcombine.low %v921_v24, %v925_v14 }
 0x3a8   : > { %8706 = vmatprep.subr.bf16.mxu0 %v11141_v27  ;;  %v801_v27 = vld [vmem:[%s13154_s9 + $0xbd0] sm:$0xff] }
 0x3a9   : > { %8746 = vmatpush1.bf16.msra.mxu1 %v11260_v3  ;;  %v11309_v3 = vcombine.high %v921_v24, %v925_v14  ;;  %v933_v34 = vld [vmem:[%s13154_s9 + $0xff0] sm:$0xff] }
 0x3aa   : > { %8747 = vmatprep.subr.bf16.mxu1 %v11269_v55  ;;  %v805_v55 = vld [vmem:[%s13154_s9 + $0xbf0] sm:$0xff] }
 0x3ab   : > { %8707 = vmatpush1.bf16.msra.mxu0 %v11140_v22  ;;  %v11189_v42 = vcombine.high %v801_v27, %v805_v55  ;;  %v937_v44 = vld [vmem:[%s13154_s9 + $0x1010] sm:$0xff] }
 0x3ac   : > { %8708 = vmatprep.subr.bf16.mxu0 %v11149_v51  ;;  %v11180_v51 = vcombine.low %v793_v18, %v797_v43  ;;  %v941_v20 = vld [vmem:[%s13154_s9 + $0x1030] sm:$0xff] }
 0x3ad   : > { %8748 = vmatpush1.bf16.msra.mxu1 %v11268_v26  ;;  %v945_v58 = vld [vmem:[%s13154_s9 + $0x1050] sm:$0xff] }
 0x3ae   : > { %8749 = vmatprep.subr.bf16.mxu1 %v11277_v38  ;;  %v949_v61 = vld [vmem:[%s13154_s9 + $0x1070] sm:$0xff] }
 0x3af   : > { %8709 = vmatpush1.bf16.msra.mxu0 %v11148_v46  ;;  %v1065_v46 = vld [vmem:[%s13154_s9 + $0x1410] sm:$0xff] }
 0x3b0   : > { %8710 = vmatprep.subr.bf16.mxu0 %v11157_v36  ;;  %v11316_v36 = vcombine.low %v929_v31, %v933_v34  ;;  %v1073_v62 = vld [vmem:[%s13154_s9 + $0x1450] sm:$0xff] }
 0x3b1   : > { %8750 = vmatpush1.bf16.msra.mxu1 %v11276_v47  ;;  %v1069_v47 = vld [vmem:[%s13154_s9 + $0x1430] sm:$0xff] }
 0x3b2   : > { %8751 = vmatprep.subr.bf16.mxu1 %v11285_v53  ;;  %v11325_v53 = vcombine.high %v937_v44, %v941_v20  ;;  %v11453_v57 = vcombine.high %v1065_v46, %v1069_v47  ;;  %v953_v7 = vld [vmem:[%s13154_s9 + $0x1090] sm:$0xff] }
 0x3b3   : > { %8711 = vmatpush1.bf16.msra.mxu0 %v11156_v0  ;;  %v1077_v0 = vld [vmem:[%s13154_s9 + $0x1470] sm:$0xff] }
 0x3b4   : > { %8712 = vmatprep.subr.bf16.mxu0 %v11165_v4  ;;  %v11452_v4 = vcombine.low %v1065_v46, %v1069_v47  ;;  %v11461_v6 = vcombine.high %v1073_v62, %v1077_v0  ;;  %v957_v45 = vld [vmem:[%s13154_s9 + $0x10b0] sm:$0xff] }
 0x3b5   : > { %8752 = vmatpush1.bf16.msra.mxu1 %v11284_v1  ;;  %v11324_v1 = vcombine.low %v937_v44, %v941_v20  ;;  %v1081_v33 = vld [vmem:[%s13154_s9 + $0x1490] sm:$0xff] }
 0x3b6   : > { %8753 = vmatprep.subr.bf16.mxu1 %v11293_v40  ;;  %v11333_v40 = vcombine.high %v945_v58, %v949_v61  ;;  %v961_v43 = vld [vmem:[%s13154_s9 + $0x10d0] sm:$0xff] }
 0x3b7   : > { %8713 = vmatpush1.bf16.msra.mxu0 %v11164_v56  ;;  %v1085_v56 = vld [vmem:[%s13154_s9 + $0x14b0] sm:$0xff] }
 0x3b8   : > { %8714 = vmatprep.subr.bf16.mxu0 %v11173_v49  ;;  %v11460_v49 = vcombine.low %v1073_v62, %v1077_v0  ;;  %v11469_v18 = vcombine.high %v1081_v33, %v1085_v56  ;;  %v965_v24 = vld [vmem:[%s13154_s9 + $0x10f0] sm:$0xff] }
 0x3b9   : > { %8754 = vmatpush1.bf16.msra.mxu1 %v11292_v13  ;;  %v8435_v35 = vpop.f32.mrb[28].mxu0  ;;  %v11332_v13 = vcombine.low %v945_v58, %v949_v61  ;;  %v1089_v14 = vld [vmem:[%s13154_s9 + $0x14d0] sm:$0xff] }
 0x3ba   : > { %8755 = vmatprep.subr.bf16.mxu1 %v11301_v15  ;;  %v14112_v29 = vadd.f32 %v8435_v35, %v14076_v12  ;;  %v8437_v32 = vpop.f32.mrb[29].mxu0  ;;  %v11317_v12 = vcombine.high %v929_v31, %v933_v34  ;;  %v11341_v15 = vcombine.high %v953_v7, %v957_v45  ;;  %v11349_v35 = vcombine.high %v961_v43, %v965_v24  ;;  %v1101_v31 = vld [vmem:[%s13154_s9 + $0x1530] sm:$0xff] }
 0x3bb   : > { %v14117_v22 = vadd.f32 %v8437_v32, %v14079_v2  ;;  %v8439_v26 = vpop.f32.mrb[30].mxu0  ;;  %8715 = vmatpush1.bf16.msra.mxu0 %v11172_v25  ;;  %v11188_v2 = vcombine.low %v801_v27, %v805_v55  ;;  %v1093_v25 = vld [vmem:[%s13154_s9 + $0x14f0] sm:$0xff]  ;;  %v11348_v34 = vcombine.low %v961_v43, %v965_v24 }
 0x3bc   : > { %v8440_v38 = vpop.f32.mrb[31].mxu0  ;;  %8716 = vmatprep.subr.bf16.mxu0 %v11181_v54  ;;  %v11468_v54 = vcombine.low %v1081_v33, %v1085_v56  ;;  %v969_v27 = vld [vmem:[%s13154_s9 + $0x1110] sm:$0xff]  ;;  %v11476_v26 = vcombine.low %v1089_v14, %v1093_v25 }
 0x3bd   : > { %8756 = vmatpush1.bf16.msra.mxu1 %v11300_v63  ;;  %v11340_v63 = vcombine.low %v953_v7, %v957_v45  ;;  %v973_v55 = vld [vmem:[%s13154_s9 + $0x1130] sm:$0xff] }
 0x3be   : > { %8757 = vmatprep.subr.bf16.mxu1 %v11309_v3  ;;  %v11477_v3 = vcombine.high %v1089_v14, %v1093_v25  ;;  %v1097_v32 = vld [vmem:[%s13154_s9 + $0x1510] sm:$0xff]  ;;  %v11356_v20 = vcombine.low %v969_v27, %v973_v55 }
 0x3bf   : > { %8717 = vmatpush1.bf16.msra.mxu0 %v11180_v51  ;;  %v11357_v51 = vcombine.high %v969_v27, %v973_v55  ;;  %v11485_v38 = vcombine.high %v1097_v32, %v1101_v31  ;;  %v1109_v44 = vld [vmem:[%s13154_s9 + $0x1570] sm:$0xff]  ;;  %v11484_v46 = vcombine.low %v1097_v32, %v1101_v31 }
 0x3c0   : > { %8718 = vmatprep.subr.bf16.mxu0 %v11189_v42  ;;  %v981_v42 = vld [vmem:[%s13154_s9 + $0x1170] sm:$0xff] }
 0x3c1   : > { %8758 = vmatpush1.bf16.msra.mxu1 %v11308_v39  ;;  %v977_v39 = vld [vmem:[%s13154_s9 + $0x1150] sm:$0xff] }
 0x3c2   : > { %8759 = vmatprep.subr.bf16.mxu1 %v11317_v12  ;;  %v1105_v12 = vld [vmem:[%s13154_s9 + $0x1550] sm:$0xff]  ;;  %v11365_v47 = vcombine.high %v977_v39, %v981_v42  ;;  %v11364_v61 = vcombine.low %v977_v39, %v981_v42 }
 0x3c3   : > { %8719 = vmatpush1.bf16.msra.mxu0 %v11188_v2  ;;  %v11493_v2 = vcombine.high %v1105_v12, %v1109_v44  ;;  %v1117_v58 = vld [vmem:[%s13154_s9 + $0x15b0] sm:$0xff]  ;;  %v11492_v62 = vcombine.low %v1105_v12, %v1109_v44 }
 0x3c4   : > { %8770 = vmatprep.subr.bf16.mxu0 %v11325_v53  ;;  %v989_v53 = vld [vmem:[%s13154_s9 + $0x11b0] sm:$0xff] }
 0x3c5   : > { %8760 = vmatpush1.bf16.msra.mxu1 %v11316_v36  ;;  %v985_v36 = vld [vmem:[%s13154_s9 + $0x1190] sm:$0xff] }
 0x3c6   : > { %8811 = vmatprep.subr.bf16.mxu1 %v11453_v57  ;;  %8721 = vmatmul.mubr.bf16.vlgmr.msra.gmra.mrb[44].mxu0 %v13352_v37  ;;  %v1113_v57 = vld [vmem:[%s13154_s9 + $0x1590] sm:$0xff]  ;;  %v11373_v0 = vcombine.high %v985_v36, %v989_v53 }
 0x3c7   : > { %8771 = vmatpush1.bf16.msra.mxu0 %v11324_v1  ;;  %8802 = vmatprep.mubr.bf16.mxu0 %v13370_v48  ;;  %v11501_v1 = vcombine.high %v1113_v57, %v1117_v58  ;;  %v1121_v7 = vld [vmem:[%s13154_s9 + $0x15d0] sm:$0xff] }
 0x3c8   : > { %8762 = vmatmul.mubr.bf16.vlgmr.msra.gmra.mrb[44].mxu1 %v13361_v41  ;;  %8772 = vmatprep.subr.bf16.mxu0 %v11333_v40  ;;  %v997_v40 = vld [vmem:[%s13154_s9 + $0x11f0] sm:$0xff] }
 0x3c9   : > { %8812 = vmatpush1.bf16.msra.mxu1 %v11452_v4  ;;  %8843 = vmatprep.mubr.bf16.mxu1 %v13377_v50  ;;  %v993_v4 = vld [vmem:[%s13154_s9 + $0x11d0] sm:$0xff] }
 0x3ca   : > { %8813 = vmatprep.subr.bf16.mxu1 %v11461_v6  ;;  %v1125_v45 = vld [vmem:[%s13154_s9 + $0x15f0] sm:$0xff]  ;;  %v11381_v43 = vcombine.high %v993_v4, %v997_v40 }
 0x3cb   : > { %8773 = vmatpush1.bf16.msra.mxu0 %v11332_v13  ;;  %v11372_v13 = vcombine.low %v985_v36, %v989_v53  ;;  %v11509_v14 = vcombine.high %v1121_v7, %v1125_v45  ;;  %v1005_v25 = vld [vmem:[%s13154_s9 + $0x1230] sm:$0xff] }
 0x3cc   : > { %8774 = vmatprep.subr.bf16.mxu0 %v11341_v15  ;;  %v1009_v55 = vld [vmem:[%s13154_s9 + $0x1250] sm:$0xff] }
 0x3cd   : > { %8814 = vmatpush1.bf16.msra.mxu1 %v11460_v49  ;;  %v1013_v32 = vld [vmem:[%s13154_s9 + $0x1270] sm:$0xff] }
 0x3ce   : > { %8815 = vmatprep.subr.bf16.mxu1 %v11469_v18  ;;  %v11500_v18 = vcombine.low %v1113_v57, %v1117_v58  ;;  %v1137_v31 = vld [vmem:[%s13154_s9 + $0x1650] sm:$0xff] }
 0x3cf   : > { %8775 = vmatpush1.bf16.msra.mxu0 %v11340_v63  ;;  %v1129_v63 = vld [vmem:[%s13154_s9 + $0x1610] sm:$0xff] }
 0x3d0   : > { %8776 = vmatprep.subr.bf16.mxu0 %v11349_v35  ;;  %v11380_v35 = vcombine.low %v993_v4, %v997_v40  ;;  %v1017_v42 = vld [vmem:[%s13154_s9 + $0x1290] sm:$0xff] }
 0x3d1   : > { %8816 = vmatpush1.bf16.msra.mxu1 %v11468_v54  ;;  %v1133_v54 = vld [vmem:[%s13154_s9 + $0x1630] sm:$0xff] }
 0x3d2   : > { %8817 = vmatprep.subr.bf16.mxu1 %v11477_v3  ;;  %v11517_v27 = vcombine.high %v1129_v63, %v1133_v54  ;;  %v1021_v12 = vld [vmem:[%s13154_s9 + $0x12b0] sm:$0xff] }
 0x3d3   : > { %8777 = vmatpush1.bf16.msra.mxu0 %v11348_v34  ;;  %v1141_v34 = vld [vmem:[%s13154_s9 + $0x1670] sm:$0xff] }
 0x3d4   : > { %8778 = vmatprep.subr.bf16.mxu0 %v11357_v51  ;;  %v11516_v51 = vcombine.low %v1129_v63, %v1133_v54  ;;  %v11525_v39 = vcombine.high %v1137_v31, %v1141_v34  ;;  %v1145_v44 = vld [vmem:[%s13154_s9 + $0x1690] sm:$0xff] }
 0x3d5   : > { %8818 = vmatpush1.bf16.msra.mxu1 %v11476_v26  ;;  %v1025_v53 = vld [vmem:[%s13154_s9 + $0x12d0] sm:$0xff] }
 0x3d6   : > { %8819 = vmatprep.subr.bf16.mxu1 %v11485_v38  ;;  %v11397_v38 = vcombine.high %v1009_v55, %v1013_v32  ;;  %v1029_v57 = vld [vmem:[%s13154_s9 + $0x12f0] sm:$0xff] }
 0x3d7   : > { %8779 = vmatpush1.bf16.msra.mxu0 %v11356_v20  ;;  %v1149_v20 = vld [vmem:[%s13154_s9 + $0x16b0] sm:$0xff] }
 0x3d8   : > { %8780 = vmatprep.subr.bf16.mxu0 %v11365_v47  ;;  %v11524_v47 = vcombine.low %v1137_v31, %v1141_v34  ;;  %v11533_v36 = vcombine.high %v1145_v44, %v1149_v20  ;;  %v1153_v58 = vld [vmem:[%s13154_s9 + $0x16d0] sm:$0xff] }
 0x3d9   : > { %8820 = vmatpush1.bf16.msra.mxu1 %v11484_v46  ;;  %v11396_v46 = vcombine.low %v1009_v55, %v1013_v32  ;;  %v1033_v40 = vld [vmem:[%s13154_s9 + $0x1310] sm:$0xff] }
 0x3da   : > { %8821 = vmatprep.subr.bf16.mxu1 %v11493_v2  ;;  %v11405_v2 = vcombine.high %v1017_v42, %v1021_v12  ;;  %v1181_v55 = vld [vmem:[%s13154_s9 + $0x17b0] sm:$0xff] }
 0x3db   : > { %v8476_v6 = vpop.f32.mrb[32].mxu1  ;;  %8781 = vmatpush1.bf16.msra.mxu0 %v11364_v61  ;;  %v1157_v61 = vld [vmem:[%s13154_s9 + $0x16f0] sm:$0xff] }
 0x3dc   : > { %v14156_v33 = vadd.f32 %v8476_v6, %v14112_v29  ;;  %v8478_v56 = vpop.f32.mrb[33].mxu1  ;;  %8782 = vmatprep.subr.bf16.mxu0 %v11373_v0  ;;  %v1001_v29 = vld [vmem:[%s13154_s9 + $0x1210] sm:$0xff]  ;;  %v11532_v0 = vcombine.low %v1145_v44, %v1149_v20  ;;  %v11541_v4 = vcombine.high %v1153_v58, %v1157_v61 }
 0x3dd   : > { %v14159_v49 = vadd.f32 %v8478_v56, %v14117_v22  ;;  %v8480_v15 = vpop.f32.mrb[34].mxu1  ;;  %8822 = vmatpush1.bf16.msra.mxu1 %v11492_v62  ;;  %v11508_v22 = vcombine.low %v1121_v7, %v1125_v45  ;;  %v11389_v3 = vcombine.high %v1001_v29, %v1005_v25  ;;  %v11388_v26 = vcombine.low %v1001_v29, %v1005_v25  ;;  %v1037_v6 = vld [vmem:[%s13154_s9 + $0x1330] sm:$0xff] }
 0x3de   : > { %v8481_v24 = vpop.f32.mrb[35].mxu1  ;;  %8823 = vmatprep.subr.bf16.mxu1 %v11501_v1  ;;  %v11404_v62 = vcombine.low %v1017_v42, %v1021_v12  ;;  %v11413_v1 = vcombine.high %v1025_v53, %v1029_v57  ;;  %v1161_v7 = vld [vmem:[%s13154_s9 + $0x1710] sm:$0xff]  ;;  %v11412_v56 = vcombine.low %v1025_v53, %v1029_v57  ;;  %v11421_v15 = vcombine.high %v1033_v40, %v1037_v6 }
 0x3df   : > { %8783 = vmatpush1.bf16.msra.mxu0 %v11372_v13  ;;  %v1165_v45 = vld [vmem:[%s13154_s9 + $0x1730] sm:$0xff]  ;;  %v11540_v13 = vcombine.low %v1153_v58, %v1157_v61  ;;  %v11420_v25 = vcombine.low %v1033_v40, %v1037_v6 }
 0x3e0   : > { %8784 = vmatprep.subr.bf16.mxu0 %v11381_v43  ;;  %v1041_v43 = vld [vmem:[%s13154_s9 + $0x1350] sm:$0xff]  ;;  %v11548_v63 = vcombine.low %v1161_v7, %v1165_v45 }
 0x3e1   : > { %8824 = vmatpush1.bf16.msra.mxu1 %v11500_v18  ;;  %v11549_v18 = vcombine.high %v1161_v7, %v1165_v45  ;;  %v1045_v24 = vld [vmem:[%s13154_s9 + $0x1370] sm:$0xff] }
 0x3e2   : > { %8825 = vmatprep.subr.bf16.mxu1 %v11509_v14  ;;  %v1169_v14 = vld [vmem:[%s13154_s9 + $0x1750] sm:$0xff]  ;;  %v11429_v54 = vcombine.high %v1041_v43, %v1045_v24  ;;  %v11428_v32 = vcombine.low %v1041_v43, %v1045_v24 }
 0x3e3   : > { %8785 = vmatpush1.bf16.msra.mxu0 %v11380_v35  ;;  %v1173_v29 = vld [vmem:[%s13154_s9 + $0x1770] sm:$0xff] }
 0x3e4   : > { %8786 = vmatprep.subr.bf16.mxu0 %v11389_v3  ;;  %v11557_v35 = vcombine.high %v1169_v14, %v1173_v29  ;;  %v1053_v3 = vld [vmem:[%s13154_s9 + $0x13b0] sm:$0xff]  ;;  %v11556_v31 = vcombine.low %v1169_v14, %v1173_v29 }
 0x3e5   : > { %8826 = vmatpush1.bf16.msra.mxu1 %v11508_v22  ;;  %v1049_v22 = vld [vmem:[%s13154_s9 + $0x1390] sm:$0xff] }
 0x3e6   : > { %8827 = vmatprep.subr.bf16.mxu1 %v11517_v27  ;;  %v1177_v27 = vld [vmem:[%s13154_s9 + $0x1790] sm:$0xff]  ;;  %v11437_v34 = vcombine.high %v1049_v22, %v1053_v3 }
 0x3e7   : > { %8787 = vmatpush1.bf16.msra.mxu0 %v11388_v26  ;;  %v1185_v44 = vld [vmem:[%s13154_s9 + $0x17d0] sm:$0xff]  ;;  %v11564_v53 = vcombine.low %v1177_v27, %v1181_v55 }
 0x3e8   : > { %8788 = vmatprep.subr.bf16.mxu0 %v11397_v38  ;;  %v1057_v38 = vld [vmem:[%s13154_s9 + $0x13d0] sm:$0xff] }
 0x3e9   : > { %8828 = vmatpush1.bf16.msra.mxu1 %v11516_v51  ;;  %v11565_v51 = vcombine.high %v1177_v27, %v1181_v55  ;;  %v1189_v20 = vld [vmem:[%s13154_s9 + $0x17f0] sm:$0xff] }
 0x3ea   : > { %8829 = vmatprep.subr.bf16.mxu1 %v11525_v39  ;;  %v1061_v39 = vld [vmem:[%s13154_s9 + $0x13f0] sm:$0xff] }
 0x3eb   : > { %8789 = vmatpush1.bf16.msra.mxu0 %v11396_v46  ;;  %v11445_v57 = vcombine.high %v1057_v38, %v1061_v39  ;;  %v1193_v58 = vld [vmem:[%s13154_s9 + $0x1810] sm:$0xff] }
 0x3ec   : > { %8790 = vmatprep.subr.bf16.mxu0 %v11405_v2  ;;  %v11436_v2 = vcombine.low %v1049_v22, %v1053_v3  ;;  %v1197_v61 = vld [vmem:[%s13154_s9 + $0x1830] sm:$0xff] }
 0x3ed   : > { %8830 = vmatpush1.bf16.msra.mxu1 %v11524_v47  ;;  %v1201_v6 = vld [vmem:[%s13154_s9 + $0x1850] sm:$0xff] }
 0x3ee   : > { %8831 = vmatprep.subr.bf16.mxu1 %v11533_v36  ;;  %v1205_v7 = vld [vmem:[%s13154_s9 + $0x1870] sm:$0xff] }
 0x3ef   : > { %8791 = vmatpush1.bf16.msra.mxu0 %v11404_v62  ;;  %v1321_v62 = vld [vmem:[%s13154_s9 + $0x1c10] sm:$0xff] }
 0x3f0   : > { %8792 = vmatprep.subr.bf16.mxu0 %v11413_v1  ;;  %v11572_v1 = vcombine.low %v1185_v44, %v1189_v20  ;;  %v1329_v45 = vld [vmem:[%s13154_s9 + $0x1c50] sm:$0xff] }
 0x3f1   : > { %8832 = vmatpush1.bf16.msra.mxu1 %v11532_v0  ;;  %v1325_v0 = vld [vmem:[%s13154_s9 + $0x1c30] sm:$0xff] }
 0x3f2   : > { %8833 = vmatprep.subr.bf16.mxu1 %v11541_v4  ;;  %v11581_v4 = vcombine.high %v1193_v58, %v1197_v61  ;;  %v11709_v40 = vcombine.high %v1321_v62, %v1325_v0  ;;  %v1209_v24 = vld [vmem:[%s13154_s9 + $0x1890] sm:$0xff] }
 0x3f3   : > { %8793 = vmatpush1.bf16.msra.mxu0 %v11412_v56  ;;  %v1333_v56 = vld [vmem:[%s13154_s9 + $0x1c70] sm:$0xff] }
 0x3f4   : > { %8794 = vmatprep.subr.bf16.mxu0 %v11421_v15  ;;  %v11708_v15 = vcombine.low %v1321_v62, %v1325_v0  ;;  %v11717_v43 = vcombine.high %v1329_v45, %v1333_v56  ;;  %v1213_v14 = vld [vmem:[%s13154_s9 + $0x18b0] sm:$0xff] }
 0x3f5   : > { %8834 = vmatpush1.bf16.msra.mxu1 %v11540_v13  ;;  %v11580_v13 = vcombine.low %v1193_v58, %v1197_v61  ;;  %v1337_v29 = vld [vmem:[%s13154_s9 + $0x1c90] sm:$0xff] }
 0x3f6   : > { %8835 = vmatprep.subr.bf16.mxu1 %v11549_v18  ;;  %v11589_v18 = vcombine.high %v1201_v6, %v1205_v7  ;;  %v1217_v3 = vld [vmem:[%s13154_s9 + $0x18d0] sm:$0xff] }
 0x3f7   : > { %8795 = vmatpush1.bf16.msra.mxu0 %v11420_v25  ;;  %v1341_v25 = vld [vmem:[%s13154_s9 + $0x1cb0] sm:$0xff] }
 0x3f8   : > { %8796 = vmatprep.subr.bf16.mxu0 %v11429_v54  ;;  %v11716_v54 = vcombine.low %v1329_v45, %v1333_v56  ;;  %v11725_v22 = vcombine.high %v1337_v29, %v1341_v25  ;;  %v1221_v27 = vld [vmem:[%s13154_s9 + $0x18f0] sm:$0xff] }
 0x3f9   : > { %8836 = vmatpush1.bf16.msra.mxu1 %v11548_v63  ;;  %v8517_v26 = vpop.f32.mrb[32].mxu0  ;;  %v11588_v63 = vcombine.low %v1201_v6, %v1205_v7  ;;  %v1345_v55 = vld [vmem:[%s13154_s9 + $0x1cd0] sm:$0xff] }
 0x3fa   : > { %8837 = vmatprep.subr.bf16.mxu1 %v11557_v35  ;;  %v14192_v42 = vadd.f32 %v8517_v26, %v14156_v33  ;;  %v8519_v12 = vpop.f32.mrb[33].mxu0  ;;  %v11573_v33 = vcombine.high %v1185_v44, %v1189_v20  ;;  %v11597_v35 = vcombine.high %v1209_v24, %v1213_v14  ;;  %v11605_v26 = vcombine.high %v1217_v3, %v1221_v27  ;;  %v1357_v44 = vld [vmem:[%s13154_s9 + $0x1d30] sm:$0xff] }
 0x3fb   : > { %v14197_v46 = vadd.f32 %v8519_v12, %v14159_v49  ;;  %v8521_v47 = vpop.f32.mrb[34].mxu0  ;;  %8797 = vmatpush1.bf16.msra.mxu0 %v11428_v32  ;;  %v11444_v49 = vcombine.low %v1057_v38, %v1061_v39  ;;  %v1349_v32 = vld [vmem:[%s13154_s9 + $0x1cf0] sm:$0xff]  ;;  %v11604_v20 = vcombine.low %v1217_v3, %v1221_v27  ;;  %v407_v3 = vld [vmem:[#allocation2 + $0x10] sm:$0xff] }
 0x3fc   : > { %v8522_v36 = vpop.f32.mrb[35].mxu0  ;;  %8798 = vmatprep.subr.bf16.mxu0 %v11437_v34  ;;  %v11724_v34 = vcombine.low %v1337_v29, %v1341_v25  ;;  %v1225_v38 = vld [vmem:[%s13154_s9 + $0x1910] sm:$0xff]  ;;  %v11732_v47 = vcombine.low %v1345_v55, %v1349_v32 }
 0x3fd   : > { %8838 = vmatpush1.bf16.msra.mxu1 %v11556_v31  ;;  %v11596_v31 = vcombine.low %v1209_v24, %v1213_v14  ;;  %v1229_v39 = vld [vmem:[%s13154_s9 + $0x1930] sm:$0xff] }
 0x3fe   : > { %8839 = vmatprep.subr.bf16.mxu1 %v11565_v51  ;;  %v11733_v51 = vcombine.high %v1345_v55, %v1349_v32  ;;  %v1353_v12 = vld [vmem:[%s13154_s9 + $0x1d10] sm:$0xff]  ;;  %v11612_v61 = vcombine.low %v1225_v38, %v1229_v39 }
 0x3ff   : > { %8799 = vmatpush1.bf16.msra.mxu0 %v11436_v2  ;;  %v11613_v2 = vcombine.high %v1225_v38, %v1229_v39  ;;  %v11741_v36 = vcombine.high %v1353_v12, %v1357_v44  ;;  %v1365_v58 = vld [vmem:[%s13154_s9 + $0x1d70] sm:$0xff]  ;;  %v11740_v62 = vcombine.low %v1353_v12, %v1357_v44 }
 0x400   : > { %8800 = vmatprep.subr.bf16.mxu0 %v11445_v57  ;;  %v1237_v57 = vld [vmem:[%s13154_s9 + $0x1970] sm:$0xff] }
 0x401   : > { %8840 = vmatpush1.bf16.msra.mxu1 %v11564_v53  ;;  %v1233_v53 = vld [vmem:[%s13154_s9 + $0x1950] sm:$0xff] }
 0x402   : > { %8841 = vmatprep.subr.bf16.mxu1 %v11573_v33  ;;  %v1361_v33 = vld [vmem:[%s13154_s9 + $0x1d50] sm:$0xff]  ;;  %v11621_v0 = vcombine.high %v1233_v53, %v1237_v57  ;;  %v11620_v7 = vcombine.low %v1233_v53, %v1237_v57 }
 0x403   : > { %8801 = vmatpush1.bf16.msra.mxu0 %v11444_v49  ;;  %v11749_v49 = vcombine.high %v1361_v33, %v1365_v58  ;;  %v1373_v6 = vld [vmem:[%s13154_s9 + $0x1db0] sm:$0xff]  ;;  %v11748_v45 = vcombine.low %v1361_v33, %v1365_v58 }
 0x404   : > { %8852 = vmatprep.subr.bf16.mxu0 %v11581_v4  ;;  %v1245_v4 = vld [vmem:[%s13154_s9 + $0x19b0] sm:$0xff] }
 0x405   : > { %8842 = vmatpush1.bf16.msra.mxu1 %v11572_v1  ;;  %v1241_v1 = vld [vmem:[%s13154_s9 + $0x1990] sm:$0xff] }
 0x406   : > { %8893 = vmatprep.subr.bf16.mxu1 %v11709_v40  ;;  %8803 = vmatmul.mubr.bf16.vlgmr.msra.gmra.mrb[48].mxu0 %v13442_v5  ;;  %v1369_v40 = vld [vmem:[%s13154_s9 + $0x1d90] sm:$0xff]  ;;  %v11629_v56 = vcombine.high %v1241_v1, %v1245_v4 }
 0x407   : > { %8853 = vmatpush1.bf16.msra.mxu0 %v11580_v13  ;;  %8884 = vmatprep.mubr.bf16.mxu0 %v13460_v16  ;;  %v1377_v29 = vld [vmem:[%s13154_s9 + $0x1dd0] sm:$0xff] }
 0x408   : > { %8844 = vmatmul.mubr.bf16.vlgmr.msra.gmra.mrb[48].mxu1 %v13451_v9  ;;  %8854 = vmatprep.subr.bf16.mxu0 %v11589_v18  ;;  %v1249_v18 = vld [vmem:[%s13154_s9 + $0x19d0] sm:$0xff] }
 0x409   : > { %8894 = vmatpush1.bf16.msra.mxu1 %v11708_v15  ;;  %8925 = vmatprep.mubr.bf16.mxu1 %v13467_v19  ;;  %v11757_v15 = vcombine.high %v1369_v40, %v1373_v6  ;;  %v1381_v25 = vld [vmem:[%s13154_s9 + $0x1df0] sm:$0xff] }
 0x40a   : > { %8895 = vmatprep.subr.bf16.mxu1 %v11717_v43  ;;  %v1253_v43 = vld [vmem:[%s13154_s9 + $0x19f0] sm:$0xff]  ;;  %v11765_v38 = vcombine.high %v1377_v29, %v1381_v25  ;;  %v11764_v53 = vcombine.low %v1377_v29, %v1381_v25 }
 0x40b   : > { %8855 = vmatpush1.bf16.msra.mxu0 %v11588_v63  ;;  %v1257_v39 = vld [vmem:[%s13154_s9 + $0x1a10] sm:$0xff] }
 0x40c   : > { %8856 = vmatprep.subr.bf16.mxu0 %v11597_v35  ;;  %v1261_v12 = vld [vmem:[%s13154_s9 + $0x1a30] sm:$0xff] }
 0x40d   : > { %8896 = vmatpush1.bf16.msra.mxu1 %v11716_v54  ;;  %v11645_v57 = vcombine.high %v1257_v39, %v1261_v12  ;;  %v1265_v58 = vld [vmem:[%s13154_s9 + $0x1a50] sm:$0xff] }
 0x40e   : > { %8897 = vmatprep.subr.bf16.mxu1 %v11725_v22  ;;  %v11628_v22 = vcombine.low %v1241_v1, %v1245_v4  ;;  %v1409_v29 = vld [vmem:[%s13154_s9 + $0x1ed0] sm:$0xff] }
 0x40f   : > { %8857 = vmatpush1.bf16.msra.mxu0 %v11596_v31  ;;  %v11756_v31 = vcombine.low %v1369_v40, %v1373_v6  ;;  %v1273_v6 = vld [vmem:[%s13154_s9 + $0x1a90] sm:$0xff] }
 0x410   : > { %8858 = vmatprep.subr.bf16.mxu0 %v11605_v26  ;;  %v1413_v25 = vld [vmem:[%s13154_s9 + $0x1ef0] sm:$0xff] }
 0x411   : > { %8898 = vmatpush1.bf16.msra.mxu1 %v11724_v34  ;;  %v11637_v34 = vcombine.high %v1249_v18, %v1253_v43 }
 0x412   : > { %8899 = vmatprep.subr.bf16.mxu1 %v11733_v51  ;;  %v408_v51 = vld [vmem:[#allocation2 + $0x18] sm:$0xff] }
 0x413   : > { %8859 = vmatpush1.bf16.msra.mxu0 %v11604_v20  ;;  %v1385_v20 = vld [vmem:[%s13154_s9 + $0x1e10] sm:$0xff] }
 0x414   : > { %8860 = vmatprep.subr.bf16.mxu0 %v11613_v2  ;;  %v11636_v2 = vcombine.low %v1249_v18, %v1253_v43 }
 0x415   : > { %8900 = vmatpush1.bf16.msra.mxu1 %v11732_v47 }
 0x416   : > { %8901 = vmatprep.subr.bf16.mxu1 %v11741_v36 }
 0x417   : > { %8861 = vmatpush1.bf16.msra.mxu0 %v11612_v61  ;;  %v1269_v61 = vld [vmem:[%s13154_s9 + $0x1a70] sm:$0xff] }
 0x418   : > { %8862 = vmatprep.subr.bf16.mxu0 %v11621_v0  ;;  %v1397_v0 = vld [vmem:[%s13154_s9 + $0x1e70] sm:$0xff]  ;;  %v11653_v4 = vcombine.high %v1265_v58, %v1269_v61 }
 0x419   : > { %8902 = vmatpush1.bf16.msra.mxu1 %v11740_v62  ;;  %v8599_v13 = vpop.f32.mrb[36].mxu0  ;;  %v1393_v62 = vld [vmem:[%s13154_s9 + $0x1e50] sm:$0xff] }
 0x41a   : > { %8903 = vmatprep.subr.bf16.mxu1 %v11749_v49  ;;  %v8601_v14 = vpop.f32.mrb[37].mxu0  ;;  %v11644_v49 = vcombine.low %v1257_v39, %v1261_v12  ;;  %v11781_v40 = vcombine.high %v1393_v62, %v1397_v0  ;;  %v1425_v39 = vld [vmem:[%s13154_s9 + $0x1f50] sm:$0xff] }
 0x41b   : > { %v8558_v24 = vpop.f32.mrb[36].mxu1  ;;  %v8603_v35 = vpop.f32.mrb[38].mxu0  ;;  %8863 = vmatpush1.bf16.msra.mxu0 %v11620_v7  ;;  %v1277_v7 = vld [vmem:[%s13154_s9 + $0x1ab0] sm:$0xff] }
 0x41c   : > { %v8559_v63 = vadd.f32 %v8558_v24, %v14192_v42  ;;  %v8560_v54 = vpop.f32.mrb[37].mxu1  ;;  %v8604_v32 = vpop.f32.mrb[39].mxu0  ;;  %8864 = vmatprep.subr.bf16.mxu0 %v11629_v56  ;;  %v1405_v56 = vld [vmem:[%s13154_s9 + $0x1eb0] sm:$0xff]  ;;  %v11661_v18 = vcombine.high %v1273_v6, %v1277_v7 }
 0x41d   : > { %v8561_v27 = vadd.f32 %v8560_v54, %v14197_v46  ;;  %v8562_v55 = vpop.f32.mrb[38].mxu1  ;;  %8904 = vmatpush1.bf16.msra.mxu1 %v11748_v45  ;;  %v1389_v46 = vld [vmem:[%s13154_s9 + $0x1e30] sm:$0xff] }
 0x41e   : > { %v8600_v26 = vadd.f32 %v8599_v13, %v8559_v63  ;;  %v8563_v42 = vpop.f32.mrb[39].mxu1  ;;  %8905 = vmatprep.subr.bf16.mxu1 %v11757_v15  ;;  %v11773_v33 = vcombine.high %v1385_v20, %v1389_v46  ;;  %v11772_v1 = vcombine.low %v1385_v20, %v1389_v46  ;;  %v1401_v45 = vld [vmem:[%s13154_s9 + $0x1e90] sm:$0xff]  ;;  %v11652_v13 = vcombine.low %v1265_v58, %v1269_v61 }
 0x41f   : > { %v8602_v44 = vadd.f32 %v8601_v14, %v8561_v27  ;;  %8865 = vmatpush1.bf16.msra.mxu0 %v11628_v22  ;;  %v11780_v15 = vcombine.low %v1393_v62, %v1397_v0  ;;  %v11789_v43 = vcombine.high %v1401_v45, %v1405_v56  ;;  %v1281_v24 = vld [vmem:[%s13154_s9 + $0x1ad0] sm:$0xff]  ;;  %v11660_v63 = vcombine.low %v1273_v6, %v1277_v7 }
 0x420   : > { %v9428_v47 = vadd.f32 %v8600_v26, %v407_v3  ;;  %8866 = vmatprep.subr.bf16.mxu0 %v11637_v34  ;;  %v1285_v14 = vld [vmem:[%s13154_s9 + $0x1af0] sm:$0xff]  ;;  %v11788_v54 = vcombine.low %v1401_v45, %v1405_v56  ;;  %v11797_v22 = vcombine.high %v1409_v29, %v1413_v25  ;;  %v11796_v34 = vcombine.low %v1409_v29, %v1413_v25 }
 0x421   : > { %v9429_v36 = vadd.f32 %v8602_v44, %v408_v51  ;;  %8906 = vmatpush1.bf16.msra.mxu1 %v11756_v31  ;;  %v11669_v35 = vcombine.high %v1281_v24, %v1285_v14  ;;  %v1289_v3 = vld [vmem:[%s13154_s9 + $0x1b10] sm:$0xff]  ;;  %v11668_v31 = vcombine.low %v1281_v24, %v1285_v14 }
 0x422   : > { %9436 = vst [vmem:[#allocation2 + $0x10] sm:$0xff] %v9428_v47  ;;  %8907 = vmatprep.subr.bf16.mxu1 %v11765_v38  ;;  %v1293_v27 = vld [vmem:[%s13154_s9 + $0x1b30] sm:$0xff] }
 0x423   : > { %9437 = vst [vmem:[#allocation2 + $0x18] sm:$0xff] %v9429_v36  ;;  %8867 = vmatpush1.bf16.msra.mxu0 %v11636_v2  ;;  %v1417_v55 = vld [vmem:[%s13154_s9 + $0x1f10] sm:$0xff]  ;;  %v11677_v26 = vcombine.high %v1289_v3, %v1293_v27  ;;  %v11676_v44 = vcombine.low %v1289_v3, %v1293_v27 }
 0x424   : > { %8868 = vmatprep.subr.bf16.mxu0 %v11645_v57  ;;  %v1421_v32 = vld [vmem:[%s13154_s9 + $0x1f30] sm:$0xff] }
 0x425   : > { %8908 = vmatpush1.bf16.msra.mxu1 %v11764_v53  ;;  %v11805_v51 = vcombine.high %v1417_v55, %v1421_v32  ;;  %v1297_v42 = vld [vmem:[%s13154_s9 + $0x1b50] sm:$0xff]  ;;  %v11804_v20 = vcombine.low %v1417_v55, %v1421_v32 }
 0x426   : > { %8909 = vmatprep.subr.bf16.mxu1 %v11773_v33  ;;  %v1301_v38 = vld [vmem:[%s13154_s9 + $0x1b70] sm:$0xff] }
 0x427   : > { %8869 = vmatpush1.bf16.msra.mxu0 %v11644_v49  ;;  %v1429_v12 = vld [vmem:[%s13154_s9 + $0x1f70] sm:$0xff]  ;;  %v11685_v46 = vcombine.high %v1297_v42, %v1301_v38  ;;  %v11684_v33 = vcombine.low %v1297_v42, %v1301_v38 }
 0x428   : > { %8870 = vmatprep.subr.bf16.mxu0 %v11653_v4  ;;  %v11813_v47 = vcombine.high %v1425_v39, %v1429_v12  ;;  %v1305_v2 = vld [vmem:[%s13154_s9 + $0x1b90] sm:$0xff]  ;;  %v11812_v58 = vcombine.low %v1425_v39, %v1429_v12 }
 0x429   : > { %8910 = vmatpush1.bf16.msra.mxu1 %v11772_v1  ;;  %v1309_v36 = vld [vmem:[%s13154_s9 + $0x1bb0] sm:$0xff] }
 0x42a   : > { %8911 = vmatprep.subr.bf16.mxu1 %v11781_v40  ;;  %v1433_v53 = vld [vmem:[%s13154_s9 + $0x1f90] sm:$0xff]  ;;  %v11693_v61 = vcombine.high %v1305_v2, %v1309_v36  ;;  %v11692_v40 = vcombine.low %v1305_v2, %v1309_v36 }
 0x42b   : > { %8871 = vmatpush1.bf16.msra.mxu0 %v11652_v13  ;;  %v1437_v57 = vld [vmem:[%s13154_s9 + $0x1fb0] sm:$0xff] }
 0x42c   : > { %8872 = vmatprep.subr.bf16.mxu0 %v11661_v18  ;;  %v11821_v62 = vcombine.high %v1433_v53, %v1437_v57  ;;  %v1313_v0 = vld [vmem:[%s13154_s9 + $0x1bd0] sm:$0xff]  ;;  %v11820_v6 = vcombine.low %v1433_v53, %v1437_v57 }
 0x42d   : > { %8912 = vmatpush1.bf16.msra.mxu1 %v11780_v15  ;;  %v1317_v49 = vld [vmem:[%s13154_s9 + $0x1bf0] sm:$0xff] }
 0x42e   : > { %8913 = vmatprep.subr.bf16.mxu1 %v11789_v43  ;;  %v1441_v1 = vld [vmem:[%s13154_s9 + $0x1fd0] sm:$0xff]  ;;  %v11701_v7 = vcombine.high %v1313_v0, %v1317_v49  ;;  %v11700_v43 = vcombine.low %v1313_v0, %v1317_v49 }
 0x42f   : > { %8873 = vmatpush1.bf16.msra.mxu0 %v11660_v63  ;;  %v1445_v4 = vld [vmem:[%s13154_s9 + $0x1ff0] sm:$0xff] }
 0x430   : > { %8874 = vmatprep.subr.bf16.mxu0 %v11669_v35  ;;  %v11829_v45 = vcombine.high %v1441_v1, %v1445_v4  ;;  %v1449_v56 = vld [vmem:[%s13154_s9 + $0x2010] sm:$0xff]  ;;  %v11828_v24 = vcombine.low %v1441_v1, %v1445_v4 }
 0x431   : > { %8914 = vmatpush1.bf16.msra.mxu1 %v11788_v54  ;;  %v1453_v13 = vld [vmem:[%s13154_s9 + $0x2030] sm:$0xff] }
 0x432   : > { %8915 = vmatprep.subr.bf16.mxu1 %v11797_v22  ;;  %v1577_v15 = vld [vmem:[%s13154_s9 + $0x2410] sm:$0xff]  ;;  %v11837_v14 = vcombine.high %v1449_v56, %v1453_v13  ;;  %v11836_v22 = vcombine.low %v1449_v56, %v1453_v13 }
 0x433   : > { %8875 = vmatpush1.bf16.msra.mxu0 %v11668_v31  ;;  %v1581_v18 = vld [vmem:[%s13154_s9 + $0x2430] sm:$0xff] }
 0x434   : > { %8876 = vmatprep.subr.bf16.mxu0 %v11677_v26  ;;  %v11965_v29 = vcombine.high %v1577_v15, %v1581_v18  ;;  %v1457_v25 = vld [vmem:[%s13154_s9 + $0x2050] sm:$0xff]  ;;  %v11964_v3 = vcombine.low %v1577_v15, %v1581_v18 }
 0x435   : > { %8916 = vmatpush1.bf16.msra.mxu1 %v11796_v34  ;;  %v1461_v63 = vld [vmem:[%s13154_s9 + $0x2070] sm:$0xff] }
 0x436   : > { %8917 = vmatprep.subr.bf16.mxu1 %v11805_v51  ;;  %v1585_v54 = vld [vmem:[%s13154_s9 + $0x2450] sm:$0xff]  ;;  %v11845_v27 = vcombine.high %v1457_v25, %v1461_v63  ;;  %v11844_v51 = vcombine.low %v1457_v25, %v1461_v63 }
 0x437   : > { %8877 = vmatpush1.bf16.msra.mxu0 %v11676_v44  ;;  %v1589_v35 = vld [vmem:[%s13154_s9 + $0x2470] sm:$0xff] }
 0x438   : > { %8878 = vmatprep.subr.bf16.mxu0 %v11685_v46  ;;  %v11973_v55 = vcombine.high %v1585_v54, %v1589_v35  ;;  %v1465_v32 = vld [vmem:[%s13154_s9 + $0x2090] sm:$0xff]  ;;  %v11972_v42 = vcombine.low %v1585_v54, %v1589_v35 }
 0x439   : > { %8918 = vmatpush1.bf16.msra.mxu1 %v11804_v20  ;;  %v1469_v31 = vld [vmem:[%s13154_s9 + $0x20b0] sm:$0xff] }
 0x43a   : > { %8919 = vmatprep.subr.bf16.mxu1 %v11813_v47  ;;  %v1593_v34 = vld [vmem:[%s13154_s9 + $0x2490] sm:$0xff]  ;;  %v11853_v38 = vcombine.high %v1465_v32, %v1469_v31  ;;  %v11852_v47 = vcombine.low %v1465_v32, %v1469_v31 }
 0x43b   : > { %8879 = vmatpush1.bf16.msra.mxu0 %v11684_v33  ;;  %v1597_v26 = vld [vmem:[%s13154_s9 + $0x24b0] sm:$0xff] }
 0x43c   : > { %8880 = vmatprep.subr.bf16.mxu0 %v11693_v61  ;;  %v11981_v39 = vcombine.high %v1593_v34, %v1597_v26  ;;  %v1473_v12 = vld [vmem:[%s13154_s9 + $0x20d0] sm:$0xff]  ;;  %v11980_v2 = vcombine.low %v1593_v34, %v1597_v26 }
 0x43d   : > { %8920 = vmatpush1.bf16.msra.mxu1 %v11812_v58  ;;  %v1477_v44 = vld [vmem:[%s13154_s9 + $0x20f0] sm:$0xff] }
 0x43e   : > { %8921 = vmatprep.subr.bf16.mxu1 %v11821_v62  ;;  %v1601_v20 = vld [vmem:[%s13154_s9 + $0x24d0] sm:$0xff]  ;;  %v11861_v36 = vcombine.high %v1473_v12, %v1477_v44  ;;  %v11860_v62 = vcombine.low %v1473_v12, %v1477_v44 }
 0x43f   : > { %8881 = vmatpush1.bf16.msra.mxu0 %v11692_v40  ;;  %v1605_v46 = vld [vmem:[%s13154_s9 + $0x24f0] sm:$0xff] }
 0x440   : > { %8882 = vmatprep.subr.bf16.mxu0 %v11701_v7  ;;  %v11989_v53 = vcombine.high %v1601_v20, %v1605_v46  ;;  %v1481_v57 = vld [vmem:[%s13154_s9 + $0x2110] sm:$0xff]  ;;  %v11988_v0 = vcombine.low %v1601_v20, %v1605_v46 }
 0x441   : > { %8922 = vmatpush1.bf16.msra.mxu1 %v11820_v6  ;;  %v1485_v33 = vld [vmem:[%s13154_s9 + $0x2130] sm:$0xff] }
 0x442   : > { %8923 = vmatprep.subr.bf16.mxu1 %v11829_v45  ;;  %v1609_v58 = vld [vmem:[%s13154_s9 + $0x2510] sm:$0xff]  ;;  %v11869_v49 = vcombine.high %v1481_v57, %v1485_v33  ;;  %v11868_v45 = vcombine.low %v1481_v57, %v1485_v33  ;;  %v430_v57 = vld [vmem:[%s13154_s9 + $0x38] sm:$0xff] }
 0x443   : > { %8883 = vmatpush1.bf16.msra.mxu0 %v11700_v43  ;;  %v1613_v61 = vld [vmem:[%s13154_s9 + $0x2530] sm:$0xff] }
 0x444   : > { %8934 = vmatprep.subr.bf16.mxu0 %v11837_v14  ;;  %v11997_v1 = vcombine.high %v1609_v58, %v1613_v61  ;;  %v1489_v4 = vld [vmem:[%s13154_s9 + $0x2150] sm:$0xff]  ;;  %v11996_v56 = vcombine.low %v1609_v58, %v1613_v61 }
 0x445   : > { %8924 = vmatpush1.bf16.msra.mxu1 %v11828_v24  ;;  %v1493_v40 = vld [vmem:[%s13154_s9 + $0x2170] sm:$0xff] }
 0x446   : > { %8975 = vmatprep.subr.bf16.mxu1 %v11965_v29  ;;  %8885 = vmatmul.mubr.bf16.vlgmr.msra.gmra.mrb[52].mxu0 %v13532_v23  ;;  %v1617_v6 = vld [vmem:[%s13154_s9 + $0x2550] sm:$0xff]  ;;  %v11877_v13 = vcombine.high %v1489_v4, %v1493_v40  ;;  %v11876_v29 = vcombine.low %v1489_v4, %v1493_v40  ;;  %v438_v4 = vld [vmem:[%s13154_s9 + $0x78] sm:$0xff] }
 0x447   : > { %8935 = vmatpush1.bf16.msra.mxu0 %v11836_v22  ;;  %8966 = vmatprep.mubr.bf16.mxu0 %v13550_v11  ;;  %v1621_v7 = vld [vmem:[%s13154_s9 + $0x2570] sm:$0xff] }
 0x448   : > { %8926 = vmatmul.mubr.bf16.vlgmr.msra.gmra.mrb[52].mxu1 %v13538_v52  ;;  %8936 = vmatprep.subr.bf16.mxu0 %v11845_v27  ;;  %v12005_v15 = vcombine.high %v1617_v6, %v1621_v7  ;;  %v1497_v18 = vld [vmem:[%s13154_s9 + $0x2190] sm:$0xff]  ;;  %v12004_v25 = vcombine.low %v1617_v6, %v1621_v7 }
 0x449   : > { %8976 = vmatpush1.bf16.msra.mxu1 %v11964_v3  ;;  %9007 = vmatprep.mubr.bf16.mxu1 %v12852_v10  ;;  %v1501_v43 = vld [vmem:[%s13154_s9 + $0x21b0] sm:$0xff] }
 0x44a   : > { %8977 = vmatprep.subr.bf16.mxu1 %v11973_v55  ;;  %v1625_v24 = vld [vmem:[%s13154_s9 + $0x2590] sm:$0xff]  ;;  %v11885_v63 = vcombine.high %v1497_v18, %v1501_v43 }
 0x44b   : > { %8937 = vmatpush1.bf16.msra.mxu0 %v11844_v51  ;;  %v1629_v14 = vld [vmem:[%s13154_s9 + $0x25b0] sm:$0xff] }
 0x44c   : > { %8938 = vmatprep.subr.bf16.mxu0 %v11853_v38  ;;  %v12013_v35 = vcombine.high %v1625_v24, %v1629_v14  ;;  %v1505_v22 = vld [vmem:[%s13154_s9 + $0x21d0] sm:$0xff]  ;;  %v12012_v44 = vcombine.low %v1625_v24, %v1629_v14 }
 0x44d   : > { %8978 = vmatpush1.bf16.msra.mxu1 %v11972_v42  ;;  %v1509_v3 = vld [vmem:[%s13154_s9 + $0x21f0] sm:$0xff]  ;;  %v11884_v42 = vcombine.low %v1497_v18, %v1501_v43  ;;  %v446_v18 = vld [vmem:[%s13154_s9 + $0xb8] sm:$0xff] }
 0x44e   : > { %8979 = vmatprep.subr.bf16.mxu1 %v11981_v39  ;;  %v1633_v32 = vld [vmem:[%s13154_s9 + $0x25d0] sm:$0xff]  ;;  %v11893_v20 = vcombine.high %v1505_v22, %v1509_v3  ;;  %v11892_v33 = vcombine.low %v1505_v22, %v1509_v3  ;;  %v454_v22 = vld [vmem:[%s13154_s9 + $0xf8] sm:$0xff] }
 0x44f   : > { %8939 = vmatpush1.bf16.msra.mxu0 %v11852_v47  ;;  %v1637_v31 = vld [vmem:[%s13154_s9 + $0x25f0] sm:$0xff] }
 0x450   : > { %8940 = vmatprep.subr.bf16.mxu0 %v11861_v36  ;;  %v12021_v47 = vcombine.high %v1633_v32, %v1637_v31  ;;  %v1517_v36 = vld [vmem:[%s13154_s9 + $0x2230] sm:$0xff]  ;;  %v12020_v58 = vcombine.low %v1633_v32, %v1637_v31 }
 0x451   : > { %8980 = vmatpush1.bf16.msra.mxu1 %v11980_v2  ;;  %v1513_v2 = vld [vmem:[%s13154_s9 + $0x2210] sm:$0xff] }
 0x452   : > { %8981 = vmatprep.subr.bf16.mxu1 %v11989_v53  ;;  %v426_v53 = vld [vmem:[%s13154_s9 + $0x18] sm:$0xff]  ;;  %v11901_v61 = vcombine.high %v1513_v2, %v1517_v36  ;;  %v11900_v40 = vcombine.low %v1513_v2, %v1517_v36  ;;  %v1545_v31 = vld [vmem:[%s13154_s9 + $0x2310] sm:$0xff] }
 0x453   : > { %8941 = vmatpush1.bf16.msra.mxu0 %v11860_v62  ;;  %v10815_v62 = vcombine.high %v426_v53, %v430_v57  ;;  %v10814_v6 = vcombine.low %v426_v53, %v430_v57  ;;  %v12346_v43 = vld [vmem:[%s13147_s24 + $0x48] ss:$0 sps:$4 sm:$0xff]  }
 0x454   : > { %8942 = vmatprep.subr.bf16.mxu0 %v11869_v49  ;;  %v1525_v49 = vld [vmem:[%s13154_s9 + $0x2270] sm:$0xff]  ;;  %v470_v2 = vld [vmem:[%s13154_s9 + $0x178] sm:$0xff] }
 0x455   : > { %8982 = vmatpush1.bf16.msra.mxu1 %v11988_v0  ;;  %v1521_v0 = vld [vmem:[%s13154_s9 + $0x2250] sm:$0xff] }
 0x456   : > { %8983 = vmatprep.subr.bf16.mxu1 %v11997_v1  ;;  %v434_v1 = vld [vmem:[%s13154_s9 + $0x58] sm:$0xff]  ;;  %v11909_v7 = vcombine.high %v1521_v0, %v1525_v49  ;;  %v11908_v24 = vcombine.low %v1521_v0, %v1525_v49 }
 0x457   : > { %8943 = vmatpush1.bf16.msra.mxu0 %v11868_v45  ;;  %v10823_v45 = vcombine.high %v434_v1, %v438_v4  ;;  %v10822_v14 = vcombine.low %v434_v1, %v438_v4  ;;  %v478_v0 = vld [vmem:[%s13154_s9 + $0x1b8] sm:$0xff] }
 0x458   : > { %8944 = vmatprep.subr.bf16.mxu0 %v11877_v13  ;;  %v1533_v13 = vld [vmem:[%s13154_s9 + $0x22b0] sm:$0xff] }
 0x459   : > { %8984 = vmatpush1.bf16.msra.mxu1 %v11996_v56  ;;  %v8640_v54 = vpop.f32.mrb[40].mxu0  ;;  %v1529_v56 = vld [vmem:[%s13154_s9 + $0x2290] sm:$0xff] }
 0x45a   : > { %8985 = vmatprep.subr.bf16.mxu1 %v12005_v15  ;;  %v8642_v55 = vpop.f32.mrb[41].mxu0  ;;  %v442_v15 = vld [vmem:[%s13154_s9 + $0x98] sm:$0xff]  ;;  %v11916_v3 = vcombine.low %v1529_v56, %v1533_v13 }
 0x45b   : > { %v8681_v27 = vpop.f32.mrb[40].mxu1  ;;  %v8644_v51 = vpop.f32.mrb[42].mxu0  ;;  %8945 = vmatpush1.bf16.msra.mxu0 %v11876_v29  ;;  %v11917_v29 = vcombine.high %v1529_v56, %v1533_v13  ;;  %v486_v56 = vld [vmem:[%s13154_s9 + $0x1f8] sm:$0xff] }
 0x45c   : > { %v14305_v34 = vadd.f32 %v8681_v27, %v8640_v54  ;;  %v8683_v26 = vpop.f32.mrb[41].mxu1  ;;  %v8645_v12 = vpop.f32.mrb[43].mxu0  ;;  %8946 = vmatprep.subr.bf16.mxu0 %v11885_v63  ;;  %v1537_v63 = vld [vmem:[%s13154_s9 + $0x22d0] sm:$0xff]  ;;  %v10830_v27 = vcombine.low %v442_v15, %v446_v18  ;;  %v458_v51 = vld [vmem:[%s13154_s9 + $0x118] sm:$0xff] }
 0x45d   : > { %v14307_v38 = vadd.f32 %v8683_v26, %v8642_v55  ;;  %v8685_v39 = vpop.f32.mrb[42].mxu1  ;;  %8986 = vmatpush1.bf16.msra.mxu1 %v12004_v25  ;;  %v10831_v25 = vcombine.high %v442_v15, %v446_v18  ;;  %v1541_v54 = vld [vmem:[%s13154_s9 + $0x22f0] sm:$0xff] }
 0x45e   : > { %v8686_v46 = vpop.f32.mrb[43].mxu1  ;;  %8987 = vmatprep.subr.bf16.mxu1 %v12013_v35  ;;  %v450_v35 = vld [vmem:[%s13154_s9 + $0xd8] sm:$0xff]  ;;  %v11925_v55 = vcombine.high %v1537_v63, %v1541_v54  ;;  %v1549_v26 = vld [vmem:[%s13154_s9 + $0x2330] sm:$0xff] }
 0x45f   : > { %8947 = vmatpush1.bf16.msra.mxu0 %v11884_v42  ;;  %v10839_v32 = vcombine.high %v450_v35, %v454_v22  ;;  %v462_v42 = vld [vmem:[%s13154_s9 + $0x138] sm:$0xff]  ;;  %v10838_v39 = vcombine.low %v450_v35, %v454_v22  ;;  %v11933_v12 = vcombine.high %v1545_v31, %v1549_v26  ;;  %v1557_v46 = vld [vmem:[%s13154_s9 + $0x2370] sm:$0xff]  ;;  %v11932_v36 = vcombine.low %v1545_v31, %v1549_v26 }
 0x460   : > { %8948 = vmatprep.subr.bf16.mxu0 %v11893_v20  ;;  %v1553_v20 = vld [vmem:[%s13154_s9 + $0x2350] sm:$0xff]  ;;  %v10846_v53 = vcombine.low %v458_v51, %v462_v42 }
 0x461   : > { %8988 = vmatpush1.bf16.msra.mxu1 %v12012_v44  ;;  %v10847_v44 = vcombine.high %v458_v51, %v462_v42  ;;  %v11941_v57 = vcombine.high %v1553_v20, %v1557_v46  ;;  %v11940_v49 = vcombine.low %v1553_v20, %v1557_v46 }
 0x462   : > { %8989 = vmatprep.subr.bf16.mxu1 %v12021_v47  ;;  %v466_v47 = vld [vmem:[%s13154_s9 + $0x158] sm:$0xff] }
 0x463   : > { %8949 = vmatpush1.bf16.msra.mxu0 %v11892_v33  ;;  %v10855_v33 = vcombine.high %v466_v47, %v470_v2  ;;  %v10854_v1 = vcombine.low %v466_v47, %v470_v2 }
 0x464   : > { %8950 = vmatprep.subr.bf16.mxu0 %v11901_v61  ;;  %v1565_v61 = vld [vmem:[%s13154_s9 + $0x23b0] sm:$0xff] }
 0x465   : > { %8990 = vmatpush1.bf16.msra.mxu1 %v12020_v58  ;;  %v1561_v58 = vld [vmem:[%s13154_s9 + $0x2390] sm:$0xff] }
 0x466   : > { %9016 = vmatprep.subr.bf16.mxu1 %v10815_v62  ;;  %v474_v62 = vld [vmem:[%s13154_s9 + $0x198] sm:$0xff]  ;;  %v11949_v4 = vcombine.high %v1561_v58, %v1565_v61  ;;  %v11948_v13 = vcombine.low %v1561_v58, %v1565_v61 }
 0x467   : > { %8951 = vmatpush1.bf16.msra.mxu0 %v11900_v40  ;;  %v10863_v40 = vcombine.high %v474_v62, %v478_v0  ;;  %v10862_v15 = vcombine.low %v474_v62, %v478_v0  ;;  %v586_v0 = vld [vmem:[%s13154_s9 + $0x518] sm:$0xff] }
 0x468   : > { %9008 = vmatmul.mubr.bf16.vlgmr.msra.gmra.mrb[56].mxu1 %v12346_v43  ;;  %8952 = vmatprep.subr.bf16.mxu0 %v11909_v7  ;;  %v1573_v7 = vld [vmem:[%s13154_s9 + $0x23f0] sm:$0xff] }
 0x469   : > { %9017 = vmatpush1.bf16.msra.mxu1 %v10814_v6  ;;  %9048 = vmatprep.mubr.bf16.mxu1 %v13212_v59  ;;  %v11924_v59 = vcombine.low %v1537_v63, %v1541_v54  ;;  %v1569_v6 = vld [vmem:[%s13154_s9 + $0x23d0] sm:$0xff] }
 0x46a   : > { %9018 = vmatprep.subr.bf16.mxu1 %v10823_v45  ;;  %v482_v45 = vld [vmem:[%s13154_s9 + $0x1d8] sm:$0xff]  ;;  %v11957_v18 = vcombine.high %v1569_v6, %v1573_v7  ;;  %v11956_v63 = vcombine.low %v1569_v6, %v1573_v7 }
 0x46b   : > { %8953 = vmatpush1.bf16.msra.mxu0 %v11908_v24  ;;  %v10871_v43 = vcombine.high %v482_v45, %v486_v56  ;;  %v554_v24 = vld [vmem:[%s13154_s9 + $0x418] sm:$0xff]  ;;  %v10870_v54 = vcombine.low %v482_v45, %v486_v56 }
 0x46c   : > { %8954 = vmatprep.subr.bf16.mxu0 %v11917_v29  ;;  %v490_v29 = vld [vmem:[%s13154_s9 + $0x218] sm:$0xff] }
 0x46d   : > { %9019 = vmatpush1.bf16.msra.mxu1 %v10822_v14  ;;  %v558_v14 = vld [vmem:[%s13154_s9 + $0x438] sm:$0xff] }
 0x46e   : > { %9020 = vmatprep.subr.bf16.mxu1 %v10831_v25  ;;  %v494_v25 = vld [vmem:[%s13154_s9 + $0x238] sm:$0xff]  ;;  %v10943_v35 = vcombine.high %v554_v24, %v558_v14  ;;  %v10942_v31 = vcombine.low %v554_v24, %v558_v14 }
 0x46f   : > { %8955 = vmatpush1.bf16.msra.mxu0 %v11916_v3  ;;  %v10879_v22 = vcombine.high %v490_v29, %v494_v25  ;;  %v562_v3 = vld [vmem:[%s13154_s9 + $0x458] sm:$0xff]  ;;  %v10878_v26 = vcombine.low %v490_v29, %v494_v25 }
 0x470   : > { %8956 = vmatprep.subr.bf16.mxu0 %v11925_v55  ;;  %v498_v55 = vld [vmem:[%s13154_s9 + $0x258] sm:$0xff] }
 0x471   : > { %9021 = vmatpush1.bf16.msra.mxu1 %v10830_v27  ;;  %v566_v27 = vld [vmem:[%s13154_s9 + $0x478] sm:$0xff] }
 0x472   : > { %9022 = vmatprep.subr.bf16.mxu1 %v10839_v32  ;;  %v502_v32 = vld [vmem:[%s13154_s9 + $0x278] sm:$0xff]  ;;  %v10951_v51 = vcombine.high %v562_v3, %v566_v27  ;;  %v10950_v20 = vcombine.low %v562_v3, %v566_v27 }
 0x473   : > { %8957 = vmatpush1.bf16.msra.mxu0 %v11924_v59  ;;  %v10887_v42 = vcombine.high %v498_v55, %v502_v32  ;;  %v570_v59 = vld [vmem:[%s13154_s9 + $0x498] sm:$0xff]  ;;  %v10886_v46 = vcombine.low %v498_v55, %v502_v32 }
 0x474   : > { %8958 = vmatprep.subr.bf16.mxu0 %v11933_v12  ;;  %v506_v12 = vld [vmem:[%s13154_s9 + $0x298] sm:$0xff] }
 0x475   : > { %9023 = vmatpush1.bf16.msra.mxu1 %v10838_v39  ;;  %v574_v39 = vld [vmem:[%s13154_s9 + $0x4b8] sm:$0xff] }
 0x476   : > { %9024 = vmatprep.subr.bf16.mxu1 %v10847_v44  ;;  %v510_v44 = vld [vmem:[%s13154_s9 + $0x2b8] sm:$0xff]  ;;  %v10959_v47 = vcombine.high %v570_v59, %v574_v39  ;;  %v10958_v58 = vcombine.low %v570_v59, %v574_v39 }
 0x477   : > { %8959 = vmatpush1.bf16.msra.mxu0 %v11932_v36  ;;  %v10895_v2 = vcombine.high %v506_v12, %v510_v44  ;;  %v578_v36 = vld [vmem:[%s13154_s9 + $0x4d8] sm:$0xff]  ;;  %v10894_v61 = vcombine.low %v506_v12, %v510_v44 }
 0x478   : > { %8960 = vmatprep.subr.bf16.mxu0 %v11941_v57  ;;  %v514_v57 = vld [vmem:[%s13154_s9 + $0x2d8] sm:$0xff] }
 0x479   : > { %9025 = vmatpush1.bf16.msra.mxu1 %v10846_v53  ;;  %v582_v53 = vld [vmem:[%s13154_s9 + $0x4f8] sm:$0xff] }
 0x47a   : > { %9026 = vmatprep.subr.bf16.mxu1 %v10855_v33  ;;  %v518_v33 = vld [vmem:[%s13154_s9 + $0x2f8] sm:$0xff] }
 0x47b   : > { %8961 = vmatpush1.bf16.msra.mxu0 %v11940_v49  ;;  %v10903_v62 = vcombine.high %v514_v57, %v518_v33  ;;  %v590_v49 = vld [vmem:[%s13154_s9 + $0x538] sm:$0xff]  ;;  %v10902_v6 = vcombine.low %v514_v57, %v518_v33 }
 0x47c   : > { %8962 = vmatprep.subr.bf16.mxu0 %v11949_v4  ;;  %v526_v4 = vld [vmem:[%s13154_s9 + $0x338] sm:$0xff]  ;;  %v10975_v7 = vcombine.high %v586_v0, %v590_v49 }
 0x47d   : > { %9027 = vmatpush1.bf16.msra.mxu1 %v10854_v1  ;;  %v522_v1 = vld [vmem:[%s13154_s9 + $0x318] sm:$0xff] }
 0x47e   : > { %9028 = vmatprep.subr.bf16.mxu1 %v10863_v40  ;;  %v10966_v40 = vcombine.low %v578_v36, %v582_v53  ;;  %v10911_v45 = vcombine.high %v522_v1, %v526_v4  ;;  %v594_v56 = vld [vmem:[%s13154_s9 + $0x558] sm:$0xff]  ;;  %v10910_v24 = vcombine.low %v522_v1, %v526_v4 }
 0x47f   : > { %8963 = vmatpush1.bf16.msra.mxu0 %v11948_v13  ;;  %v598_v13 = vld [vmem:[%s13154_s9 + $0x578] sm:$0xff] }
 0x480   : > { %8964 = vmatprep.subr.bf16.mxu0 %v11957_v18  ;;  %v534_v18 = vld [vmem:[%s13154_s9 + $0x378] sm:$0xff]  ;;  %v10983_v14 = vcombine.high %v594_v56, %v598_v13 }
 0x481   : > { %9029 = vmatpush1.bf16.msra.mxu1 %v10862_v15  ;;  %v530_v15 = vld [vmem:[%s13154_s9 + $0x358] sm:$0xff] }
 0x482   : > { %9030 = vmatprep.subr.bf16.mxu1 %v10871_v43  ;;  %v10974_v43 = vcombine.low %v586_v0, %v590_v49  ;;  %v10919_v29 = vcombine.high %v530_v15, %v534_v18  ;;  %v602_v25 = vld [vmem:[%s13154_s9 + $0x598] sm:$0xff]  ;;  %v10918_v3 = vcombine.low %v530_v15, %v534_v18 }
 0x483   : > { %8965 = vmatpush1.bf16.msra.mxu0 %v11956_v63  ;;  %v606_v63 = vld [vmem:[%s13154_s9 + $0x5b8] sm:$0xff] }
 0x484   : > { %9057 = vmatprep.subr.bf16.mxu0 %v10943_v35  ;;  %v542_v35 = vld [vmem:[%s13154_s9 + $0x3b8] sm:$0xff]  ;;  %v10991_v27 = vcombine.high %v602_v25, %v606_v63 }
 0x485   : > { %9031 = vmatpush1.bf16.msra.mxu1 %v10870_v54  ;;  %v538_v54 = vld [vmem:[%s13154_s9 + $0x398] sm:$0xff] }
 0x486   : > { %9032 = vmatprep.subr.bf16.mxu1 %v10879_v22  ;;  %8967 = vmatmul.mubr.bf16.vlgmr.msra.gmra.mrb[56].mxu0 %v13621_v8  ;;  %v10982_v22 = vcombine.low %v594_v56, %v598_v13  ;;  %v10927_v32 = vcombine.high %v538_v54, %v542_v35  ;;  %v546_v39 = vld [vmem:[%s13154_s9 + $0x3d8] sm:$0xff] }
 0x487   : > { %9058 = vmatpush1.bf16.msra.mxu0 %v10942_v31  ;;  %9089 = vmatprep.mubr.bf16.mxu0 %v13216_v60  ;;  %v10967_v60 = vcombine.high %v578_v36, %v582_v53  ;;  %v610_v31 = vld [vmem:[%s13154_s9 + $0x5d8] sm:$0xff] }
 0x488   : > { %9059 = vmatprep.subr.bf16.mxu0 %v10951_v51  ;;  %v550_v12 = vld [vmem:[%s13154_s9 + $0x3f8] sm:$0xff] }
 0x489   : > { %9033 = vmatpush1.bf16.msra.mxu1 %v10878_v26  ;;  %v614_v26 = vld [vmem:[%s13154_s9 + $0x5f8] sm:$0xff]  ;;  %v10934_v1 = vcombine.low %v546_v39, %v550_v12 }
 0x48a   : > { %9034 = vmatprep.subr.bf16.mxu1 %v10887_v42  ;;  %v10999_v57 = vcombine.high %v610_v31, %v614_v26  ;;  %v686_v0 = vld [vmem:[%s13154_s9 + $0x838] sm:$0xff]  ;;  %v10998_v49 = vcombine.low %v610_v31, %v614_v26 }
 0x48b   : > { %9060 = vmatpush1.bf16.msra.mxu0 %v10950_v20  ;;  %v694_v56 = vld [vmem:[%s13154_s9 + $0x878] sm:$0xff] }
 0x48c   : > { %9061 = vmatprep.subr.bf16.mxu0 %v10959_v47  ;;  %v10990_v47 = vcombine.low %v602_v25, %v606_v63  ;;  %v702_v25 = vld [vmem:[%s13154_s9 + $0x8b8] sm:$0xff] }
 0x48d   : > { %9035 = vmatpush1.bf16.msra.mxu1 %v10886_v46 }
 0x48e   : > { %9036 = vmatprep.subr.bf16.mxu1 %v10895_v2 }
 0x48f   : > { %9062 = vmatpush1.bf16.msra.mxu0 %v10958_v58  ;;  %v10935_v58 = vcombine.high %v546_v39, %v550_v12  ;;  %v714_v39 = vld [vmem:[%s13154_s9 + $0x918] sm:$0xff] }
 0x490   : > { %9063 = vmatprep.subr.bf16.mxu0 %v10967_v60  ;;  %v622_v60 = vld [vmem:[%s13154_s9 + $0x638] sm:$0xff] }
 0x491   : > { %9037 = vmatpush1.bf16.msra.mxu1 %v10894_v61  ;;  %v618_v61 = vld [vmem:[%s13154_s9 + $0x618] sm:$0xff] }
 0x492   : > { %9038 = vmatprep.subr.bf16.mxu1 %v10903_v62  ;;  %v682_v62 = vld [vmem:[%s13154_s9 + $0x818] sm:$0xff]  ;;  %v11007_v4 = vcombine.high %v618_v61, %v622_v60  ;;  %v11006_v13 = vcombine.low %v618_v61, %v622_v60 }
 0x493   : > { %9064 = vmatpush1.bf16.msra.mxu0 %v10966_v40  ;;  %v11071_v40 = vcombine.high %v682_v62, %v686_v0  ;;  %v11070_v15 = vcombine.low %v682_v62, %v686_v0  ;;  %v718_v12 = vld [vmem:[%s13154_s9 + $0x938] sm:$0xff] }
 0x494   : > { %9065 = vmatprep.subr.bf16.mxu0 %v10975_v7  ;;  %v630_v7 = vld [vmem:[%s13154_s9 + $0x678] sm:$0xff] }
 0x495   : > { %9039 = vmatpush1.bf16.msra.mxu1 %v10902_v6  ;;  %v626_v6 = vld [vmem:[%s13154_s9 + $0x658] sm:$0xff] }
 0x496   : > { %9040 = vmatprep.subr.bf16.mxu1 %v10911_v45  ;;  %v690_v45 = vld [vmem:[%s13154_s9 + $0x858] sm:$0xff]  ;;  %v11015_v18 = vcombine.high %v626_v6, %v630_v7  ;;  %v11014_v63 = vcombine.low %v626_v6, %v630_v7 }
 0x497   : > { %9066 = vmatpush1.bf16.msra.mxu0 %v10974_v43  ;;  %v11079_v43 = vcombine.high %v690_v45, %v694_v56  ;;  %v666_v60 = vld [vmem:[%s13154_s9 + $0x798] sm:$0xff] }
 0x498   : > { %9067 = vmatprep.subr.bf16.mxu0 %v10983_v14  ;;  %v638_v14 = vld [vmem:[%s13154_s9 + $0x6b8] sm:$0xff] }
 0x499   : > { %9041 = vmatpush1.bf16.msra.mxu1 %v10910_v24  ;;  %v8722_v55 = vpop.f32.mrb[44].mxu0  ;;  %v634_v24 = vld [vmem:[%s13154_s9 + $0x698] sm:$0xff] }
 0x49a   : > { %9042 = vmatprep.subr.bf16.mxu1 %v10919_v29  ;;  %v8723_v51 = vadd.f32 %v8722_v55, %v14305_v34  ;;  %v8724_v59 = vpop.f32.mrb[45].mxu0  ;;  %v10926_v34 = vcombine.low %v538_v54, %v542_v35  ;;  %v698_v29 = vld [vmem:[%s13154_s9 + $0x898] sm:$0xff]  ;;  %v11078_v54 = vcombine.low %v690_v45, %v694_v56  ;;  %v11023_v35 = vcombine.high %v634_v24, %v638_v14 }
 0x49b   : > { %v8763_v42 = vpop.f32.mrb[44].mxu1  ;;  %v8725_v44 = vadd.f32 %v8724_v59, %v14307_v38  ;;  %v8726_v46 = vpop.f32.mrb[46].mxu0  ;;  %9068 = vmatpush1.bf16.msra.mxu0 %v10982_v22  ;;  %v11087_v22 = vcombine.high %v698_v29, %v702_v25  ;;  %v706_v55 = vld [vmem:[%s13154_s9 + $0x8d8] sm:$0xff]  ;;  %v11086_v31 = vcombine.low %v698_v29, %v702_v25 }
 0x49c   : > { %v8765_v20 = vpop.f32.mrb[45].mxu1  ;;  %v14379_v2 = vadd.f32 %v8763_v42, %v8723_v51  ;;  %v8727_v53 = vpop.f32.mrb[47].mxu0  ;;  %9069 = vmatprep.subr.bf16.mxu0 %v10991_v27  ;;  %v646_v27 = vld [vmem:[%s13154_s9 + $0x6f8] sm:$0xff]  ;;  %v11103_v46 = vcombine.high %v714_v39, %v718_v12 }
 0x49d   : > { %v8767_v36 = vpop.f32.mrb[46].mxu1  ;;  %9043 = vmatpush1.bf16.msra.mxu1 %v10918_v3  ;;  %v14381_v33 = vadd.f32 %v8765_v20, %v8725_v44  ;;  %v642_v3 = vld [vmem:[%s13154_s9 + $0x6d8] sm:$0xff] }
 0x49e   : > { %v8768_v38 = vpop.f32.mrb[47].mxu1  ;;  %9044 = vmatprep.subr.bf16.mxu1 %v10927_v32  ;;  %v710_v32 = vld [vmem:[%s13154_s9 + $0x8f8] sm:$0xff]  ;;  %v11031_v26 = vcombine.high %v642_v3, %v646_v27 }
 0x49f   : > { %9070 = vmatpush1.bf16.msra.mxu0 %v10990_v47  ;;  %v11095_v51 = vcombine.high %v706_v55, %v710_v32  ;;  %v650_v42 = vld [vmem:[%s13154_s9 + $0x718] sm:$0xff]  ;;  %v11094_v44 = vcombine.low %v706_v55, %v710_v32  ;;  %v11102_v38 = vcombine.low %v714_v39, %v718_v12 }
 0x4a0   : > { %9071 = vmatprep.subr.bf16.mxu0 %v10999_v57  ;;  %v654_v59 = vld [vmem:[%s13154_s9 + $0x738] sm:$0xff] }
 0x4a1   : > { %9045 = vmatpush1.bf16.msra.mxu1 %v10926_v34  ;;  %v11039_v20 = vcombine.high %v650_v42, %v654_v59  ;;  %v658_v47 = vld [vmem:[%s13154_s9 + $0x758] sm:$0xff]  ;;  %v11038_v57 = vcombine.low %v650_v42, %v654_v59 }
 0x4a2   : > { %9046 = vmatprep.subr.bf16.mxu1 %v10935_v58  ;;  %v662_v36 = vld [vmem:[%s13154_s9 + $0x778] sm:$0xff] }
 0x4a3   : > { %9072 = vmatpush1.bf16.msra.mxu0 %v10998_v49  ;;  %v722_v53 = vld [vmem:[%s13154_s9 + $0x958] sm:$0xff]  ;;  %v11047_v58 = vcombine.high %v658_v47, %v662_v36 }
 0x4a4   : > { %9073 = vmatprep.subr.bf16.mxu0 %v11007_v4  ;;  %v726_v34 = vld [vmem:[%s13154_s9 + $0x978] sm:$0xff] }
 0x4a5   : > { %9047 = vmatpush1.bf16.msra.mxu1 %v10934_v1  ;;  %v11111_v61 = vcombine.high %v722_v53, %v726_v34  ;;  %v670_v62 = vld [vmem:[%s13154_s9 + $0x7b8] sm:$0xff]  ;;  %v11046_v1 = vcombine.low %v658_v47, %v662_v36  ;;  %v11110_v4 = vcombine.low %v722_v53, %v726_v34 }
 0x4a6   : > { %9098 = vmatprep.subr.bf16.mxu1 %v11071_v40  ;;  %v730_v0 = vld [vmem:[%s13154_s9 + $0x998] sm:$0xff]  ;;  %v11055_v40 = vcombine.high %v666_v60, %v670_v62 }
 0x4a7   : > { %9074 = vmatpush1.bf16.msra.mxu0 %v11006_v13  ;;  %v734_v49 = vld [vmem:[%s13154_s9 + $0x9b8] sm:$0xff] }
 0x4a8   : > { %9049 = vmatmul.mubr.bf16.vlgmr.msra.gmra.mrb[60].mxu1 %v13262_v17  ;;  %9075 = vmatprep.subr.bf16.mxu0 %v11015_v18  ;;  %v11022_v17 = vcombine.low %v634_v24, %v638_v14  ;;  %v11119_v6 = vcombine.high %v730_v0, %v734_v49  ;;  %v674_v7 = vld [vmem:[%s13154_s9 + $0x7d8] sm:$0xff]  ;;  %v11118_v18 = vcombine.low %v730_v0, %v734_v49 }
 0x4a9   : > { %9099 = vmatpush1.bf16.msra.mxu1 %v11070_v15  ;;  %9130 = vmatprep.mubr.bf16.mxu1 %v13280_v28  ;;  %v11030_v28 = vcombine.low %v642_v3, %v646_v27  ;;  %v678_v45 = vld [vmem:[%s13154_s9 + $0x7f8] sm:$0xff]  ;;  %v11054_v15 = vcombine.low %v666_v60, %v670_v62 }
 0x4aa   : > { %9100 = vmatprep.subr.bf16.mxu1 %v11079_v43  ;;  %v738_v56 = vld [vmem:[%s13154_s9 + $0x9d8] sm:$0xff]  ;;  %v11063_v43 = vcombine.high %v674_v7, %v678_v45 }
 0x4ab   : > { %9076 = vmatpush1.bf16.msra.mxu0 %v11014_v63  ;;  %v742_v13 = vld [vmem:[%s13154_s9 + $0x9f8] sm:$0xff] }
 0x4ac   : > { %9077 = vmatprep.subr.bf16.mxu0 %v11023_v35  ;;  %v11127_v24 = vcombine.high %v738_v56, %v742_v13  ;;  %v810_v14 = vld [vmem:[%s13154_s9 + $0xc18] sm:$0xff]  ;;  %v11126_v35 = vcombine.low %v738_v56, %v742_v13 }
 0x4ad   : > { %9101 = vmatpush1.bf16.msra.mxu1 %v11078_v54  ;;  %v814_v29 = vld [vmem:[%s13154_s9 + $0xc38] sm:$0xff]  ;;  %v11062_v54 = vcombine.low %v674_v7, %v678_v45 }
 0x4ae   : > { %9102 = vmatprep.subr.bf16.mxu1 %v11087_v22  ;;  %v746_v25 = vld [vmem:[%s13154_s9 + $0xa18] sm:$0xff]  ;;  %v11199_v22 = vcombine.high %v810_v14, %v814_v29 }
 0x4af   : > { %9078 = vmatpush1.bf16.msra.mxu0 %v11022_v17  ;;  %v750_v63 = vld [vmem:[%s13154_s9 + $0xa38] sm:$0xff] }
 0x4b0   : > { %9079 = vmatprep.subr.bf16.mxu0 %v11031_v26  ;;  %v11135_v3 = vcombine.high %v746_v25, %v750_v63  ;;  %v818_v27 = vld [vmem:[%s13154_s9 + $0xc58] sm:$0xff]  ;;  %v11134_v26 = vcombine.low %v746_v25, %v750_v63 }
 0x4b1   : > { %9103 = vmatpush1.bf16.msra.mxu1 %v11086_v31  ;;  %v822_v55 = vld [vmem:[%s13154_s9 + $0xc78] sm:$0xff]  ;;  %v11198_v31 = vcombine.low %v810_v14, %v814_v29 }
 0x4b2   : > { %9104 = vmatprep.subr.bf16.mxu1 %v11095_v51  ;;  %v754_v32 = vld [vmem:[%s13154_s9 + $0xa58] sm:$0xff]  ;;  %v11207_v51 = vcombine.high %v818_v27, %v822_v55 }
 0x4b3   : > { %9080 = vmatpush1.bf16.msra.mxu0 %v11030_v28  ;;  %v758_v17 = vld [vmem:[%s13154_s9 + $0xa78] sm:$0xff] }
 0x4b4   : > { %9081 = vmatprep.subr.bf16.mxu0 %v11039_v20  ;;  %v11143_v42 = vcombine.high %v754_v32, %v758_v17  ;;  %v826_v59 = vld [vmem:[%s13154_s9 + $0xc98] sm:$0xff]  ;;  %v11142_v20 = vcombine.low %v754_v32, %v758_v17 }
 0x4b5   : > { %9105 = vmatpush1.bf16.msra.mxu1 %v11094_v44  ;;  %v830_v39 = vld [vmem:[%s13154_s9 + $0xcb8] sm:$0xff]  ;;  %v11206_v44 = vcombine.low %v818_v27, %v822_v55 }
 0x4b6   : > { %9106 = vmatprep.subr.bf16.mxu1 %v11103_v46  ;;  %v762_v12 = vld [vmem:[%s13154_s9 + $0xa98] sm:$0xff]  ;;  %v11215_v46 = vcombine.high %v826_v59, %v830_v39 }
 0x4b7   : > { %9082 = vmatpush1.bf16.msra.mxu0 %v11038_v57  ;;  %v766_v28 = vld [vmem:[%s13154_s9 + $0xab8] sm:$0xff]  ;;  %v11214_v57 = vcombine.low %v826_v59, %v830_v39 }
 0x4b8   : > { %9083 = vmatprep.subr.bf16.mxu0 %v11047_v58  ;;  %v11151_v47 = vcombine.high %v762_v12, %v766_v28  ;;  %v834_v36 = vld [vmem:[%s13154_s9 + $0xcd8] sm:$0xff] }
 0x4b9   : > { %9107 = vmatpush1.bf16.msra.mxu1 %v11102_v38  ;;  %v838_v53 = vld [vmem:[%s13154_s9 + $0xcf8] sm:$0xff]  ;;  %v11150_v38 = vcombine.low %v762_v12, %v766_v28 }
 0x4ba   : > { %9108 = vmatprep.subr.bf16.mxu1 %v11111_v61  ;;  %v770_v34 = vld [vmem:[%s13154_s9 + $0xad8] sm:$0xff]  ;;  %v11222_v49 = vcombine.low %v834_v36, %v838_v53 }
 0x4bb   : > { %9084 = vmatpush1.bf16.msra.mxu0 %v11046_v1  ;;  %v842_v61 = vld [vmem:[%s13154_s9 + $0xd18] sm:$0xff] }
 0x4bc   : > { %9085 = vmatprep.subr.bf16.mxu0 %v11055_v40  ;;  %v846_v60 = vld [vmem:[%s13154_s9 + $0xd38] sm:$0xff] }
 0x4bd   : > { %9109 = vmatpush1.bf16.msra.mxu1 %v11110_v4  ;;  %v778_v62 = vld [vmem:[%s13154_s9 + $0xb18] sm:$0xff]  ;;  %v11231_v4 = vcombine.high %v842_v61, %v846_v60  ;;  %v11230_v13 = vcombine.low %v842_v61, %v846_v60 }
 0x4be   : > { %9110 = vmatprep.subr.bf16.mxu1 %v11119_v6  ;;  %v782_v0 = vld [vmem:[%s13154_s9 + $0xb38] sm:$0xff] }
 0x4bf   : > { %9086 = vmatpush1.bf16.msra.mxu0 %v11054_v15  ;;  %v11167_v40 = vcombine.high %v778_v62, %v782_v0  ;;  %v850_v6 = vld [vmem:[%s13154_s9 + $0xd58] sm:$0xff]  ;;  %v11166_v15 = vcombine.low %v778_v62, %v782_v0 }
 0x4c0   : > { %9087 = vmatprep.subr.bf16.mxu0 %v11063_v43  ;;  %v854_v7 = vld [vmem:[%s13154_s9 + $0xd78] sm:$0xff] }
 0x4c1   : > { %9111 = vmatpush1.bf16.msra.mxu1 %v11118_v18  ;;  %v786_v45 = vld [vmem:[%s13154_s9 + $0xb58] sm:$0xff]  ;;  %v11239_v18 = vcombine.high %v850_v6, %v854_v7  ;;  %v11238_v63 = vcombine.low %v850_v6, %v854_v7 }
 0x4c2   : > { %9112 = vmatprep.subr.bf16.mxu1 %v11127_v24  ;;  %v790_v56 = vld [vmem:[%s13154_s9 + $0xb78] sm:$0xff] }
 0x4c3   : > { %9088 = vmatpush1.bf16.msra.mxu0 %v11062_v54  ;;  %v11175_v43 = vcombine.high %v786_v45, %v790_v56  ;;  %v858_v24 = vld [vmem:[%s13154_s9 + $0xd98] sm:$0xff]  ;;  %v11174_v54 = vcombine.low %v786_v45, %v790_v56 }
 0x4c4   : > { %9139 = vmatprep.subr.bf16.mxu0 %v11199_v22  ;;  %v862_v14 = vld [vmem:[%s13154_s9 + $0xdb8] sm:$0xff] }
 0x4c5   : > { %9113 = vmatpush1.bf16.msra.mxu1 %v11126_v35  ;;  %v794_v29 = vld [vmem:[%s13154_s9 + $0xb98] sm:$0xff]  ;;  %v11247_v35 = vcombine.high %v858_v24, %v862_v14  ;;  %v11246_v12 = vcombine.low %v858_v24, %v862_v14 }
 0x4c6   : > { %9114 = vmatprep.subr.bf16.mxu1 %v11135_v3  ;;  %9090 = vmatmul.mubr.bf16.vlgmr.msra.gmra.mrb[60].mxu0 %v13271_v21  ;;  %v774_v21 = vld [vmem:[%s13154_s9 + $0xaf8] sm:$0xff] }
 0x4c7   : > { %9140 = vmatpush1.bf16.msra.mxu0 %v11198_v31  ;;  %9171 = vmatprep.mubr.bf16.mxu0 %v13287_v30  ;;  %v11223_v30 = vcombine.high %v834_v36, %v838_v53  ;;  %v11159_v58 = vcombine.high %v770_v34, %v774_v21  ;;  %v11158_v1 = vcombine.low %v770_v34, %v774_v21  ;;  %v798_v25 = vld [vmem:[%s13154_s9 + $0xbb8] sm:$0xff] }
 0x4c8   : > { %9141 = vmatprep.subr.bf16.mxu0 %v11207_v51  ;;  %v11183_v3 = vcombine.high %v794_v29, %v798_v25  ;;  %v866_v27 = vld [vmem:[%s13154_s9 + $0xdd8] sm:$0xff] }
 0x4c9   : > { %9115 = vmatpush1.bf16.msra.mxu1 %v11134_v26  ;;  %v870_v55 = vld [vmem:[%s13154_s9 + $0xdf8] sm:$0xff] }
 0x4ca   : > { %9116 = vmatprep.subr.bf16.mxu1 %v11143_v42  ;;  %v802_v26 = vld [vmem:[%s13154_s9 + $0xbd8] sm:$0xff] }
 0x4cb   : > { %9142 = vmatpush1.bf16.msra.mxu0 %v11206_v44  ;;  %v806_v51 = vld [vmem:[%s13154_s9 + $0xbf8] sm:$0xff] }
 0x4cc   : > { %9143 = vmatprep.subr.bf16.mxu0 %v11215_v46  ;;  %v11255_v46 = vcombine.high %v866_v27, %v870_v55  ;;  %v11191_v36 = vcombine.high %v802_v26, %v806_v51  ;;  %v874_v53 = vld [vmem:[%s13154_s9 + $0xe18] sm:$0xff] }
 0x4cd   : > { %9117 = vmatpush1.bf16.msra.mxu1 %v11142_v20  ;;  %v878_v34 = vld [vmem:[%s13154_s9 + $0xe38] sm:$0xff] }
 0x4ce   : > { %9118 = vmatprep.subr.bf16.mxu1 %v11151_v47  ;;  %v938_v21 = vld [vmem:[%s13154_s9 + $0x1018] sm:$0xff] }
 0x4cf   : > { %9144 = vmatpush1.bf16.msra.mxu0 %v11214_v57  ;;  %v942_v57 = vld [vmem:[%s13154_s9 + $0x1038] sm:$0xff] }
 0x4d0   : > { %9145 = vmatprep.subr.bf16.mxu0 %v11223_v30  ;;  %v11190_v30 = vcombine.low %v802_v26, %v806_v51  ;;  %v11327_v61 = vcombine.high %v938_v21, %v942_v57  ;;  %v882_v60 = vld [vmem:[%s13154_s9 + $0xe58] sm:$0xff] }
 0x4d1   : > { %9119 = vmatpush1.bf16.msra.mxu1 %v11150_v38  ;;  %v11254_v38 = vcombine.low %v866_v27, %v870_v55  ;;  %v886_v62 = vld [vmem:[%s13154_s9 + $0xe78] sm:$0xff] }
 0x4d2   : > { %9120 = vmatprep.subr.bf16.mxu1 %v11159_v58  ;;  %v11263_v58 = vcombine.high %v874_v53, %v878_v34  ;;  %v946_v0 = vld [vmem:[%s13154_s9 + $0x1058] sm:$0xff] }
 0x4d3   : > { %9146 = vmatpush1.bf16.msra.mxu0 %v11222_v49  ;;  %v950_v49 = vld [vmem:[%s13154_s9 + $0x1078] sm:$0xff] }
 0x4d4   : > { %9147 = vmatprep.subr.bf16.mxu0 %v11231_v4  ;;  %v11326_v4 = vcombine.low %v938_v21, %v942_v57  ;;  %v11335_v6 = vcombine.high %v946_v0, %v950_v49  ;;  %v890_v7 = vld [vmem:[%s13154_s9 + $0xe98] sm:$0xff] }
 0x4d5   : > { %9121 = vmatpush1.bf16.msra.mxu1 %v11158_v1  ;;  %v11262_v1 = vcombine.low %v874_v53, %v878_v34  ;;  %v894_v45 = vld [vmem:[%s13154_s9 + $0xeb8] sm:$0xff] }
 0x4d6   : > { %9122 = vmatprep.subr.bf16.mxu1 %v11167_v40  ;;  %v11271_v40 = vcombine.high %v882_v60, %v886_v62  ;;  %v954_v56 = vld [vmem:[%s13154_s9 + $0x1098] sm:$0xff] }
 0x4d7   : > { %9148 = vmatpush1.bf16.msra.mxu0 %v11230_v13  ;;  %v958_v13 = vld [vmem:[%s13154_s9 + $0x10b8] sm:$0xff] }
 0x4d8   : > { %9149 = vmatprep.subr.bf16.mxu0 %v11239_v18  ;;  %v11334_v18 = vcombine.low %v946_v0, %v950_v49  ;;  %v11343_v24 = vcombine.high %v954_v56, %v958_v13  ;;  %v898_v14 = vld [vmem:[%s13154_s9 + $0xed8] sm:$0xff] }
 0x4d9   : > { %9123 = vmatpush1.bf16.msra.mxu1 %v11166_v15  ;;  %v8804_v22 = vpop.f32.mrb[48].mxu0  ;;  %v11270_v15 = vcombine.low %v882_v60, %v886_v62  ;;  %v910_v27 = vld [vmem:[%s13154_s9 + $0xf38] sm:$0xff] }
 0x4da   : > { %9124 = vmatprep.subr.bf16.mxu1 %v11175_v43  ;;  %v8805_v32 = vadd.f32 %v8804_v22, %v14379_v2  ;;  %v8806_v31 = vpop.f32.mrb[49].mxu0  ;;  %v11182_v2 = vcombine.low %v794_v29, %v798_v25  ;;  %v11279_v43 = vcombine.high %v890_v7, %v894_v45  ;;  %v902_v29 = vld [vmem:[%s13154_s9 + $0xef8] sm:$0xff] }
 0x4db   : > { %v8845_v17 = vpop.f32.mrb[48].mxu1  ;;  %v8807_v42 = vadd.f32 %v8806_v31, %v14381_v33  ;;  %v8808_v39 = vpop.f32.mrb[50].mxu0  ;;  %9150 = vmatpush1.bf16.msra.mxu0 %v11238_v63  ;;  %v962_v25 = vld [vmem:[%s13154_s9 + $0x10d8] sm:$0xff] }
 0x4dc   : > { %v8847_v59 = vpop.f32.mrb[49].mxu1  ;;  %v14453_v28 = vadd.f32 %v8845_v17, %v8805_v32  ;;  %v8809_v20 = vpop.f32.mrb[51].mxu0  ;;  %9151 = vmatprep.subr.bf16.mxu0 %v11247_v35  ;;  %v966_v63 = vld [vmem:[%s13154_s9 + $0x10f8] sm:$0xff]  ;;  %v11287_v35 = vcombine.high %v898_v14, %v902_v29 }
 0x4dd   : > { %v8849_v44 = vpop.f32.mrb[50].mxu1  ;;  %9125 = vmatpush1.bf16.msra.mxu1 %v11174_v54  ;;  %v14455_v47 = vadd.f32 %v8847_v59, %v8807_v42  ;;  %v11342_v54 = vcombine.low %v954_v56, %v958_v13  ;;  %v11351_v22 = vcombine.high %v962_v25, %v966_v63  ;;  %v970_v55 = vld [vmem:[%s13154_s9 + $0x1118] sm:$0xff]  ;;  %v11350_v17 = vcombine.low %v962_v25, %v966_v63 }
 0x4de   : > { %v8850_v33 = vpop.f32.mrb[51].mxu1  ;;  %9126 = vmatprep.subr.bf16.mxu1 %v11183_v3  ;;  %v906_v3 = vld [vmem:[%s13154_s9 + $0xf18] sm:$0xff] }
 0x4df   : > { %9152 = vmatpush1.bf16.msra.mxu0 %v11246_v12  ;;  %v974_v32 = vld [vmem:[%s13154_s9 + $0x1138] sm:$0xff]  ;;  %v11295_v31 = vcombine.high %v906_v3, %v910_v27  ;;  %v11294_v12 = vcombine.low %v906_v3, %v910_v27 }
 0x4e0   : > { %9153 = vmatprep.subr.bf16.mxu0 %v11255_v46  ;;  %v11359_v26 = vcombine.high %v970_v55, %v974_v32  ;;  %v914_v51 = vld [vmem:[%s13154_s9 + $0xf58] sm:$0xff]  ;;  %v11358_v44 = vcombine.low %v970_v55, %v974_v32 }
 0x4e1   : > { %9127 = vmatpush1.bf16.msra.mxu1 %v11182_v2  ;;  %v918_v42 = vld [vmem:[%s13154_s9 + $0xf78] sm:$0xff] }
 0x4e2   : > { %9128 = vmatprep.subr.bf16.mxu1 %v11191_v36  ;;  %v978_v59 = vld [vmem:[%s13154_s9 + $0x1158] sm:$0xff]  ;;  %v11303_v20 = vcombine.high %v914_v51, %v918_v42  ;;  %v11302_v34 = vcombine.low %v914_v51, %v918_v42 }
 0x4e3   : > { %9154 = vmatpush1.bf16.msra.mxu0 %v11254_v38  ;;  %v982_v39 = vld [vmem:[%s13154_s9 + $0x1178] sm:$0xff] }
 0x4e4   : > { %9155 = vmatprep.subr.bf16.mxu0 %v11263_v58  ;;  %v11367_v2 = vcombine.high %v978_v59, %v982_v39  ;;  %v922_v46 = vld [vmem:[%s13154_s9 + $0xf98] sm:$0xff]  ;;  %v11366_v21 = vcombine.low %v978_v59, %v982_v39 }
 0x4e5   : > { %9129 = vmatpush1.bf16.msra.mxu1 %v11190_v30  ;;  %v926_v33 = vld [vmem:[%s13154_s9 + $0xfb8] sm:$0xff] }
 0x4e6   : > { %9180 = vmatprep.subr.bf16.mxu1 %v11327_v61  ;;  %v986_v36 = vld [vmem:[%s13154_s9 + $0x1198] sm:$0xff]  ;;  %v11311_v57 = vcombine.high %v922_v46, %v926_v33  ;;  %v11310_v62 = vcombine.low %v922_v46, %v926_v33 }
 0x4e7   : > { %9156 = vmatpush1.bf16.msra.mxu0 %v11262_v1  ;;  %v990_v53 = vld [vmem:[%s13154_s9 + $0x11b8] sm:$0xff] }
 0x4e8   : > { %9131 = vmatmul.mubr.bf16.vlgmr.msra.gmra.mrb[64].mxu1 %v13352_v37  ;;  %9157 = vmatprep.subr.bf16.mxu0 %v11271_v40  ;;  %v11278_v37 = vcombine.low %v890_v7, %v894_v45  ;;  %v11375_v38 = vcombine.high %v986_v36, %v990_v53  ;;  %v930_v30 = vld [vmem:[%s13154_s9 + $0xfd8] sm:$0xff]  ;;  %v11374_v0 = vcombine.low %v986_v36, %v990_v53 }
 0x4e9   : > { %9181 = vmatpush1.bf16.msra.mxu1 %v11326_v4  ;;  %9212 = vmatprep.mubr.bf16.mxu1 %v13370_v48  ;;  %v11286_v48 = vcombine.low %v898_v14, %v902_v29  ;;  %v934_v58 = vld [vmem:[%s13154_s9 + $0xff8] sm:$0xff] }
 0x4ea   : > { %9182 = vmatprep.subr.bf16.mxu1 %v11335_v6  ;;  %v994_v61 = vld [vmem:[%s13154_s9 + $0x11d8] sm:$0xff]  ;;  %v11319_v49 = vcombine.high %v930_v30, %v934_v58  ;;  %v11318_v45 = vcombine.low %v930_v30, %v934_v58 }
 0x4eb   : > { %9158 = vmatpush1.bf16.msra.mxu0 %v11270_v15  ;;  %v998_v60 = vld [vmem:[%s13154_s9 + $0x11f8] sm:$0xff] }
 0x4ec   : > { %9159 = vmatprep.subr.bf16.mxu0 %v11279_v43  ;;  %v11383_v1 = vcombine.high %v994_v61, %v998_v60  ;;  %v1066_v4 = vld [vmem:[%s13154_s9 + $0x1418] sm:$0xff]  ;;  %v11382_v56 = vcombine.low %v994_v61, %v998_v60 }
 0x4ed   : > { %9183 = vmatpush1.bf16.msra.mxu1 %v11334_v18  ;;  %v1070_v40 = vld [vmem:[%s13154_s9 + $0x1438] sm:$0xff] }
 0x4ee   : > { %9184 = vmatprep.subr.bf16.mxu1 %v11343_v24  ;;  %v1002_v6 = vld [vmem:[%s13154_s9 + $0x1218] sm:$0xff]  ;;  %v11455_v13 = vcombine.high %v1066_v4, %v1070_v40  ;;  %v11454_v29 = vcombine.low %v1066_v4, %v1070_v40 }
 0x4ef   : > { %9160 = vmatpush1.bf16.msra.mxu0 %v11278_v37  ;;  %v1006_v7 = vld [vmem:[%s13154_s9 + $0x1238] sm:$0xff] }
 0x4f0   : > { %9161 = vmatprep.subr.bf16.mxu0 %v11287_v35  ;;  %v11391_v15 = vcombine.high %v1002_v6, %v1006_v7  ;;  %v1074_v18 = vld [vmem:[%s13154_s9 + $0x1458] sm:$0xff]  ;;  %v11390_v25 = vcombine.low %v1002_v6, %v1006_v7 }
 0x4f1   : > { %9185 = vmatpush1.bf16.msra.mxu1 %v11342_v54  ;;  %v1078_v43 = vld [vmem:[%s13154_s9 + $0x1478] sm:$0xff] }
 0x4f2   : > { %9186 = vmatprep.subr.bf16.mxu1 %v11351_v22  ;;  %v1010_v24 = vld [vmem:[%s13154_s9 + $0x1258] sm:$0xff]  ;;  %v11463_v63 = vcombine.high %v1074_v18, %v1078_v43  ;;  %v11462_v27 = vcombine.low %v1074_v18, %v1078_v43 }
 0x4f3   : > { %9162 = vmatpush1.bf16.msra.mxu0 %v11286_v48  ;;  %v1014_v14 = vld [vmem:[%s13154_s9 + $0x1278] sm:$0xff] }
 0x4f4   : > { %9163 = vmatprep.subr.bf16.mxu0 %v11295_v31  ;;  %v11399_v37 = vcombine.high %v1010_v24, %v1014_v14  ;;  %v1082_v54 = vld [vmem:[%s13154_s9 + $0x1498] sm:$0xff]  ;;  %v11398_v55 = vcombine.low %v1010_v24, %v1014_v14 }
 0x4f5   : > { %9187 = vmatpush1.bf16.msra.mxu1 %v11350_v17  ;;  %v1086_v35 = vld [vmem:[%s13154_s9 + $0x14b8] sm:$0xff] }
 0x4f6   : > { %9188 = vmatprep.subr.bf16.mxu1 %v11359_v26  ;;  %v1018_v22 = vld [vmem:[%s13154_s9 + $0x1298] sm:$0xff]  ;;  %v11471_v32 = vcombine.high %v1082_v54, %v1086_v35  ;;  %v11470_v51 = vcombine.low %v1082_v54, %v1086_v35 }
 0x4f7   : > { %9164 = vmatpush1.bf16.msra.mxu0 %v11294_v12  ;;  %v1022_v3 = vld [vmem:[%s13154_s9 + $0x12b8] sm:$0xff] }
 0x4f8   : > { %9165 = vmatprep.subr.bf16.mxu0 %v11303_v20  ;;  %v11407_v48 = vcombine.high %v1018_v22, %v1022_v3  ;;  %v1090_v17 = vld [vmem:[%s13154_s9 + $0x14d8] sm:$0xff]  ;;  %v11406_v42 = vcombine.low %v1018_v22, %v1022_v3 }
 0x4f9   : > { %9189 = vmatpush1.bf16.msra.mxu1 %v11358_v44  ;;  %v1094_v31 = vld [vmem:[%s13154_s9 + $0x14f8] sm:$0xff] }
 0x4fa   : > { %9190 = vmatprep.subr.bf16.mxu1 %v11367_v2  ;;  %v1026_v26 = vld [vmem:[%s13154_s9 + $0x12d8] sm:$0xff]  ;;  %v11478_v2 = vcombine.low %v1090_v17, %v1094_v31 }
 0x4fb   : > { %9166 = vmatpush1.bf16.msra.mxu0 %v11302_v34  ;;  %v1098_v39 = vld [vmem:[%s13154_s9 + $0x1518] sm:$0xff] }
 0x4fc   : > { %9167 = vmatprep.subr.bf16.mxu0 %v11311_v57  ;;  %v1102_v12 = vld [vmem:[%s13154_s9 + $0x1538] sm:$0xff] }
 0x4fd   : > { %9191 = vmatpush1.bf16.msra.mxu1 %v11366_v21  ;;  %v1034_v44 = vld [vmem:[%s13154_s9 + $0x1318] sm:$0xff]  ;;  %v11487_v33 = vcombine.high %v1098_v39, %v1102_v12 }
 0x4fe   : > { %9192 = vmatprep.subr.bf16.mxu1 %v11375_v38  ;;  %v1038_v20 = vld [vmem:[%s13154_s9 + $0x1338] sm:$0xff]  ;;  %v11486_v38 = vcombine.low %v1098_v39, %v1102_v12 }
 0x4ff   : > { %9168 = vmatpush1.bf16.msra.mxu0 %v11310_v62  ;;  %v11423_v36 = vcombine.high %v1034_v44, %v1038_v20  ;;  %v1106_v53 = vld [vmem:[%s13154_s9 + $0x1558] sm:$0xff]  ;;  %v11422_v30 = vcombine.low %v1034_v44, %v1038_v20 }
 0x500   : > { %9169 = vmatprep.subr.bf16.mxu0 %v11319_v49  ;;  %v1110_v34 = vld [vmem:[%s13154_s9 + $0x1578] sm:$0xff] }
 0x501   : > { %9193 = vmatpush1.bf16.msra.mxu1 %v11374_v0  ;;  %v1042_v21 = vld [vmem:[%s13154_s9 + $0x1358] sm:$0xff]  ;;  %v11495_v58 = vcombine.high %v1106_v53, %v1110_v34 }
 0x502   : > { %9194 = vmatprep.subr.bf16.mxu1 %v11383_v1  ;;  %v1046_v57 = vld [vmem:[%s13154_s9 + $0x1378] sm:$0xff]  ;;  %v11494_v1 = vcombine.low %v1106_v53, %v1110_v34 }
 0x503   : > { %9170 = vmatpush1.bf16.msra.mxu0 %v11318_v45  ;;  %v11431_v61 = vcombine.high %v1042_v21, %v1046_v57  ;;  %v1114_v60 = vld [vmem:[%s13154_s9 + $0x1598] sm:$0xff]  ;;  %v11430_v4 = vcombine.low %v1042_v21, %v1046_v57 }
 0x504   : > { %9221 = vmatprep.subr.bf16.mxu0 %v11455_v13  ;;  %v1118_v62 = vld [vmem:[%s13154_s9 + $0x15b8] sm:$0xff] }
 0x505   : > { %9195 = vmatpush1.bf16.msra.mxu1 %v11382_v56  ;;  %v1050_v0 = vld [vmem:[%s13154_s9 + $0x1398] sm:$0xff]  ;;  %v11503_v40 = vcombine.high %v1114_v60, %v1118_v62 }
 0x506   : > { %9196 = vmatprep.subr.bf16.mxu1 %v11391_v15  ;;  %9172 = vmatmul.mubr.bf16.vlgmr.msra.gmra.mrb[64].mxu0 %v13361_v41  ;;  %v1030_v41 = vld [vmem:[%s13154_s9 + $0x12f8] sm:$0xff] }
 0x507   : > { %9222 = vmatpush1.bf16.msra.mxu0 %v11454_v29  ;;  %9253 = vmatprep.mubr.bf16.mxu0 %v13377_v50  ;;  %v11479_v50 = vcombine.high %v1090_v17, %v1094_v31  ;;  %v11415_v59 = vcombine.high %v1026_v26, %v1030_v41  ;;  %v11414_v46 = vcombine.low %v1026_v26, %v1030_v41  ;;  %v1054_v49 = vld [vmem:[%s13154_s9 + $0x13b8] sm:$0xff] }
 0x508   : > { %9223 = vmatprep.subr.bf16.mxu0 %v11463_v63  ;;  %v11439_v7 = vcombine.high %v1050_v0, %v1054_v49  ;;  %v1122_v45 = vld [vmem:[%s13154_s9 + $0x15d8] sm:$0xff]  ;;  %v11502_v63 = vcombine.low %v1114_v60, %v1118_v62 }
 0x509   : > { %9197 = vmatpush1.bf16.msra.mxu1 %v11390_v25  ;;  %v1126_v56 = vld [vmem:[%s13154_s9 + $0x15f8] sm:$0xff] }
 0x50a   : > { %9198 = vmatprep.subr.bf16.mxu1 %v11399_v37  ;;  %v1058_v43 = vld [vmem:[%s13154_s9 + $0x13d8] sm:$0xff]  ;;  %v11511_v22 = vcombine.high %v1122_v45, %v1126_v56  ;;  %v11510_v31 = vcombine.low %v1122_v45, %v1126_v56 }
 0x50b   : > { %9224 = vmatpush1.bf16.msra.mxu0 %v11462_v27  ;;  %v1062_v24 = vld [vmem:[%s13154_s9 + $0x13f8] sm:$0xff] }
 0x50c   : > { %9225 = vmatprep.subr.bf16.mxu0 %v11471_v32  ;;  %v11447_v27 = vcombine.high %v1058_v43, %v1062_v24  ;;  %v1134_v32 = vld [vmem:[%s13154_s9 + $0x1638] sm:$0xff]  ;;  %v11446_v26 = vcombine.low %v1058_v43, %v1062_v24 }
 0x50d   : > { %9199 = vmatpush1.bf16.msra.mxu1 %v11398_v55  ;;  %v1130_v55 = vld [vmem:[%s13154_s9 + $0x1618] sm:$0xff] }
 0x50e   : > { %9200 = vmatprep.subr.bf16.mxu1 %v11407_v48  ;;  %v1194_v48 = vld [vmem:[%s13154_s9 + $0x1818] sm:$0xff]  ;;  %v11519_v41 = vcombine.high %v1130_v55, %v1134_v32  ;;  %v11518_v12 = vcombine.low %v1130_v55, %v1134_v32 }
 0x50f   : > { %9226 = vmatpush1.bf16.msra.mxu0 %v11470_v51  ;;  %v1198_v17 = vld [vmem:[%s13154_s9 + $0x1838] sm:$0xff] }
 0x510   : > { %9227 = vmatprep.subr.bf16.mxu0 %v11479_v50  ;;  %v11583_v51 = vcombine.high %v1194_v48, %v1198_v17  ;;  %v1142_v50 = vld [vmem:[%s13154_s9 + $0x1678] sm:$0xff]  ;;  %v11582_v44 = vcombine.low %v1194_v48, %v1198_v17 }
 0x511   : > { %9201 = vmatpush1.bf16.msra.mxu1 %v11406_v42  ;;  %v1138_v42 = vld [vmem:[%s13154_s9 + $0x1658] sm:$0xff] }
 0x512   : > { %9202 = vmatprep.subr.bf16.mxu1 %v11415_v59  ;;  %v1202_v59 = vld [vmem:[%s13154_s9 + $0x1858] sm:$0xff]  ;;  %v11527_v20 = vcombine.high %v1138_v42, %v1142_v50  ;;  %v11526_v34 = vcombine.low %v1138_v42, %v1142_v50 }
 0x513   : > { %9228 = vmatpush1.bf16.msra.mxu0 %v11478_v2  ;;  %v1206_v39 = vld [vmem:[%s13154_s9 + $0x1878] sm:$0xff] }
 0x514   : > { %9229 = vmatprep.subr.bf16.mxu0 %v11487_v33  ;;  %v11591_v2 = vcombine.high %v1202_v59, %v1206_v39  ;;  %v1150_v33 = vld [vmem:[%s13154_s9 + $0x16b8] sm:$0xff]  ;;  %v11590_v21 = vcombine.low %v1202_v59, %v1206_v39 }
 0x515   : > { %9203 = vmatpush1.bf16.msra.mxu1 %v11414_v46  ;;  %v1146_v46 = vld [vmem:[%s13154_s9 + $0x1698] sm:$0xff] }
 0x516   : > { %9204 = vmatprep.subr.bf16.mxu1 %v11423_v36  ;;  %v1210_v36 = vld [vmem:[%s13154_s9 + $0x1898] sm:$0xff]  ;;  %v11535_v57 = vcombine.high %v1146_v46, %v1150_v33 }
 0x517   : > { %9230 = vmatpush1.bf16.msra.mxu0 %v11486_v38  ;;  %v1214_v53 = vld [vmem:[%s13154_s9 + $0x18b8] sm:$0xff] }
 0x518   : > { %9231 = vmatprep.subr.bf16.mxu0 %v11495_v58  ;;  %v11599_v38 = vcombine.high %v1210_v36, %v1214_v53  ;;  %v1158_v58 = vld [vmem:[%s13154_s9 + $0x16f8] sm:$0xff]  ;;  %v11598_v62 = vcombine.low %v1210_v36, %v1214_v53 }
 0x519   : > { %9205 = vmatpush1.bf16.msra.mxu1 %v11422_v30  ;;  %v8886_v6 = vpop.f32.mrb[52].mxu0  ;;  %v1154_v30 = vld [vmem:[%s13154_s9 + $0x16d8] sm:$0xff] }
 0x51a   : > { %9206 = vmatprep.subr.bf16.mxu1 %v11431_v61  ;;  %v8887_v13 = vadd.f32 %v8886_v6, %v14453_v28  ;;  %v8888_v18 = vpop.f32.mrb[53].mxu0  ;;  %v11438_v28 = vcombine.low %v1050_v0, %v1054_v49  ;;  %v1218_v61 = vld [vmem:[%s13154_s9 + $0x18d8] sm:$0xff]  ;;  %v11543_v0 = vcombine.high %v1154_v30, %v1158_v58 }
 0x51b   : > { %v8927_v15 = vpop.f32.mrb[52].mxu1  ;;  %v8889_v14 = vadd.f32 %v8888_v18, %v14455_v47  ;;  %v8890_v25 = vpop.f32.mrb[54].mxu0  ;;  %9232 = vmatpush1.bf16.msra.mxu0 %v11494_v1  ;;  %v1222_v60 = vld [vmem:[%s13154_s9 + $0x18f8] sm:$0xff] }
 0x51c   : > { %v8929_v29 = vpop.f32.mrb[53].mxu1  ;;  %v14527_v37 = vadd.f32 %v8927_v15, %v8887_v13  ;;  %v8891_v35 = vpop.f32.mrb[55].mxu0  ;;  %9233 = vmatprep.subr.bf16.mxu0 %v11503_v40  ;;  %v11607_v49 = vcombine.high %v1218_v61, %v1222_v60  ;;  %v1162_v1 = vld [vmem:[%s13154_s9 + $0x1718] sm:$0xff] }
 0x51d   : > { %v8931_v54 = vpop.f32.mrb[54].mxu1  ;;  %9207 = vmatpush1.bf16.msra.mxu1 %v11430_v4  ;;  %v14529_v3 = vadd.f32 %v8929_v29, %v8889_v14  ;;  %v1166_v4 = vld [vmem:[%s13154_s9 + $0x1738] sm:$0xff] }
 0x51e   : > { %v8932_v47 = vpop.f32.mrb[55].mxu1  ;;  %9208 = vmatprep.subr.bf16.mxu1 %v11439_v7  ;;  %v1226_v40 = vld [vmem:[%s13154_s9 + $0x1918] sm:$0xff]  ;;  %v11606_v7 = vcombine.low %v1218_v61, %v1222_v60  ;;  %v11551_v45 = vcombine.high %v1162_v1, %v1166_v4  ;;  %v11550_v24 = vcombine.low %v1162_v1, %v1166_v4 }
 0x51f   : > { %9234 = vmatpush1.bf16.msra.mxu0 %v11502_v63  ;;  %v1230_v6 = vld [vmem:[%s13154_s9 + $0x1938] sm:$0xff] }
 0x520   : > { %9235 = vmatprep.subr.bf16.mxu0 %v11511_v22  ;;  %v11615_v56 = vcombine.high %v1226_v40, %v1230_v6  ;;  %v1170_v13 = vld [vmem:[%s13154_s9 + $0x1758] sm:$0xff]  ;;  %v11614_v14 = vcombine.low %v1226_v40, %v1230_v6 }
 0x521   : > { %9209 = vmatpush1.bf16.msra.mxu1 %v11438_v28  ;;  %v1174_v15 = vld [vmem:[%s13154_s9 + $0x1778] sm:$0xff] }
 0x522   : > { %9210 = vmatprep.subr.bf16.mxu1 %v11447_v27  ;;  %v1234_v18 = vld [vmem:[%s13154_s9 + $0x1958] sm:$0xff]  ;;  %v11559_v29 = vcombine.high %v1170_v13, %v1174_v15  ;;  %v11558_v22 = vcombine.low %v1170_v13, %v1174_v15 }
 0x523   : > { %9236 = vmatpush1.bf16.msra.mxu0 %v11510_v31  ;;  %v1238_v43 = vld [vmem:[%s13154_s9 + $0x1978] sm:$0xff] }
 0x524   : > { %9237 = vmatprep.subr.bf16.mxu0 %v11519_v41  ;;  %v11623_v25 = vcombine.high %v1234_v18, %v1238_v43  ;;  %v1178_v63 = vld [vmem:[%s13154_s9 + $0x1798] sm:$0xff]  ;;  %v11622_v47 = vcombine.low %v1234_v18, %v1238_v43 }
 0x525   : > { %9211 = vmatpush1.bf16.msra.mxu1 %v11446_v26  ;;  %v1182_v54 = vld [vmem:[%s13154_s9 + $0x17b8] sm:$0xff] }
 0x526   : > { %9262 = vmatprep.subr.bf16.mxu1 %v11583_v51  ;;  %v1242_v35 = vld [vmem:[%s13154_s9 + $0x1998] sm:$0xff]  ;;  %v11567_v27 = vcombine.high %v1178_v63, %v1182_v54  ;;  %v11566_v51 = vcombine.low %v1178_v63, %v1182_v54 }
 0x527   : > { %9238 = vmatpush1.bf16.msra.mxu0 %v11518_v12  ;;  %v1246_v28 = vld [vmem:[%s13154_s9 + $0x19b8] sm:$0xff] }
 0x528   : > { %9213 = vmatmul.mubr.bf16.vlgmr.msra.gmra.mrb[68].mxu1 %v13442_v5  ;;  %9239 = vmatprep.subr.bf16.mxu0 %v11527_v20  ;;  %v11534_v5 = vcombine.low %v1146_v46, %v1150_v33  ;;  %v11631_v55 = vcombine.high %v1242_v35, %v1246_v28  ;;  %v1186_v32 = vld [vmem:[%s13154_s9 + $0x17d8] sm:$0xff]  ;;  %v11630_v50 = vcombine.low %v1242_v35, %v1246_v28 }
 0x529   : > { %9263 = vmatpush1.bf16.msra.mxu1 %v11582_v44  ;;  %9294 = vmatprep.mubr.bf16.mxu1 %v13460_v16  ;;  %v11542_v16 = vcombine.low %v1154_v30, %v1158_v58  ;;  %v1190_v48 = vld [vmem:[%s13154_s9 + $0x17f8] sm:$0xff] }
 0x52a   : > { %9264 = vmatprep.subr.bf16.mxu1 %v11591_v2  ;;  %v1250_v31 = vld [vmem:[%s13154_s9 + $0x19d8] sm:$0xff]  ;;  %v11575_v59 = vcombine.high %v1186_v32, %v1190_v48  ;;  %v11574_v33 = vcombine.low %v1186_v32, %v1190_v48 }
 0x52b   : > { %9240 = vmatpush1.bf16.msra.mxu0 %v11526_v34  ;;  %v1254_v26 = vld [vmem:[%s13154_s9 + $0x19f8] sm:$0xff] }
 0x52c   : > { %9241 = vmatprep.subr.bf16.mxu0 %v11535_v57  ;;  %v11639_v12 = vcombine.high %v1250_v31, %v1254_v26  ;;  %v1322_v44 = vld [vmem:[%s13154_s9 + $0x1c18] sm:$0xff]  ;;  %v11638_v36 = vcombine.low %v1250_v31, %v1254_v26 }
 0x52d   : > { %9265 = vmatpush1.bf16.msra.mxu1 %v11590_v21  ;;  %v1326_v20 = vld [vmem:[%s13154_s9 + $0x1c38] sm:$0xff] }
 0x52e   : > { %9266 = vmatprep.subr.bf16.mxu1 %v11599_v38  ;;  %v1258_v2 = vld [vmem:[%s13154_s9 + $0x1a18] sm:$0xff]  ;;  %v11711_v53 = vcombine.high %v1322_v44, %v1326_v20  ;;  %v11710_v58 = vcombine.low %v1322_v44, %v1326_v20 }
 0x52f   : > { %9242 = vmatpush1.bf16.msra.mxu0 %v11534_v5  ;;  %v1262_v46 = vld [vmem:[%s13154_s9 + $0x1a38] sm:$0xff] }
 0x530   : > { %9243 = vmatprep.subr.bf16.mxu0 %v11543_v0  ;;  %v11647_v34 = vcombine.high %v1258_v2, %v1262_v46  ;;  %v1330_v21 = vld [vmem:[%s13154_s9 + $0x1c58] sm:$0xff]  ;;  %v11646_v61 = vcombine.low %v1258_v2, %v1262_v46 }
 0x531   : > { %9267 = vmatpush1.bf16.msra.mxu1 %v11598_v62  ;;  %v1334_v57 = vld [vmem:[%s13154_s9 + $0x1c78] sm:$0xff] }
 0x532   : > { %9268 = vmatprep.subr.bf16.mxu1 %v11607_v49  ;;  %v1266_v38 = vld [vmem:[%s13154_s9 + $0x1a58] sm:$0xff]  ;;  %v11719_v60 = vcombine.high %v1330_v21, %v1334_v57  ;;  %v11718_v4 = vcombine.low %v1330_v21, %v1334_v57  ;;  %v409_v21 = vld [vmem:[#allocation2 + $0x20] sm:$0xff] }
 0x533   : > { %9244 = vmatpush1.bf16.msra.mxu0 %v11542_v16  ;;  %v1270_v30 = vld [vmem:[%s13154_s9 + $0x1a78] sm:$0xff] }
 0x534   : > { %9245 = vmatprep.subr.bf16.mxu0 %v11551_v45  ;;  %v11655_v5 = vcombine.high %v1266_v38, %v1270_v30  ;;  %v1338_v62 = vld [vmem:[%s13154_s9 + $0x1c98] sm:$0xff]  ;;  %v11654_v40 = vcombine.low %v1266_v38, %v1270_v30 }
 0x535   : > { %9269 = vmatpush1.bf16.msra.mxu1 %v11606_v7  ;;  %v1342_v0 = vld [vmem:[%s13154_s9 + $0x1cb8] sm:$0xff] }
 0x536   : > { %9270 = vmatprep.subr.bf16.mxu1 %v11615_v56  ;;  %v1274_v49 = vld [vmem:[%s13154_s9 + $0x1a98] sm:$0xff]  ;;  %v11727_v6 = vcombine.high %v1338_v62, %v1342_v0  ;;  %v11726_v13 = vcombine.low %v1338_v62, %v1342_v0 }
 0x537   : > { %9246 = vmatpush1.bf16.msra.mxu0 %v11550_v24  ;;  %v1278_v1 = vld [vmem:[%s13154_s9 + $0x1ab8] sm:$0xff] }
 0x538   : > { %9247 = vmatprep.subr.bf16.mxu0 %v11559_v29  ;;  %v11663_v16 = vcombine.high %v1274_v49, %v1278_v1  ;;  %v1346_v7 = vld [vmem:[%s13154_s9 + $0x1cd8] sm:$0xff]  ;;  %v11662_v15 = vcombine.low %v1274_v49, %v1278_v1 }
 0x539   : > { %9271 = vmatpush1.bf16.msra.mxu1 %v11614_v14  ;;  %v1350_v45 = vld [vmem:[%s13154_s9 + $0x1cf8] sm:$0xff] }
 0x53a   : > { %9272 = vmatprep.subr.bf16.mxu1 %v11623_v25  ;;  %v1282_v56 = vld [vmem:[%s13154_s9 + $0x1ad8] sm:$0xff]  ;;  %v11734_v25 = vcombine.low %v1346_v7, %v1350_v45 }
 0x53b   : > { %v14563_v17 = vpop.f32.mrb[56].mxu1  ;;  %9248 = vmatpush1.bf16.msra.mxu0 %v11558_v22  ;;  %v1354_v43 = vld [vmem:[%s13154_s9 + $0x1d18] sm:$0xff] }
 0x53c   : > { %v14567_v41 = vpop.f32.mrb[57].mxu1  ;;  %9249 = vmatprep.subr.bf16.mxu0 %v11567_v27  ;;  %v1358_v24 = vld [vmem:[%s13154_s9 + $0x1d38] sm:$0xff] }
 0x53d   : > { %v9013_v42 = vpop.f32.mrb[58].mxu1  ;;  %9273 = vmatpush1.bf16.msra.mxu1 %v11622_v47  ;;  %v1290_v14 = vld [vmem:[%s13154_s9 + $0x1b18] sm:$0xff]  ;;  %v11743_v54 = vcombine.high %v1354_v43, %v1358_v24 }
 0x53e   : > { %v9014_v39 = vpop.f32.mrb[59].mxu1  ;;  %9274 = vmatprep.subr.bf16.mxu1 %v11631_v55  ;;  %v1294_v29 = vld [vmem:[%s13154_s9 + $0x1b38] sm:$0xff]  ;;  %v11742_v55 = vcombine.low %v1354_v43, %v1358_v24 }
 0x53f   : > { %9250 = vmatpush1.bf16.msra.mxu0 %v11566_v51  ;;  %v11679_v35 = vcombine.high %v1290_v14, %v1294_v29  ;;  %v1362_v28 = vld [vmem:[%s13154_s9 + $0x1d58] sm:$0xff]  ;;  %v11678_v32 = vcombine.low %v1290_v14, %v1294_v29 }
 0x540   : > { %9251 = vmatprep.subr.bf16.mxu0 %v11575_v59  ;;  %v1366_v22 = vld [vmem:[%s13154_s9 + $0x1d78] sm:$0xff] }
 0x541   : > { %9275 = vmatpush1.bf16.msra.mxu1 %v11630_v50  ;;  %v1298_v47 = vld [vmem:[%s13154_s9 + $0x1b58] sm:$0xff]  ;;  %v11751_v48 = vcombine.high %v1362_v28, %v1366_v22  ;;  %v11750_v59 = vcombine.low %v1362_v28, %v1366_v22 }
 0x542   : > { %9276 = vmatprep.subr.bf16.mxu1 %v11639_v12  ;;  %v1302_v27 = vld [vmem:[%s13154_s9 + $0x1b78] sm:$0xff] }
 0x543   : > { %9252 = vmatpush1.bf16.msra.mxu0 %v11574_v33  ;;  %v11687_v31 = vcombine.high %v1298_v47, %v1302_v27  ;;  %v1370_v26 = vld [vmem:[%s13154_s9 + $0x1d98] sm:$0xff]  ;;  %v11686_v39 = vcombine.low %v1298_v47, %v1302_v27 }
 0x544   : > { %9303 = vmatprep.subr.bf16.mxu0 %v11711_v53  ;;  %v1374_v51 = vld [vmem:[%s13154_s9 + $0x1db8] sm:$0xff] }
 0x545   : > { %9277 = vmatpush1.bf16.msra.mxu1 %v11638_v36  ;;  %v1306_v42 = vld [vmem:[%s13154_s9 + $0x1b98] sm:$0xff]  ;;  %v11759_v12 = vcombine.high %v1370_v26, %v1374_v51  ;;  %v11758_v30 = vcombine.low %v1370_v26, %v1374_v51 }
 0x546   : > { %9278 = vmatprep.subr.bf16.mxu1 %v11647_v34  ;;  %9254 = vmatmul.mubr.bf16.vlgmr.msra.gmra.mrb[68].mxu0 %v13451_v9  ;;  %v1286_v9 = vld [vmem:[%s13154_s9 + $0x1af8] sm:$0xff] }
 0x547   : > { %9304 = vmatpush1.bf16.msra.mxu0 %v11710_v58  ;;  %9335 = vmatprep.mubr.bf16.mxu0 %v13467_v19  ;;  %v11735_v19 = vcombine.high %v1346_v7, %v1350_v45  ;;  %v11671_v18 = vcombine.high %v1282_v56, %v1286_v9  ;;  %v11670_v63 = vcombine.low %v1282_v56, %v1286_v9  ;;  %v1310_v50 = vld [vmem:[%s13154_s9 + $0x1bb8] sm:$0xff] }
 0x548   : > { %9305 = vmatprep.subr.bf16.mxu0 %v11719_v60  ;;  %v11695_v20 = vcombine.high %v1306_v42, %v1310_v50  ;;  %v1378_v2 = vld [vmem:[%s13154_s9 + $0x1dd8] sm:$0xff] }
 0x549   : > { %9279 = vmatpush1.bf16.msra.mxu1 %v11646_v61  ;;  %v1382_v46 = vld [vmem:[%s13154_s9 + $0x1df8] sm:$0xff]  ;;  %v410_v61 = vld [vmem:[#allocation2 + $0x28] sm:$0xff] }
 0x54a   : > { %9280 = vmatprep.subr.bf16.mxu1 %v11655_v5  ;;  %v1314_v53 = vld [vmem:[%s13154_s9 + $0x1bd8] sm:$0xff]  ;;  %v11694_v5 = vcombine.low %v1306_v42, %v1310_v50 }
 0x54b   : > { %9306 = vmatpush1.bf16.msra.mxu0 %v11718_v4  ;;  %v1318_v34 = vld [vmem:[%s13154_s9 + $0x1bf8] sm:$0xff] }
 0x54c   : > { %9307 = vmatprep.subr.bf16.mxu0 %v11727_v6  ;;  %v11703_v0 = vcombine.high %v1314_v53, %v1318_v34  ;;  %v1386_v49 = vld [vmem:[%s13154_s9 + $0x1e18] sm:$0xff]  ;;  %v11766_v6 = vcombine.low %v1378_v2, %v1382_v46 }
 0x54d   : > { %9281 = vmatpush1.bf16.msra.mxu1 %v11654_v40  ;;  %v1450_v4 = vld [vmem:[%s13154_s9 + $0x2018] sm:$0xff] }
 0x54e   : > { %9282 = vmatprep.subr.bf16.mxu1 %v11663_v16  ;;  %v1454_v40 = vld [vmem:[%s13154_s9 + $0x2038] sm:$0xff]  ;;  %v11702_v16 = vcombine.low %v1314_v53, %v1318_v34 }
 0x54f   : > { %9308 = vmatpush1.bf16.msra.mxu0 %v11726_v13  ;;  %v1394_v45 = vld [vmem:[%s13154_s9 + $0x1e58] sm:$0xff] }
 0x550   : > { %9309 = vmatprep.subr.bf16.mxu0 %v11735_v19  ;;  %v1398_v56 = vld [vmem:[%s13154_s9 + $0x1e78] sm:$0xff]  ;;  %v11838_v19 = vcombine.low %v1450_v4, %v1454_v40 }
 0x551   : > { %9283 = vmatpush1.bf16.msra.mxu1 %v11662_v15  ;;  %v1458_v9 = vld [vmem:[%s13154_s9 + $0x2058] sm:$0xff] }
 0x552   : > { %9284 = vmatprep.subr.bf16.mxu1 %v11671_v18  ;;  %v1462_v13 = vld [vmem:[%s13154_s9 + $0x2078] sm:$0xff]  ;;  %v11783_v18 = vcombine.high %v1394_v45, %v1398_v56 }
 0x553   : > { %9310 = vmatpush1.bf16.msra.mxu0 %v11734_v25  ;;  %v11847_v43 = vcombine.high %v1458_v9, %v1462_v13  ;;  %v1402_v24 = vld [vmem:[%s13154_s9 + $0x1e98] sm:$0xff] }
 0x554   : > { %9311 = vmatprep.subr.bf16.mxu0 %v11743_v54  ;;  %v1406_v14 = vld [vmem:[%s13154_s9 + $0x1eb8] sm:$0xff]  ;;  %v11846_v54 = vcombine.low %v1458_v9, %v1462_v13 }
 0x555   : > { %9285 = vmatpush1.bf16.msra.mxu1 %v11670_v63  ;;  %v1466_v29 = vld [vmem:[%s13154_s9 + $0x2098] sm:$0xff]  ;;  %v11782_v63 = vcombine.low %v1394_v45, %v1398_v56 }
 0x556   : > { %9286 = vmatprep.subr.bf16.mxu1 %v11679_v35  ;;  %v1470_v25 = vld [vmem:[%s13154_s9 + $0x20b8] sm:$0xff]  ;;  %v11791_v35 = vcombine.high %v1402_v24, %v1406_v14 }
 0x557   : > { %9312 = vmatpush1.bf16.msra.mxu0 %v11742_v55  ;;  %v11855_v28 = vcombine.high %v1466_v29, %v1470_v25  ;;  %v1410_v22 = vld [vmem:[%s13154_s9 + $0x1ed8] sm:$0xff] }
 0x558   : > { %9313 = vmatprep.subr.bf16.mxu0 %v11751_v48  ;;  %v1414_v47 = vld [vmem:[%s13154_s9 + $0x1ef8] sm:$0xff] }
 0x559   : > { %9287 = vmatpush1.bf16.msra.mxu1 %v11678_v32  ;;  %v8968_v44 = vpop.f32.mrb[56].mxu0  ;;  %v1474_v27 = vld [vmem:[%s13154_s9 + $0x20d8] sm:$0xff]  ;;  %v11854_v32 = vcombine.low %v1466_v29, %v1470_v25  ;;  %v11799_v48 = vcombine.high %v1410_v22, %v1414_v47 }
 0x55a   : > { %9288 = vmatprep.subr.bf16.mxu1 %v11687_v31  ;;  %v8969_v33 = vadd.f32 %v8968_v44, %v14527_v37  ;;  %v8970_v36 = vpop.f32.mrb[57].mxu0  ;;  %v11767_v37 = vcombine.high %v1378_v2, %v1382_v46  ;;  %v1478_v55 = vld [vmem:[%s13154_s9 + $0x20f8] sm:$0xff] }
 0x55b   : > { %v8971_v57 = vadd.f32 %v8970_v36, %v14529_v3  ;;  %v8972_v38 = vpop.f32.mrb[58].mxu0  ;;  %9314 = vmatpush1.bf16.msra.mxu0 %v11750_v59  ;;  %v1390_v3 = vld [vmem:[%s13154_s9 + $0x1e38] sm:$0xff]  ;;  %v11863_v31 = vcombine.high %v1474_v27, %v1478_v55  ;;  %v11862_v59 = vcombine.low %v1474_v27, %v1478_v55 }
 0x55c   : > { %v9010_v58 = vadd.f32 %v14563_v17, %v8969_v33  ;;  %v8973_v60 = vpop.f32.mrb[59].mxu0  ;;  %9315 = vmatprep.subr.bf16.mxu0 %v11759_v12  ;;  %v11775_v7 = vcombine.high %v1386_v49, %v1390_v3  ;;  %v11774_v15 = vcombine.low %v1386_v49, %v1390_v3  ;;  %v1418_v26 = vld [vmem:[%s13154_s9 + $0x1f18] sm:$0xff] }
 0x55d   : > { %9289 = vmatpush1.bf16.msra.mxu1 %v11686_v39  ;;  %v9012_v62 = vadd.f32 %v14567_v41, %v8971_v57  ;;  %v11839_v41 = vcombine.high %v1450_v4, %v1454_v40  ;;  %v1422_v51 = vld [vmem:[%s13154_s9 + $0x1f38] sm:$0xff] }
 0x55e   : > { %9290 = vmatprep.subr.bf16.mxu1 %v11695_v20  ;;  %v9430_v1 = vadd.f32 %v9010_v58, %v409_v21  ;;  %v1482_v42 = vld [vmem:[%s13154_s9 + $0x2118] sm:$0xff]  ;;  %v11807_v39 = vcombine.high %v1418_v26, %v1422_v51  ;;  %v11806_v33 = vcombine.low %v1418_v26, %v1422_v51 }
 0x55f   : > { %v9431_v17 = vadd.f32 %v9012_v62, %v410_v61  ;;  %9316 = vmatpush1.bf16.msra.mxu0 %v11758_v30  ;;  %v1486_v50 = vld [vmem:[%s13154_s9 + $0x2138] sm:$0xff] }
 0x560   : > { %9438 = vst [vmem:[#allocation2 + $0x20] sm:$0xff] %v9430_v1  ;;  %9317 = vmatprep.subr.bf16.mxu0 %v11767_v37  ;;  %v11871_v12 = vcombine.high %v1482_v42, %v1486_v50  ;;  %v1426_v44 = vld [vmem:[%s13154_s9 + $0x1f58] sm:$0xff]  ;;  %v11870_v36 = vcombine.low %v1482_v42, %v1486_v50 }
 0x561   : > { %9291 = vmatpush1.bf16.msra.mxu1 %v11694_v5  ;;  %9439 = vst [vmem:[#allocation2 + $0x28] sm:$0xff] %v9431_v17  ;;  %v1430_v20 = vld [vmem:[%s13154_s9 + $0x1f78] sm:$0xff] }
 0x562   : > { %9292 = vmatprep.subr.bf16.mxu1 %v11703_v0  ;;  %v1490_v2 = vld [vmem:[%s13154_s9 + $0x2158] sm:$0xff]  ;;  %v11815_v53 = vcombine.high %v1426_v44, %v1430_v20  ;;  %v11814_v58 = vcombine.low %v1426_v44, %v1430_v20 }
 0x563   : > { %9318 = vmatpush1.bf16.msra.mxu0 %v11766_v6  ;;  %v1494_v46 = vld [vmem:[%s13154_s9 + $0x2178] sm:$0xff] }
 0x564   : > { %9319 = vmatprep.subr.bf16.mxu0 %v11775_v7  ;;  %v11879_v34 = vcombine.high %v1490_v2, %v1494_v46  ;;  %v1434_v21 = vld [vmem:[%s13154_s9 + $0x1f98] sm:$0xff]  ;;  %v11878_v61 = vcombine.low %v1490_v2, %v1494_v46 }
 0x565   : > { %9293 = vmatpush1.bf16.msra.mxu1 %v11702_v16  ;;  %v1438_v57 = vld [vmem:[%s13154_s9 + $0x1fb8] sm:$0xff] }
 0x566   : > { %9344 = vmatprep.subr.bf16.mxu1 %v11839_v41  ;;  %v1498_v38 = vld [vmem:[%s13154_s9 + $0x2198] sm:$0xff]  ;;  %v11823_v60 = vcombine.high %v1434_v21, %v1438_v57  ;;  %v11822_v4 = vcombine.low %v1434_v21, %v1438_v57 }
 0x567   : > { %9320 = vmatpush1.bf16.msra.mxu0 %v11774_v15  ;;  %v1502_v30 = vld [vmem:[%s13154_s9 + $0x21b8] sm:$0xff] }
 0x568   : > { %9295 = vmatmul.mubr.bf16.vlgmr.msra.gmra.mrb[72].mxu1 %v13532_v23  ;;  %9321 = vmatprep.subr.bf16.mxu0 %v11783_v18  ;;  %v11790_v23 = vcombine.low %v1402_v24, %v1406_v14  ;;  %v11887_v5 = vcombine.high %v1498_v38, %v1502_v30  ;;  %v1442_v37 = vld [vmem:[%s13154_s9 + $0x1fd8] sm:$0xff]  ;;  %v11886_v17 = vcombine.low %v1498_v38, %v1502_v30 }
 0x569   : > { %9345 = vmatpush1.bf16.msra.mxu1 %v11838_v19  ;;  %9376 = vmatprep.mubr.bf16.mxu1 %v13550_v11  ;;  %v11798_v11 = vcombine.low %v1410_v22, %v1414_v47  ;;  %v1446_v62 = vld [vmem:[%s13154_s9 + $0x1ff8] sm:$0xff] }
 0x56a   : > { %9346 = vmatprep.subr.bf16.mxu1 %v11847_v43  ;;  %v1506_v49 = vld [vmem:[%s13154_s9 + $0x21d8] sm:$0xff]  ;;  %v11831_v6 = vcombine.high %v1442_v37, %v1446_v62  ;;  %v11830_v13 = vcombine.low %v1442_v37, %v1446_v62 }
 0x56b   : > { %9322 = vmatpush1.bf16.msra.mxu0 %v11782_v63  ;;  %v1510_v3 = vld [vmem:[%s13154_s9 + $0x21f8] sm:$0xff] }
 0x56c   : > { %9323 = vmatprep.subr.bf16.mxu0 %v11791_v35  ;;  %v11895_v7 = vcombine.high %v1506_v49, %v1510_v3  ;;  %v1578_v41 = vld [vmem:[%s13154_s9 + $0x2418] sm:$0xff]  ;;  %v11894_v15 = vcombine.low %v1506_v49, %v1510_v3 }
 0x56d   : > { %9347 = vmatpush1.bf16.msra.mxu1 %v11846_v54  ;;  %v1582_v45 = vld [vmem:[%s13154_s9 + $0x2438] sm:$0xff] }
 0x56e   : > { %9348 = vmatprep.subr.bf16.mxu1 %v11855_v28  ;;  %v1514_v56 = vld [vmem:[%s13154_s9 + $0x2218] sm:$0xff]  ;;  %v11967_v19 = vcombine.high %v1578_v41, %v1582_v45  ;;  %v11966_v25 = vcombine.low %v1578_v41, %v1582_v45 }
 0x56f   : > { %9324 = vmatpush1.bf16.msra.mxu0 %v11790_v23  ;;  %v1518_v9 = vld [vmem:[%s13154_s9 + $0x2238] sm:$0xff] }
 0x570   : > { %9325 = vmatprep.subr.bf16.mxu0 %v11799_v48  ;;  %v11903_v18 = vcombine.high %v1514_v56, %v1518_v9  ;;  %v1586_v43 = vld [vmem:[%s13154_s9 + $0x2458] sm:$0xff]  ;;  %v11902_v63 = vcombine.low %v1514_v56, %v1518_v9 }
 0x571   : > { %9349 = vmatpush1.bf16.msra.mxu1 %v11854_v32  ;;  %v1590_v24 = vld [vmem:[%s13154_s9 + $0x2478] sm:$0xff] }
 0x572   : > { %9350 = vmatprep.subr.bf16.mxu1 %v11863_v31  ;;  %v1522_v14 = vld [vmem:[%s13154_s9 + $0x2258] sm:$0xff]  ;;  %v11975_v54 = vcombine.high %v1586_v43, %v1590_v24  ;;  %v11974_v55 = vcombine.low %v1586_v43, %v1590_v24 }
 0x573   : > { %9326 = vmatpush1.bf16.msra.mxu0 %v11798_v11  ;;  %v1526_v29 = vld [vmem:[%s13154_s9 + $0x2278] sm:$0xff] }
 0x574   : > { %9327 = vmatprep.subr.bf16.mxu0 %v11807_v39  ;;  %v11911_v35 = vcombine.high %v1522_v14, %v1526_v29  ;;  %v1594_v28 = vld [vmem:[%s13154_s9 + $0x2498] sm:$0xff]  ;;  %v11910_v23 = vcombine.low %v1522_v14, %v1526_v29 }
 0x575   : > { %9351 = vmatpush1.bf16.msra.mxu1 %v11862_v59  ;;  %v1598_v22 = vld [vmem:[%s13154_s9 + $0x24b8] sm:$0xff] }
 0x576   : > { %9352 = vmatprep.subr.bf16.mxu1 %v11871_v12  ;;  %v1530_v47 = vld [vmem:[%s13154_s9 + $0x2298] sm:$0xff]  ;;  %v11983_v32 = vcombine.high %v1594_v28, %v1598_v22  ;;  %v11982_v42 = vcombine.low %v1594_v28, %v1598_v22 }
 0x577   : > { %9328 = vmatpush1.bf16.msra.mxu0 %v11806_v33  ;;  %v1534_v27 = vld [vmem:[%s13154_s9 + $0x22b8] sm:$0xff] }
 0x578   : > { %9329 = vmatprep.subr.bf16.mxu0 %v11815_v53  ;;  %v11919_v48 = vcombine.high %v1530_v47, %v1534_v27  ;;  %v1602_v31 = vld [vmem:[%s13154_s9 + $0x24d8] sm:$0xff]  ;;  %v11918_v50 = vcombine.low %v1530_v47, %v1534_v27 }
 0x579   : > { %9353 = vmatpush1.bf16.msra.mxu1 %v11870_v36  ;;  %v1606_v26 = vld [vmem:[%s13154_s9 + $0x24f8] sm:$0xff] }
 0x57a   : > { %9354 = vmatprep.subr.bf16.mxu1 %v11879_v34  ;;  %v1538_v51 = vld [vmem:[%s13154_s9 + $0x22d8] sm:$0xff]  ;;  %v11990_v20 = vcombine.low %v1602_v31, %v1606_v26 }
 0x57b   : > { %v14639_v0 = vpop.f32.mrb[60].mxu1  ;;  %9330 = vmatpush1.bf16.msra.mxu0 %v11814_v58  ;;  %v1610_v59 = vld [vmem:[%s13154_s9 + $0x2518] sm:$0xff] }
 0x57c   : > { %v14643_v1 = vpop.f32.mrb[61].mxu1  ;;  %9331 = vmatprep.subr.bf16.mxu0 %v11823_v60  ;;  %v1614_v39 = vld [vmem:[%s13154_s9 + $0x2538] sm:$0xff] }
 0x57d   : > { %v9054_v40 = vpop.f32.mrb[62].mxu1  ;;  %9355 = vmatpush1.bf16.msra.mxu1 %v11878_v61  ;;  %v1546_v12 = vld [vmem:[%s13154_s9 + $0x2318] sm:$0xff]  ;;  %v11999_v46 = vcombine.high %v1610_v59, %v1614_v39  ;;  %v11998_v57 = vcombine.low %v1610_v59, %v1614_v39 }
 0x57e   : > { %v9055_v16 = vpop.f32.mrb[63].mxu1  ;;  %9356 = vmatprep.subr.bf16.mxu1 %v11887_v5  ;;  %v1550_v44 = vld [vmem:[%s13154_s9 + $0x2338] sm:$0xff] }
 0x57f   : > { %9332 = vmatpush1.bf16.msra.mxu0 %v11822_v4  ;;  %v11935_v33 = vcombine.high %v1546_v12, %v1550_v44  ;;  %v1618_v36 = vld [vmem:[%s13154_s9 + $0x2558] sm:$0xff]  ;;  %v11934_v38 = vcombine.low %v1546_v12, %v1550_v44 }
 0x580   : > { %9333 = vmatprep.subr.bf16.mxu0 %v11831_v6  ;;  %v1622_v53 = vld [vmem:[%s13154_s9 + $0x2578] sm:$0xff] }
 0x581   : > { %9357 = vmatpush1.bf16.msra.mxu1 %v11886_v17  ;;  %v1554_v34 = vld [vmem:[%s13154_s9 + $0x2358] sm:$0xff]  ;;  %v12007_v30 = vcombine.high %v1618_v36, %v1622_v53  ;;  %v12006_v62 = vcombine.low %v1618_v36, %v1622_v53 }
 0x582   : > { %9358 = vmatprep.subr.bf16.mxu1 %v11895_v7  ;;  %v1558_v21 = vld [vmem:[%s13154_s9 + $0x2378] sm:$0xff] }
 0x583   : > { %9334 = vmatpush1.bf16.msra.mxu0 %v11830_v13  ;;  %v11943_v58 = vcombine.high %v1554_v34, %v1558_v21  ;;  %v1626_v61 = vld [vmem:[%s13154_s9 + $0x2598] sm:$0xff]  ;;  %v11942_v49 = vcombine.low %v1554_v34, %v1558_v21 }
 0x584   : > { %9385 = vmatprep.subr.bf16.mxu0 %v11967_v19  ;;  %v1630_v60 = vld [vmem:[%s13154_s9 + $0x25b8] sm:$0xff] }
 0x585   : > { %9359 = vmatpush1.bf16.msra.mxu1 %v11894_v15  ;;  %v1562_v5 = vld [vmem:[%s13154_s9 + $0x2398] sm:$0xff]  ;;  %v12015_v3 = vcombine.high %v1626_v61, %v1630_v60  ;;  %v12014_v13 = vcombine.low %v1626_v61, %v1630_v60 }
 0x586   : > { %9360 = vmatprep.subr.bf16.mxu1 %v11903_v18  ;;  %9336 = vmatmul.mubr.bf16.vlgmr.msra.gmra.mrb[72].mxu0 %v13538_v52  ;;  %v1542_v52 = vld [vmem:[%s13154_s9 + $0x22f8] sm:$0xff] }
 0x587   : > { %9386 = vmatpush1.bf16.msra.mxu0 %v11966_v25  ;;  %9417 = vmatprep.mubr.bf16.mxu0 %v12852_v10  ;;  %v11991_v10 = vcombine.high %v1602_v31, %v1606_v26  ;;  %v11927_v11 = vcombine.high %v1538_v51, %v1542_v52  ;;  %v11926_v2 = vcombine.low %v1538_v51, %v1542_v52  ;;  %v1566_v37 = vld [vmem:[%s13154_s9 + $0x23b8] sm:$0xff] }
 0x588   : > { %9387 = vmatprep.subr.bf16.mxu0 %v11975_v54  ;;  %v11951_v40 = vcombine.high %v1562_v5, %v1566_v37  ;;  %v1634_v17 = vld [vmem:[%s13154_s9 + $0x25d8] sm:$0xff]  ;;  %v11950_v19 = vcombine.low %v1562_v5, %v1566_v37 }
 0x589   : > { %9361 = vmatpush1.bf16.msra.mxu1 %v11902_v63  ;;  %v1638_v6 = vld [vmem:[%s13154_s9 + $0x25f8] sm:$0xff] }
 0x58a   : > { %9362 = vmatprep.subr.bf16.mxu1 %v11911_v35  ;;  %v1570_v41 = vld [vmem:[%s13154_s9 + $0x23d8] sm:$0xff]  ;;  %v12023_v18 = vcombine.high %v1634_v17, %v1638_v6  ;;  %v12022_v24 = vcombine.low %v1634_v17, %v1638_v6 }
 0x58b   : > { %9388 = vmatpush1.bf16.msra.mxu0 %v11974_v55  ;;  %v1574_v45 = vld [vmem:[%s13154_s9 + $0x23f8] sm:$0xff] }
 0x58c   : > { %9389 = vmatprep.subr.bf16.mxu0 %v11983_v32  ;;  %v11959_v43 = vcombine.high %v1570_v41, %v1574_v45  ;;  %v411_v37 = vld [vmem:[#allocation2 + $0x30] sm:$0xff] }
 0x58d   : > { %9363 = vmatpush1.bf16.msra.mxu1 %v11910_v23 }
 0x58e   : > { %9364 = vmatprep.subr.bf16.mxu1 %v11919_v48 }
 0x58f   : > { %9390 = vmatpush1.bf16.msra.mxu0 %v11982_v42 }
 0x590   : > { %9391 = vmatprep.subr.bf16.mxu0 %v11991_v10 }
 0x591   : > { %9365 = vmatpush1.bf16.msra.mxu1 %v11918_v50 }
 0x592   : > { %9366 = vmatprep.subr.bf16.mxu1 %v11927_v11 }
 0x593   : > { %9392 = vmatpush1.bf16.msra.mxu0 %v11990_v20 }
 0x594   : > { %9393 = vmatprep.subr.bf16.mxu0 %v11999_v46 }
 0x595   : > { %9367 = vmatpush1.bf16.msra.mxu1 %v11926_v2 }
 0x596   : > { %9368 = vmatprep.subr.bf16.mxu1 %v11935_v33 }
 0x597   : > { %9394 = vmatpush1.bf16.msra.mxu0 %v11998_v57 }
 0x598   : > { %9395 = vmatprep.subr.bf16.mxu0 %v12007_v30 }
 0x599   : > { %9369 = vmatpush1.bf16.msra.mxu1 %v11934_v38  ;;  %v9091_v4 = vpop.f32.mrb[60].mxu0 }
 0x59a   : > { %9370 = vmatprep.subr.bf16.mxu1 %v11943_v58  ;;  %v9092_v16 = vadd.f32 %v9091_v4, %v14639_v0  ;;  %v9093_v7 = vpop.f32.mrb[61].mxu0  ;;  %v11958_v0 = vcombine.low %v1570_v41, %v1574_v45  ;;  %v12348_v41 = vld [vmem:[#allocation9 + $0x4] ss:$8 sps:$4 sm:$0xff] (!%p12024_p7)  }
 0x59b   : > { %v9094_v56 = vadd.f32 %v9093_v7, %v14643_v1  ;;  %v9095_v9 = vpop.f32.mrb[62].mxu0  ;;  %9396 = vmatpush1.bf16.msra.mxu0 %v12006_v62  ;;  %v12347_v1 = vld [vmem:[%s13147_s24 + $0x48] ss:$0 sps:$4 sm:$0xff]   ;;  %v12350_v45 = vld [vmem:[#allocation9 + $0x204] ss:$8 sps:$4 sm:$0xff] (!%p12024_p7)  }
 0x59c   : > { %v9096_v15 = vpop.f32.mrb[63].mxu0  ;;  %9397 = vmatprep.subr.bf16.mxu0 %v12015_v3  ;;  %v12353_v9 = vld [vmem:[#allocation9 + $0x200] ss:$8 sps:$4 sm:$0xff] (!%p12024_p7)  }
 0x59d   : > { %9371 = vmatpush1.bf16.msra.mxu1 %v11942_v49  ;;  %v12356_v15 = vld [vmem:[#allocation9 + $0x214] ss:$8 sps:$4 sm:$0xff] (!%p12024_p7)  }
 0x59e   : > { %9372 = vmatprep.subr.bf16.mxu1 %v11951_v40  ;;  %v412_v40 = vld [vmem:[#allocation2 + $0x38] sm:$0xff] }
 0x59f   : > { %9398 = vmatpush1.bf16.msra.mxu0 %v12014_v13  ;;  %v12354_v13 = vld [vmem:[#allocation9 + $0x14] ss:$8 sps:$4 sm:$0xff] (!%p12024_p7)  }
 0x5a0   : > { %9399 = vmatprep.subr.bf16.mxu0 %v12023_v18  ;;  %v12359_v18 = vld [vmem:[#allocation9 + $0x210] ss:$8 sps:$4 sm:$0xff] (!%p12024_p7)  }
 0x5a1   : > { %9373 = vmatpush1.bf16.msra.mxu1 %v11950_v19  ;;  %v12358_v19 = vld [vmem:[#allocation9 + $0x10] ss:$8 sps:$4 sm:$0xff] (!%p12024_p7)  }
 0x5a2   : > { %9374 = vmatprep.subr.bf16.mxu1 %v11959_v43  ;;  %v12360_v43 = vld [vmem:[#allocation9 + $0x24] ss:$8 sps:$4 sm:$0xff] (!%p12024_p7)  }
 0x5a3   : > { %9400 = vmatpush1.bf16.msra.mxu0 %v12022_v24  ;;  %v12362_v24 = vld [vmem:[#allocation9 + $0x224] ss:$8 sps:$4 sm:$0xff] (!%p12024_p7)  }
 0x5a4   : > { %10382 = vmatprep.subr.bf16.mxu0 (!%p12024_p7), %v12350_v45  ;;  %v12424_v45 = vld [vmem:[#allocation9 + $0xc0] ss:$8 sps:$4 sm:$0xff] (!%p12024_p7)  }
 0x5a5   : > { %9375 = vmatpush1.bf16.msra.mxu1 %v11958_v0  ;;  %v12364_v0 = vld [vmem:[#allocation9 + $0x20] ss:$8 sps:$4 sm:$0xff] (!%p12024_p7)  }
 0x5a6   : > { %9418 = vmatmul.mubr.bf16.vlgmr.msra.gmra.mrb[76].mxu0 %v12347_v1  ;;  %10300 = vmatprep.subr.bf16.mxu1 (!%p12024_p7), %v12348_v41  ;;  %v12365_v1 = vld [vmem:[#allocation9 + $0x220] ss:$8 sps:$4 sm:$0xff] (!%p12024_p7)  }
 0x5a7   : > { %10383 = vmatpush1.bf16.msra.mxu0 (!%p12024_p7), %v12353_v9 }
 0x5a8   : > { %9377 = vmatmul.mubr.bf16.vlgmr.msra.gmra.mrb[76].mxu1 %v13621_v8  ;;  %10384 = vmatprep.subr.bf16.mxu0 (!%p12024_p7), %v12356_v15 }
 0x5ab   : > { %10385 = vmatpush1.bf16.msra.mxu0 (!%p12024_p7), %v12359_v18  ;;  %v12426_v18 = vld [vmem:[#allocation9 + $0xd4] ss:$8 sps:$4 sm:$0xff] (!%p12024_p7)  }
 0x5ac   : > { %10386 = vmatprep.subr.bf16.mxu0 (!%p12024_p7), %v12362_v24  ;;  %v12430_v24 = vld [vmem:[#allocation9 + $0xd0] ss:$8 sps:$4 sm:$0xff] (!%p12024_p7)  }
 0x5af   : > { %10387 = vmatpush1.bf16.msra.mxu0 (!%p12024_p7), %v12365_v1 }
 0x5bb   : > { %v9132_v14 = vpop.f32.mrb[64].mxu1 }
 0x5bc   : > { %v9133_v29 = vadd.f32 %v9132_v14, %v9092_v16  ;;  %v9134_v25 = vpop.f32.mrb[65].mxu1  ;;  %v12366_v14 = vld [vmem:[#allocation9 + $0x34] ss:$8 sps:$4 sm:$0xff] (!%p12024_p7)  }
 0x5bd   : > { %v9135_v63 = vadd.f32 %v9134_v25, %v9094_v56  ;;  %v9136_v54 = vpop.f32.mrb[66].mxu1  ;;  %v12352_v56 = vld [vmem:[#allocation9] ss:$8 sps:$4 sm:$0xff] (!%p12024_p7)   ;;  %v12370_v25 = vld [vmem:[#allocation9 + $0x30] ss:$8 sps:$4 sm:$0xff] (!%p12024_p7)  }
 0x5be   : > { %v9137_v35 = vpop.f32.mrb[67].mxu1  ;;  %10301 = vmatpush1.bf16.msra.mxu1 (!%p12024_p7), %v12352_v56  ;;  %v12372_v54 = vld [vmem:[#allocation9 + $0x44] ss:$8 sps:$4 sm:$0xff] (!%p12024_p7)  }
 0x5bf   : > { %10302 = vmatprep.subr.bf16.mxu1 (!%p12024_p7), %v12354_v13  ;;  %v12374_v35 = vld [vmem:[#allocation9 + $0x244] ss:$8 sps:$4 sm:$0xff] (!%p12024_p7)   ;;  %v12425_v13 = vld [vmem:[#allocation9 + $0x2c0] ss:$8 sps:$4 sm:$0xff] (!%p12024_p7)  }
 0x5c2   : > { %10303 = vmatpush1.bf16.msra.mxu1 (!%p12024_p7), %v12358_v19 }
 0x5c3   : > { %10304 = vmatprep.subr.bf16.mxu1 (!%p12024_p7), %v12360_v43  ;;  %v12428_v43 = vld [vmem:[#allocation9 + $0x2d4] ss:$8 sps:$4 sm:$0xff] (!%p12024_p7)  }
 0x5c6   : > { %10305 = vmatpush1.bf16.msra.mxu1 (!%p12024_p7), %v12364_v0 }
 0x5c7   : > { %10306 = vmatprep.subr.bf16.mxu1 (!%p12024_p7), %v12366_v14  ;;  %v12431_v14 = vld [vmem:[#allocation9 + $0x2d0] ss:$8 sps:$4 sm:$0xff] (!%p12024_p7)  }
 0x5ca   : > { %10307 = vmatpush1.bf16.msra.mxu1 (!%p12024_p7), %v12370_v25 }
 0x5cb   : > { %10308 = vmatprep.subr.bf16.mxu1 (!%p12024_p7), %v12372_v54  ;;  %v9450_v54 = vld [vmem:[#allocation2 + $0x20] sm:$0xff] (!%p12024_p7) }
 0x5d9   : > { %v9173_v28 = vpop.f32.mrb[64].mxu0 }
 0x5da   : > { %v9174_v22 = vadd.f32 %v9173_v28, %v9133_v29  ;;  %v9175_v47 = vpop.f32.mrb[65].mxu0  ;;  %v12368_v29 = vld [vmem:[#allocation9 + $0x234] ss:$8 sps:$4 sm:$0xff] (!%p12024_p7)   ;;  %v12376_v28 = vld [vmem:[#allocation9 + $0x40] ss:$8 sps:$4 sm:$0xff] (!%p12024_p7)  }
 0x5db   : > { %v9176_v27 = vadd.f32 %v9175_v47, %v9135_v63  ;;  %v9177_v55 = vpop.f32.mrb[66].mxu0  ;;  %v12371_v63 = vld [vmem:[#allocation9 + $0x230] ss:$8 sps:$4 sm:$0xff] (!%p12024_p7)   ;;  %10388 = vmatprep.subr.bf16.mxu0 (!%p12024_p7), %v12368_v29  ;;  %v12378_v47 = vld [vmem:[#allocation9 + $0x54] ss:$8 sps:$4 sm:$0xff] (!%p12024_p7)   ;;  %10309 = vmatpush1.bf16.msra.mxu1 (!%p12024_p7), %v12376_v28 }
 0x5dc   : > { %v9178_v23 = vpop.f32.mrb[67].mxu0  ;;  %10389 = vmatpush1.bf16.msra.mxu0 (!%p12024_p7), %v12371_v63  ;;  %v12382_v55 = vld [vmem:[#allocation9 + $0x50] ss:$8 sps:$4 sm:$0xff] (!%p12024_p7)   ;;  %10310 = vmatprep.subr.bf16.mxu1 (!%p12024_p7), %v12378_v47  ;;  %v9446_v63 = vld [vmem:[#allocation2] sm:$0xff] (!%p12024_p7) }
 0x5dd   : > { %10390 = vmatprep.subr.bf16.mxu0 (!%p12024_p7), %v12374_v35  ;;  %v12383_v23 = vld [vmem:[#allocation9 + $0x250] ss:$8 sps:$4 sm:$0xff] (!%p12024_p7)   ;;  %v12432_v35 = vld [vmem:[#allocation9 + $0xe4] ss:$8 sps:$4 sm:$0xff] (!%p12024_p7)  }
 0x5de   : > { %v12434_v28 = vld [vmem:[#allocation9 + $0x2e4] ss:$8 sps:$4 sm:$0xff] (!%p12024_p7)  }
 0x5df   : > { %10311 = vmatpush1.bf16.msra.mxu1 (!%p12024_p7), %v12382_v55  ;;  %v12437_v55 = vld [vmem:[#allocation9 + $0x2e0] ss:$8 sps:$4 sm:$0xff] (!%p12024_p7)  }
 0x5fb   : > { %v9214_v32 = vpop.f32.mrb[68].mxu1 }
 0x5fc   : > { %v9215_v48 = vadd.f32 %v9214_v32, %v9174_v22  ;;  %v9216_v31 = vpop.f32.mrb[69].mxu1  ;;  %v12377_v22 = vld [vmem:[#allocation9 + $0x240] ss:$8 sps:$4 sm:$0xff] (!%p12024_p7)   ;;  %v12384_v32 = vld [vmem:[#allocation9 + $0x64] ss:$8 sps:$4 sm:$0xff] (!%p12024_p7)  }
 0x5fd   : > { %v9217_v26 = vadd.f32 %v9216_v31, %v9176_v27  ;;  %v9218_v51 = vpop.f32.mrb[70].mxu1  ;;  %v12380_v27 = vld [vmem:[#allocation9 + $0x254] ss:$8 sps:$4 sm:$0xff] (!%p12024_p7)   ;;  %10391 = vmatpush1.bf16.msra.mxu0 (!%p12024_p7), %v12377_v22  ;;  %v12388_v31 = vld [vmem:[#allocation9 + $0x60] ss:$8 sps:$4 sm:$0xff] (!%p12024_p7)   ;;  %10312 = vmatprep.subr.bf16.mxu1 (!%p12024_p7), %v12384_v32 }
 0x5fe   : > { %v9219_v52 = vpop.f32.mrb[71].mxu1  ;;  %10392 = vmatprep.subr.bf16.mxu0 (!%p12024_p7), %v12380_v27  ;;  %v12390_v51 = vld [vmem:[#allocation9 + $0x74] ss:$8 sps:$4 sm:$0xff] (!%p12024_p7)   ;;  %10313 = vmatpush1.bf16.msra.mxu1 (!%p12024_p7), %v12388_v31  ;;  %v12436_v27 = vld [vmem:[#allocation9 + $0xe0] ss:$8 sps:$4 sm:$0xff] (!%p12024_p7)  }
 0x5ff   : > { %v12392_v52 = vld [vmem:[#allocation9 + $0x274] ss:$8 sps:$4 sm:$0xff] (!%p12024_p7)   ;;  %10314 = vmatprep.subr.bf16.mxu1 (!%p12024_p7), %v12390_v51  ;;  %v12443_v51 = vld [vmem:[#allocation9 + $0x2f0] ss:$8 sps:$4 sm:$0xff] (!%p12024_p7)  }
 0x600   : > { %v12440_v32 = vld [vmem:[#allocation9 + $0x2f4] ss:$8 sps:$4 sm:$0xff] (!%p12024_p7)  }
 0x601   : > { %10393 = vmatpush1.bf16.msra.mxu0 (!%p12024_p7), %v12383_v23  ;;  %v12438_v23 = vld [vmem:[#allocation9 + $0xf4] ss:$8 sps:$4 sm:$0xff] (!%p12024_p7)  }
 0x619   : > { %v9255_v42 = vpop.f32.mrb[68].mxu0 }
 0x61a   : > { %v9256_v8 = vadd.f32 %v9255_v42, %v9215_v48  ;;  %v9257_v50 = vpop.f32.mrb[69].mxu0  ;;  %v12386_v48 = vld [vmem:[#allocation9 + $0x264] ss:$8 sps:$4 sm:$0xff] (!%p12024_p7)   ;;  %v12394_v42 = vld [vmem:[#allocation9 + $0x70] ss:$8 sps:$4 sm:$0xff] (!%p12024_p7)  }
 0x61b   : > { %v9258_v10 = vadd.f32 %v9257_v50, %v9217_v26  ;;  %v9259_v11 = vpop.f32.mrb[70].mxu0  ;;  %v12389_v26 = vld [vmem:[#allocation9 + $0x260] ss:$8 sps:$4 sm:$0xff] (!%p12024_p7)   ;;  %10394 = vmatprep.subr.bf16.mxu0 (!%p12024_p7), %v12386_v48  ;;  %v12396_v50 = vld [vmem:[#allocation9 + $0x84] ss:$8 sps:$4 sm:$0xff] (!%p12024_p7)   ;;  %10315 = vmatpush1.bf16.msra.mxu1 (!%p12024_p7), %v12394_v42 }
 0x61c   : > { %v9260_v59 = vpop.f32.mrb[71].mxu0  ;;  %10395 = vmatpush1.bf16.msra.mxu0 (!%p12024_p7), %v12389_v26  ;;  %v12400_v11 = vld [vmem:[#allocation9 + $0x80] ss:$8 sps:$4 sm:$0xff] (!%p12024_p7)   ;;  %10316 = vmatprep.subr.bf16.mxu1 (!%p12024_p7), %v12396_v50  ;;  %v12442_v26 = vld [vmem:[#allocation9 + $0xf0] ss:$8 sps:$4 sm:$0xff] (!%p12024_p7)  }
 0x61d   : > { %10396 = vmatprep.subr.bf16.mxu0 (!%p12024_p7), %v12392_v52  ;;  %v12401_v59 = vld [vmem:[#allocation9 + $0x280] ss:$8 sps:$4 sm:$0xff] (!%p12024_p7)   ;;  %v12446_v52 = vld [vmem:[#allocation9 + $0x104] ss:$8 sps:$4 sm:$0xff] (!%p12024_p7)  }
 0x61e   : > { %v12449_v42 = vld [vmem:[#allocation9 + $0x304] ss:$8 sps:$4 sm:$0xff] (!%p12024_p7)  }
 0x61f   : > { %10317 = vmatpush1.bf16.msra.mxu1 (!%p12024_p7), %v12400_v11  ;;  %v12447_v11 = vld [vmem:[#allocation9 + $0x300] ss:$8 sps:$4 sm:$0xff] (!%p12024_p7)  }
 0x63b   : > { %v9296_v39 = vpop.f32.mrb[72].mxu1 }
 0x63c   : > { %v9297_v12 = vadd.f32 %v9296_v39, %v9256_v8  ;;  %v9298_v44 = vpop.f32.mrb[73].mxu1  ;;  %v12395_v8 = vld [vmem:[#allocation9 + $0x270] ss:$8 sps:$4 sm:$0xff] (!%p12024_p7)   ;;  %v12402_v39 = vld [vmem:[#allocation9 + $0x94] ss:$8 sps:$4 sm:$0xff] (!%p12024_p7)  }
 0x63d   : > { %v9299_v20 = vadd.f32 %v9298_v44, %v9258_v10  ;;  %v9300_v2 = vpop.f32.mrb[74].mxu1  ;;  %v12398_v10 = vld [vmem:[#allocation9 + $0x284] ss:$8 sps:$4 sm:$0xff] (!%p12024_p7)   ;;  %10397 = vmatpush1.bf16.msra.mxu0 (!%p12024_p7), %v12395_v8  ;;  %v12404_v44 = vld [vmem:[#allocation9 + $0x294] ss:$8 sps:$4 sm:$0xff] (!%p12024_p7)   ;;  %10318 = vmatprep.subr.bf16.mxu1 (!%p12024_p7), %v12402_v39 }
 0x63e   : > { %v9301_v46 = vpop.f32.mrb[75].mxu1  ;;  %10398 = vmatprep.subr.bf16.mxu0 (!%p12024_p7), %v12398_v10  ;;  %v12407_v2 = vld [vmem:[#allocation9 + $0x290] ss:$8 sps:$4 sm:$0xff] (!%p12024_p7)   ;;  %v12444_v10 = vld [vmem:[#allocation9 + $0x100] ss:$8 sps:$4 sm:$0xff] (!%p12024_p7)  }
 0x63f   : > { %v12408_v46 = vld [vmem:[#allocation9 + $0xa4] ss:$8 sps:$4 sm:$0xff] (!%p12024_p7)   ;;  %v12455_v39 = vld [vmem:[#allocation9 + $0x314] ss:$8 sps:$4 sm:$0xff] (!%p12024_p7)  }
 0x641   : > { %10399 = vmatpush1.bf16.msra.mxu0 (!%p12024_p7), %v12401_v59  ;;  %v12452_v59 = vld [vmem:[#allocation9 + $0x114] ss:$8 sps:$4 sm:$0xff] (!%p12024_p7)  }
 0x642   : > { %10400 = vmatprep.subr.bf16.mxu0 (!%p12024_p7), %v12404_v44  ;;  %v12453_v44 = vld [vmem:[#allocation9 + $0x310] ss:$8 sps:$4 sm:$0xff] (!%p12024_p7)  }
 0x645   : > { %10401 = vmatpush1.bf16.msra.mxu0 (!%p12024_p7), %v12407_v2  ;;  %v12461_v2 = vld [vmem:[#allocation9 + $0x324] ss:$8 sps:$4 sm:$0xff] (!%p12024_p7)  }
 0x659   : > { %v9337_v33 = vpop.f32.mrb[72].mxu0 }
 0x65a   : > { %v9338_v36 = vadd.f32 %v9337_v33, %v9297_v12  ;;  %v9339_v53 = vpop.f32.mrb[73].mxu0  ;;  %v9456_v12 = vlaneseq (!%p12024_p7) }
 0x65b   : > { %v9340_v34 = vadd.f32 %v9339_v53, %v9299_v20  ;;  %v9341_v21 = vpop.f32.mrb[74].mxu0  ;;  %v12406_v20 = vld [vmem:[#allocation9 + $0x90] ss:$8 sps:$4 sm:$0xff] (!%p12024_p7)   ;;  %v12412_v53 = vld [vmem:[#allocation9 + $0xa0] ss:$8 sps:$4 sm:$0xff] (!%p12024_p7)  }
 0x65c   : > { %v9342_v57 = vpop.f32.mrb[75].mxu0  ;;  %v14684_v33 = vshrl.u32 (!%p12024_p7), %v9456_v12, 7  ;;  %10319 = vmatpush1.bf16.msra.mxu1 (!%p12024_p7), %v12406_v20  ;;  %v12414_v21 = vld [vmem:[#allocation9 + $0xb4] ss:$8 sps:$4 sm:$0xff] (!%p12024_p7)   ;;  %v12450_v12 = vld [vmem:[#allocation9 + $0x110] ss:$8 sps:$4 sm:$0xff] (!%p12024_p7)  }
 0x65d   : > { %10320 = vmatprep.subr.bf16.mxu1 (!%p12024_p7), %v12408_v46  ;;  %v12458_v20 = vld [vmem:[#allocation9 + $0x124] ss:$8 sps:$4 sm:$0xff] (!%p12024_p7)   ;;  %v12456_v46 = vld [vmem:[#allocation9 + $0x120] ss:$8 sps:$4 sm:$0xff] (!%p12024_p7)  }
 0x65e   : > { %v9462_v57 = vsub.s32 (!%p12024_p7), 1, %v14684_v33  ;;  %v9458_v56 = vsub.s32 (!%p12024_p7), 0, %v14684_v33  ;;  %v9474_v9 = vsub.s32 (!%p12024_p7), 4, %v14684_v33 }
 0x660   : > { %10321 = vmatpush1.bf16.msra.mxu1 (!%p12024_p7), %v12412_v53  ;;  %v12464_v53 = vld [vmem:[#allocation9 + $0x134] ss:$8 sps:$4 sm:$0xff] (!%p12024_p7)  }
 0x661   : > { %10322 = vmatprep.subr.bf16.mxu1 (!%p12024_p7), %v12414_v21  ;;  %v12462_v21 = vld [vmem:[#allocation9 + $0x130] ss:$8 sps:$4 sm:$0xff] (!%p12024_p7)  }
 0x679   : > { %v9419_v38 = vpop.f32.mrb[76].mxu0 }
 0x67a   : > { %v9421_v58 = vpop.f32.mrb[77].mxu0 }
 0x67b   : > { %v9378_v30 = vpop.f32.mrb[76].mxu1  ;;  %v9423_v5 = vpop.f32.mrb[78].mxu0 }
 0x67c   : > { %v9379_v61 = vadd.f32 %v9378_v30, %v9338_v36  ;;  %v9380_v60 = vpop.f32.mrb[77].mxu1  ;;  %v9424_v3 = vpop.f32.mrb[79].mxu0  ;;  %v12410_v36 = vld [vmem:[#allocation9 + $0x2a4] ss:$8 sps:$4 sm:$0xff] (!%p12024_p7)   ;;  %v12416_v30 = vld [vmem:[#allocation9 + $0x2b4] ss:$8 sps:$4 sm:$0xff] (!%p12024_p7)  }
 0x67d   : > { %v9381_v62 = vadd.f32 %v9380_v60, %v9340_v34  ;;  %v9382_v49 = vpop.f32.mrb[78].mxu1  ;;  %9445 = sbr.rel (%p12024_p7) target bundleno = 2187 (0x88b), region = 84  ;;  %v12413_v34 = vld [vmem:[#allocation9 + $0x2a0] ss:$8 sps:$4 sm:$0xff] (!%p12024_p7)   ;;  %10402 = vmatprep.subr.bf16.mxu0 (!%p12024_p7), %v12410_v36  ;;  %v9466_v60 = vsub.s32 (!%p12024_p7), 2, %v14684_v33  ;;  %v9482_v5 = vsub.s32 (!%p12024_p7), 6, %v14684_v33 }
 0x67e   : > { %v9420_v4 = vadd.f32 %v9419_v38, %v9379_v61  ;;  %v9383_v17 = vpop.f32.mrb[79].mxu1  ;;  %v9478_v38 = vsub.s32 (!%p12024_p7), 5, %v14684_v33  ;;  %v9447_v61 = vld [vmem:[#allocation2 + $0x8] sm:$0xff] (!%p12024_p7)  ;;  %10403 = vmatpush1.bf16.msra.mxu0 (!%p12024_p7), %v12413_v34  ;;  %v12467_v34 = vld [vmem:[#allocation9 + $0x334] ss:$8 sps:$4 sm:$0xff] (!%p12024_p7)  }
 0x67f   : > { %v9422_v6 = vadd.f32 %v9421_v58, %v9381_v62  ;;  %v12418_v58 = vld [vmem:[#allocation9 + $0xb0] ss:$8 sps:$4 sm:$0xff] (!%p12024_p7)   ;;  %v12420_v49 = vld [vmem:[#allocation9 + $0xc4] ss:$8 sps:$4 sm:$0xff] (!%p12024_p7)   ;;  %10404 = vmatprep.subr.bf16.mxu0 (!%p12024_p7), %v12416_v30  ;;  %v12459_v36 = vld [vmem:[#allocation9 + $0x320] ss:$8 sps:$4 sm:$0xff] (!%p12024_p7)  }
 0x680   : > { %v9432_v16 = vadd.f32 %v9420_v4, %v411_v37  ;;  %v14690_v37 = vld [vmem:[#allocation8] sm:$0xff] (!%p12024_p7)  ;;  %v9451_v4 = vld [vmem:[#allocation2 + $0x28] sm:$0xff] (!%p12024_p7)  ;;  %10323 = vmatpush1.bf16.msra.mxu1 (!%p12024_p7), %v12418_v58 }
 0x681   : > { %v9433_v7 = vadd.f32 %v9422_v6, %v412_v40  ;;  %v12419_v62 = vld [vmem:[#allocation9 + $0x2b0] ss:$8 sps:$4 sm:$0xff] (!%p12024_p7)   ;;  %v9463_v3 = vrot.slane (!%p12024_p7), %v14690_v37, %v9462_v57  ;;  %v9479_v40 = vrot.slane (!%p12024_p7), %v14690_v37, %v9478_v38  ;;  %v12422_v17 = vld [vmem:[#allocation9 + $0x2c4] ss:$8 sps:$4 sm:$0xff] (!%p12024_p7)   ;;  %v14700_v41 = vrot.slane (!%p12024_p7), %v14690_v37, %v9482_v5  ;;  %10324 = vmatprep.subr.bf16.mxu1 (!%p12024_p7), %v12420_v49  ;;  %v12471_v5 = vld [vmem:[#allocation9 + $0x340] ss:$8 sps:$4 sm:$0xff] (!%p12024_p7)  }
 0x682   : > { %9440 = vst [vmem:[#allocation2 + $0x30] sm:$0xff] %v9432_v16  ;;  %10405 = vmatpush1.bf16.msra.mxu0 (!%p12024_p7), %v12419_v62  ;;  %v9459_v29 = vrot.slane (!%p12024_p7), %v14690_v37, %v9458_v56  ;;  %v9475_v25 = vrot.slane (!%p12024_p7), %v14690_v37, %v9474_v9  ;;  %v12465_v38 = vld [vmem:[#allocation9 + $0x330] ss:$8 sps:$4 sm:$0xff] (!%p12024_p7)   ;;  %v12470_v30 = vld [vmem:[#allocation9 + $0x144] ss:$8 sps:$4 sm:$0xff] (!%p12024_p7)   ;;  %v9486_v62 = vsub.s32 (!%p12024_p7), 7, %v14684_v33 }
 0x683   : > { %9441 = vst [vmem:[#allocation2 + $0x38] sm:$0xff] %v9433_v7  ;;  %v9497_v6 = vadd.f32 (!%p12024_p7), %v9463_v3, %v9447_v61  ;;  %v9501_v16 = vadd.f32 (!%p12024_p7), %v9479_v40, %v9451_v4  ;;  %v14697_v7 = vrot.slane (!%p12024_p7), %v14690_v37, %v9466_v60  ;;  %10406 = vmatprep.subr.bf16.mxu0 (!%p12024_p7), %v12422_v17  ;;  %v12473_v58 = vld [vmem:[#allocation9 + $0x344] ss:$8 sps:$4 sm:$0xff] (!%p12024_p7)   ;;  %v9470_v61 = vsub.s32 (!%p12024_p7), 3, %v14684_v33  ;;  %v12468_v60 = vld [vmem:[#allocation9 + $0x140] ss:$8 sps:$4 sm:$0xff] (!%p12024_p7)  }
 0x684   : > { %10325 = vmatpush1.bf16.msra.mxu1 %v12424_v45  ;;  %v9496_v22 = vadd.f32 %v9459_v29, %v9446_v63  ;;  %v9500_v47 = vadd.f32 %v9475_v25, %v9450_v54  ;;  %v12476_v49 = vld [vmem:[#allocation9 + $0x154] ss:$8 sps:$4 sm:$0xff]   ;;  %v12474_v4 = vld [vmem:[#allocation9 + $0x150] ss:$8 sps:$4 sm:$0xff]   ;;  %v12485_v45 = vld [vmem:[#allocation9 + $0x364] ss:$8 sps:$4 sm:$0xff]  }
 0x685   : > { %v9505_v15 = vmax.f32 %v9497_v6, 0.0  ;;  %v9509_v19 = vmax.f32 %v9501_v16, 0.0  ;;  %10326 = vmatprep.subr.bf16.mxu1 %v12426_v18  ;;  %v12479_v3 = vld [vmem:[#allocation9 + $0x354] ss:$8 sps:$4 sm:$0xff]   ;;  %v12477_v40 = vld [vmem:[#allocation9 + $0x350] ss:$8 sps:$4 sm:$0xff]   ;;  %v9471_v17 = vrot.slane %v14690_v37, %v9470_v61  ;;  %v9487_v6 = vrot.slane %v14690_v37, %v9486_v62 }
 0x686   : > { %10407 = vmatpush1.bf16.msra.mxu0 %v12425_v13  ;;  %v9504_v48 = vmax.f32 %v9496_v22, 0.0  ;;  %v9508_v31 = vmax.f32 %v9500_v47, 0.0  ;;  %v12482_v16 = vld [vmem:[#allocation9 + $0x164] ss:$8 sps:$4 sm:$0xff]   ;;  %v12480_v9 = vld [vmem:[#allocation9 + $0x160] ss:$8 sps:$4 sm:$0xff]  }
 0x687   : > { %v9513_v0 = vpack.c.bf16 %v9505_v15, %v9505_v15  ;;  %v9517_v1 = vpack.c.bf16 %v9509_v19, %v9509_v19  ;;  %10408 = vmatprep.subr.bf16.mxu0 %v12428_v43  ;;  %v9449_v13 = vld [vmem:[#allocation2 + $0x18] sm:$0xff]  ;;  %v12483_v19 = vld [vmem:[#allocation9 + $0x360] ss:$8 sps:$4 sm:$0xff]   ;;  %v12494_v25 = vld [vmem:[#allocation9 + $0x184] ss:$8 sps:$4 sm:$0xff]  }
 0x688   : > { %10327 = vmatpush1.bf16.msra.mxu1 %v12430_v24  ;;  %v9512_v8 = vpack.c.bf16 %v9504_v48, %v9504_v48  ;;  %v9516_v50 = vpack.c.bf16 %v9508_v31, %v9508_v31  ;;  %v12488_v18 = vld [vmem:[#allocation9 + $0x174] ss:$8 sps:$4 sm:$0xff]   ;;  %v9499_v43 = vadd.f32 %v9471_v17, %v9449_v13  ;;  %v12489_v37 = vld [vmem:[#allocation9 + $0x370] ss:$8 sps:$4 sm:$0xff]   ;;  %v12495_v22 = vld [vmem:[#allocation9 + $0x380] ss:$8 sps:$4 sm:$0xff]  }
 0x689   : > { %10332 = vmatprep.mubr.bf16.mxu1 %v9513_v0  ;;  %10414 = vmatprep.mubr.bf16.mxu0 %v9517_v1  ;;  %v12491_v0 = vld [vmem:[#allocation9 + $0x374] ss:$8 sps:$4 sm:$0xff]   ;;  %v12486_v1 = vld [vmem:[#allocation9 + $0x170] ss:$8 sps:$4 sm:$0xff]   ;;  %v12509_v48 = vld [vmem:[#allocation9 + $0x3a4] ss:$8 sps:$4 sm:$0xff]  }
 0x68a   : > { %10409 = vmatpush1.bf16.msra.mxu0 %v12431_v14  ;;  %10328 = vmatprep.subr.bf16.mxu1 %v12432_v35  ;;  %v9453_v15 = vld [vmem:[#allocation2 + $0x38] sm:$0xff]  ;;  %v9507_v14 = vmax.f32 %v9499_v43, 0.0  ;;  %v12497_v35 = vld [vmem:[#allocation9 + $0x384] ss:$8 sps:$4 sm:$0xff]   ;;  %v12504_v31 = vld [vmem:[#allocation9 + $0x1a0] ss:$8 sps:$4 sm:$0xff]  }
 0x68b   : > { %10410 = vmatprep.subr.bf16.mxu0 %v12434_v28  ;;  %v9503_v24 = vadd.f32 %v9487_v6, %v9453_v15  ;;  %v12492_v28 = vld [vmem:[#allocation9 + $0x180] ss:$8 sps:$4 sm:$0xff]   ;;  %v12500_v47 = vld [vmem:[#allocation9 + $0x194] ss:$8 sps:$4 sm:$0xff]   ;;  %v12534_v62 = vld [vmem:[#allocation9 + $0x1f0] ss:$8 sps:$4 sm:$0xff]  }
 0x68c   : > { %10329 = vmatpush1.bf16.msra.mxu1 %v12436_v27  ;;  %v9515_v63 = vpack.c.bf16 %v9507_v14, %v9507_v14  ;;  %v12503_v27 = vld [vmem:[#allocation9 + $0x394] ss:$8 sps:$4 sm:$0xff]   ;;  %v12543_v17 = vld [vmem:[#allocation12 + $0x8] sm:$0xff]   ;;  %v12548_v13 = vld [vmem:[#allocation12 + $0x60] sm:$0xff]  }
 0x68d   : > { %10330 = vmatprep.subr.bf16.mxu1 %v12438_v23  ;;  %v9511_v29 = vmax.f32 %v9503_v24, 0.0  ;;  %v12501_v23 = vld [vmem:[#allocation9 + $0x390] ss:$8 sps:$4 sm:$0xff]   ;;  %v12539_v61 = vld [vmem:[#allocation9 + $0x3f4] ss:$8 sps:$4 sm:$0xff]   ;;  %v12549_v15 = vld [vmem:[#allocation12 + $0x20] sm:$0xff]  }
 0x68e   : > { %10411 = vmatpush1.bf16.msra.mxu0 %v12437_v55  ;;  %v12498_v55 = vld [vmem:[#allocation9 + $0x190] ss:$8 sps:$4 sm:$0xff]   ;;  %v9648_v14 = vld [vmem:[#allocation11] sm:$0x3] }
 0x68f   : > { %10412 = vmatprep.subr.bf16.mxu0 %v12440_v32  ;;  %v9519_v54 = vpack.c.bf16 %v9511_v29, %v9511_v29  ;;  %v12506_v32 = vld [vmem:[#allocation9 + $0x1a4] ss:$8 sps:$4 sm:$0xff]   ;;  %v12544_v6 = vld [vmem:[#allocation12 + $0x50] sm:$0xff]   ;;  %v9653_v29 = vrot.slane %v9648_v14, %v9458_v56 }
 0x690   : > { %10331 = vmatpush1.bf16.msra.mxu1 %v12442_v26  ;;  %v12507_v26 = vld [vmem:[#allocation9 + $0x3a0] ss:$8 sps:$4 sm:$0xff]   ;;  %v12552_v43 = vld [vmem:[#allocation12 + $0x70] sm:$0xff]  }
 0x691   : > { %10341 = vmatprep.subr.bf16.mxu1 %v12446_v52  ;;  %v12515_v52 = vld [vmem:[#allocation9 + $0x3b4] ss:$8 sps:$4 sm:$0xff]  }
 0x692   : > { %10413 = vmatpush1.bf16.msra.mxu0 %v12443_v51  ;;  %v12512_v51 = vld [vmem:[#allocation9 + $0x1b4] ss:$8 sps:$4 sm:$0xff]  }
 0x693   : > { %10423 = vmatprep.subr.bf16.mxu0 %v12449_v42  ;;  %10333 = vmatmul.mubr.bf16.vlgmr.msra.gmra.mrb[0].mxu1 %v9512_v8  ;;  %v12510_v42 = vld [vmem:[#allocation9 + $0x1b0] ss:$8 sps:$4 sm:$0xff]  }
 0x694   : > { %10342 = vmatpush1.bf16.msra.mxu1 %v12444_v10  ;;  %10373 = vmatprep.mubr.bf16.mxu1 %v9515_v63  ;;  %v12513_v8 = vld [vmem:[#allocation9 + $0x3b0] ss:$8 sps:$4 sm:$0xff]   ;;  %v12521_v10 = vld [vmem:[#allocation9 + $0x3c4] ss:$8 sps:$4 sm:$0xff]  }
 0x695   : > { %10415 = vmatmul.mubr.bf16.vlgmr.msra.gmra.mrb[0].mxu0 %v9516_v50  ;;  %10343 = vmatprep.subr.bf16.mxu1 %v12452_v59  ;;  %v12518_v50 = vld [vmem:[#allocation9 + $0x1c4] ss:$8 sps:$4 sm:$0xff]   ;;  %v12519_v59 = vld [vmem:[#allocation9 + $0x3c0] ss:$8 sps:$4 sm:$0xff]   ;;  %v12553_v24 = vld [vmem:[#allocation12 + $0x30] sm:$0xff]  }
 0x696   : > { %10424 = vmatpush1.bf16.msra.mxu0 %v12447_v11  ;;  %10455 = vmatprep.mubr.bf16.mxu0 %v9519_v54  ;;  %v12516_v11 = vld [vmem:[#allocation9 + $0x1c0] ss:$8 sps:$4 sm:$0xff]  }
 0x697   : > { %10425 = vmatprep.subr.bf16.mxu0 %v12455_v39  ;;  %v12524_v39 = vld [vmem:[#allocation9 + $0x1d4] ss:$8 sps:$4 sm:$0xff]  }
 0x698   : > { %10344 = vmatpush1.bf16.msra.mxu1 %v12450_v12  ;;  %v12527_v12 = vld [vmem:[#allocation9 + $0x3d4] ss:$8 sps:$4 sm:$0xff]  }
 0x699   : > { %10345 = vmatprep.subr.bf16.mxu1 %v12458_v20  ;;  %v12525_v20 = vld [vmem:[#allocation9 + $0x3d0] ss:$8 sps:$4 sm:$0xff]  }
 0x69a   : > { %10426 = vmatpush1.bf16.msra.mxu0 %v12453_v44  ;;  %v12522_v44 = vld [vmem:[#allocation9 + $0x1d0] ss:$8 sps:$4 sm:$0xff]  }
 0x69b   : > { %10427 = vmatprep.subr.bf16.mxu0 %v12461_v2  ;;  %v9448_v2 = vld [vmem:[#allocation2 + $0x10] sm:$0xff] }
 0x69c   : > { %10346 = vmatpush1.bf16.msra.mxu1 %v12456_v46  ;;  %v9452_v46 = vld [vmem:[#allocation2 + $0x30] sm:$0xff] }
 0x69d   : > { %10347 = vmatprep.subr.bf16.mxu1 %v12464_v53  ;;  %v12533_v53 = vld [vmem:[#allocation9 + $0x3e4] ss:$8 sps:$4 sm:$0xff]  }
 0x69e   : > { %10428 = vmatpush1.bf16.msra.mxu0 %v12459_v36  ;;  %v12530_v36 = vld [vmem:[#allocation9 + $0x1e4] ss:$8 sps:$4 sm:$0xff]  }
 0x69f   : > { %10429 = vmatprep.subr.bf16.mxu0 %v12467_v34  ;;  %v9498_v34 = vadd.f32 %v14697_v7, %v9448_v2 }
 0x6a0   : > { %10348 = vmatpush1.bf16.msra.mxu1 %v12462_v21  ;;  %v9502_v21 = vadd.f32 %v14700_v41, %v9452_v46  ;;  %v12541_v41 = vld [vmem:[#allocation12] sm:$0xff]  }
 0x6a1   : > { %10349 = vmatprep.subr.bf16.mxu1 %v12470_v30  ;;  %v12531_v30 = vld [vmem:[#allocation9 + $0x3e0] ss:$8 sps:$4 sm:$0xff]  }
 0x6a2   : > { %10430 = vmatpush1.bf16.msra.mxu0 %v12465_v38  ;;  %v12528_v38 = vld [vmem:[#allocation9 + $0x1e0] ss:$8 sps:$4 sm:$0xff]  }
 0x6a3   : > { %10431 = vmatprep.subr.bf16.mxu0 %v12473_v58  ;;  %v12536_v58 = vld [vmem:[#allocation9 + $0x1f4] ss:$8 sps:$4 sm:$0xff]  }
 0x6a4   : > { %10350 = vmatpush1.bf16.msra.mxu1 %v12468_v60  ;;  %v9506_v60 = vmax.f32 %v9498_v34, 0.0 }
 0x6a5   : > { %10351 = vmatprep.subr.bf16.mxu1 %v12476_v49  ;;  %v12537_v49 = vld [vmem:[#allocation9 + $0x3f0] ss:$8 sps:$4 sm:$0xff]  }
 0x6a6   : > { %10432 = vmatpush1.bf16.msra.mxu0 %v12471_v5  ;;  %v9510_v5 = vmax.f32 %v9502_v21, 0.0  ;;  %v9514_v7 = vpack.c.bf16 %v9506_v60, %v9506_v60 }
 0x6a7   : > { %10433 = vmatprep.subr.bf16.mxu0 %v12479_v3  ;;  %v12540_v3 = vld [vmem:[#allocation12 + $0x40] sm:$0xff]  }
 0x6a8   : > { %10352 = vmatpush1.bf16.msra.mxu1 %v12474_v4  ;;  %v9518_v4 = vpack.c.bf16 %v9510_v5, %v9510_v5 }
 0x6a9   : > { %10353 = vmatprep.subr.bf16.mxu1 %v12482_v16  ;;  %v12545_v16 = vld [vmem:[#allocation12 + $0x10] sm:$0xff]  }
 0x6aa   : > { %10434 = vmatpush1.bf16.msra.mxu0 %v12477_v40  ;;  %v12542_v40 = vld [vmem:[#allocation12 + $0x48] sm:$0xff]  }
 0x6ab   : > { %10435 = vmatprep.subr.bf16.mxu0 %v12485_v45  ;;  %v12546_v45 = vld [vmem:[#allocation12 + $0x58] sm:$0xff]  }
 0x6ac   : > { %10354 = vmatpush1.bf16.msra.mxu1 %v12480_v9  ;;  %v12547_v9 = vld [vmem:[#allocation12 + $0x18] sm:$0xff]  }
 0x6ad   : > { %10355 = vmatprep.subr.bf16.mxu1 %v12488_v18  ;;  %v12551_v18 = vld [vmem:[#allocation12 + $0x28] sm:$0xff]  }
 0x6ae   : > { %10436 = vmatpush1.bf16.msra.mxu0 %v12483_v19  ;;  %v12550_v19 = vld [vmem:[#allocation12 + $0x68] sm:$0xff]  }
 0x6af   : > { %10437 = vmatprep.subr.bf16.mxu0 %v12491_v0  ;;  %v12554_v0 = vld [vmem:[#allocation12 + $0x78] sm:$0xff]  }
 0x6b0   : > { %10356 = vmatpush1.bf16.msra.mxu1 %v12486_v1  ;;  %v12555_v1 = vld [vmem:[#allocation12 + $0x38] sm:$0xff]  }
 0x6b1   : > { %10357 = vmatprep.subr.bf16.mxu1 %v12494_v25 }
 0x6b2   : > { %10438 = vmatpush1.bf16.msra.mxu0 %v12489_v37  ;;  %v9657_v37 = vrot.slane %v9648_v14, %v9462_v57  ;;  %v12153_v57 = vld [vmem:[#allocation14] ss:$0 sm:$0xff] }
 0x6b3   : > { %10439 = vmatprep.subr.bf16.mxu0 %v12497_v35 }
 0x6b4   : > { %10358 = vmatpush1.bf16.msra.mxu1 %v12492_v28 }
 0x6b5   : > { %10359 = vmatprep.subr.bf16.mxu1 %v12500_v47 }
 0x6b6   : > { %10440 = vmatpush1.bf16.msra.mxu0 %v12495_v22 }
 0x6b7   : > { %10441 = vmatprep.subr.bf16.mxu0 %v12503_v27 }
 0x6b8   : > { %10360 = vmatpush1.bf16.msra.mxu1 %v12498_v55 }
 0x6b9   : > { %10361 = vmatprep.subr.bf16.mxu1 %v12506_v32 }
 0x6ba   : > { %10442 = vmatpush1.bf16.msra.mxu0 %v12501_v23 }
 0x6bb   : > { %10443 = vmatprep.subr.bf16.mxu0 %v12509_v48 }
 0x6bc   : > { %10362 = vmatpush1.bf16.msra.mxu1 %v12504_v31 }
 0x6bd   : > { %10363 = vmatprep.subr.bf16.mxu1 %v12512_v51 }
 0x6be   : > { %10444 = vmatpush1.bf16.msra.mxu0 %v12507_v26 }
 0x6bf   : > { %10445 = vmatprep.subr.bf16.mxu0 %v12515_v52 }
 0x6c0   : > { %10364 = vmatpush1.bf16.msra.mxu1 %v12510_v42 }
 0x6c1   : > { %10365 = vmatprep.subr.bf16.mxu1 %v12518_v50 }
 0x6c2   : > { %10446 = vmatpush1.bf16.msra.mxu0 %v12513_v8 }
 0x6c3   : > { %10447 = vmatprep.subr.bf16.mxu0 %v12521_v10 }
 0x6c4   : > { %10366 = vmatpush1.bf16.msra.mxu1 %v12516_v11 }
 0x6c5   : > { %10367 = vmatprep.subr.bf16.mxu1 %v12524_v39 }
 0x6c6   : > { %10448 = vmatpush1.bf16.msra.mxu0 %v12519_v59 }
 0x6c7   : > { %10449 = vmatprep.subr.bf16.mxu0 %v12527_v12 }
 0x6c8   : > { %10368 = vmatpush1.bf16.msra.mxu1 %v12522_v44 }
 0x6c9   : > { %10369 = vmatprep.subr.bf16.mxu1 %v12530_v36 }
 0x6ca   : > { %10450 = vmatpush1.bf16.msra.mxu0 %v12525_v20 }
 0x6cb   : > { %10451 = vmatprep.subr.bf16.mxu0 %v12533_v53 }
 0x6cc   : > { %10370 = vmatpush1.bf16.msra.mxu1 %v12528_v38 }
 0x6cd   : > { %10371 = vmatprep.subr.bf16.mxu1 %v12536_v58 }
 0x6ce   : > { %10452 = vmatpush1.bf16.msra.mxu0 %v12531_v30 }
 0x6cf   : > { %10453 = vmatprep.subr.bf16.mxu0 %v12539_v61 }
 0x6d0   : > { %10372 = vmatpush1.bf16.msra.mxu1 %v12534_v62 }
 0x6d1   : > { %12178 = vmatprep.subr.bf16.mxu1 %v12540_v3 }
 0x6d2   : > { %10454 = vmatpush1.bf16.msra.mxu0 %v12537_v49 }
 0x6d3   : > { %10374 = vmatmul.mubr.bf16.vlgmr.msra.gmra.mrb[0].mxu1 %v9514_v7 }
 0x6d4   : > { %12179 = vmatpush3.bf16.msra.mxu1 %v12541_v41 }
 0x6d5   : > { %10456 = vmatmul.mubr.bf16.vlgmr.msra.gmra.mrb[0].mxu0 %v9518_v4  ;;  %12180 = vmatprep.subr.bf16.mxu1 %v12542_v40 }
 0x6d8   : > { %12181 = vmatpush3.bf16.msra.mxu1 %v12543_v17 }
 0x6d9   : > { %12182 = vmatprep.subr.bf16.mxu1 %v12544_v6 }
 0x6dc   : > { %12183 = vmatpush3.bf16.msra.mxu1 %v12545_v16 }
 0x6dd   : > { %12184 = vmatprep.subr.bf16.mxu1 %v12546_v45 }
 0x6e0   : > { %12185 = vmatpush3.bf16.msra.mxu1 %v12547_v9 }
 0x6e1   : > { %12186 = vmatprep.subr.bf16.mxu1 %v12548_v13 }
 0x6e4   : > { %12187 = vmatpush3.bf16.msra.mxu1 %v12549_v15 }
 0x6e5   : > { %12188 = vmatprep.subr.bf16.mxu1 %v12550_v19 }
 0x6e8   : > { %12189 = vmatpush3.bf16.msra.mxu1 %v12551_v18 }
 0x6e9   : > { %12190 = vmatprep.subr.bf16.mxu1 %v12552_v43 }
 0x6ec   : > { %12191 = vmatpush3.bf16.msra.mxu1 %v12553_v24 }
 0x6ed   : > { %12192 = vmatprep.subr.bf16.mxu1 %v12554_v0 }
 0x6f0   : > { %12193 = vmatpush3.bf16.msra.mxu1 %v12555_v1 }
 0x7a6   : > { %v10375_v25 = vpop.f32.mrb[0].mxu1 }
 0x7a7   : > { %v12200_v54 = vadd.f32 %v10375_v25, %v9653_v29  ;;  %v10377_v35 = vpop.f32.mrb[1].mxu1 }
 0x7a8   : > { %v10457_v63 = vpop.f32.mrb[0].mxu0  ;;  %v12202_v22 = vadd.f32 %v10377_v35, %v9657_v37  ;;  %v10379_v47 = vpop.f32.mrb[2].mxu1 }
 0x7a9   : > { %v10459_v28 = vpop.f32.mrb[1].mxu0  ;;  %v12201_v55 = vadd.f32 %v12200_v54, %v10457_v63  ;;  %v10380_v23 = vpop.f32.mrb[3].mxu1 }
 0x7aa   : > { %v10461_v27 = vpop.f32.mrb[2].mxu0  ;;  %v12203_v48 = vadd.f32 %v12202_v22, %v10459_v28 }
 0x7ab   : > { %v10462_v32 = vpop.f32.mrb[3].mxu0  ;;  %v10464_v31 = vmax.f32 %v12201_v55, 0.0 }
 0x7ac   : > { %v10465_v26 = vmax.f32 %v12203_v48, 0.0 }
 0x7ad   : > { %v10466_v52 = vpack.c.bf16 %v10464_v31, %v10464_v31 }
 0x7ae   : > { %v10467_v51 = vpack.c.bf16 %v10465_v26, %v10465_v26 }
 0x7b0   : > { %10635 = vmatprep.mubr.bf16.mxu1 %v10467_v51 }
 0x7b1   : > { %10636 = vmatmul.mubr.bf16.vlgmr.msra.gmra.mrb[4].mxu1 %v10466_v52 }
 0x884   : > { %v12194_v33 = vpop.f32.mrb[4].mxu1 }
 0x885   : > { %v12195_v56 = vpop.f32.mrb[5].mxu1 }
 0x886   : > { %v12196_v42 = vadd.f32 %v12195_v56, %v12194_v33  ;;  %v12197_v8 = vpop.f32.mrb[6].mxu1 }
 0x887   : > { %v12198_v50 = vpop.f32.mrb[7].mxu1 }
 0x888   : > { %v10638_v10 = vadd.f32 %v12196_v42, %v12153_v57 }
 0x88a   : > { %10643 = vst [vmem:[#allocation15] sm:$0xff] %v10638_v10 }
 0x88b PF: > { %p12278_p2 = scmp.eq.s32.totalorder %s12915_s30, 1  ;;  %s12853_s8 = smov [#allocation15]  }
 0x88c   : > { %s10651_s18 = sshll.u32 %s12853_s8, 4  ;;  %s10652_s18 = int_to_ptr.vmem [resolvable:$true] %s10651_s18 }
 0x88d   : > { %s12756_s21 = scalar_lea.vmem %s10652_s18, 128  ;;  %p12763_p11 = scmp.lt.s32.totalorder %s10652_s18, %s10652_s18 }
 0x88e   : > { %p12757_p9 = scmp.ne.s32.totalorder %s10652_s18, %s12756_s21  ;;  %p12764_p13 = scmp.lt.s32.totalorder %s12756_s21, %s12756_s21 }
 0x890   : > { %p12758_p1 = pnand %p12757_p9, %p12278_p2  ;;  %p12765_p6 = por %p12764_p13, %p12763_p11 }
 0x892   : > { %p12759_p4 = pneg %p12758_p1 }
 0x894   : > { %p12766_p3 = pnand %p12765_p6, %p12759_p4 }
 0x896   : > { %12769 = shalt.err (!%p12766_p3)
}
 0x897   : > { %s12770_s15 = scalar_lea.hbm %s14761_s7, 128 }
 0x898   : > { %p12771_p12 = scmp.ne.s32.totalorder %s14761_s7, %s12770_s15  ;;  %p12776_p8 = scmp.lt.u32.totalorder %s12770_s15, %s14761_s7 }
 0x89a   : > { %p12772_p0 = pnand %p12771_p12, %p12278_p2 }
 0x89c   : > { %p12773_p5 = pneg %p12772_p0 }
 0x89e   : > { %p12778_p10 = pnand %p12776_p8, %p12773_p5 }
 0x8a0   : > { %12781 = shalt.err (!%p12778_p10)
}
 0x8a1   : > { %12241 = dma.vmem_to_hbm [thread:$0]  (%p12278_p2), %s10652_s18, 128, %s14761_s7, [#allocation5]  }
 0x8a2   : > { %12819 = dma.done.wait (%p12278_p2), [#allocation5], 128  }
 0x8a3   : > { %12821 = vsyncadd (%p12278_p2), [#allocation5], 4294967168 }
 0x8a4 PF: > { %p23_p7 = scmp.ge.s32.totalorder %s13044_s19, 4   ;;  %s14780_s24 = smov %s12828_s25 }
 0x8a5   : > { %s14781_s25 = smov %s12832_s26  ;;  %s14782_s26 = smov %s13055_s13 }
 0x8a6   : > { %s14783_s27 = smov %s13044_s19  ;;  %25 = sbr.rel (!%p23_p7) target bundleno = 10 (0xa), region = 126 }
 0x8ad   :  { %10664 = vsyncpa [#allocation4], 1 }
 0x8ae   :  { %10666 = vsyncpa [#allocation4 + $0x1], 1 }
 0x8af   :  { %10667 = vsyncpa [#allocation7], 1 }
 0x8b0   :  { %10669 = vsyncpa [#allocation7 + $0x1], 1 }
 0x8b1   :  { %10670 = vsyncpa [#allocation10], 1 }
 0x8b2   :  { %10671 = vsyncpa [#allocation13], 1 }
 0x8b3   :  { %10672 = vsyncpa [#allocation5], 1 }
 0x8b4   :  { %10674 = vsyncpa [#allocation5 + $0x1], 1 }

</bundles_post_ra>
